<compile_context>
chip_gen: v7x
topology: tpu7x:2x2x1
jax: 0.10.0
libtpu: 0.0.40
codegen_flags: <defaults>
</compile_context>

<pallas_src>
import functools
import math

import jax
import jax.numpy as jnp
from jax.experimental import pallas as pl
from jax.experimental.pallas import tpu as pltpu

DTYPE = jnp.bfloat16          # activation / GEMM-operand dtype (f32 accumulate)
TM_MAX = 1024                 # max tile along the flattened N*H*W ("M") axis
BN_EPS = 1e-5
VMEM_LIMIT = 32 * 1024 * 1024


def _round_up(x, m):
    return ((x + m - 1) // m) * m


def _pick_tm(m):
    # lane-dense tiles: always a multiple of 128, capped at TM_MAX
    return min(TM_MAX, _round_up(max(m, 1), 128))


# ------------------------------------------------------------------
# Pallas kernels (all in CM layout: (channels, flattened pixels))
# ------------------------------------------------------------------

def _gemm_stats_kernel(w_ref, x_ref, o_ref, sum_ref, ssq_ref):
    """y = W @ patches (f32 accumulate) with fused per-channel sum / sum-sq.

    Used for norm=True convs (no bias, no ReLU before BN).  The stats outputs
    have a constant index_map over the M grid axis and are accumulated across
    grid steps (axis marked "arbitrary").  Padded M columns of `patches` are
    zero and there is no bias, so they contribute 0 to both sums.
    """
    acc = jnp.dot(w_ref[...], x_ref[...], preferred_element_type=jnp.float32)
    o_ref[...] = acc.astype(o_ref.dtype)

    @pl.when(pl.program_id(0) == 0)
    def _():
        sum_ref[...] = jnp.zeros_like(sum_ref)
        ssq_ref[...] = jnp.zeros_like(ssq_ref)

    sum_ref[...] += jnp.sum(acc, axis=1, keepdims=True)
    ssq_ref[...] += jnp.sum(acc * acc, axis=1, keepdims=True)


def _gemm_bias_kernel(w_ref, x_ref, bias_ref, o_ref, *, relu):
    """y = W @ patches + bias (+ReLU).  Used for norm=False convs."""
    acc = jnp.dot(w_ref[...], x_ref[...], preferred_element_type=jnp.float32)
    acc = acc + bias_ref[...]
    if relu:
        acc = jnp.maximum(acc, 0.0)
    o_ref[...] = acc.astype(o_ref.dtype)


def _affine_kernel(x_ref, scale_ref, shift_ref, o_ref, *, relu):
    y = x_ref[...].astype(jnp.float32) * scale_ref[...] + shift_ref[...]
    if relu:
        y = jnp.maximum(y, 0.0)
    o_ref[...] = y.astype(o_ref.dtype)


def _affine_res_kernel(x_ref, scale_ref, shift_ref, res_ref, o_ref, *, relu):
    y = (x_ref[...].astype(jnp.float32) * scale_ref[...] + shift_ref[...]
         + res_ref[...].astype(jnp.float32))
    if relu:
        y = jnp.maximum(y, 0.0)
    o_ref[...] = y.astype(o_ref.dtype)


def _sigmoid_add_kernel(a_ref, b_ref, o_ref):
    v = a_ref[...] + b_ref[...]
    # exp + reciprocal both go to the EUP slot; clamp guards approx overshoot.
    p = pl.reciprocal(1.0 + jnp.exp(-v), approx=True)
    o_ref[...] = jnp.clip(p, 0.0, 1.0)


# ------------------------------------------------------------------
# Pallas wrappers
# ------------------------------------------------------------------

def conv_gemm(w_mat, patches, m, *, stats, bias=None, relu=False,
              out_dtype=DTYPE):
    """CM-layout conv GEMM:  (Cout, K) @ (K, M) -> (Cout, M), tiled along M.

    stats=True  : no bias / no ReLU; returns (y_padded, sum, ssq)  (BN path)
    stats=False : fused bias (+ReLU); returns y_padded
    """
    cout, kk = w_mat.shape
    kp = _round_up(kk, 8)
    if kp != kk:                                   # keep K sublane-aligned
        w_mat = jnp.pad(w_mat, ((0, 0), (0, kp - kk)))
        patches = jnp.pad(patches, ((0, kp - kk), (0, 0)))
    w_mat = w_mat.astype(DTYPE)
    patches = patches.astype(DTYPE)

    tm = _pick_tm(m)
    mp = _round_up(m, tm)
    if patches.shape[1] != mp:
        patches = jnp.pad(patches, ((0, 0), (0, mp - patches.shape[1])))
    grid = (mp // tm,)

    w_spec = pl.BlockSpec((cout, kp), lambda i: (0, 0))     # resident weights
    x_spec = pl.BlockSpec((kp, tm), lambda i: (0, i))
    y_spec = pl.BlockSpec((cout, tm), lambda i: (0, i))     # lane-dense stores

    if stats:
        y, s, ss = pl.pallas_call(
            _gemm_stats_kernel,
            out_shape=(jax.ShapeDtypeStruct((cout, mp), out_dtype),
                       jax.ShapeDtypeStruct((cout, 1), jnp.float32),
                       jax.ShapeDtypeStruct((cout, 1), jnp.float32)),
            grid=grid,
            in_specs=[w_spec, x_spec],
            out_specs=(y_spec,
                       pl.BlockSpec((cout, 1), lambda i: (0, 0)),
                       pl.BlockSpec((cout, 1), lambda i: (0, 0))),
            compiler_params=pltpu.CompilerParams(
                dimension_semantics=("arbitrary",),      # stats accumulate
                vmem_limit_bytes=VMEM_LIMIT),
        )(w_mat, patches)
        return y, s, ss

    bias2 = bias.reshape(cout, 1).astype(jnp.float32)
    y = pl.pallas_call(
        functools.partial(_gemm_bias_kernel, relu=relu),
        out_shape=jax.ShapeDtypeStruct((cout, mp), out_dtype),
        grid=grid,
        in_specs=[w_spec, x_spec, pl.BlockSpec((cout, 1), lambda i: (0, 0))],
        out_specs=y_spec,
        compiler_params=pltpu.CompilerParams(
            dimension_semantics=("parallel",),
            vmem_limit_bytes=VMEM_LIMIT),
    )(w_mat, patches, bias2)
    return y


def affine_pallas(x, scale, shift, relu, residual=None, out_dtype=DTYPE):
    """y = x*scale + shift (+residual) (+ReLU), CM layout, tiled along M."""
    c, m = x.shape
    tm = _pick_tm(m)
    mp = _round_up(m, tm)
    if mp != m:
        x = jnp.pad(x, ((0, 0), (0, mp - m)))
    grid = (mp // tm,)
    x_spec = pl.BlockSpec((c, tm), lambda i: (0, i))
    v_spec = pl.BlockSpec((c, 1), lambda i: (0, 0))
    cp = pltpu.CompilerParams(dimension_semantics=("parallel",),
                              vmem_limit_bytes=VMEM_LIMIT)
    if residual is None:
        return pl.pallas_call(
            functools.partial(_affine_kernel, relu=relu),
            out_shape=jax.ShapeDtypeStruct((c, mp), out_dtype),
            grid=grid,
            in_specs=[x_spec, v_spec, v_spec],
            out_specs=x_spec,
            compiler_params=cp,
        )(x, scale, shift)
    if residual.shape[1] != mp:
        residual = jnp.pad(residual, ((0, 0), (0, mp - residual.shape[1])))
    return pl.pallas_call(
        functools.partial(_affine_res_kernel, relu=relu),
        out_shape=jax.ShapeDtypeStruct((c, mp), out_dtype),
        grid=grid,
        in_specs=[x_spec, v_spec, v_spec, x_spec],
        out_specs=x_spec,
        compiler_params=cp,
    )(x, scale, shift, residual)


def sigmoid_add_pallas(z, x):
    """sigmoid(z + x); z, x: (C, N, H, W) float32."""
    c = z.shape[0]
    shp = z.shape
    a = z.reshape(c, -1).astype(jnp.float32)
    b = x.reshape(c, -1).astype(jnp.float32)
    m = a.shape[1]
    tm = _pick_tm(m)
    mp = _round_up(m, tm)
    if mp != m:
        a = jnp.pad(a, ((0, 0), (0, mp - m)))
        b = jnp.pad(b, ((0, 0), (0, mp - m)))
    spec = pl.BlockSpec((c, tm), lambda i: (0, i))
    out = pl.pallas_call(
        _sigmoid_add_kernel,
        out_shape=jax.ShapeDtypeStruct((c, mp), jnp.float32),
        grid=(mp // tm,),
        in_specs=[spec, spec],
        out_specs=spec,
        compiler_params=pltpu.CompilerParams(
            dimension_semantics=("parallel",),
            vmem_limit_bytes=VMEM_LIMIT),
    )(a, b)
    return out[:, :m].reshape(shp)


# ------------------------------------------------------------------
# Conv / BN glue (im2col, phase decomposition, weight reshaping: plain JAX)
# ------------------------------------------------------------------

def _bn_scale_shift(s, ss, count, gamma, beta):
    mean = s[:, 0] / count
    # guard against E[x^2] - E[x]^2 cancellation going slightly negative
    var = jnp.maximum(ss[:, 0] / count - mean * mean, 0.0)
    inv = gamma / jnp.sqrt(var + BN_EPS)
    scale = inv
    shift = beta - mean * inv
    return (scale.reshape(-1, 1).astype(jnp.float32),
            shift.reshape(-1, 1).astype(jnp.float32))


def _patches_conv(x, k, stride, pad):
    """x: (C, N, H, W) -> patches (k*k*C, N*Ho*Wo), K ordered (kh, kw, cin)."""
    c, n, h, w = x.shape
    xp = jnp.pad(x, ((0, 0), (0, 0), (pad, pad), (pad, pad)))
    ho = (h + 2 * pad - k) // stride + 1
    wo = (w + 2 * pad - k) // stride + 1
    cols = []
    for di in range(k):
        for dj in range(k):
            sl = xp[:, :, di:di + (ho - 1) * stride + 1:stride,
                          dj:dj + (wo - 1) * stride + 1:stride]
            cols.append(sl.reshape(c, n * ho * wo))
    # TODO(synk): implicit in-kernel im2col (halo-block DMA) would avoid
    # materializing this k*k patch blow-up in HBM.
    return jnp.concatenate(cols, axis=0), (n, ho, wo)


def basic_conv(p, x, *, stride, norm=True, relu=True, residual=None):
    """BasicConv (Conv2d [+BN] [+ReLU]) with optional fused residual add."""
    w = p["w"]                                   # (Cout, Cin, k, k)
    cout, cin, k, _ = w.shape
    pad = k // 2
    patches, (n, ho, wo) = _patches_conv(x, k, stride, pad)
    # lhs[cout, (kh, kw, cin)] = w[cout, cin, kh, kw]
    w_mat = jnp.transpose(w, (0, 2, 3, 1)).reshape(cout, k * k * cin)
    m = n * ho * wo

    if norm:                                     # conv -> BN (-> ReLU)[-> +res]
        y_pad, s, ss = conv_gemm(w_mat, patches, m, stats=True, out_dtype=DTYPE)
        scale, shift = _bn_scale_shift(s, ss, float(m), p["gamma"], p["beta"])
        res2 = None if residual is None else residual.reshape(cout, -1)
        out = affine_pallas(y_pad, scale, shift, relu, res2)[:, :m]
    else:                                        # conv (+bias) (-> ReLU)
        bias = p.get("b", jnp.zeros((cout,), jnp.float32))
        out = conv_gemm(w_mat, patches, m, stats=False, bias=bias, relu=relu,
                        out_dtype=jnp.float32)[:, :m]
    return out.reshape(cout, n, ho, wo)


def transpose_conv(p, x):
    """ConvTranspose2d(k=4, stride=2, padding=1) + BN + ReLU via 2x2 output
    phase decomposition (4 stride-1 GEMMs on the undilated input + interleave):
    no zero-insertion, 4x fewer MACs / patch bytes than the dilation approach.
    """
    w = p["w"]                                   # (Cin, Cout, 4, 4)
    cin, cout = w.shape[0], w.shape[1]
    c, n, h, wd = x.shape
    m = n * h * wd

    phases = []
    s_tot = jnp.zeros((cout, 1), jnp.float32)
    ss_tot = jnp.zeros((cout, 1), jnp.float32)
    for py in (0, 1):
        for px in (0, 1):
            xp = jnp.pad(x, ((0, 0), (0, 0),
                             (1, 0) if py == 0 else (0, 1),
                             (1, 0) if px == 0 else (0, 1)))
            cols, wcols = [], []
            for dy in (0, 1):
                for dx in (0, 1):
                    cols.append(xp[:, :, dy:dy + h, dx:dx + wd].reshape(c, m))
                    ky = 3 - py - 2 * dy          # kernel tap for this phase
                    kx = 3 - px - 2 * dx
                    wcols.append(jnp.transpose(w[:, :, ky, kx], (1, 0)))
            patches = jnp.concatenate(cols, axis=0)          # (4*Cin, M)
            w_mat = jnp.concatenate(wcols, axis=1)           # (Cout, 4*Cin)
            y_pad, s, ss = conv_gemm(w_mat, patches, m, stats=True,
                                     out_dtype=DTYPE)
            phases.append(y_pad[:, :m].reshape(cout, n, h, wd))
            s_tot = s_tot + s
            ss_tot = ss_tot + ss

    # depth-to-space interleave of the 4 output phases -> (Cout, N, 2H, 2W)
    full = jnp.stack(phases, axis=0).reshape(2, 2, cout, n, h, wd)
    full = jnp.transpose(full, (2, 3, 4, 0, 5, 1)).reshape(cout, n, 2 * h, 2 * wd)

    scale, shift = _bn_scale_shift(s_tot, ss_tot, float(4 * m),
                                   p["gamma"], p["beta"])
    out = affine_pallas(full.reshape(cout, -1), scale, shift, relu=True)
    return out[:, :4 * m].reshape(cout, n, 2 * h, 2 * wd)


def res_block(p, x):
    y = basic_conv(p["conv1"], x, stride=1, norm=True, relu=True)
    # second conv: BN, no ReLU, residual add fused into the affine kernel
    return basic_conv(p["conv2"], y, stride=1, norm=True, relu=False,
                      residual=x)


def block(params_list, x):          # EBlock / DBlock
    for p in params_list:
        x = res_block(p, x)
    return x


# ------------------------------------------------------------------
# Parameter init (deterministic, PyTorch-like shapes)
# ------------------------------------------------------------------

def _init_conv(key, cin, cout, k, *, bias, norm, transpose=False):
    k1, k2 = jax.random.split(key)
    fan_in = cin * k * k
    bound = 1.0 / math.sqrt(fan_in)
    if transpose:
        w_shape = (cin, cout, k, k)    # ConvTranspose2d weight layout
    else:
        w_shape = (cout, cin, k, k)    # Conv2d weight layout
    p = {"w": jax.random.uniform(k1, w_shape, jnp.float32, -bound, bound)}
    if bias:
        p["b"] = jax.random.uniform(k2, (cout,), jnp.float32, -bound, bound)
    if norm:
        p["gamma"] = jnp.ones((cout,), jnp.float32)
        p["beta"] = jnp.zeros((cout,), jnp.float32)
    return p


def _init_resblock(key, c):
    k1, k2 = jax.random.split(key)
    return {"conv1": _init_conv(k1, c, c, 3, bias=False, norm=True),
            "conv2": _init_conv(k2, c, c, 3, bias=False, norm=True)}


def _init_block(key, c, num_res):
    return [_init_resblock(k, c) for k in jax.random.split(key, num_res)]


def init_generator(key, num_res=8):
    base = 24
    ks = jax.random.split(key, 14)
    return {
        "feat": [
            _init_conv(ks[0], 3, base, 3, bias=False, norm=True),
            _init_conv(ks[1], base, base * 2, 3, bias=False, norm=True),
            _init_conv(ks[2], base * 2, base * 4, 3, bias=False, norm=True),
            _init_conv(ks[3], base * 4, base * 2, 4, bias=False, norm=True,
                       transpose=True),
            _init_conv(ks[4], base * 2, base, 4, bias=False, norm=True,
                       transpose=True),
            _init_conv(ks[5], base, 3, 3, bias=True, norm=False),
        ],
        "enc": [_init_block(ks[6], base, num_res),
                _init_block(ks[7], base * 2, num_res),
                _init_block(ks[8], base * 4, num_res)],
        "dec": [_init_block(ks[9], base * 4, num_res),
                _init_block(ks[10], base * 2, num_res),
                _init_block(ks[11], base, num_res)],
        "convs": [_init_conv(ks[12], base * 4, base * 2, 1, bias=False, norm=True),
                  _init_conv(ks[13], base * 2, base, 1, bias=False, norm=True)],
    }


# ------------------------------------------------------------------
# Generator forward (NCHW in / NCHW out, like the PyTorch module)
# ------------------------------------------------------------------

def generator_forward(params, x_nchw):
    x32 = jnp.transpose(x_nchw, (1, 0, 2, 3)).astype(jnp.float32)  # (C,N,H,W)
    x = x32.astype(DTYPE)

    z = basic_conv(params["feat"][0], x, stride=1, norm=True, relu=True)
    res1 = block(params["enc"][0], z)

    z = basic_conv(params["feat"][1], res1, stride=2, norm=True, relu=True)
    res2 = block(params["enc"][1], z)

    z = basic_conv(params["feat"][2], res2, stride=2, norm=True, relu=True)
    z = block(params["enc"][2], z)

    z = block(params["dec"][0], z)
    z = transpose_conv(params["feat"][3], z)
    z = jnp.concatenate([z, res2], axis=0)            # channel concat (dim=1 NCHW)
    z = basic_conv(params["convs"][0], z, stride=1, norm=True, relu=True)

    z = block(params["dec"][1], z)
    z = transpose_conv(params["feat"][4], z)
    z = jnp.concatenate([z, res1], axis=0)
    z = basic_conv(params["convs"][1], z, stride=1, norm=True, relu=True)

    z = block(params["dec"][2], z)
    z = basic_conv(params["feat"][5], z, stride=1, norm=False, relu=False)  # f32

    out = sigmoid_add_pallas(z, x32)                   # sigmoid(z + x)
    return jnp.transpose(out, (1, 0, 2, 3))            # -> NCHW


# ------------------------------------------------------------------

if __name__ == "__main__":
    key = jax.random.PRNGKey(0)
    pkey, xkey = jax.random.split(key)

    num_res = 1    # small instance of the num_res constructor arg (default 8)
    params = init_generator(pkey, num_res=num_res)

    x = jax.random.normal(xkey, (2, 3, 16, 16), jnp.float32)   # NCHW like PyTorch

    fwd = jax.jit(generator_forward)
    out = jax.block_until_ready(fwd(params, x))

    assert out.shape == (2, 3, 16, 16)
    assert bool(jnp.all(jnp.isfinite(out)))
    assert bool(jnp.all((out >= 0.0) & (out <= 1.0)))   # sigmoid range
    print("KERNEL_OK")
</pallas_src>

<mosaic_0001>
module attributes {stable_mosaic.version = 11 : i64} {
  func.func @_gemm_stats_kernel(%arg0: i32, %arg1: memref<24x32xbf16, #tpu.memory_space<vmem>>, %arg2: memref<32x512xbf16, #tpu.memory_space<vmem>>, %arg3: memref<24x512xbf16, #tpu.memory_space<vmem>>, %arg4: memref<24x1xf32, #tpu.memory_space<vmem>>, %arg5: memref<24x1xf32, #tpu.memory_space<vmem>>) attributes {dimension_semantics = [#tpu.dimension_semantics<arbitrary>], iteration_bounds = array<i64: 1>, scalar_prefetch = 0 : i64, scratch_operands = 0 : i64, tpu.core_type = #tpu.core_type<tc>, window_params = [{pipeline_mode = #tpu.pipeline_mode<synchronous>, transform_indices = @transform_0, window_bounds = array<i64: 24, 32>}, {transform_indices = @transform_1, window_bounds = array<i64: 32, 512>}, {transform_indices = @transform_2, window_bounds = array<i64: 24, 512>}, {pipeline_mode = #tpu.pipeline_mode<synchronous>, transform_indices = @transform_3, window_bounds = array<i64: 24, 1>}, {pipeline_mode = #tpu.pipeline_mode<synchronous>, transform_indices = @transform_4, window_bounds = array<i64: 24, 1>}]} {
    %c0 = arith.constant 0 : index
    %c0_0 = arith.constant 0 : index
    %0 = vector.load %arg1[%c0, %c0_0] : memref<24x32xbf16, #tpu.memory_space<vmem>>, vector<24x32xbf16>
    %c0_1 = arith.constant 0 : index
    %c0_2 = arith.constant 0 : index
    %1 = vector.load %arg2[%c0_1, %c0_2] : memref<32x512xbf16, #tpu.memory_space<vmem>>, vector<32x512xbf16>
    %cst = arith.constant dense<0.000000e+00> : vector<24x512xf32>
    %2 = tpu.matmul %0, %1, %cst {dimension_numbers = #tpu.dot_dimension_numbers<[1], [0], [0], [1], [0, 0, 1, 1], [], []>} : vector<24x32xbf16>, vector<32x512xbf16>, vector<24x512xf32> -> vector<24x512xf32>
    %3 = arith.truncf %2 : vector<24x512xf32> to vector<24x512xbf16>
    %c0_3 = arith.constant 0 : index
    %c0_4 = arith.constant 0 : index
    %4 = vector.load %arg3[%c0_3, %c0_4] : memref<24x512xbf16, #tpu.memory_space<vmem>>, vector<24x512xbf16>
    tpu.vector_store %arg3[%c0_3, %c0_4], %3 {strides = array<i32>} : memref<24x512xbf16, #tpu.memory_space<vmem>>, vector<24x512xbf16>,
    %c0_i32 = arith.constant 0 : i32
    %5 = arith.cmpi eq, %arg0, %c0_i32 : i32
    %6 = arith.extui %5 : i1 to i32
    %c0_i32_5 = arith.constant 0 : i32
    %7 = arith.cmpi ne, %6, %c0_i32_5 : i32
    scf.if %7 {
      %cst_16 = arith.constant 0.000000e+00 : f32
      %19 = vector.broadcast %cst_16 : f32 to vector<24x1xf32>
      %c0_17 = arith.constant 0 : index
      %c0_18 = arith.constant 0 : index
      %20 = vector.load %arg4[%c0_17, %c0_18] : memref<24x1xf32, #tpu.memory_space<vmem>>, vector<24x1xf32>
      tpu.vector_store %arg4[%c0_17, %c0_18], %19 {strides = array<i32>} : memref<24x1xf32, #tpu.memory_space<vmem>>, vector<24x1xf32>,
      %cst_19 = arith.constant 0.000000e+00 : f32
      %21 = vector.broadcast %cst_19 : f32 to vector<24x1xf32>
      %c0_20 = arith.constant 0 : index
      %c0_21 = arith.constant 0 : index
      %22 = vector.load %arg5[%c0_20, %c0_21] : memref<24x1xf32, #tpu.memory_space<vmem>>, vector<24x1xf32>
      tpu.vector_store %arg5[%c0_20, %c0_21], %21 {strides = array<i32>} : memref<24x1xf32, #tpu.memory_space<vmem>>, vector<24x1xf32>,
    } else {
    }
    %c0_6 = arith.constant 0 : index
    %c0_7 = arith.constant 0 : index
    %8 = vector.load %arg4[%c0_6, %c0_7] : memref<24x1xf32, #tpu.memory_space<vmem>>, vector<24x1xf32>
    %cst_8 = arith.constant dense<0.000000e+00> : vector<24xf32>
    %9 = vector.multi_reduction <add>, %2, %cst_8 [1] : vector<24x512xf32> to vector<24xf32>
    %10 = vector.shape_cast %9 : vector<24xf32> to vector<24x1xf32>
    %11 = arith.addf %8, %10 : vector<24x1xf32>
    %c0_9 = arith.constant 0 : index
    %c0_10 = arith.constant 0 : index
    %12 = vector.load %arg4[%c0_9, %c0_10] : memref<24x1xf32, #tpu.memory_space<vmem>>, vector<24x1xf32>
    tpu.vector_store %arg4[%c0_9, %c0_10], %11 {strides = array<i32>} : memref<24x1xf32, #tpu.memory_space<vmem>>, vector<24x1xf32>,
    %c0_11 = arith.constant 0 : index
    %c0_12 = arith.constant 0 : index
    %13 = vector.load %arg5[%c0_11, %c0_12] : memref<24x1xf32, #tpu.memory_space<vmem>>, vector<24x1xf32>
    %14 = arith.mulf %2, %2 : vector<24x512xf32>
    %cst_13 = arith.constant dense<0.000000e+00> : vector<24xf32>
    %15 = vector.multi_reduction <add>, %14, %cst_13 [1] : vector<24x512xf32> to vector<24xf32>
    %16 = vector.shape_cast %15 : vector<24xf32> to vector<24x1xf32>
    %17 = arith.addf %13, %16 : vector<24x1xf32>
    %c0_14 = arith.constant 0 : index
    %c0_15 = arith.constant 0 : index
    %18 = vector.load %arg5[%c0_14, %c0_15] : memref<24x1xf32, #tpu.memory_space<vmem>>, vector<24x1xf32>
    tpu.vector_store %arg5[%c0_14, %c0_15], %17 {strides = array<i32>} : memref<24x1xf32, #tpu.memory_space<vmem>>, vector<24x1xf32>,
    return
  }
  func.func @transform_0(%arg0: i32) -> (i32, i32) {
    %c0_i32 = arith.constant 0 : i32
    %c0_i32_0 = arith.constant 0 : i32
    %c0_i32_1 = arith.constant 0 : i32
    return %c0_i32, %c0_i32_0 : i32, i32
  }
  func.func @transform_1(%arg0: i32) -> (i32, i32) {
    %c0_i32 = arith.constant 0 : i32
    %c0_i32_0 = arith.constant 0 : i32
    return %c0_i32, %arg0 : i32, i32
  }
  func.func @transform_2(%arg0: i32) -> (i32, i32) {
    %c0_i32 = arith.constant 0 : i32
    %c0_i32_0 = arith.constant 0 : i32
    return %c0_i32, %arg0 : i32, i32
  }
  func.func @transform_3(%arg0: i32) -> (i32, i32) {
    %c0_i32 = arith.constant 0 : i32
    %c0_i32_0 = arith.constant 0 : i32
    %c0_i32_1 = arith.constant 0 : i32
    return %c0_i32, %c0_i32_0 : i32, i32
  }
  func.func @transform_4(%arg0: i32) -> (i32, i32) {
    %c0_i32 = arith.constant 0 : i32
    %c0_i32_0 = arith.constant 0 : i32
    %c0_i32_1 = arith.constant 0 : i32
    return %c0_i32, %c0_i32_0 : i32, i32
  }
}

module attributes {stable_mosaic.version = 11 : i64} {
  func.func @_affine_kernel(%arg0: i32, %arg1: memref<24x512xbf16, #tpu.memory_space<vmem>>, %arg2: memref<24x1xf32, #tpu.memory_space<vmem>>, %arg3: memref<24x1xf32, #tpu.memory_space<vmem>>, %arg4: memref<24x512xbf16, #tpu.memory_space<vmem>>) attributes {dimension_semantics = [#tpu.dimension_semantics<parallel>], iteration_bounds = array<i64: 1>, scalar_prefetch = 0 : i64, scratch_operands = 0 : i64, tpu.core_type = #tpu.core_type<tc>, window_params = [{transform_indices = @transform_0, window_bounds = array<i64: 24, 512>}, {pipeline_mode = #tpu.pipeline_mode<synchronous>, transform_indices = @transform_1, window_bounds = array<i64: 24, 1>}, {pipeline_mode = #tpu.pipeline_mode<synchronous>, transform_indices = @transform_2, window_bounds = array<i64: 24, 1>}, {transform_indices = @transform_3, window_bounds = array<i64: 24, 512>}]} {
    %c0 = arith.constant 0 : index
    %c0_0 = arith.constant 0 : index
    %0 = vector.load %arg1[%c0, %c0_0] : memref<24x512xbf16, #tpu.memory_space<vmem>>, vector<24x512xbf16>
    %1 = arith.extf %0 : vector<24x512xbf16> to vector<24x512xf32>
    %c0_1 = arith.constant 0 : index
    %c0_2 = arith.constant 0 : index
    %2 = vector.load %arg2[%c0_1, %c0_2] : memref<24x1xf32, #tpu.memory_space<vmem>>, vector<24x1xf32>
    %3 = vector.broadcast %2 : vector<24x1xf32> to vector<24x512xf32>
    %4 = arith.mulf %1, %3 : vector<24x512xf32>
    %c0_3 = arith.constant 0 : index
    %c0_4 = arith.constant 0 : index
    %5 = vector.load %arg3[%c0_3, %c0_4] : memref<24x1xf32, #tpu.memory_space<vmem>>, vector<24x1xf32>
    %6 = vector.broadcast %5 : vector<24x1xf32> to vector<24x512xf32>
    %7 = arith.addf %4, %6 : vector<24x512xf32>
    %cst = arith.constant 0.000000e+00 : f32
    %8 = vector.broadcast %cst : f32 to vector<24x512xf32>
    %9 = arith.maximumf %7, %8 : vector<24x512xf32>
    %10 = arith.truncf %9 : vector<24x512xf32> to vector<24x512xbf16>
    %c0_5 = arith.constant 0 : index
    %c0_6 = arith.constant 0 : index
    %11 = vector.load %arg4[%c0_5, %c0_6] : memref<24x512xbf16, #tpu.memory_space<vmem>>, vector<24x512xbf16>
    tpu.vector_store %arg4[%c0_5, %c0_6], %10 {strides = array<i32>} : memref<24x512xbf16, #tpu.memory_space<vmem>>, vector<24x512xbf16>,
    return
  }
  func.func @transform_0(%arg0: i32) -> (i32, i32) {
    %c0_i32 = arith.constant 0 : i32
    %c0_i32_0 = arith.constant 0 : i32
    return %c0_i32, %arg0 : i32, i32
  }
  func.func @transform_1(%arg0: i32) -> (i32, i32) {
    %c0_i32 = arith.constant 0 : i32
    %c0_i32_0 = arith.constant 0 : i32
    %c0_i32_1 = arith.constant 0 : i32
    return %c0_i32, %c0_i32_0 : i32, i32
  }
  func.func @transform_2(%arg0: i32) -> (i32, i32) {
    %c0_i32 = arith.constant 0 : i32
    %c0_i32_0 = arith.constant 0 : i32
    %c0_i32_1 = arith.constant 0 : i32
    return %c0_i32, %c0_i32_0 : i32, i32
  }
  func.func @transform_3(%arg0: i32) -> (i32, i32) {
    %c0_i32 = arith.constant 0 : i32
    %c0_i32_0 = arith.constant 0 : i32
    return %c0_i32, %arg0 : i32, i32
  }
}

module attributes {stable_mosaic.version = 11 : i64} {
  func.func @_affine_res_kernel(%arg0: i32, %arg1: memref<24x512xbf16, #tpu.memory_space<vmem>>, %arg2: memref<24x1xf32, #tpu.memory_space<vmem>>, %arg3: memref<24x1xf32, #tpu.memory_space<vmem>>, %arg4: memref<24x512xbf16, #tpu.memory_space<vmem>>, %arg5: memref<24x512xbf16, #tpu.memory_space<vmem>>) attributes {dimension_semantics = [#tpu.dimension_semantics<parallel>], iteration_bounds = array<i64: 1>, scalar_prefetch = 0 : i64, scratch_operands = 0 : i64, tpu.core_type = #tpu.core_type<tc>, window_params = [{transform_indices = @transform_0, window_bounds = array<i64: 24, 512>}, {pipeline_mode = #tpu.pipeline_mode<synchronous>, transform_indices = @transform_1, window_bounds = array<i64: 24, 1>}, {pipeline_mode = #tpu.pipeline_mode<synchronous>, transform_indices = @transform_2, window_bounds = array<i64: 24, 1>}, {transform_indices = @transform_3, window_bounds = array<i64: 24, 512>}, {transform_indices = @transform_4, window_bounds = array<i64: 24, 512>}]} {
    %c0 = arith.constant 0 : index
    %c0_0 = arith.constant 0 : index
    %0 = vector.load %arg1[%c0, %c0_0] : memref<24x512xbf16, #tpu.memory_space<vmem>>, vector<24x512xbf16>
    %1 = arith.extf %0 : vector<24x512xbf16> to vector<24x512xf32>
    %c0_1 = arith.constant 0 : index
    %c0_2 = arith.constant 0 : index
    %2 = vector.load %arg2[%c0_1, %c0_2] : memref<24x1xf32, #tpu.memory_space<vmem>>, vector<24x1xf32>
    %3 = vector.broadcast %2 : vector<24x1xf32> to vector<24x512xf32>
    %4 = arith.mulf %1, %3 : vector<24x512xf32>
    %c0_3 = arith.constant 0 : index
    %c0_4 = arith.constant 0 : index
    %5 = vector.load %arg3[%c0_3, %c0_4] : memref<24x1xf32, #tpu.memory_space<vmem>>, vector<24x1xf32>
    %6 = vector.broadcast %5 : vector<24x1xf32> to vector<24x512xf32>
    %7 = arith.addf %4, %6 : vector<24x512xf32>
    %c0_5 = arith.constant 0 : index
    %c0_6 = arith.constant 0 : index
    %8 = vector.load %arg4[%c0_5, %c0_6] : memref<24x512xbf16, #tpu.memory_space<vmem>>, vector<24x512xbf16>
    %9 = arith.extf %8 : vector<24x512xbf16> to vector<24x512xf32>
    %10 = arith.addf %7, %9 : vector<24x512xf32>
    %11 = arith.truncf %10 : vector<24x512xf32> to vector<24x512xbf16>
    %c0_7 = arith.constant 0 : index
    %c0_8 = arith.constant 0 : index
    %12 = vector.load %arg5[%c0_7, %c0_8] : memref<24x512xbf16, #tpu.memory_space<vmem>>, vector<24x512xbf16>
    tpu.vector_store %arg5[%c0_7, %c0_8], %11 {strides = array<i32>} : memref<24x512xbf16, #tpu.memory_space<vmem>>, vector<24x512xbf16>,
    return
  }
  func.func @transform_0(%arg0: i32) -> (i32, i32) {
    %c0_i32 = arith.constant 0 : i32
    %c0_i32_0 = arith.constant 0 : i32
    return %c0_i32, %arg0 : i32, i32
  }
  func.func @transform_1(%arg0: i32) -> (i32, i32) {
    %c0_i32 = arith.constant 0 : i32
    %c0_i32_0 = arith.constant 0 : i32
    %c0_i32_1 = arith.constant 0 : i32
    return %c0_i32, %c0_i32_0 : i32, i32
  }
  func.func @transform_2(%arg0: i32) -> (i32, i32) {
    %c0_i32 = arith.constant 0 : i32
    %c0_i32_0 = arith.constant 0 : i32
    %c0_i32_1 = arith.constant 0 : i32
    return %c0_i32, %c0_i32_0 : i32, i32
  }
  func.func @transform_3(%arg0: i32) -> (i32, i32) {
    %c0_i32 = arith.constant 0 : i32
    %c0_i32_0 = arith.constant 0 : i32
    return %c0_i32, %arg0 : i32, i32
  }
  func.func @transform_4(%arg0: i32) -> (i32, i32) {
    %c0_i32 = arith.constant 0 : i32
    %c0_i32_0 = arith.constant 0 : i32
    return %c0_i32, %arg0 : i32, i32
  }
}

module attributes {stable_mosaic.version = 11 : i64} {
  func.func @_gemm_stats_kernel(%arg0: i32, %arg1: memref<24x216xbf16, #tpu.memory_space<vmem>>, %arg2: memref<216x512xbf16, #tpu.memory_space<vmem>>, %arg3: memref<24x512xbf16, #tpu.memory_space<vmem>>, %arg4: memref<24x1xf32, #tpu.memory_space<vmem>>, %arg5: memref<24x1xf32, #tpu.memory_space<vmem>>) attributes {dimension_semantics = [#tpu.dimension_semantics<arbitrary>], iteration_bounds = array<i64: 1>, scalar_prefetch = 0 : i64, scratch_operands = 0 : i64, tpu.core_type = #tpu.core_type<tc>, window_params = [{pipeline_mode = #tpu.pipeline_mode<synchronous>, transform_indices = @transform_0, window_bounds = array<i64: 24, 216>}, {transform_indices = @transform_1, window_bounds = array<i64: 216, 512>}, {transform_indices = @transform_2, window_bounds = array<i64: 24, 512>}, {pipeline_mode = #tpu.pipeline_mode<synchronous>, transform_indices = @transform_3, window_bounds = array<i64: 24, 1>}, {pipeline_mode = #tpu.pipeline_mode<synchronous>, transform_indices = @transform_4, window_bounds = array<i64: 24, 1>}]} {
    %c0 = arith.constant 0 : index
    %c0_0 = arith.constant 0 : index
    %0 = vector.load %arg1[%c0, %c0_0] : memref<24x216xbf16, #tpu.memory_space<vmem>>, vector<24x216xbf16>
    %c0_1 = arith.constant 0 : index
    %c0_2 = arith.constant 0 : index
    %1 = vector.load %arg2[%c0_1, %c0_2] : memref<216x512xbf16, #tpu.memory_space<vmem>>, vector<216x512xbf16>
    %cst = arith.constant dense<0.000000e+00> : vector<24x512xf32>
    %2 = tpu.matmul %0, %1, %cst {dimension_numbers = #tpu.dot_dimension_numbers<[1], [0], [0], [1], [0, 0, 1, 1], [], []>} : vector<24x216xbf16>, vector<216x512xbf16>, vector<24x512xf32> -> vector<24x512xf32>
    %3 = arith.truncf %2 : vector<24x512xf32> to vector<24x512xbf16>
    %c0_3 = arith.constant 0 : index
    %c0_4 = arith.constant 0 : index
    %4 = vector.load %arg3[%c0_3, %c0_4] : memref<24x512xbf16, #tpu.memory_space<vmem>>, vector<24x512xbf16>
    tpu.vector_store %arg3[%c0_3, %c0_4], %3 {strides = array<i32>} : memref<24x512xbf16, #tpu.memory_space<vmem>>, vector<24x512xbf16>,
    %c0_i32 = arith.constant 0 : i32
    %5 = arith.cmpi eq, %arg0, %c0_i32 : i32
    %6 = arith.extui %5 : i1 to i32
    %c0_i32_5 = arith.constant 0 : i32
    %7 = arith.cmpi ne, %6, %c0_i32_5 : i32
    scf.if %7 {
      %cst_16 = arith.constant 0.000000e+00 : f32
      %19 = vector.broadcast %cst_16 : f32 to vector<24x1xf32>
      %c0_17 = arith.constant 0 : index
      %c0_18 = arith.constant 0 : index
      %20 = vector.load %arg4[%c0_17, %c0_18] : memref<24x1xf32, #tpu.memory_space<vmem>>, vector<24x1xf32>
      tpu.vector_store %arg4[%c0_17, %c0_18], %19 {strides = array<i32>} : memref<24x1xf32, #tpu.memory_space<vmem>>, vector<24x1xf32>,
      %cst_19 = arith.constant 0.000000e+00 : f32
      %21 = vector.broadcast %cst_19 : f32 to vector<24x1xf32>
      %c0_20 = arith.constant 0 : index
      %c0_21 = arith.constant 0 : index
      %22 = vector.load %arg5[%c0_20, %c0_21] : memref<24x1xf32, #tpu.memory_space<vmem>>, vector<24x1xf32>
      tpu.vector_store %arg5[%c0_20, %c0_21], %21 {strides = array<i32>} : memref<24x1xf32, #tpu.memory_space<vmem>>, vector<24x1xf32>,
    } else {
    }
    %c0_6 = arith.constant 0 : index
    %c0_7 = arith.constant 0 : index
    %8 = vector.load %arg4[%c0_6, %c0_7] : memref<24x1xf32, #tpu.memory_space<vmem>>, vector<24x1xf32>
    %cst_8 = arith.constant dense<0.000000e+00> : vector<24xf32>
    %9 = vector.multi_reduction <add>, %2, %cst_8 [1] : vector<24x512xf32> to vector<24xf32>
    %10 = vector.shape_cast %9 : vector<24xf32> to vector<24x1xf32>
    %11 = arith.addf %8, %10 : vector<24x1xf32>
    %c0_9 = arith.constant 0 : index
    %c0_10 = arith.constant 0 : index
    %12 = vector.load %arg4[%c0_9, %c0_10] : memref<24x1xf32, #tpu.memory_space<vmem>>, vector<24x1xf32>
    tpu.vector_store %arg4[%c0_9, %c0_10], %11 {strides = array<i32>} : memref<24x1xf32, #tpu.memory_space<vmem>>, vector<24x1xf32>,
    %c0_11 = arith.constant 0 : index
    %c0_12 = arith.constant 0 : index
    %13 = vector.load %arg5[%c0_11, %c0_12] : memref<24x1xf32, #tpu.memory_space<vmem>>, vector<24x1xf32>
    %14 = arith.mulf %2, %2 : vector<24x512xf32>
    %cst_13 = arith.constant dense<0.000000e+00> : vector<24xf32>
    %15 = vector.multi_reduction <add>, %14, %cst_13 [1] : vector<24x512xf32> to vector<24xf32>
    %16 = vector.shape_cast %15 : vector<24xf32> to vector<24x1xf32>
    %17 = arith.addf %13, %16 : vector<24x1xf32>
    %c0_14 = arith.constant 0 : index
    %c0_15 = arith.constant 0 : index
    %18 = vector.load %arg5[%c0_14, %c0_15] : memref<24x1xf32, #tpu.memory_space<vmem>>, vector<24x1xf32>
    tpu.vector_store %arg5[%c0_14, %c0_15], %17 {strides = array<i32>} : memref<24x1xf32, #tpu.memory_space<vmem>>, vector<24x1xf32>,
    return
  }
  func.func @transform_0(%arg0: i32) -> (i32, i32) {
    %c0_i32 = arith.constant 0 : i32
    %c0_i32_0 = arith.constant 0 : i32
    %c0_i32_1 = arith.constant 0 : i32
    return %c0_i32, %c0_i32_0 : i32, i32
  }
  func.func @transform_1(%arg0: i32) -> (i32, i32) {
    %c0_i32 = arith.constant 0 : i32
    %c0_i32_0 = arith.constant 0 : i32
    return %c0_i32, %arg0 : i32, i32
  }
  func.func @transform_2(%arg0: i32) -> (i32, i32) {
    %c0_i32 = arith.constant 0 : i32
    %c0_i32_0 = arith.constant 0 : i32
    return %c0_i32, %arg0 : i32, i32
  }
  func.func @transform_3(%arg0: i32) -> (i32, i32) {
    %c0_i32 = arith.constant 0 : i32
    %c0_i32_0 = arith.constant 0 : i32
    %c0_i32_1 = arith.constant 0 : i32
    return %c0_i32, %c0_i32_0 : i32, i32
  }
  func.func @transform_4(%arg0: i32) -> (i32, i32) {
    %c0_i32 = arith.constant 0 : i32
    %c0_i32_0 = arith.constant 0 : i32
    %c0_i32_1 = arith.constant 0 : i32
    return %c0_i32, %c0_i32_0 : i32, i32
  }
}

module attributes {stable_mosaic.version = 11 : i64} {
  func.func @_gemm_stats_kernel(%arg0: i32, %arg1: memref<48x216xbf16, #tpu.memory_space<vmem>>, %arg2: memref<216x128xbf16, #tpu.memory_space<vmem>>, %arg3: memref<48x128xbf16, #tpu.memory_space<vmem>>, %arg4: memref<48x1xf32, #tpu.memory_space<vmem>>, %arg5: memref<48x1xf32, #tpu.memory_space<vmem>>) attributes {dimension_semantics = [#tpu.dimension_semantics<arbitrary>], iteration_bounds = array<i64: 1>, scalar_prefetch = 0 : i64, scratch_operands = 0 : i64, tpu.core_type = #tpu.core_type<tc>, window_params = [{pipeline_mode = #tpu.pipeline_mode<synchronous>, transform_indices = @transform_0, window_bounds = array<i64: 48, 216>}, {transform_indices = @transform_1, window_bounds = array<i64: 216, 128>}, {transform_indices = @transform_2, window_bounds = array<i64: 48, 128>}, {pipeline_mode = #tpu.pipeline_mode<synchronous>, transform_indices = @transform_3, window_bounds = array<i64: 48, 1>}, {pipeline_mode = #tpu.pipeline_mode<synchronous>, transform_indices = @transform_4, window_bounds = array<i64: 48, 1>}]} {
    %c0 = arith.constant 0 : index
    %c0_0 = arith.constant 0 : index
    %0 = vector.load %arg1[%c0, %c0_0] : memref<48x216xbf16, #tpu.memory_space<vmem>>, vector<48x216xbf16>
    %c0_1 = arith.constant 0 : index
    %c0_2 = arith.constant 0 : index
    %1 = vector.load %arg2[%c0_1, %c0_2] : memref<216x128xbf16, #tpu.memory_space<vmem>>, vector<216x128xbf16>
    %cst = arith.constant dense<0.000000e+00> : vector<48x128xf32>
    %2 = tpu.matmul %0, %1, %cst {dimension_numbers = #tpu.dot_dimension_numbers<[1], [0], [0], [1], [0, 0, 1, 1], [], []>} : vector<48x216xbf16>, vector<216x128xbf16>, vector<48x128xf32> -> vector<48x128xf32>
    %3 = arith.truncf %2 : vector<48x128xf32> to vector<48x128xbf16>
    %c0_3 = arith.constant 0 : index
    %c0_4 = arith.constant 0 : index
    %4 = vector.load %arg3[%c0_3, %c0_4] : memref<48x128xbf16, #tpu.memory_space<vmem>>, vector<48x128xbf16>
    tpu.vector_store %arg3[%c0_3, %c0_4], %3 {strides = array<i32>} : memref<48x128xbf16, #tpu.memory_space<vmem>>, vector<48x128xbf16>,
    %c0_i32 = arith.constant 0 : i32
    %5 = arith.cmpi eq, %arg0, %c0_i32 : i32
    %6 = arith.extui %5 : i1 to i32
    %c0_i32_5 = arith.constant 0 : i32
    %7 = arith.cmpi ne, %6, %c0_i32_5 : i32
    scf.if %7 {
      %cst_16 = arith.constant 0.000000e+00 : f32
      %19 = vector.broadcast %cst_16 : f32 to vector<48x1xf32>
      %c0_17 = arith.constant 0 : index
      %c0_18 = arith.constant 0 : index
      %20 = vector.load %arg4[%c0_17, %c0_18] : memref<48x1xf32, #tpu.memory_space<vmem>>, vector<48x1xf32>
      tpu.vector_store %arg4[%c0_17, %c0_18], %19 {strides = array<i32>} : memref<48x1xf32, #tpu.memory_space<vmem>>, vector<48x1xf32>,
      %cst_19 = arith.constant 0.000000e+00 : f32
      %21 = vector.broadcast %cst_19 : f32 to vector<48x1xf32>
      %c0_20 = arith.constant 0 : index
      %c0_21 = arith.constant 0 : index
      %22 = vector.load %arg5[%c0_20, %c0_21] : memref<48x1xf32, #tpu.memory_space<vmem>>, vector<48x1xf32>
      tpu.vector_store %arg5[%c0_20, %c0_21], %21 {strides = array<i32>} : memref<48x1xf32, #tpu.memory_space<vmem>>, vector<48x1xf32>,
    } else {
    }
    %c0_6 = arith.constant 0 : index
    %c0_7 = arith.constant 0 : index
    %8 = vector.load %arg4[%c0_6, %c0_7] : memref<48x1xf32, #tpu.memory_space<vmem>>, vector<48x1xf32>
    %cst_8 = arith.constant dense<0.000000e+00> : vector<48xf32>
    %9 = vector.multi_reduction <add>, %2, %cst_8 [1] : vector<48x128xf32> to vector<48xf32>
    %10 = vector.shape_cast %9 : vector<48xf32> to vector<48x1xf32>
    %11 = arith.addf %8, %10 : vector<48x1xf32>
    %c0_9 = arith.constant 0 : index
    %c0_10 = arith.constant 0 : index
    %12 = vector.load %arg4[%c0_9, %c0_10] : memref<48x1xf32, #tpu.memory_space<vmem>>, vector<48x1xf32>
    tpu.vector_store %arg4[%c0_9, %c0_10], %11 {strides = array<i32>} : memref<48x1xf32, #tpu.memory_space<vmem>>, vector<48x1xf32>,
    %c0_11 = arith.constant 0 : index
    %c0_12 = arith.constant 0 : index
    %13 = vector.load %arg5[%c0_11, %c0_12] : memref<48x1xf32, #tpu.memory_space<vmem>>, vector<48x1xf32>
    %14 = arith.mulf %2, %2 : vector<48x128xf32>
    %cst_13 = arith.constant dense<0.000000e+00> : vector<48xf32>
    %15 = vector.multi_reduction <add>, %14, %cst_13 [1] : vector<48x128xf32> to vector<48xf32>
    %16 = vector.shape_cast %15 : vector<48xf32> to vector<48x1xf32>
    %17 = arith.addf %13, %16 : vector<48x1xf32>
    %c0_14 = arith.constant 0 : index
    %c0_15 = arith.constant 0 : index
    %18 = vector.load %arg5[%c0_14, %c0_15] : memref<48x1xf32, #tpu.memory_space<vmem>>, vector<48x1xf32>
    tpu.vector_store %arg5[%c0_14, %c0_15], %17 {strides = array<i32>} : memref<48x1xf32, #tpu.memory_space<vmem>>, vector<48x1xf32>,
    return
  }
  func.func @transform_0(%arg0: i32) -> (i32, i32) {
    %c0_i32 = arith.constant 0 : i32
    %c0_i32_0 = arith.constant 0 : i32
    %c0_i32_1 = arith.constant 0 : i32
    return %c0_i32, %c0_i32_0 : i32, i32
  }
  func.func @transform_1(%arg0: i32) -> (i32, i32) {
    %c0_i32 = arith.constant 0 : i32
    %c0_i32_0 = arith.constant 0 : i32
    return %c0_i32, %arg0 : i32, i32
  }
  func.func @transform_2(%arg0: i32) -> (i32, i32) {
    %c0_i32 = arith.constant 0 : i32
    %c0_i32_0 = arith.constant 0 : i32
    return %c0_i32, %arg0 : i32, i32
  }
  func.func @transform_3(%arg0: i32) -> (i32, i32) {
    %c0_i32 = arith.constant 0 : i32
    %c0_i32_0 = arith.constant 0 : i32
    %c0_i32_1 = arith.constant 0 : i32
    return %c0_i32, %c0_i32_0 : i32, i32
  }
  func.func @transform_4(%arg0: i32) -> (i32, i32) {
    %c0_i32 = arith.constant 0 : i32
    %c0_i32_0 = arith.constant 0 : i32
    %c0_i32_1 = arith.constant 0 : i32
    return %c0_i32, %c0_i32_0 : i32, i32
  }
}

module attributes {stable_mosaic.version = 11 : i64} {
  func.func @_affine_kernel(%arg0: i32, %arg1: memref<48x128xbf16, #tpu.memory_space<vmem>>, %arg2: memref<48x1xf32, #tpu.memory_space<vmem>>, %arg3: memref<48x1xf32, #tpu.memory_space<vmem>>, %arg4: memref<48x128xbf16, #tpu.memory_space<vmem>>) attributes {dimension_semantics = [#tpu.dimension_semantics<parallel>], iteration_bounds = array<i64: 1>, scalar_prefetch = 0 : i64, scratch_operands = 0 : i64, tpu.core_type = #tpu.core_type<tc>, window_params = [{transform_indices = @transform_0, window_bounds = array<i64: 48, 128>}, {pipeline_mode = #tpu.pipeline_mode<synchronous>, transform_indices = @transform_1, window_bounds = array<i64: 48, 1>}, {pipeline_mode = #tpu.pipeline_mode<synchronous>, transform_indices = @transform_2, window_bounds = array<i64: 48, 1>}, {transform_indices = @transform_3, window_bounds = array<i64: 48, 128>}]} {
    %c0 = arith.constant 0 : index
    %c0_0 = arith.constant 0 : index
    %0 = vector.load %arg1[%c0, %c0_0] : memref<48x128xbf16, #tpu.memory_space<vmem>>, vector<48x128xbf16>
    %1 = arith.extf %0 : vector<48x128xbf16> to vector<48x128xf32>
    %c0_1 = arith.constant 0 : index
    %c0_2 = arith.constant 0 : index
    %2 = vector.load %arg2[%c0_1, %c0_2] : memref<48x1xf32, #tpu.memory_space<vmem>>, vector<48x1xf32>
    %3 = vector.broadcast %2 : vector<48x1xf32> to vector<48x128xf32>
    %4 = arith.mulf %1, %3 : vector<48x128xf32>
    %c0_3 = arith.constant 0 : index
    %c0_4 = arith.constant 0 : index
    %5 = vector.load %arg3[%c0_3, %c0_4] : memref<48x1xf32, #tpu.memory_space<vmem>>, vector<48x1xf32>
    %6 = vector.broadcast %5 : vector<48x1xf32> to vector<48x128xf32>
    %7 = arith.addf %4, %6 : vector<48x128xf32>
    %cst = arith.constant 0.000000e+00 : f32
    %8 = vector.broadcast %cst : f32 to vector<48x128xf32>
    %9 = arith.maximumf %7, %8 : vector<48x128xf32>
    %10 = arith.truncf %9 : vector<48x128xf32> to vector<48x128xbf16>
    %c0_5 = arith.constant 0 : index
    %c0_6 = arith.constant 0 : index
    %11 = vector.load %arg4[%c0_5, %c0_6] : memref<48x128xbf16, #tpu.memory_space<vmem>>, vector<48x128xbf16>
    tpu.vector_store %arg4[%c0_5, %c0_6], %10 {strides = array<i32>} : memref<48x128xbf16, #tpu.memory_space<vmem>>, vector<48x128xbf16>,
    return
  }
  func.func @transform_0(%arg0: i32) -> (i32, i32) {
    %c0_i32 = arith.constant 0 : i32
    %c0_i32_0 = arith.constant 0 : i32
    return %c0_i32, %arg0 : i32, i32
  }
  func.func @transform_1(%arg0: i32) -> (i32, i32) {
    %c0_i32 = arith.constant 0 : i32
    %c0_i32_0 = arith.constant 0 : i32
    %c0_i32_1 = arith.constant 0 : i32
    return %c0_i32, %c0_i32_0 : i32, i32
  }
  func.func @transform_2(%arg0: i32) -> (i32, i32) {
    %c0_i32 = arith.constant 0 : i32
    %c0_i32_0 = arith.constant 0 : i32
    %c0_i32_1 = arith.constant 0 : i32
    return %c0_i32, %c0_i32_0 : i32, i32
  }
  func.func @transform_3(%arg0: i32) -> (i32, i32) {
    %c0_i32 = arith.constant 0 : i32
    %c0_i32_0 = arith.constant 0 : i32
    return %c0_i32, %arg0 : i32, i32
  }
}

module attributes {stable_mosaic.version = 11 : i64} {
  func.func @_gemm_stats_kernel(%arg0: i32, %arg1: memref<48x432xbf16, #tpu.memory_space<vmem>>, %arg2: memref<432x128xbf16, #tpu.memory_space<vmem>>, %arg3: memref<48x128xbf16, #tpu.memory_space<vmem>>, %arg4: memref<48x1xf32, #tpu.memory_space<vmem>>, %arg5: memref<48x1xf32, #tpu.memory_space<vmem>>) attributes {dimension_semantics = [#tpu.dimension_semantics<arbitrary>], iteration_bounds = array<i64: 1>, scalar_prefetch = 0 : i64, scratch_operands = 0 : i64, tpu.core_type = #tpu.core_type<tc>, window_params = [{pipeline_mode = #tpu.pipeline_mode<synchronous>, transform_indices = @transform_0, window_bounds = array<i64: 48, 432>}, {transform_indices = @transform_1, window_bounds = array<i64: 432, 128>}, {transform_indices = @transform_2, window_bounds = array<i64: 48, 128>}, {pipeline_mode = #tpu.pipeline_mode<synchronous>, transform_indices = @transform_3, window_bounds = array<i64: 48, 1>}, {pipeline_mode = #tpu.pipeline_mode<synchronous>, transform_indices = @transform_4, window_bounds = array<i64: 48, 1>}]} {
    %c0 = arith.constant 0 : index
    %c0_0 = arith.constant 0 : index
    %0 = vector.load %arg1[%c0, %c0_0] : memref<48x432xbf16, #tpu.memory_space<vmem>>, vector<48x432xbf16>
    %c0_1 = arith.constant 0 : index
    %c0_2 = arith.constant 0 : index
    %1 = vector.load %arg2[%c0_1, %c0_2] : memref<432x128xbf16, #tpu.memory_space<vmem>>, vector<432x128xbf16>
    %cst = arith.constant dense<0.000000e+00> : vector<48x128xf32>
    %2 = tpu.matmul %0, %1, %cst {dimension_numbers = #tpu.dot_dimension_numbers<[1], [0], [0], [1], [0, 0, 1, 1], [], []>} : vector<48x432xbf16>, vector<432x128xbf16>, vector<48x128xf32> -> vector<48x128xf32>
    %3 = arith.truncf %2 : vector<48x128xf32> to vector<48x128xbf16>
    %c0_3 = arith.constant 0 : index
    %c0_4 = arith.constant 0 : index
    %4 = vector.load %arg3[%c0_3, %c0_4] : memref<48x128xbf16, #tpu.memory_space<vmem>>, vector<48x128xbf16>
    tpu.vector_store %arg3[%c0_3, %c0_4], %3 {strides = array<i32>} : memref<48x128xbf16, #tpu.memory_space<vmem>>, vector<48x128xbf16>,
    %c0_i32 = arith.constant 0 : i32
    %5 = arith.cmpi eq, %arg0, %c0_i32 : i32
    %6 = arith.extui %5 : i1 to i32
    %c0_i32_5 = arith.constant 0 : i32
    %7 = arith.cmpi ne, %6, %c0_i32_5 : i32
    scf.if %7 {
      %cst_16 = arith.constant 0.000000e+00 : f32
      %19 = vector.broadcast %cst_16 : f32 to vector<48x1xf32>
      %c0_17 = arith.constant 0 : index
      %c0_18 = arith.constant 0 : index
      %20 = vector.load %arg4[%c0_17, %c0_18] : memref<48x1xf32, #tpu.memory_space<vmem>>, vector<48x1xf32>
      tpu.vector_store %arg4[%c0_17, %c0_18], %19 {strides = array<i32>} : memref<48x1xf32, #tpu.memory_space<vmem>>, vector<48x1xf32>,
      %cst_19 = arith.constant 0.000000e+00 : f32
      %21 = vector.broadcast %cst_19 : f32 to vector<48x1xf32>
      %c0_20 = arith.constant 0 : index
      %c0_21 = arith.constant 0 : index
      %22 = vector.load %arg5[%c0_20, %c0_21] : memref<48x1xf32, #tpu.memory_space<vmem>>, vector<48x1xf32>
      tpu.vector_store %arg5[%c0_20, %c0_21], %21 {strides = array<i32>} : memref<48x1xf32, #tpu.memory_space<vmem>>, vector<48x1xf32>,
    } else {
    }
    %c0_6 = arith.constant 0 : index
    %c0_7 = arith.constant 0 : index
    %8 = vector.load %arg4[%c0_6, %c0_7] : memref<48x1xf32, #tpu.memory_space<vmem>>, vector<48x1xf32>
    %cst_8 = arith.constant dense<0.000000e+00> : vector<48xf32>
    %9 = vector.multi_reduction <add>, %2, %cst_8 [1] : vector<48x128xf32> to vector<48xf32>
    %10 = vector.shape_cast %9 : vector<48xf32> to vector<48x1xf32>
    %11 = arith.addf %8, %10 : vector<48x1xf32>
    %c0_9 = arith.constant 0 : index
    %c0_10 = arith.constant 0 : index
    %12 = vector.load %arg4[%c0_9, %c0_10] : memref<48x1xf32, #tpu.memory_space<vmem>>, vector<48x1xf32>
    tpu.vector_store %arg4[%c0_9, %c0_10], %11 {strides = array<i32>} : memref<48x1xf32, #tpu.memory_space<vmem>>, vector<48x1xf32>,
    %c0_11 = arith.constant 0 : index
    %c0_12 = arith.constant 0 : index
    %13 = vector.load %arg5[%c0_11, %c0_12] : memref<48x1xf32, #tpu.memory_space<vmem>>, vector<48x1xf32>
    %14 = arith.mulf %2, %2 : vector<48x128xf32>
    %cst_13 = arith.constant dense<0.000000e+00> : vector<48xf32>
    %15 = vector.multi_reduction <add>, %14, %cst_13 [1] : vector<48x128xf32> to vector<48xf32>
    %16 = vector.shape_cast %15 : vector<48xf32> to vector<48x1xf32>
    %17 = arith.addf %13, %16 : vector<48x1xf32>
    %c0_14 = arith.constant 0 : index
    %c0_15 = arith.constant 0 : index
    %18 = vector.load %arg5[%c0_14, %c0_15] : memref<48x1xf32, #tpu.memory_space<vmem>>, vector<48x1xf32>
    tpu.vector_store %arg5[%c0_14, %c0_15], %17 {strides = array<i32>} : memref<48x1xf32, #tpu.memory_space<vmem>>, vector<48x1xf32>,
    return
  }
  func.func @transform_0(%arg0: i32) -> (i32, i32) {
    %c0_i32 = arith.constant 0 : i32
    %c0_i32_0 = arith.constant 0 : i32
    %c0_i32_1 = arith.constant 0 : i32
    return %c0_i32, %c0_i32_0 : i32, i32
  }
  func.func @transform_1(%arg0: i32) -> (i32, i32) {
    %c0_i32 = arith.constant 0 : i32
    %c0_i32_0 = arith.constant 0 : i32
    return %c0_i32, %arg0 : i32, i32
  }
  func.func @transform_2(%arg0: i32) -> (i32, i32) {
    %c0_i32 = arith.constant 0 : i32
    %c0_i32_0 = arith.constant 0 : i32
    return %c0_i32, %arg0 : i32, i32
  }
  func.func @transform_3(%arg0: i32) -> (i32, i32) {
    %c0_i32 = arith.constant 0 : i32
    %c0_i32_0 = arith.constant 0 : i32
    %c0_i32_1 = arith.constant 0 : i32
    return %c0_i32, %c0_i32_0 : i32, i32
  }
  func.func @transform_4(%arg0: i32) -> (i32, i32) {
    %c0_i32 = arith.constant 0 : i32
    %c0_i32_0 = arith.constant 0 : i32
    %c0_i32_1 = arith.constant 0 : i32
    return %c0_i32, %c0_i32_0 : i32, i32
  }
}

module attributes {stable_mosaic.version = 11 : i64} {
  func.func @_affine_res_kernel(%arg0: i32, %arg1: memref<48x128xbf16, #tpu.memory_space<vmem>>, %arg2: memref<48x1xf32, #tpu.memory_space<vmem>>, %arg3: memref<48x1xf32, #tpu.memory_space<vmem>>, %arg4: memref<48x128xbf16, #tpu.memory_space<vmem>>, %arg5: memref<48x128xbf16, #tpu.memory_space<vmem>>) attributes {dimension_semantics = [#tpu.dimension_semantics<parallel>], iteration_bounds = array<i64: 1>, scalar_prefetch = 0 : i64, scratch_operands = 0 : i64, tpu.core_type = #tpu.core_type<tc>, window_params = [{transform_indices = @transform_0, window_bounds = array<i64: 48, 128>}, {pipeline_mode = #tpu.pipeline_mode<synchronous>, transform_indices = @transform_1, window_bounds = array<i64: 48, 1>}, {pipeline_mode = #tpu.pipeline_mode<synchronous>, transform_indices = @transform_2, window_bounds = array<i64: 48, 1>}, {transform_indices = @transform_3, window_bounds = array<i64: 48, 128>}, {transform_indices = @transform_4, window_bounds = array<i64: 48, 128>}]} {
    %c0 = arith.constant 0 : index
    %c0_0 = arith.constant 0 : index
    %0 = vector.load %arg1[%c0, %c0_0] : memref<48x128xbf16, #tpu.memory_space<vmem>>, vector<48x128xbf16>
    %1 = arith.extf %0 : vector<48x128xbf16> to vector<48x128xf32>
    %c0_1 = arith.constant 0 : index
    %c0_2 = arith.constant 0 : index
    %2 = vector.load %arg2[%c0_1, %c0_2] : memref<48x1xf32, #tpu.memory_space<vmem>>, vector<48x1xf32>
    %3 = vector.broadcast %2 : vector<48x1xf32> to vector<48x128xf32>
    %4 = arith.mulf %1, %3 : vector<48x128xf32>
    %c0_3 = arith.constant 0 : index
    %c0_4 = arith.constant 0 : index
    %5 = vector.load %arg3[%c0_3, %c0_4] : memref<48x1xf32, #tpu.memory_space<vmem>>, vector<48x1xf32>
    %6 = vector.broadcast %5 : vector<48x1xf32> to vector<48x128xf32>
    %7 = arith.addf %4, %6 : vector<48x128xf32>
    %c0_5 = arith.constant 0 : index
    %c0_6 = arith.constant 0 : index
    %8 = vector.load %arg4[%c0_5, %c0_6] : memref<48x128xbf16, #tpu.memory_space<vmem>>, vector<48x128xbf16>
    %9 = arith.extf %8 : vector<48x128xbf16> to vector<48x128xf32>
    %10 = arith.addf %7, %9 : vector<48x128xf32>
    %11 = arith.truncf %10 : vector<48x128xf32> to vector<48x128xbf16>
    %c0_7 = arith.constant 0 : index
    %c0_8 = arith.constant 0 : index
    %12 = vector.load %arg5[%c0_7, %c0_8] : memref<48x128xbf16, #tpu.memory_space<vmem>>, vector<48x128xbf16>
    tpu.vector_store %arg5[%c0_7, %c0_8], %11 {strides = array<i32>} : memref<48x128xbf16, #tpu.memory_space<vmem>>, vector<48x128xbf16>,
    return
  }
  func.func @transform_0(%arg0: i32) -> (i32, i32) {
    %c0_i32 = arith.constant 0 : i32
    %c0_i32_0 = arith.constant 0 : i32
    return %c0_i32, %arg0 : i32, i32
  }
  func.func @transform_1(%arg0: i32) -> (i32, i32) {
    %c0_i32 = arith.constant 0 : i32
    %c0_i32_0 = arith.constant 0 : i32
    %c0_i32_1 = arith.constant 0 : i32
    return %c0_i32, %c0_i32_0 : i32, i32
  }
  func.func @transform_2(%arg0: i32) -> (i32, i32) {
    %c0_i32 = arith.constant 0 : i32
    %c0_i32_0 = arith.constant 0 : i32
    %c0_i32_1 = arith.constant 0 : i32
    return %c0_i32, %c0_i32_0 : i32, i32
  }
  func.func @transform_3(%arg0: i32) -> (i32, i32) {
    %c0_i32 = arith.constant 0 : i32
    %c0_i32_0 = arith.constant 0 : i32
    return %c0_i32, %arg0 : i32, i32
  }
  func.func @transform_4(%arg0: i32) -> (i32, i32) {
    %c0_i32 = arith.constant 0 : i32
    %c0_i32_0 = arith.constant 0 : i32
    return %c0_i32, %arg0 : i32, i32
  }
}

module attributes {stable_mosaic.version = 11 : i64} {
  func.func @_gemm_stats_kernel(%arg0: i32, %arg1: memref<96x432xbf16, #tpu.memory_space<vmem>>, %arg2: memref<432x128xbf16, #tpu.memory_space<vmem>>, %arg3: memref<96x128xbf16, #tpu.memory_space<vmem>>, %arg4: memref<96x1xf32, #tpu.memory_space<vmem>>, %arg5: memref<96x1xf32, #tpu.memory_space<vmem>>) attributes {dimension_semantics = [#tpu.dimension_semantics<arbitrary>], iteration_bounds = array<i64: 1>, scalar_prefetch = 0 : i64, scratch_operands = 0 : i64, tpu.core_type = #tpu.core_type<tc>, window_params = [{pipeline_mode = #tpu.pipeline_mode<synchronous>, transform_indices = @transform_0, window_bounds = array<i64: 96, 432>}, {transform_indices = @transform_1, window_bounds = array<i64: 432, 128>}, {transform_indices = @transform_2, window_bounds = array<i64: 96, 128>}, {pipeline_mode = #tpu.pipeline_mode<synchronous>, transform_indices = @transform_3, window_bounds = array<i64: 96, 1>}, {pipeline_mode = #tpu.pipeline_mode<synchronous>, transform_indices = @transform_4, window_bounds = array<i64: 96, 1>}]} {
    %c0 = arith.constant 0 : index
    %c0_0 = arith.constant 0 : index
    %0 = vector.load %arg1[%c0, %c0_0] : memref<96x432xbf16, #tpu.memory_space<vmem>>, vector<96x432xbf16>
    %c0_1 = arith.constant 0 : index
    %c0_2 = arith.constant 0 : index
    %1 = vector.load %arg2[%c0_1, %c0_2] : memref<432x128xbf16, #tpu.memory_space<vmem>>, vector<432x128xbf16>
    %cst = arith.constant dense<0.000000e+00> : vector<96x128xf32>
    %2 = tpu.matmul %0, %1, %cst {dimension_numbers = #tpu.dot_dimension_numbers<[1], [0], [0], [1], [0, 0, 1, 1], [], []>} : vector<96x432xbf16>, vector<432x128xbf16>, vector<96x128xf32> -> vector<96x128xf32>
    %3 = arith.truncf %2 : vector<96x128xf32> to vector<96x128xbf16>
    %c0_3 = arith.constant 0 : index
    %c0_4 = arith.constant 0 : index
    %4 = vector.load %arg3[%c0_3, %c0_4] : memref<96x128xbf16, #tpu.memory_space<vmem>>, vector<96x128xbf16>
    tpu.vector_store %arg3[%c0_3, %c0_4], %3 {strides = array<i32>} : memref<96x128xbf16, #tpu.memory_space<vmem>>, vector<96x128xbf16>,
    %c0_i32 = arith.constant 0 : i32
    %5 = arith.cmpi eq, %arg0, %c0_i32 : i32
    %6 = arith.extui %5 : i1 to i32
    %c0_i32_5 = arith.constant 0 : i32
    %7 = arith.cmpi ne, %6, %c0_i32_5 : i32
    scf.if %7 {
      %cst_16 = arith.constant 0.000000e+00 : f32
      %19 = vector.broadcast %cst_16 : f32 to vector<96x1xf32>
      %c0_17 = arith.constant 0 : index
      %c0_18 = arith.constant 0 : index
      %20 = vector.load %arg4[%c0_17, %c0_18] : memref<96x1xf32, #tpu.memory_space<vmem>>, vector<96x1xf32>
      tpu.vector_store %arg4[%c0_17, %c0_18], %19 {strides = array<i32>} : memref<96x1xf32, #tpu.memory_space<vmem>>, vector<96x1xf32>,
      %cst_19 = arith.constant 0.000000e+00 : f32
      %21 = vector.broadcast %cst_19 : f32 to vector<96x1xf32>
      %c0_20 = arith.constant 0 : index
      %c0_21 = arith.constant 0 : index
      %22 = vector.load %arg5[%c0_20, %c0_21] : memref<96x1xf32, #tpu.memory_space<vmem>>, vector<96x1xf32>
      tpu.vector_store %arg5[%c0_20, %c0_21], %21 {strides = array<i32>} : memref<96x1xf32, #tpu.memory_space<vmem>>, vector<96x1xf32>,
    } else {
    }
    %c0_6 = arith.constant 0 : index
    %c0_7 = arith.constant 0 : index
    %8 = vector.load %arg4[%c0_6, %c0_7] : memref<96x1xf32, #tpu.memory_space<vmem>>, vector<96x1xf32>
    %cst_8 = arith.constant dense<0.000000e+00> : vector<96xf32>
    %9 = vector.multi_reduction <add>, %2, %cst_8 [1] : vector<96x128xf32> to vector<96xf32>
    %10 = vector.shape_cast %9 : vector<96xf32> to vector<96x1xf32>
    %11 = arith.addf %8, %10 : vector<96x1xf32>
    %c0_9 = arith.constant 0 : index
    %c0_10 = arith.constant 0 : index
    %12 = vector.load %arg4[%c0_9, %c0_10] : memref<96x1xf32, #tpu.memory_space<vmem>>, vector<96x1xf32>
    tpu.vector_store %arg4[%c0_9, %c0_10], %11 {strides = array<i32>} : memref<96x1xf32, #tpu.memory_space<vmem>>, vector<96x1xf32>,
    %c0_11 = arith.constant 0 : index
    %c0_12 = arith.constant 0 : index
    %13 = vector.load %arg5[%c0_11, %c0_12] : memref<96x1xf32, #tpu.memory_space<vmem>>, vector<96x1xf32>
    %14 = arith.mulf %2, %2 : vector<96x128xf32>
    %cst_13 = arith.constant dense<0.000000e+00> : vector<96xf32>
    %15 = vector.multi_reduction <add>, %14, %cst_13 [1] : vector<96x128xf32> to vector<96xf32>
    %16 = vector.shape_cast %15 : vector<96xf32> to vector<96x1xf32>
    %17 = arith.addf %13, %16 : vector<96x1xf32>
    %c0_14 = arith.constant 0 : index
    %c0_15 = arith.constant 0 : index
    %18 = vector.load %arg5[%c0_14, %c0_15] : memref<96x1xf32, #tpu.memory_space<vmem>>, vector<96x1xf32>
    tpu.vector_store %arg5[%c0_14, %c0_15], %17 {strides = array<i32>} : memref<96x1xf32, #tpu.memory_space<vmem>>, vector<96x1xf32>,
    return
  }
  func.func @transform_0(%arg0: i32) -> (i32, i32) {
    %c0_i32 = arith.constant 0 : i32
    %c0_i32_0 = arith.constant 0 : i32
    %c0_i32_1 = arith.constant 0 : i32
    return %c0_i32, %c0_i32_0 : i32, i32
  }
  func.func @transform_1(%arg0: i32) -> (i32, i32) {
    %c0_i32 = arith.constant 0 : i32
    %c0_i32_0 = arith.constant 0 : i32
    return %c0_i32, %arg0 : i32, i32
  }
  func.func @transform_2(%arg0: i32) -> (i32, i32) {
    %c0_i32 = arith.constant 0 : i32
    %c0_i32_0 = arith.constant 0 : i32
    return %c0_i32, %arg0 : i32, i32
  }
  func.func @transform_3(%arg0: i32) -> (i32, i32) {
    %c0_i32 = arith.constant 0 : i32
    %c0_i32_0 = arith.constant 0 : i32
    %c0_i32_1 = arith.constant 0 : i32
    return %c0_i32, %c0_i32_0 : i32, i32
  }
  func.func @transform_4(%arg0: i32) -> (i32, i32) {
    %c0_i32 = arith.constant 0 : i32
    %c0_i32_0 = arith.constant 0 : i32
    %c0_i32_1 = arith.constant 0 : i32
    return %c0_i32, %c0_i32_0 : i32, i32
  }
}

module attributes {stable_mosaic.version = 11 : i64} {
  func.func @_affine_kernel(%arg0: i32, %arg1: memref<96x128xbf16, #tpu.memory_space<vmem>>, %arg2: memref<96x1xf32, #tpu.memory_space<vmem>>, %arg3: memref<96x1xf32, #tpu.memory_space<vmem>>, %arg4: memref<96x128xbf16, #tpu.memory_space<vmem>>) attributes {dimension_semantics = [#tpu.dimension_semantics<parallel>], iteration_bounds = array<i64: 1>, scalar_prefetch = 0 : i64, scratch_operands = 0 : i64, tpu.core_type = #tpu.core_type<tc>, window_params = [{transform_indices = @transform_0, window_bounds = array<i64: 96, 128>}, {pipeline_mode = #tpu.pipeline_mode<synchronous>, transform_indices = @transform_1, window_bounds = array<i64: 96, 1>}, {pipeline_mode = #tpu.pipeline_mode<synchronous>, transform_indices = @transform_2, window_bounds = array<i64: 96, 1>}, {transform_indices = @transform_3, window_bounds = array<i64: 96, 128>}]} {
    %c0 = arith.constant 0 : index
    %c0_0 = arith.constant 0 : index
    %0 = vector.load %arg1[%c0, %c0_0] : memref<96x128xbf16, #tpu.memory_space<vmem>>, vector<96x128xbf16>
    %1 = arith.extf %0 : vector<96x128xbf16> to vector<96x128xf32>
    %c0_1 = arith.constant 0 : index
    %c0_2 = arith.constant 0 : index
    %2 = vector.load %arg2[%c0_1, %c0_2] : memref<96x1xf32, #tpu.memory_space<vmem>>, vector<96x1xf32>
    %3 = vector.broadcast %2 : vector<96x1xf32> to vector<96x128xf32>
    %4 = arith.mulf %1, %3 : vector<96x128xf32>
    %c0_3 = arith.constant 0 : index
    %c0_4 = arith.constant 0 : index
    %5 = vector.load %arg3[%c0_3, %c0_4] : memref<96x1xf32, #tpu.memory_space<vmem>>, vector<96x1xf32>
    %6 = vector.broadcast %5 : vector<96x1xf32> to vector<96x128xf32>
    %7 = arith.addf %4, %6 : vector<96x128xf32>
    %cst = arith.constant 0.000000e+00 : f32
    %8 = vector.broadcast %cst : f32 to vector<96x128xf32>
    %9 = arith.maximumf %7, %8 : vector<96x128xf32>
    %10 = arith.truncf %9 : vector<96x128xf32> to vector<96x128xbf16>
    %c0_5 = arith.constant 0 : index
    %c0_6 = arith.constant 0 : index
    %11 = vector.load %arg4[%c0_5, %c0_6] : memref<96x128xbf16, #tpu.memory_space<vmem>>, vector<96x128xbf16>
    tpu.vector_store %arg4[%c0_5, %c0_6], %10 {strides = array<i32>} : memref<96x128xbf16, #tpu.memory_space<vmem>>, vector<96x128xbf16>,
    return
  }
  func.func @transform_0(%arg0: i32) -> (i32, i32) {
    %c0_i32 = arith.constant 0 : i32
    %c0_i32_0 = arith.constant 0 : i32
    return %c0_i32, %arg0 : i32, i32
  }
  func.func @transform_1(%arg0: i32) -> (i32, i32) {
    %c0_i32 = arith.constant 0 : i32
    %c0_i32_0 = arith.constant 0 : i32
    %c0_i32_1 = arith.constant 0 : i32
    return %c0_i32, %c0_i32_0 : i32, i32
  }
  func.func @transform_2(%arg0: i32) -> (i32, i32) {
    %c0_i32 = arith.constant 0 : i32
    %c0_i32_0 = arith.constant 0 : i32
    %c0_i32_1 = arith.constant 0 : i32
    return %c0_i32, %c0_i32_0 : i32, i32
  }
  func.func @transform_3(%arg0: i32) -> (i32, i32) {
    %c0_i32 = arith.constant 0 : i32
    %c0_i32_0 = arith.constant 0 : i32
    return %c0_i32, %arg0 : i32, i32
  }
}

module attributes {stable_mosaic.version = 11 : i64} {
  func.func @_gemm_stats_kernel(%arg0: i32, %arg1: memref<96x864xbf16, #tpu.memory_space<vmem>>, %arg2: memref<864x128xbf16, #tpu.memory_space<vmem>>, %arg3: memref<96x128xbf16, #tpu.memory_space<vmem>>, %arg4: memref<96x1xf32, #tpu.memory_space<vmem>>, %arg5: memref<96x1xf32, #tpu.memory_space<vmem>>) attributes {dimension_semantics = [#tpu.dimension_semantics<arbitrary>], iteration_bounds = array<i64: 1>, scalar_prefetch = 0 : i64, scratch_operands = 0 : i64, tpu.core_type = #tpu.core_type<tc>, window_params = [{pipeline_mode = #tpu.pipeline_mode<synchronous>, transform_indices = @transform_0, window_bounds = array<i64: 96, 864>}, {transform_indices = @transform_1, window_bounds = array<i64: 864, 128>}, {transform_indices = @transform_2, window_bounds = array<i64: 96, 128>}, {pipeline_mode = #tpu.pipeline_mode<synchronous>, transform_indices = @transform_3, window_bounds = array<i64: 96, 1>}, {pipeline_mode = #tpu.pipeline_mode<synchronous>, transform_indices = @transform_4, window_bounds = array<i64: 96, 1>}]} {
    %c0 = arith.constant 0 : index
    %c0_0 = arith.constant 0 : index
    %0 = vector.load %arg1[%c0, %c0_0] : memref<96x864xbf16, #tpu.memory_space<vmem>>, vector<96x864xbf16>
    %c0_1 = arith.constant 0 : index
    %c0_2 = arith.constant 0 : index
    %1 = vector.load %arg2[%c0_1, %c0_2] : memref<864x128xbf16, #tpu.memory_space<vmem>>, vector<864x128xbf16>
    %cst = arith.constant dense<0.000000e+00> : vector<96x128xf32>
    %2 = tpu.matmul %0, %1, %cst {dimension_numbers = #tpu.dot_dimension_numbers<[1], [0], [0], [1], [0, 0, 1, 1], [], []>} : vector<96x864xbf16>, vector<864x128xbf16>, vector<96x128xf32> -> vector<96x128xf32>
    %3 = arith.truncf %2 : vector<96x128xf32> to vector<96x128xbf16>
    %c0_3 = arith.constant 0 : index
    %c0_4 = arith.constant 0 : index
    %4 = vector.load %arg3[%c0_3, %c0_4] : memref<96x128xbf16, #tpu.memory_space<vmem>>, vector<96x128xbf16>
    tpu.vector_store %arg3[%c0_3, %c0_4], %3 {strides = array<i32>} : memref<96x128xbf16, #tpu.memory_space<vmem>>, vector<96x128xbf16>,
    %c0_i32 = arith.constant 0 : i32
    %5 = arith.cmpi eq, %arg0, %c0_i32 : i32
    %6 = arith.extui %5 : i1 to i32
    %c0_i32_5 = arith.constant 0 : i32
    %7 = arith.cmpi ne, %6, %c0_i32_5 : i32
    scf.if %7 {
      %cst_16 = arith.constant 0.000000e+00 : f32
      %19 = vector.broadcast %cst_16 : f32 to vector<96x1xf32>
      %c0_17 = arith.constant 0 : index
      %c0_18 = arith.constant 0 : index
      %20 = vector.load %arg4[%c0_17, %c0_18] : memref<96x1xf32, #tpu.memory_space<vmem>>, vector<96x1xf32>
      tpu.vector_store %arg4[%c0_17, %c0_18], %19 {strides = array<i32>} : memref<96x1xf32, #tpu.memory_space<vmem>>, vector<96x1xf32>,
      %cst_19 = arith.constant 0.000000e+00 : f32
      %21 = vector.broadcast %cst_19 : f32 to vector<96x1xf32>
      %c0_20 = arith.constant 0 : index
      %c0_21 = arith.constant 0 : index
      %22 = vector.load %arg5[%c0_20, %c0_21] : memref<96x1xf32, #tpu.memory_space<vmem>>, vector<96x1xf32>
      tpu.vector_store %arg5[%c0_20, %c0_21], %21 {strides = array<i32>} : memref<96x1xf32, #tpu.memory_space<vmem>>, vector<96x1xf32>,
    } else {
    }
    %c0_6 = arith.constant 0 : index
    %c0_7 = arith.constant 0 : index
    %8 = vector.load %arg4[%c0_6, %c0_7] : memref<96x1xf32, #tpu.memory_space<vmem>>, vector<96x1xf32>
    %cst_8 = arith.constant dense<0.000000e+00> : vector<96xf32>
    %9 = vector.multi_reduction <add>, %2, %cst_8 [1] : vector<96x128xf32> to vector<96xf32>
    %10 = vector.shape_cast %9 : vector<96xf32> to vector<96x1xf32>
    %11 = arith.addf %8, %10 : vector<96x1xf32>
    %c0_9 = arith.constant 0 : index
    %c0_10 = arith.constant 0 : index
    %12 = vector.load %arg4[%c0_9, %c0_10] : memref<96x1xf32, #tpu.memory_space<vmem>>, vector<96x1xf32>
    tpu.vector_store %arg4[%c0_9, %c0_10], %11 {strides = array<i32>} : memref<96x1xf32, #tpu.memory_space<vmem>>, vector<96x1xf32>,
    %c0_11 = arith.constant 0 : index
    %c0_12 = arith.constant 0 : index
    %13 = vector.load %arg5[%c0_11, %c0_12] : memref<96x1xf32, #tpu.memory_space<vmem>>, vector<96x1xf32>
    %14 = arith.mulf %2, %2 : vector<96x128xf32>
    %cst_13 = arith.constant dense<0.000000e+00> : vector<96xf32>
    %15 = vector.multi_reduction <add>, %14, %cst_13 [1] : vector<96x128xf32> to vector<96xf32>
    %16 = vector.shape_cast %15 : vector<96xf32> to vector<96x1xf32>
    %17 = arith.addf %13, %16 : vector<96x1xf32>
    %c0_14 = arith.constant 0 : index
    %c0_15 = arith.constant 0 : index
    %18 = vector.load %arg5[%c0_14, %c0_15] : memref<96x1xf32, #tpu.memory_space<vmem>>, vector<96x1xf32>
    tpu.vector_store %arg5[%c0_14, %c0_15], %17 {strides = array<i32>} : memref<96x1xf32, #tpu.memory_space<vmem>>, vector<96x1xf32>,
    return
  }
  func.func @transform_0(%arg0: i32) -> (i32, i32) {
    %c0_i32 = arith.constant 0 : i32
    %c0_i32_0 = arith.constant 0 : i32
    %c0_i32_1 = arith.constant 0 : i32
    return %c0_i32, %c0_i32_0 : i32, i32
  }
  func.func @transform_1(%arg0: i32) -> (i32, i32) {
    %c0_i32 = arith.constant 0 : i32
    %c0_i32_0 = arith.constant 0 : i32
    return %c0_i32, %arg0 : i32, i32
  }
  func.func @transform_2(%arg0: i32) -> (i32, i32) {
    %c0_i32 = arith.constant 0 : i32
    %c0_i32_0 = arith.constant 0 : i32
    return %c0_i32, %arg0 : i32, i32
  }
  func.func @transform_3(%arg0: i32) -> (i32, i32) {
    %c0_i32 = arith.constant 0 : i32
    %c0_i32_0 = arith.constant 0 : i32
    %c0_i32_1 = arith.constant 0 : i32
    return %c0_i32, %c0_i32_0 : i32, i32
  }
  func.func @transform_4(%arg0: i32) -> (i32, i32) {
    %c0_i32 = arith.constant 0 : i32
    %c0_i32_0 = arith.constant 0 : i32
    %c0_i32_1 = arith.constant 0 : i32
    return %c0_i32, %c0_i32_0 : i32, i32
  }
}

module attributes {stable_mosaic.version = 11 : i64} {
  func.func @_affine_res_kernel(%arg0: i32, %arg1: memref<96x128xbf16, #tpu.memory_space<vmem>>, %arg2: memref<96x1xf32, #tpu.memory_space<vmem>>, %arg3: memref<96x1xf32, #tpu.memory_space<vmem>>, %arg4: memref<96x128xbf16, #tpu.memory_space<vmem>>, %arg5: memref<96x128xbf16, #tpu.memory_space<vmem>>) attributes {dimension_semantics = [#tpu.dimension_semantics<parallel>], iteration_bounds = array<i64: 1>, scalar_prefetch = 0 : i64, scratch_operands = 0 : i64, tpu.core_type = #tpu.core_type<tc>, window_params = [{transform_indices = @transform_0, window_bounds = array<i64: 96, 128>}, {pipeline_mode = #tpu.pipeline_mode<synchronous>, transform_indices = @transform_1, window_bounds = array<i64: 96, 1>}, {pipeline_mode = #tpu.pipeline_mode<synchronous>, transform_indices = @transform_2, window_bounds = array<i64: 96, 1>}, {transform_indices = @transform_3, window_bounds = array<i64: 96, 128>}, {transform_indices = @transform_4, window_bounds = array<i64: 96, 128>}]} {
    %c0 = arith.constant 0 : index
    %c0_0 = arith.constant 0 : index
    %0 = vector.load %arg1[%c0, %c0_0] : memref<96x128xbf16, #tpu.memory_space<vmem>>, vector<96x128xbf16>
    %1 = arith.extf %0 : vector<96x128xbf16> to vector<96x128xf32>
    %c0_1 = arith.constant 0 : index
    %c0_2 = arith.constant 0 : index
    %2 = vector.load %arg2[%c0_1, %c0_2] : memref<96x1xf32, #tpu.memory_space<vmem>>, vector<96x1xf32>
    %3 = vector.broadcast %2 : vector<96x1xf32> to vector<96x128xf32>
    %4 = arith.mulf %1, %3 : vector<96x128xf32>
    %c0_3 = arith.constant 0 : index
    %c0_4 = arith.constant 0 : index
    %5 = vector.load %arg3[%c0_3, %c0_4] : memref<96x1xf32, #tpu.memory_space<vmem>>, vector<96x1xf32>
    %6 = vector.broadcast %5 : vector<96x1xf32> to vector<96x128xf32>
    %7 = arith.addf %4, %6 : vector<96x128xf32>
    %c0_5 = arith.constant 0 : index
    %c0_6 = arith.constant 0 : index
    %8 = vector.load %arg4[%c0_5, %c0_6] : memref<96x128xbf16, #tpu.memory_space<vmem>>, vector<96x128xbf16>
    %9 = arith.extf %8 : vector<96x128xbf16> to vector<96x128xf32>
    %10 = arith.addf %7, %9 : vector<96x128xf32>
    %11 = arith.truncf %10 : vector<96x128xf32> to vector<96x128xbf16>
    %c0_7 = arith.constant 0 : index
    %c0_8 = arith.constant 0 : index
    %12 = vector.load %arg5[%c0_7, %c0_8] : memref<96x128xbf16, #tpu.memory_space<vmem>>, vector<96x128xbf16>
    tpu.vector_store %arg5[%c0_7, %c0_8], %11 {strides = array<i32>} : memref<96x128xbf16, #tpu.memory_space<vmem>>, vector<96x128xbf16>,
    return
  }
  func.func @transform_0(%arg0: i32) -> (i32, i32) {
    %c0_i32 = arith.constant 0 : i32
    %c0_i32_0 = arith.constant 0 : i32
    return %c0_i32, %arg0 : i32, i32
  }
  func.func @transform_1(%arg0: i32) -> (i32, i32) {
    %c0_i32 = arith.constant 0 : i32
    %c0_i32_0 = arith.constant 0 : i32
    %c0_i32_1 = arith.constant 0 : i32
    return %c0_i32, %c0_i32_0 : i32, i32
  }
  func.func @transform_2(%arg0: i32) -> (i32, i32) {
    %c0_i32 = arith.constant 0 : i32
    %c0_i32_0 = arith.constant 0 : i32
    %c0_i32_1 = arith.constant 0 : i32
    return %c0_i32, %c0_i32_0 : i32, i32
  }
  func.func @transform_3(%arg0: i32) -> (i32, i32) {
    %c0_i32 = arith.constant 0 : i32
    %c0_i32_0 = arith.constant 0 : i32
    return %c0_i32, %arg0 : i32, i32
  }
  func.func @transform_4(%arg0: i32) -> (i32, i32) {
    %c0_i32 = arith.constant 0 : i32
    %c0_i32_0 = arith.constant 0 : i32
    return %c0_i32, %arg0 : i32, i32
  }
}

module attributes {stable_mosaic.version = 11 : i64} {
  func.func @_gemm_stats_kernel(%arg0: i32, %arg1: memref<48x384xbf16, #tpu.memory_space<vmem>>, %arg2: memref<384x128xbf16, #tpu.memory_space<vmem>>, %arg3: memref<48x128xbf16, #tpu.memory_space<vmem>>, %arg4: memref<48x1xf32, #tpu.memory_space<vmem>>, %arg5: memref<48x1xf32, #tpu.memory_space<vmem>>) attributes {dimension_semantics = [#tpu.dimension_semantics<arbitrary>], iteration_bounds = array<i64: 1>, scalar_prefetch = 0 : i64, scratch_operands = 0 : i64, tpu.core_type = #tpu.core_type<tc>, window_params = [{pipeline_mode = #tpu.pipeline_mode<synchronous>, transform_indices = @transform_0, window_bounds = array<i64: 48, 384>}, {transform_indices = @transform_1, window_bounds = array<i64: 384, 128>}, {transform_indices = @transform_2, window_bounds = array<i64: 48, 128>}, {pipeline_mode = #tpu.pipeline_mode<synchronous>, transform_indices = @transform_3, window_bounds = array<i64: 48, 1>}, {pipeline_mode = #tpu.pipeline_mode<synchronous>, transform_indices = @transform_4, window_bounds = array<i64: 48, 1>}]} {
    %c0 = arith.constant 0 : index
    %c0_0 = arith.constant 0 : index
    %0 = vector.load %arg1[%c0, %c0_0] : memref<48x384xbf16, #tpu.memory_space<vmem>>, vector<48x384xbf16>
    %c0_1 = arith.constant 0 : index
    %c0_2 = arith.constant 0 : index
    %1 = vector.load %arg2[%c0_1, %c0_2] : memref<384x128xbf16, #tpu.memory_space<vmem>>, vector<384x128xbf16>
    %cst = arith.constant dense<0.000000e+00> : vector<48x128xf32>
    %2 = tpu.matmul %0, %1, %cst {dimension_numbers = #tpu.dot_dimension_numbers<[1], [0], [0], [1], [0, 0, 1, 1], [], []>} : vector<48x384xbf16>, vector<384x128xbf16>, vector<48x128xf32> -> vector<48x128xf32>
    %3 = arith.truncf %2 : vector<48x128xf32> to vector<48x128xbf16>
    %c0_3 = arith.constant 0 : index
    %c0_4 = arith.constant 0 : index
    %4 = vector.load %arg3[%c0_3, %c0_4] : memref<48x128xbf16, #tpu.memory_space<vmem>>, vector<48x128xbf16>
    tpu.vector_store %arg3[%c0_3, %c0_4], %3 {strides = array<i32>} : memref<48x128xbf16, #tpu.memory_space<vmem>>, vector<48x128xbf16>,
    %c0_i32 = arith.constant 0 : i32
    %5 = arith.cmpi eq, %arg0, %c0_i32 : i32
    %6 = arith.extui %5 : i1 to i32
    %c0_i32_5 = arith.constant 0 : i32
    %7 = arith.cmpi ne, %6, %c0_i32_5 : i32
    scf.if %7 {
      %cst_16 = arith.constant 0.000000e+00 : f32
      %19 = vector.broadcast %cst_16 : f32 to vector<48x1xf32>
      %c0_17 = arith.constant 0 : index
      %c0_18 = arith.constant 0 : index
      %20 = vector.load %arg4[%c0_17, %c0_18] : memref<48x1xf32, #tpu.memory_space<vmem>>, vector<48x1xf32>
      tpu.vector_store %arg4[%c0_17, %c0_18], %19 {strides = array<i32>} : memref<48x1xf32, #tpu.memory_space<vmem>>, vector<48x1xf32>,
      %cst_19 = arith.constant 0.000000e+00 : f32
      %21 = vector.broadcast %cst_19 : f32 to vector<48x1xf32>
      %c0_20 = arith.constant 0 : index
      %c0_21 = arith.constant 0 : index
      %22 = vector.load %arg5[%c0_20, %c0_21] : memref<48x1xf32, #tpu.memory_space<vmem>>, vector<48x1xf32>
      tpu.vector_store %arg5[%c0_20, %c0_21], %21 {strides = array<i32>} : memref<48x1xf32, #tpu.memory_space<vmem>>, vector<48x1xf32>,
    } else {
    }
    %c0_6 = arith.constant 0 : index
    %c0_7 = arith.constant 0 : index
    %8 = vector.load %arg4[%c0_6, %c0_7] : memref<48x1xf32, #tpu.memory_space<vmem>>, vector<48x1xf32>
    %cst_8 = arith.constant dense<0.000000e+00> : vector<48xf32>
    %9 = vector.multi_reduction <add>, %2, %cst_8 [1] : vector<48x128xf32> to vector<48xf32>
    %10 = vector.shape_cast %9 : vector<48xf32> to vector<48x1xf32>
    %11 = arith.addf %8, %10 : vector<48x1xf32>
    %c0_9 = arith.constant 0 : index
    %c0_10 = arith.constant 0 : index
    %12 = vector.load %arg4[%c0_9, %c0_10] : memref<48x1xf32, #tpu.memory_space<vmem>>, vector<48x1xf32>
    tpu.vector_store %arg4[%c0_9, %c0_10], %11 {strides = array<i32>} : memref<48x1xf32, #tpu.memory_space<vmem>>, vector<48x1xf32>,
    %c0_11 = arith.constant 0 : index
    %c0_12 = arith.constant 0 : index
    %13 = vector.load %arg5[%c0_11, %c0_12] : memref<48x1xf32, #tpu.memory_space<vmem>>, vector<48x1xf32>
    %14 = arith.mulf %2, %2 : vector<48x128xf32>
    %cst_13 = arith.constant dense<0.000000e+00> : vector<48xf32>
    %15 = vector.multi_reduction <add>, %14, %cst_13 [1] : vector<48x128xf32> to vector<48xf32>
    %16 = vector.shape_cast %15 : vector<48xf32> to vector<48x1xf32>
    %17 = arith.addf %13, %16 : vector<48x1xf32>
    %c0_14 = arith.constant 0 : index
    %c0_15 = arith.constant 0 : index
    %18 = vector.load %arg5[%c0_14, %c0_15] : memref<48x1xf32, #tpu.memory_space<vmem>>, vector<48x1xf32>
    tpu.vector_store %arg5[%c0_14, %c0_15], %17 {strides = array<i32>} : memref<48x1xf32, #tpu.memory_space<vmem>>, vector<48x1xf32>,
    return
  }
  func.func @transform_0(%arg0: i32) -> (i32, i32) {
    %c0_i32 = arith.constant 0 : i32
    %c0_i32_0 = arith.constant 0 : i32
    %c0_i32_1 = arith.constant 0 : i32
    return %c0_i32, %c0_i32_0 : i32, i32
  }
  func.func @transform_1(%arg0: i32) -> (i32, i32) {
    %c0_i32 = arith.constant 0 : i32
    %c0_i32_0 = arith.constant 0 : i32
    return %c0_i32, %arg0 : i32, i32
  }
  func.func @transform_2(%arg0: i32) -> (i32, i32) {
    %c0_i32 = arith.constant 0 : i32
    %c0_i32_0 = arith.constant 0 : i32
    return %c0_i32, %arg0 : i32, i32
  }
  func.func @transform_3(%arg0: i32) -> (i32, i32) {
    %c0_i32 = arith.constant 0 : i32
    %c0_i32_0 = arith.constant 0 : i32
    %c0_i32_1 = arith.constant 0 : i32
    return %c0_i32, %c0_i32_0 : i32, i32
  }
  func.func @transform_4(%arg0: i32) -> (i32, i32) {
    %c0_i32 = arith.constant 0 : i32
    %c0_i32_0 = arith.constant 0 : i32
    %c0_i32_1 = arith.constant 0 : i32
    return %c0_i32, %c0_i32_0 : i32, i32
  }
}

module attributes {stable_mosaic.version = 11 : i64} {
  func.func @_gemm_stats_kernel(%arg0: i32, %arg1: memref<48x96xbf16, #tpu.memory_space<vmem>>, %arg2: memref<96x128xbf16, #tpu.memory_space<vmem>>, %arg3: memref<48x128xbf16, #tpu.memory_space<vmem>>, %arg4: memref<48x1xf32, #tpu.memory_space<vmem>>, %arg5: memref<48x1xf32, #tpu.memory_space<vmem>>) attributes {dimension_semantics = [#tpu.dimension_semantics<arbitrary>], iteration_bounds = array<i64: 1>, scalar_prefetch = 0 : i64, scratch_operands = 0 : i64, tpu.core_type = #tpu.core_type<tc>, window_params = [{pipeline_mode = #tpu.pipeline_mode<synchronous>, transform_indices = @transform_0, window_bounds = array<i64: 48, 96>}, {transform_indices = @transform_1, window_bounds = array<i64: 96, 128>}, {transform_indices = @transform_2, window_bounds = array<i64: 48, 128>}, {pipeline_mode = #tpu.pipeline_mode<synchronous>, transform_indices = @transform_3, window_bounds = array<i64: 48, 1>}, {pipeline_mode = #tpu.pipeline_mode<synchronous>, transform_indices = @transform_4, window_bounds = array<i64: 48, 1>}]} {
    %c0 = arith.constant 0 : index
    %c0_0 = arith.constant 0 : index
    %0 = vector.load %arg1[%c0, %c0_0] : memref<48x96xbf16, #tpu.memory_space<vmem>>, vector<48x96xbf16>
    %c0_1 = arith.constant 0 : index
    %c0_2 = arith.constant 0 : index
    %1 = vector.load %arg2[%c0_1, %c0_2] : memref<96x128xbf16, #tpu.memory_space<vmem>>, vector<96x128xbf16>
    %cst = arith.constant dense<0.000000e+00> : vector<48x128xf32>
    %2 = tpu.matmul %0, %1, %cst {dimension_numbers = #tpu.dot_dimension_numbers<[1], [0], [0], [1], [0, 0, 1, 1], [], []>} : vector<48x96xbf16>, vector<96x128xbf16>, vector<48x128xf32> -> vector<48x128xf32>
    %3 = arith.truncf %2 : vector<48x128xf32> to vector<48x128xbf16>
    %c0_3 = arith.constant 0 : index
    %c0_4 = arith.constant 0 : index
    %4 = vector.load %arg3[%c0_3, %c0_4] : memref<48x128xbf16, #tpu.memory_space<vmem>>, vector<48x128xbf16>
    tpu.vector_store %arg3[%c0_3, %c0_4], %3 {strides = array<i32>} : memref<48x128xbf16, #tpu.memory_space<vmem>>, vector<48x128xbf16>,
    %c0_i32 = arith.constant 0 : i32
    %5 = arith.cmpi eq, %arg0, %c0_i32 : i32
    %6 = arith.extui %5 : i1 to i32
    %c0_i32_5 = arith.constant 0 : i32
    %7 = arith.cmpi ne, %6, %c0_i32_5 : i32
    scf.if %7 {
      %cst_16 = arith.constant 0.000000e+00 : f32
      %19 = vector.broadcast %cst_16 : f32 to vector<48x1xf32>
      %c0_17 = arith.constant 0 : index
      %c0_18 = arith.constant 0 : index
      %20 = vector.load %arg4[%c0_17, %c0_18] : memref<48x1xf32, #tpu.memory_space<vmem>>, vector<48x1xf32>
      tpu.vector_store %arg4[%c0_17, %c0_18], %19 {strides = array<i32>} : memref<48x1xf32, #tpu.memory_space<vmem>>, vector<48x1xf32>,
      %cst_19 = arith.constant 0.000000e+00 : f32
      %21 = vector.broadcast %cst_19 : f32 to vector<48x1xf32>
      %c0_20 = arith.constant 0 : index
      %c0_21 = arith.constant 0 : index
      %22 = vector.load %arg5[%c0_20, %c0_21] : memref<48x1xf32, #tpu.memory_space<vmem>>, vector<48x1xf32>
      tpu.vector_store %arg5[%c0_20, %c0_21], %21 {strides = array<i32>} : memref<48x1xf32, #tpu.memory_space<vmem>>, vector<48x1xf32>,
    } else {
    }
    %c0_6 = arith.constant 0 : index
    %c0_7 = arith.constant 0 : index
    %8 = vector.load %arg4[%c0_6, %c0_7] : memref<48x1xf32, #tpu.memory_space<vmem>>, vector<48x1xf32>
    %cst_8 = arith.constant dense<0.000000e+00> : vector<48xf32>
    %9 = vector.multi_reduction <add>, %2, %cst_8 [1] : vector<48x128xf32> to vector<48xf32>
    %10 = vector.shape_cast %9 : vector<48xf32> to vector<48x1xf32>
    %11 = arith.addf %8, %10 : vector<48x1xf32>
    %c0_9 = arith.constant 0 : index
    %c0_10 = arith.constant 0 : index
    %12 = vector.load %arg4[%c0_9, %c0_10] : memref<48x1xf32, #tpu.memory_space<vmem>>, vector<48x1xf32>
    tpu.vector_store %arg4[%c0_9, %c0_10], %11 {strides = array<i32>} : memref<48x1xf32, #tpu.memory_space<vmem>>, vector<48x1xf32>,
    %c0_11 = arith.constant 0 : index
    %c0_12 = arith.constant 0 : index
    %13 = vector.load %arg5[%c0_11, %c0_12] : memref<48x1xf32, #tpu.memory_space<vmem>>, vector<48x1xf32>
    %14 = arith.mulf %2, %2 : vector<48x128xf32>
    %cst_13 = arith.constant dense<0.000000e+00> : vector<48xf32>
    %15 = vector.multi_reduction <add>, %14, %cst_13 [1] : vector<48x128xf32> to vector<48xf32>
    %16 = vector.shape_cast %15 : vector<48xf32> to vector<48x1xf32>
    %17 = arith.addf %13, %16 : vector<48x1xf32>
    %c0_14 = arith.constant 0 : index
    %c0_15 = arith.constant 0 : index
    %18 = vector.load %arg5[%c0_14, %c0_15] : memref<48x1xf32, #tpu.memory_space<vmem>>, vector<48x1xf32>
    tpu.vector_store %arg5[%c0_14, %c0_15], %17 {strides = array<i32>} : memref<48x1xf32, #tpu.memory_space<vmem>>, vector<48x1xf32>,
    return
  }
  func.func @transform_0(%arg0: i32) -> (i32, i32) {
    %c0_i32 = arith.constant 0 : i32
    %c0_i32_0 = arith.constant 0 : i32
    %c0_i32_1 = arith.constant 0 : i32
    return %c0_i32, %c0_i32_0 : i32, i32
  }
  func.func @transform_1(%arg0: i32) -> (i32, i32) {
    %c0_i32 = arith.constant 0 : i32
    %c0_i32_0 = arith.constant 0 : i32
    return %c0_i32, %arg0 : i32, i32
  }
  func.func @transform_2(%arg0: i32) -> (i32, i32) {
    %c0_i32 = arith.constant 0 : i32
    %c0_i32_0 = arith.constant 0 : i32
    return %c0_i32, %arg0 : i32, i32
  }
  func.func @transform_3(%arg0: i32) -> (i32, i32) {
    %c0_i32 = arith.constant 0 : i32
    %c0_i32_0 = arith.constant 0 : i32
    %c0_i32_1 = arith.constant 0 : i32
    return %c0_i32, %c0_i32_0 : i32, i32
  }
  func.func @transform_4(%arg0: i32) -> (i32, i32) {
    %c0_i32 = arith.constant 0 : i32
    %c0_i32_0 = arith.constant 0 : i32
    %c0_i32_1 = arith.constant 0 : i32
    return %c0_i32, %c0_i32_0 : i32, i32
  }
}

module attributes {stable_mosaic.version = 11 : i64} {
  func.func @_gemm_stats_kernel(%arg0: i32, %arg1: memref<24x192xbf16, #tpu.memory_space<vmem>>, %arg2: memref<192x128xbf16, #tpu.memory_space<vmem>>, %arg3: memref<24x128xbf16, #tpu.memory_space<vmem>>, %arg4: memref<24x1xf32, #tpu.memory_space<vmem>>, %arg5: memref<24x1xf32, #tpu.memory_space<vmem>>) attributes {dimension_semantics = [#tpu.dimension_semantics<arbitrary>], iteration_bounds = array<i64: 1>, scalar_prefetch = 0 : i64, scratch_operands = 0 : i64, tpu.core_type = #tpu.core_type<tc>, window_params = [{pipeline_mode = #tpu.pipeline_mode<synchronous>, transform_indices = @transform_0, window_bounds = array<i64: 24, 192>}, {transform_indices = @transform_1, window_bounds = array<i64: 192, 128>}, {transform_indices = @transform_2, window_bounds = array<i64: 24, 128>}, {pipeline_mode = #tpu.pipeline_mode<synchronous>, transform_indices = @transform_3, window_bounds = array<i64: 24, 1>}, {pipeline_mode = #tpu.pipeline_mode<synchronous>, transform_indices = @transform_4, window_bounds = array<i64: 24, 1>}]} {
    %c0 = arith.constant 0 : index
    %c0_0 = arith.constant 0 : index
    %0 = vector.load %arg1[%c0, %c0_0] : memref<24x192xbf16, #tpu.memory_space<vmem>>, vector<24x192xbf16>
    %c0_1 = arith.constant 0 : index
    %c0_2 = arith.constant 0 : index
    %1 = vector.load %arg2[%c0_1, %c0_2] : memref<192x128xbf16, #tpu.memory_space<vmem>>, vector<192x128xbf16>
    %cst = arith.constant dense<0.000000e+00> : vector<24x128xf32>
    %2 = tpu.matmul %0, %1, %cst {dimension_numbers = #tpu.dot_dimension_numbers<[1], [0], [0], [1], [0, 0, 1, 1], [], []>} : vector<24x192xbf16>, vector<192x128xbf16>, vector<24x128xf32> -> vector<24x128xf32>
    %3 = arith.truncf %2 : vector<24x128xf32> to vector<24x128xbf16>
    %c0_3 = arith.constant 0 : index
    %c0_4 = arith.constant 0 : index
    %4 = vector.load %arg3[%c0_3, %c0_4] : memref<24x128xbf16, #tpu.memory_space<vmem>>, vector<24x128xbf16>
    tpu.vector_store %arg3[%c0_3, %c0_4], %3 {strides = array<i32>} : memref<24x128xbf16, #tpu.memory_space<vmem>>, vector<24x128xbf16>,
    %c0_i32 = arith.constant 0 : i32
    %5 = arith.cmpi eq, %arg0, %c0_i32 : i32
    %6 = arith.extui %5 : i1 to i32
    %c0_i32_5 = arith.constant 0 : i32
    %7 = arith.cmpi ne, %6, %c0_i32_5 : i32
    scf.if %7 {
      %cst_16 = arith.constant 0.000000e+00 : f32
      %19 = vector.broadcast %cst_16 : f32 to vector<24x1xf32>
      %c0_17 = arith.constant 0 : index
      %c0_18 = arith.constant 0 : index
      %20 = vector.load %arg4[%c0_17, %c0_18] : memref<24x1xf32, #tpu.memory_space<vmem>>, vector<24x1xf32>
      tpu.vector_store %arg4[%c0_17, %c0_18], %19 {strides = array<i32>} : memref<24x1xf32, #tpu.memory_space<vmem>>, vector<24x1xf32>,
      %cst_19 = arith.constant 0.000000e+00 : f32
      %21 = vector.broadcast %cst_19 : f32 to vector<24x1xf32>
      %c0_20 = arith.constant 0 : index
      %c0_21 = arith.constant 0 : index
      %22 = vector.load %arg5[%c0_20, %c0_21] : memref<24x1xf32, #tpu.memory_space<vmem>>, vector<24x1xf32>
      tpu.vector_store %arg5[%c0_20, %c0_21], %21 {strides = array<i32>} : memref<24x1xf32, #tpu.memory_space<vmem>>, vector<24x1xf32>,
    } else {
    }
    %c0_6 = arith.constant 0 : index
    %c0_7 = arith.constant 0 : index
    %8 = vector.load %arg4[%c0_6, %c0_7] : memref<24x1xf32, #tpu.memory_space<vmem>>, vector<24x1xf32>
    %cst_8 = arith.constant dense<0.000000e+00> : vector<24xf32>
    %9 = vector.multi_reduction <add>, %2, %cst_8 [1] : vector<24x128xf32> to vector<24xf32>
    %10 = vector.shape_cast %9 : vector<24xf32> to vector<24x1xf32>
    %11 = arith.addf %8, %10 : vector<24x1xf32>
    %c0_9 = arith.constant 0 : index
    %c0_10 = arith.constant 0 : index
    %12 = vector.load %arg4[%c0_9, %c0_10] : memref<24x1xf32, #tpu.memory_space<vmem>>, vector<24x1xf32>
    tpu.vector_store %arg4[%c0_9, %c0_10], %11 {strides = array<i32>} : memref<24x1xf32, #tpu.memory_space<vmem>>, vector<24x1xf32>,
    %c0_11 = arith.constant 0 : index
    %c0_12 = arith.constant 0 : index
    %13 = vector.load %arg5[%c0_11, %c0_12] : memref<24x1xf32, #tpu.memory_space<vmem>>, vector<24x1xf32>
    %14 = arith.mulf %2, %2 : vector<24x128xf32>
    %cst_13 = arith.constant dense<0.000000e+00> : vector<24xf32>
    %15 = vector.multi_reduction <add>, %14, %cst_13 [1] : vector<24x128xf32> to vector<24xf32>
    %16 = vector.shape_cast %15 : vector<24xf32> to vector<24x1xf32>
    %17 = arith.addf %13, %16 : vector<24x1xf32>
    %c0_14 = arith.constant 0 : index
    %c0_15 = arith.constant 0 : index
    %18 = vector.load %arg5[%c0_14, %c0_15] : memref<24x1xf32, #tpu.memory_space<vmem>>, vector<24x1xf32>
    tpu.vector_store %arg5[%c0_14, %c0_15], %17 {strides = array<i32>} : memref<24x1xf32, #tpu.memory_space<vmem>>, vector<24x1xf32>,
    return
  }
  func.func @transform_0(%arg0: i32) -> (i32, i32) {
    %c0_i32 = arith.constant 0 : i32
    %c0_i32_0 = arith.constant 0 : i32
    %c0_i32_1 = arith.constant 0 : i32
    return %c0_i32, %c0_i32_0 : i32, i32
  }
  func.func @transform_1(%arg0: i32) -> (i32, i32) {
    %c0_i32 = arith.constant 0 : i32
    %c0_i32_0 = arith.constant 0 : i32
    return %c0_i32, %arg0 : i32, i32
  }
  func.func @transform_2(%arg0: i32) -> (i32, i32) {
    %c0_i32 = arith.constant 0 : i32
    %c0_i32_0 = arith.constant 0 : i32
    return %c0_i32, %arg0 : i32, i32
  }
  func.func @transform_3(%arg0: i32) -> (i32, i32) {
    %c0_i32 = arith.constant 0 : i32
    %c0_i32_0 = arith.constant 0 : i32
    %c0_i32_1 = arith.constant 0 : i32
    return %c0_i32, %c0_i32_0 : i32, i32
  }
  func.func @transform_4(%arg0: i32) -> (i32, i32) {
    %c0_i32 = arith.constant 0 : i32
    %c0_i32_0 = arith.constant 0 : i32
    %c0_i32_1 = arith.constant 0 : i32
    return %c0_i32, %c0_i32_0 : i32, i32
  }
}

module attributes {stable_mosaic.version = 11 : i64} {
  func.func @_gemm_stats_kernel(%arg0: i32, %arg1: memref<24x48xbf16, #tpu.memory_space<vmem>>, %arg2: memref<48x512xbf16, #tpu.memory_space<vmem>>, %arg3: memref<24x512xbf16, #tpu.memory_space<vmem>>, %arg4: memref<24x1xf32, #tpu.memory_space<vmem>>, %arg5: memref<24x1xf32, #tpu.memory_space<vmem>>) attributes {dimension_semantics = [#tpu.dimension_semantics<arbitrary>], iteration_bounds = array<i64: 1>, scalar_prefetch = 0 : i64, scratch_operands = 0 : i64, tpu.core_type = #tpu.core_type<tc>, window_params = [{pipeline_mode = #tpu.pipeline_mode<synchronous>, transform_indices = @transform_0, window_bounds = array<i64: 24, 48>}, {transform_indices = @transform_1, window_bounds = array<i64: 48, 512>}, {transform_indices = @transform_2, window_bounds = array<i64: 24, 512>}, {pipeline_mode = #tpu.pipeline_mode<synchronous>, transform_indices = @transform_3, window_bounds = array<i64: 24, 1>}, {pipeline_mode = #tpu.pipeline_mode<synchronous>, transform_indices = @transform_4, window_bounds = array<i64: 24, 1>}]} {
    %c0 = arith.constant 0 : index
    %c0_0 = arith.constant 0 : index
    %0 = vector.load %arg1[%c0, %c0_0] : memref<24x48xbf16, #tpu.memory_space<vmem>>, vector<24x48xbf16>
    %c0_1 = arith.constant 0 : index
    %c0_2 = arith.constant 0 : index
    %1 = vector.load %arg2[%c0_1, %c0_2] : memref<48x512xbf16, #tpu.memory_space<vmem>>, vector<48x512xbf16>
    %cst = arith.constant dense<0.000000e+00> : vector<24x512xf32>
    %2 = tpu.matmul %0, %1, %cst {dimension_numbers = #tpu.dot_dimension_numbers<[1], [0], [0], [1], [0, 0, 1, 1], [], []>} : vector<24x48xbf16>, vector<48x512xbf16>, vector<24x512xf32> -> vector<24x512xf32>
    %3 = arith.truncf %2 : vector<24x512xf32> to vector<24x512xbf16>
    %c0_3 = arith.constant 0 : index
    %c0_4 = arith.constant 0 : index
    %4 = vector.load %arg3[%c0_3, %c0_4] : memref<24x512xbf16, #tpu.memory_space<vmem>>, vector<24x512xbf16>
    tpu.vector_store %arg3[%c0_3, %c0_4], %3 {strides = array<i32>} : memref<24x512xbf16, #tpu.memory_space<vmem>>, vector<24x512xbf16>,
    %c0_i32 = arith.constant 0 : i32
    %5 = arith.cmpi eq, %arg0, %c0_i32 : i32
    %6 = arith.extui %5 : i1 to i32
    %c0_i32_5 = arith.constant 0 : i32
    %7 = arith.cmpi ne, %6, %c0_i32_5 : i32
    scf.if %7 {
      %cst_16 = arith.constant 0.000000e+00 : f32
      %19 = vector.broadcast %cst_16 : f32 to vector<24x1xf32>
      %c0_17 = arith.constant 0 : index
      %c0_18 = arith.constant 0 : index
      %20 = vector.load %arg4[%c0_17, %c0_18] : memref<24x1xf32, #tpu.memory_space<vmem>>, vector<24x1xf32>
      tpu.vector_store %arg4[%c0_17, %c0_18], %19 {strides = array<i32>} : memref<24x1xf32, #tpu.memory_space<vmem>>, vector<24x1xf32>,
      %cst_19 = arith.constant 0.000000e+00 : f32
      %21 = vector.broadcast %cst_19 : f32 to vector<24x1xf32>
      %c0_20 = arith.constant 0 : index
      %c0_21 = arith.constant 0 : index
      %22 = vector.load %arg5[%c0_20, %c0_21] : memref<24x1xf32, #tpu.memory_space<vmem>>, vector<24x1xf32>
      tpu.vector_store %arg5[%c0_20, %c0_21], %21 {strides = array<i32>} : memref<24x1xf32, #tpu.memory_space<vmem>>, vector<24x1xf32>,
    } else {
    }
    %c0_6 = arith.constant 0 : index
    %c0_7 = arith.constant 0 : index
    %8 = vector.load %arg4[%c0_6, %c0_7] : memref<24x1xf32, #tpu.memory_space<vmem>>, vector<24x1xf32>
    %cst_8 = arith.constant dense<0.000000e+00> : vector<24xf32>
    %9 = vector.multi_reduction <add>, %2, %cst_8 [1] : vector<24x512xf32> to vector<24xf32>
    %10 = vector.shape_cast %9 : vector<24xf32> to vector<24x1xf32>
    %11 = arith.addf %8, %10 : vector<24x1xf32>
    %c0_9 = arith.constant 0 : index
    %c0_10 = arith.constant 0 : index
    %12 = vector.load %arg4[%c0_9, %c0_10] : memref<24x1xf32, #tpu.memory_space<vmem>>, vector<24x1xf32>
    tpu.vector_store %arg4[%c0_9, %c0_10], %11 {strides = array<i32>} : memref<24x1xf32, #tpu.memory_space<vmem>>, vector<24x1xf32>,
    %c0_11 = arith.constant 0 : index
    %c0_12 = arith.constant 0 : index
    %13 = vector.load %arg5[%c0_11, %c0_12] : memref<24x1xf32, #tpu.memory_space<vmem>>, vector<24x1xf32>
    %14 = arith.mulf %2, %2 : vector<24x512xf32>
    %cst_13 = arith.constant dense<0.000000e+00> : vector<24xf32>
    %15 = vector.multi_reduction <add>, %14, %cst_13 [1] : vector<24x512xf32> to vector<24xf32>
    %16 = vector.shape_cast %15 : vector<24xf32> to vector<24x1xf32>
    %17 = arith.addf %13, %16 : vector<24x1xf32>
    %c0_14 = arith.constant 0 : index
    %c0_15 = arith.constant 0 : index
    %18 = vector.load %arg5[%c0_14, %c0_15] : memref<24x1xf32, #tpu.memory_space<vmem>>, vector<24x1xf32>
    tpu.vector_store %arg5[%c0_14, %c0_15], %17 {strides = array<i32>} : memref<24x1xf32, #tpu.memory_space<vmem>>, vector<24x1xf32>,
    return
  }
  func.func @transform_0(%arg0: i32) -> (i32, i32) {
    %c0_i32 = arith.constant 0 : i32
    %c0_i32_0 = arith.constant 0 : i32
    %c0_i32_1 = arith.constant 0 : i32
    return %c0_i32, %c0_i32_0 : i32, i32
  }
  func.func @transform_1(%arg0: i32) -> (i32, i32) {
    %c0_i32 = arith.constant 0 : i32
    %c0_i32_0 = arith.constant 0 : i32
    return %c0_i32, %arg0 : i32, i32
  }
  func.func @transform_2(%arg0: i32) -> (i32, i32) {
    %c0_i32 = arith.constant 0 : i32
    %c0_i32_0 = arith.constant 0 : i32
    return %c0_i32, %arg0 : i32, i32
  }
  func.func @transform_3(%arg0: i32) -> (i32, i32) {
    %c0_i32 = arith.constant 0 : i32
    %c0_i32_0 = arith.constant 0 : i32
    %c0_i32_1 = arith.constant 0 : i32
    return %c0_i32, %c0_i32_0 : i32, i32
  }
  func.func @transform_4(%arg0: i32) -> (i32, i32) {
    %c0_i32 = arith.constant 0 : i32
    %c0_i32_0 = arith.constant 0 : i32
    %c0_i32_1 = arith.constant 0 : i32
    return %c0_i32, %c0_i32_0 : i32, i32
  }
}

module attributes {stable_mosaic.version = 11 : i64} {
  func.func @_gemm_bias_kernel(%arg0: i32, %arg1: memref<3x216xbf16, #tpu.memory_space<vmem>>, %arg2: memref<216x512xbf16, #tpu.memory_space<vmem>>, %arg3: memref<3x1xf32, #tpu.memory_space<vmem>>, %arg4: memref<3x512xf32, #tpu.memory_space<vmem>>) attributes {dimension_semantics = [#tpu.dimension_semantics<parallel>], iteration_bounds = array<i64: 1>, scalar_prefetch = 0 : i64, scratch_operands = 0 : i64, tpu.core_type = #tpu.core_type<tc>, window_params = [{pipeline_mode = #tpu.pipeline_mode<synchronous>, transform_indices = @transform_0, window_bounds = array<i64: 3, 216>}, {transform_indices = @transform_1, window_bounds = array<i64: 216, 512>}, {pipeline_mode = #tpu.pipeline_mode<synchronous>, transform_indices = @transform_2, window_bounds = array<i64: 3, 1>}, {transform_indices = @transform_3, window_bounds = array<i64: 3, 512>}]} {
    %c0 = arith.constant 0 : index
    %c0_0 = arith.constant 0 : index
    %0 = vector.load %arg1[%c0, %c0_0] : memref<3x216xbf16, #tpu.memory_space<vmem>>, vector<3x216xbf16>
    %c0_1 = arith.constant 0 : index
    %c0_2 = arith.constant 0 : index
    %1 = vector.load %arg2[%c0_1, %c0_2] : memref<216x512xbf16, #tpu.memory_space<vmem>>, vector<216x512xbf16>
    %cst = arith.constant dense<0.000000e+00> : vector<3x512xf32>
    %2 = tpu.matmul %0, %1, %cst {dimension_numbers = #tpu.dot_dimension_numbers<[1], [0], [0], [1], [0, 0, 1, 1], [], []>} : vector<3x216xbf16>, vector<216x512xbf16>, vector<3x512xf32> -> vector<3x512xf32>
    %c0_3 = arith.constant 0 : index
    %c0_4 = arith.constant 0 : index
    %3 = vector.load %arg3[%c0_3, %c0_4] : memref<3x1xf32, #tpu.memory_space<vmem>>, vector<3x1xf32>
    %4 = vector.broadcast %3 : vector<3x1xf32> to vector<3x512xf32>
    %5 = arith.addf %2, %4 : vector<3x512xf32>
    %c0_5 = arith.constant 0 : index
    %c0_6 = arith.constant 0 : index
    %6 = vector.load %arg4[%c0_5, %c0_6] : memref<3x512xf32, #tpu.memory_space<vmem>>, vector<3x512xf32>
    tpu.vector_store %arg4[%c0_5, %c0_6], %5 {strides = array<i32>} : memref<3x512xf32, #tpu.memory_space<vmem>>, vector<3x512xf32>,
    return
  }
  func.func @transform_0(%arg0: i32) -> (i32, i32) {
    %c0_i32 = arith.constant 0 : i32
    %c0_i32_0 = arith.constant 0 : i32
    %c0_i32_1 = arith.constant 0 : i32
    return %c0_i32, %c0_i32_0 : i32, i32
  }
  func.func @transform_1(%arg0: i32) -> (i32, i32) {
    %c0_i32 = arith.constant 0 : i32
    %c0_i32_0 = arith.constant 0 : i32
    return %c0_i32, %arg0 : i32, i32
  }
  func.func @transform_2(%arg0: i32) -> (i32, i32) {
    %c0_i32 = arith.constant 0 : i32
    %c0_i32_0 = arith.constant 0 : i32
    %c0_i32_1 = arith.constant 0 : i32
    return %c0_i32, %c0_i32_0 : i32, i32
  }
  func.func @transform_3(%arg0: i32) -> (i32, i32) {
    %c0_i32 = arith.constant 0 : i32
    %c0_i32_0 = arith.constant 0 : i32
    return %c0_i32, %arg0 : i32, i32
  }
}

module attributes {stable_mosaic.version = 11 : i64} {
  func.func @_sigmoid_add_kernel(%arg0: i32, %arg1: memref<3x512xf32, #tpu.memory_space<vmem>>, %arg2: memref<3x512xf32, #tpu.memory_space<vmem>>, %arg3: memref<3x512xf32, #tpu.memory_space<vmem>>) attributes {dimension_semantics = [#tpu.dimension_semantics<parallel>], iteration_bounds = array<i64: 1>, scalar_prefetch = 0 : i64, scratch_operands = 0 : i64, tpu.core_type = #tpu.core_type<tc>, window_params = [{transform_indices = @transform_0, window_bounds = array<i64: 3, 512>}, {transform_indices = @transform_1, window_bounds = array<i64: 3, 512>}, {transform_indices = @transform_2, window_bounds = array<i64: 3, 512>}]} {
    %c0 = arith.constant 0 : index
    %c0_0 = arith.constant 0 : index
    %0 = vector.load %arg1[%c0, %c0_0] : memref<3x512xf32, #tpu.memory_space<vmem>>, vector<3x512xf32>
    %c0_1 = arith.constant 0 : index
    %c0_2 = arith.constant 0 : index
    %1 = vector.load %arg2[%c0_1, %c0_2] : memref<3x512xf32, #tpu.memory_space<vmem>>, vector<3x512xf32>
    %2 = arith.addf %0, %1 : vector<3x512xf32>
    %cst = arith.constant 0.000000e+00 : f32
    %3 = vector.broadcast %cst : f32 to vector<3x512xf32>
    %4 = arith.subf %3, %2 : vector<3x512xf32>
    %5 = math.exp %4 : vector<3x512xf32>
    %cst_3 = arith.constant 1.000000e+00 : f32
    %6 = vector.broadcast %cst_3 : f32 to vector<3x512xf32>
    %7 = arith.addf %6, %5 : vector<3x512xf32>
    %8 = tpu.reciprocal %7 {approx = true} : vector<3x512xf32> -> vector<3x512xf32>
    %cst_4 = arith.constant 0.000000e+00 : f32
    %cst_5 = arith.constant 1.000000e+00 : f32
    %9 = vector.broadcast %cst_4 : f32 to vector<3x512xf32>
    %10 = arith.maximumf %9, %8 : vector<3x512xf32>
    %11 = vector.broadcast %cst_5 : f32 to vector<3x512xf32>
    %12 = arith.minimumf %11, %10 : vector<3x512xf32>
    %c0_6 = arith.constant 0 : index
    %c0_7 = arith.constant 0 : index
    %13 = vector.load %arg3[%c0_6, %c0_7] : memref<3x512xf32, #tpu.memory_space<vmem>>, vector<3x512xf32>
    tpu.vector_store %arg3[%c0_6, %c0_7], %12 {strides = array<i32>} : memref<3x512xf32, #tpu.memory_space<vmem>>, vector<3x512xf32>,
    return
  }
  func.func @transform_0(%arg0: i32) -> (i32, i32) {
    %c0_i32 = arith.constant 0 : i32
    %c0_i32_0 = arith.constant 0 : i32
    return %c0_i32, %arg0 : i32, i32
  }
  func.func @transform_1(%arg0: i32) -> (i32, i32) {
    %c0_i32 = arith.constant 0 : i32
    %c0_i32_0 = arith.constant 0 : i32
    return %c0_i32, %arg0 : i32, i32
  }
  func.func @transform_2(%arg0: i32) -> (i32, i32) {
    %c0_i32 = arith.constant 0 : i32
    %c0_i32_0 = arith.constant 0 : i32
    return %c0_i32, %arg0 : i32, i32
  }
}

</mosaic_0001>

<bundles_post_ra>
// kernel: generator_forward.47
= control target key start
LH: loop header
LB: loop body
LE: loop exit
PB: predicated region body
PF: predicated region fallthrough
CT: control target
= control target key end

     0   :  { %v169_v0 = vmov 0   ;;  %s244_s1 = inlined_call_operand.vmem [shape: f32[24,1], index: 1, kind: input, shape index: {}]   ;;  %s245_s2 = inlined_call_operand.vmem [shape: f32[24,1], index: 2, kind: input, shape index: {}]   ;;  %s246_s0 = inlined_call_operand.vmem [shape: bf16[24,512], index: 0, kind: input, shape index: {}]   ;;  %s247_s3 = inlined_call_operand.vmem [shape: bf16[24,512], index: 3, kind: output, shape index: {}]  }
   0x1   :  { %168 = vset.pattern.permute.xlu1 %v169_v0  ;;  %167 = vset.pattern.permute.xlu0 %v169_v0  ;;  %v34_v1 = vld [vmem:[%s244_s1 + $0x10] sm:$0xff]  ;;  %v32_v2 = vld [vmem:[%s244_s1] sm:$0xff]  ;;  %v33_v4 = vld [vmem:[%s244_s1 + $0x8] sm:$0xff] }
   0x2   :  { %47 = vperm.xlu1 %168, %v34_v1   ;;  %37 = vperm.xlu0 %167, %v32_v2   ;;  %v62_v3 = vld [vmem:[%s245_s2] sm:$0xff]  ;;  %v64_v5 = vld [vmem:[%s245_s2 + $0x10] sm:$0xff]  ;;  %v63_v6 = vld [vmem:[%s245_s2 + $0x8] sm:$0xff] }
   0x3   :  { %v14_v7 = vld [vmem:[%s246_s0] sm:$0xff]  ;;  %v15_v8 = vld [vmem:[%s246_s0 + $0x8] sm:$0xff]  ;;  %v16_v17 = vld [vmem:[%s246_s0 + $0x10] sm:$0xff] }
   0x4   :  { %v20_v9 = vunpack.c.l.bf16 %v14_v7  ;;  %v21_v10 = vunpack.c.h.bf16 %v14_v7  ;;  %v22_v11 = vunpack.c.l.bf16 %v15_v8  ;;  %v23_v12 = vunpack.c.h.bf16 %v15_v8  ;;  %v18_v13 = vld [vmem:[%s246_s0 + $0x20] sm:$0xff]  ;;  %v19_v14 = vld [vmem:[%s246_s0 + $0x28] sm:$0xff]  ;;  %v17_v18 = vld [vmem:[%s246_s0 + $0x18] sm:$0xff] }
   0x5   :  { %v28_v19 = vunpack.c.l.bf16 %v18_v13  ;;  %v29_v20 = vunpack.c.h.bf16 %v18_v13  ;;  %v30_v21 = vunpack.c.l.bf16 %v19_v14  ;;  %v31_v22 = vunpack.c.h.bf16 %v19_v14 }
   0x6   :  { %67 = vperm.xlu1 %168, %v62_v3   ;;  %42 = vperm.xlu0 %167, %v33_v4   ;;  %v24_v29 = vunpack.c.l.bf16 %v16_v17  ;;  %v25_v30 = vunpack.c.h.bf16 %v16_v17  ;;  %v26_v31 = vunpack.c.l.bf16 %v17_v18  ;;  %v27_v32 = vunpack.c.h.bf16 %v17_v18 }
   0xa   :  { %77 = vperm.xlu1 %168, %v64_v5   ;;  %72 = vperm.xlu0 %167, %v63_v6  }
  0x81   :  { %v48_v15 = vpop.permute.xlu1 %47  ;;  %v38_v16 = vpop.permute.xlu0 %37 }
  0x82   :  { %v50_v23 = vmul.f32 %v38_v16, %v20_v9  ;;  %v51_v24 = vmul.f32 %v38_v16, %v21_v10  ;;  %v52_v25 = vmul.f32 %v38_v16, %v22_v11  ;;  %v53_v26 = vmul.f32 %v38_v16, %v23_v12 }
  0x83   :  { %v58_v37 = vmul.f32 %v48_v15, %v28_v19  ;;  %v59_v38 = vmul.f32 %v48_v15, %v29_v20  ;;  %v60_v39 = vmul.f32 %v48_v15, %v30_v21  ;;  %v61_v40 = vmul.f32 %v48_v15, %v31_v22 }
  0x85   :  { %v68_v27 = vpop.permute.xlu1 %67  ;;  %v43_v28 = vpop.permute.xlu0 %42 }
  0x86   :  { %v80_v33 = vadd.f32 %v68_v27, %v50_v23  ;;  %v81_v34 = vadd.f32 %v68_v27, %v51_v24  ;;  %v82_v35 = vadd.f32 %v68_v27, %v52_v25  ;;  %v83_v36 = vadd.f32 %v68_v27, %v53_v26 }
  0x87   :  { %v54_v47 = vmul.f32 %v43_v28, %v24_v29  ;;  %v55_v48 = vmul.f32 %v43_v28, %v25_v30  ;;  %v56_v49 = vmul.f32 %v43_v28, %v26_v31  ;;  %v57_v50 = vmul.f32 %v43_v28, %v27_v32 }
  0x88   :  { %v92_v41 = vmax.f32 %v80_v33, 0.0  ;;  %v93_v42 = vmax.f32 %v81_v34, 0.0  ;;  %v94_v43 = vmax.f32 %v82_v35, 0.0  ;;  %v95_v44 = vmax.f32 %v83_v36, 0.0 }
  0x89   :  { %v78_v45 = vpop.permute.xlu1 %77  ;;  %v73_v46 = vpop.permute.xlu0 %72 }
  0x8a   :  { %v160_v51 = vpack.c.bf16 %v93_v42, %v92_v41  ;;  %v161_v52 = vpack.c.bf16 %v95_v44, %v94_v43  ;;  %v88_v53 = vadd.f32 %v78_v45, %v58_v37  ;;  %v89_v54 = vadd.f32 %v78_v45, %v59_v38 }
  0x8b   :  { %v90_v55 = vadd.f32 %v78_v45, %v60_v39  ;;  %v91_v56 = vadd.f32 %v78_v45, %v61_v40  ;;  %v84_v57 = vadd.f32 %v73_v46, %v54_v47  ;;  %v85_v58 = vadd.f32 %v73_v46, %v55_v48 }
  0x8c   :  { %144 = vst [vmem:[%s247_s3] sm:$0xff] %v160_v51  ;;  %145 = vst [vmem:[%s247_s3 + $0x8] sm:$0xff] %v161_v52  ;;  %v100_v59 = vmax.f32 %v88_v53, 0.0  ;;  %v101_v60 = vmax.f32 %v89_v54, 0.0  ;;  %v86_v61 = vadd.f32 %v73_v46, %v56_v49  ;;  %v87_v62 = vadd.f32 %v73_v46, %v57_v50 }
  0x8d   :  { %v102_v63 = vmax.f32 %v90_v55, 0.0  ;;  %v103_v0 = vmax.f32 %v91_v56, 0.0  ;;  %v96_v1 = vmax.f32 %v84_v57, 0.0  ;;  %v97_v2 = vmax.f32 %v85_v58, 0.0 }
  0x8e   :  { %v164_v3 = vpack.c.bf16 %v101_v60, %v100_v59  ;;  %v98_v4 = vmax.f32 %v86_v61, 0.0  ;;  %v99_v5 = vmax.f32 %v87_v62, 0.0 }
  0x8f   :  { %v165_v6 = vpack.c.bf16 %v103_v0, %v102_v63  ;;  %v162_v7 = vpack.c.bf16 %v97_v2, %v96_v1 }
  0x90   :  { %148 = vst [vmem:[%s247_s3 + $0x20] sm:$0xff] %v164_v3  ;;  %v163_v8 = vpack.c.bf16 %v99_v5, %v98_v4 }
  0x91   :  { %149 = vst [vmem:[%s247_s3 + $0x28] sm:$0xff] %v165_v6  ;;  %146 = vst [vmem:[%s247_s3 + $0x10] sm:$0xff] %v162_v7 }
  0x92   :  { %147 = vst [vmem:[%s247_s3 + $0x18] sm:$0xff] %v163_v8 }

// kernel: generator_forward.46
= control target key start
LH: loop header
LB: loop body
LE: loop exit
PB: predicated region body
PF: predicated region fallthrough
CT: control target
= control target key end

     0   :  { %v355_v1 = vmov 0   ;;  %vm74_vm0 = vcmask 261120   ;;  %vm233_vm1 = vcmask 7168   ;;  %v356_v11 = vmov 0.0   ;;  %s502_s1 = inlined_call_operand.vmem [shape: bf16[32,512], index: 1, kind: input, shape index: {}]   ;;  %s503_s0 = inlined_call_operand.vmem [shape: bf16[24,32], index: 0, kind: input, shape index: {}]   ;;  %s504_s3 = inlined_call_operand.vmem [shape: f32[24,1], index: 3, kind: output, shape index: {1}]   ;;  %s505_s2 = inlined_call_operand.vmem [shape: bf16[24,512], index: 2, kind: output, shape index: {0}]   ;;  %s506_s4 = inlined_call_operand.vmem [shape: f32[24,1], index: 4, kind: output, shape index: {2}]  }
   0x1   :  { %v341_v0 = vld [vmem:[%s502_s1 + $0x4] ss:$16 sps:$4 sm:$0xff]   ;;  %113 = vmatprep.mubr.bf16.mxu0 %v355_v1  ;;  %164 = vmatprep.mubr.bf16.mxu1 %v355_v1  ;;  %v343_v2 = vld [vmem:[%s502_s1 + $0xc] ss:$16 sps:$4 sm:$0xff]   ;;  %v345_v3 = vld [vmem:[%s502_s1] ss:$16 sps:$4 sm:$0xff]  }
   0x2   :  { %81 = vmatprep.subr.bf16.mxu0 %v341_v0  ;;  %v346_v4 = vld [vmem:[%s502_s1 + $0x8] ss:$16 sps:$4 sm:$0xff]   ;;  %132 = vmatprep.subr.bf16.mxu1 %v343_v2  ;;  %v347_v5 = vld [vmem:[%s502_s1 + $0x24] ss:$16 sps:$4 sm:$0xff]   ;;  %v349_v6 = vld [vmem:[%s502_s1 + $0x2c] ss:$16 sps:$4 sm:$0xff]  }
   0x3   :  { %82 = vmatpush1.bf16.msra.mxu0 %v345_v3  ;;  %133 = vmatpush1.bf16.msra.mxu1 %v346_v4  ;;  %v351_v7 = vld [vmem:[%s502_s1 + $0x20] ss:$16 sps:$4 sm:$0xff]   ;;  %v352_v8 = vld [vmem:[%s502_s1 + $0x28] ss:$16 sps:$4 sm:$0xff]   ;;  %234 = vst.msk [vmem:[%s504_s3] sm:$0xff] %vm233_vm1, %v356_v11  ;;  %235 = vst.msk [vmem:[%s504_s3 + $0x8] sm:$0xff] %vm233_vm1, %v356_v11 }
   0x4   :  { %83 = vmatprep.subr.bf16.mxu0 %v347_v5  ;;  %134 = vmatprep.subr.bf16.mxu1 %v349_v6  ;;  %v353_v9 = vld [vmem:[%s503_s0] sm:$0xff]   ;;  %v354_v10 = vld [vmem:[%s503_s0 + $0x8] ss:$0 sps:$4 sm:$0xff]   ;;  %236 = vst.msk [vmem:[%s504_s3 + $0x10] sm:$0xff] %vm233_vm1, %v356_v11  ;;  %237 = vst.msk [vmem:[%s506_s4] sm:$0xff] %vm233_vm1, %v356_v11 }
   0x5   :  { %238 = vst.msk [vmem:[%s506_s4 + $0x8] sm:$0xff] %vm233_vm1, %v356_v11  ;;  %239 = vst.msk [vmem:[%s506_s4 + $0x10] sm:$0xff] %vm233_vm1, %v356_v11 }
   0x7   :  { %84 = vmatpush1.bf16.msra.mxu0 %v351_v7  ;;  %135 = vmatpush1.bf16.msra.mxu1 %v352_v8 }
   0xa   :  { %323 = vmatmul.mubr.msk.bf16.vlgmr.msra.gmra.mrb[0].mxu0 %vm74_vm0, %v353_v9  ;;  %325 = vmatmul.mubr.msk.bf16.vlgmr.msra.gmra.mrb[0].mxu1 %vm74_vm0, %v353_v9  ;;  %v240_v0 = vld [vmem:[%s504_s3] sm:$0xff]  ;;  %v241_v5 = vld [vmem:[%s504_s3 + $0x8] sm:$0xff] }
   0xb   :  { %123 = vmatprep.mubr.bf16.mxu0 %v355_v1  ;;  %174 = vmatprep.mubr.bf16.mxu1 %v355_v1  ;;  %v265_v2 = vld [vmem:[%s506_s4] sm:$0xff]  ;;  %v242_v9 = vld [vmem:[%s504_s3 + $0x10] sm:$0xff] }
  0x12   :  { %324 = vmatmul.mubr.msk.bf16.gmra.mrb[4].mxu0 %vm74_vm0, %v354_v10  ;;  %326 = vmatmul.mubr.msk.bf16.gmra.mrb[4].mxu1 %vm74_vm0, %v354_v10  ;;  %v266_v10 = vld [vmem:[%s506_s4 + $0x8] sm:$0xff] }
  0xdd   :  { %v115_v12 = vpop.f32.mrb[0].mxu0  ;;  %v166_v13 = vpop.f32.mrb[0].mxu1 }
  0xde   :  { %v268_v14 = vmul.f32 %v115_v12, %v115_v12  ;;  %v117_v15 = vpop.f32.mrb[1].mxu0  ;;  %v168_v16 = vpop.f32.mrb[1].mxu1  ;;  %v270_v23 = vmul.f32 %v166_v13, %v166_v13 }
  0xdf   :  { %v333_v17 = vpack.c.bf16 %v117_v15, %v115_v12  ;;  %v243_v18 = vadd.f32 %v117_v15, %v115_v12  ;;  %v269_v19 = vmul.f32 %v117_v15, %v117_v15  ;;  %v334_v20 = vpack.c.bf16 %v168_v16, %v166_v13  ;;  %v119_v21 = vpop.f32.mrb[2].mxu0  ;;  %v170_v22 = vpop.f32.mrb[2].mxu1  ;;  %v267_v15 = vld [vmem:[%s506_s4 + $0x10] sm:$0xff] }
  0xe0   :  { %v272_v24 = vmul.f32 %v119_v21, %v119_v21  ;;  %v121_v25 = vpop.f32.mrb[3].mxu0  ;;  %v172_v26 = vpop.f32.mrb[3].mxu1  ;;  %v274_v33 = vmul.f32 %v170_v22, %v170_v22  ;;  %v271_v37 = vmul.f32 %v168_v16, %v168_v16 }
  0xe1   :  { %223 = vst [vmem:[%s505_s2] sm:$0xff] %v333_v17  ;;  %224 = vst [vmem:[%s505_s2 + $0x8] sm:$0xff] %v334_v20  ;;  %v335_v27 = vpack.c.bf16 %v121_v25, %v119_v21  ;;  %v248_v28 = vadd.f32 %v121_v25, %v119_v21  ;;  %v273_v29 = vmul.f32 %v121_v25, %v121_v25 }
  0xe2   :  { %v336_v30 = vpack.c.bf16 %v172_v26, %v170_v22  ;;  %v244_v31 = vadd.f32 %v243_v18, %v166_v13  ;;  %v280_v32 = vadd.f32 %v269_v19, %v268_v14  ;;  %v275_v48 = vmul.f32 %v172_v26, %v172_v26 }
  0xe3   :  { %225 = vst [vmem:[%s505_s2 + $0x10] sm:$0xff] %v335_v27  ;;  %v249_v34 = vadd.f32 %v248_v28, %v170_v22  ;;  %v285_v35 = vadd.f32 %v273_v29, %v272_v24 }
  0xe4   :  { %226 = vst [vmem:[%s505_s2 + $0x18] sm:$0xff] %v336_v30  ;;  %v245_v36 = vadd.f32 %v244_v31, %v168_v16  ;;  %v281_v38 = vadd.f32 %v280_v32, %v270_v23 }
  0xe5   :  { %v176_v39 = vpop.f32.mrb[4].mxu1  ;;  %v125_v40 = vpop.f32.mrb[4].mxu0  ;;  %v250_v41 = vadd.f32 %v249_v34, %v172_v26  ;;  %v286_v42 = vadd.f32 %v285_v35, %v274_v33 }
  0xe6   :  { %v278_v43 = vmul.f32 %v176_v39, %v176_v39  ;;  %246 = vadd.xlane.f32.xlu0 %v245_v36  ;;  %v276_v44 = vmul.f32 %v125_v40, %v125_v40  ;;  %v127_v45 = vpop.f32.mrb[5].mxu0  ;;  %v178_v46 = vpop.f32.mrb[5].mxu1  ;;  %v282_v47 = vadd.f32 %v281_v38, %v271_v37 }
  0xe7   :  { %v337_v49 = vpack.c.bf16 %v127_v45, %v125_v40  ;;  %v253_v50 = vadd.f32 %v127_v45, %v125_v40  ;;  %v277_v51 = vmul.f32 %v127_v45, %v127_v45  ;;  %v338_v52 = vpack.c.bf16 %v178_v46, %v176_v39  ;;  %v180_v53 = vpop.f32.mrb[6].mxu1  ;;  %v129_v54 = vpop.f32.mrb[6].mxu0 }
  0xe8   :  { %283 = vadd.xlane.f32.xlu1 %v282_v47  ;;  %v130_v55 = vpop.f32.mrb[7].mxu0  ;;  %v181_v56 = vpop.f32.mrb[7].mxu1  ;;  %v287_v57 = vadd.f32 %v286_v42, %v275_v48  ;;  %v279_v61 = vmul.f32 %v178_v46, %v178_v46 }
  0xe9   :  { %227 = vst [vmem:[%s505_s2 + $0x20] sm:$0xff] %v337_v49  ;;  %228 = vst [vmem:[%s505_s2 + $0x28] sm:$0xff] %v338_v52  ;;  %v254_v58 = vadd.f32 %v253_v50, %v176_v39  ;;  %v290_v59 = vadd.f32 %v277_v51, %v276_v44 }
  0xea   :  { %251 = vadd.xlane.f32.xlu0 %v250_v41 }
  0xeb   :  { %v255_v60 = vadd.f32 %v254_v58, %v178_v46  ;;  %v291_v62 = vadd.f32 %v290_v59, %v278_v43 }
  0xed   :  { %256 = vadd.xlane.f32.xlu1 %v255_v60  ;;  %v292_v63 = vadd.f32 %v291_v62, %v279_v61 }
  0xee   :  { %288 = vadd.xlane.f32.xlu0 %v287_v57 }
  0xf1   :  { %293 = vadd.xlane.f32.xlu1 %v292_v63 }
 0x173   :  { %v247_v1 = vpop.xlane.xlu0 %246 }
 0x174   :  { %v258_v3 = vadd.f32 %v247_v1, %v240_v0 }
 0x175   :  { %v284_v4 = vpop.xlane.xlu1 %283 }
 0x176   :  { %262 = vst.msk [vmem:[%s504_s3] sm:$0xff] %vm233_vm1, %v258_v3  ;;  %v295_v6 = vadd.f32 %v284_v4, %v265_v2 }
 0x177   :  { %v252_v7 = vpop.xlane.xlu0 %251 }
 0x178   :  { %298 = vst.msk [vmem:[%s506_s4] sm:$0xff] %vm233_vm1, %v295_v6  ;;  %v259_v8 = vadd.f32 %v252_v7, %v241_v5 }
 0x17a   :  { %263 = vst.msk [vmem:[%s504_s3 + $0x8] sm:$0xff] %vm233_vm1, %v259_v8  ;;  %v257_v11 = vpop.xlane.xlu1 %256 }
 0x17b   :  { %v289_v12 = vpop.xlane.xlu0 %288  ;;  %v260_v13 = vadd.f32 %v257_v11, %v242_v9 }
 0x17c   :  { %v296_v14 = vadd.f32 %v289_v12, %v266_v10 }
 0x17d   :  { %264 = vst.msk [vmem:[%s504_s3 + $0x10] sm:$0xff] %vm233_vm1, %v260_v13 }
 0x17e   :  { %299 = vst.msk [vmem:[%s506_s4 + $0x8] sm:$0xff] %vm233_vm1, %v296_v14  ;;  %v294_v16 = vpop.xlane.xlu1 %293 }
 0x17f   :  { %v297_v17 = vadd.f32 %v294_v16, %v267_v15 }
 0x181   :  { %300 = vst.msk [vmem:[%s506_s4 + $0x10] sm:$0xff] %vm233_vm1, %v297_v17 }

// kernel: generator_forward.51
= control target key start
LH: loop header
LB: loop body
LE: loop exit
PB: predicated region body
PF: predicated region fallthrough
CT: control target
= control target key end

     0   :  { %v190_v0 = vmov 0   ;;  %s288_s1 = inlined_call_operand.vmem [shape: f32[24,1], index: 1, kind: input, shape index: {}]   ;;  %s289_s2 = inlined_call_operand.vmem [shape: f32[24,1], index: 2, kind: input, shape index: {}]   ;;  %s290_s0 = inlined_call_operand.vmem [shape: bf16[24,512], index: 0, kind: input, shape index: {}]   ;;  %s291_s3 = inlined_call_operand.vmem [shape: bf16[24,512], index: 3, kind: input, shape index: {}]   ;;  %s292_s4 = inlined_call_operand.vmem [shape: bf16[24,512], index: 4, kind: output, shape index: {}]  }
   0x1   :  { %189 = vset.pattern.permute.xlu1 %v190_v0  ;;  %188 = vset.pattern.permute.xlu0 %v190_v0  ;;  %v37_v1 = vld [vmem:[%s288_s1 + $0x10] sm:$0xff]  ;;  %v35_v2 = vld [vmem:[%s288_s1] sm:$0xff]  ;;  %v36_v4 = vld [vmem:[%s288_s1 + $0x8] sm:$0xff] }
   0x2   :  { %50 = vperm.xlu1 %189, %v37_v1   ;;  %40 = vperm.xlu0 %188, %v35_v2   ;;  %v65_v3 = vld [vmem:[%s289_s2] sm:$0xff]  ;;  %v67_v5 = vld [vmem:[%s289_s2 + $0x10] sm:$0xff]  ;;  %v66_v6 = vld [vmem:[%s289_s2 + $0x8] sm:$0xff] }
   0x3   :  { %v17_v7 = vld [vmem:[%s290_s0] sm:$0xff]  ;;  %v18_v8 = vld [vmem:[%s290_s0 + $0x8] sm:$0xff]  ;;  %v19_v17 = vld [vmem:[%s290_s0 + $0x10] sm:$0xff] }
   0x4   :  { %v95_v9 = vld [vmem:[%s291_s3] sm:$0xff]  ;;  %v96_v10 = vld [vmem:[%s291_s3 + $0x8] sm:$0xff]  ;;  %v23_v13 = vunpack.c.l.bf16 %v17_v7  ;;  %v24_v14 = vunpack.c.h.bf16 %v17_v7  ;;  %v25_v15 = vunpack.c.l.bf16 %v18_v8  ;;  %v26_v16 = vunpack.c.h.bf16 %v18_v8  ;;  %v20_v18 = vld [vmem:[%s290_s0 + $0x18] sm:$0xff] }
   0x5   :  { %v21_v11 = vld [vmem:[%s290_s0 + $0x20] sm:$0xff]  ;;  %v22_v12 = vld [vmem:[%s290_s0 + $0x28] sm:$0xff]  ;;  %v101_v19 = vunpack.c.l.bf16 %v95_v9  ;;  %v102_v20 = vunpack.c.h.bf16 %v95_v9  ;;  %v103_v21 = vunpack.c.l.bf16 %v96_v10  ;;  %v104_v22 = vunpack.c.h.bf16 %v96_v10  ;;  %v97_v31 = vld [vmem:[%s291_s3 + $0x10] sm:$0xff] }
   0x6   :  { %70 = vperm.xlu1 %189, %v65_v3   ;;  %45 = vperm.xlu0 %188, %v36_v4   ;;  %v99_v23 = vld [vmem:[%s291_s3 + $0x20] sm:$0xff]  ;;  %v100_v24 = vld [vmem:[%s291_s3 + $0x28] sm:$0xff]  ;;  %v31_v27 = vunpack.c.l.bf16 %v21_v11  ;;  %v32_v28 = vunpack.c.h.bf16 %v21_v11  ;;  %v33_v29 = vunpack.c.l.bf16 %v22_v12  ;;  %v34_v30 = vunpack.c.h.bf16 %v22_v12  ;;  %v98_v32 = vld [vmem:[%s291_s3 + $0x18] sm:$0xff] }
   0x7   :  { %v27_v33 = vunpack.c.l.bf16 %v19_v17  ;;  %v28_v34 = vunpack.c.h.bf16 %v19_v17  ;;  %v29_v35 = vunpack.c.l.bf16 %v20_v18  ;;  %v30_v36 = vunpack.c.h.bf16 %v20_v18 }
   0x8   :  { %v109_v37 = vunpack.c.l.bf16 %v99_v23  ;;  %v110_v38 = vunpack.c.h.bf16 %v99_v23  ;;  %v111_v39 = vunpack.c.l.bf16 %v100_v24  ;;  %v112_v40 = vunpack.c.h.bf16 %v100_v24 }
   0x9   :  { %v105_v47 = vunpack.c.l.bf16 %v97_v31  ;;  %v106_v48 = vunpack.c.h.bf16 %v97_v31  ;;  %v107_v49 = vunpack.c.l.bf16 %v98_v32  ;;  %v108_v50 = vunpack.c.h.bf16 %v98_v32 }
   0xa   :  { %80 = vperm.xlu1 %189, %v67_v5   ;;  %75 = vperm.xlu0 %188, %v66_v6  }
  0x81   :  { %v51_v25 = vpop.permute.xlu1 %50  ;;  %v41_v26 = vpop.permute.xlu0 %40 }
  0x82   :  { %v53_v41 = vmul.f32 %v41_v26, %v23_v13  ;;  %v54_v42 = vmul.f32 %v41_v26, %v24_v14  ;;  %v55_v43 = vmul.f32 %v41_v26, %v25_v15  ;;  %v56_v44 = vmul.f32 %v41_v26, %v26_v16 }
  0x83   :  { %v61_v55 = vmul.f32 %v51_v25, %v31_v27  ;;  %v62_v56 = vmul.f32 %v51_v25, %v32_v28  ;;  %v63_v57 = vmul.f32 %v51_v25, %v33_v29  ;;  %v64_v58 = vmul.f32 %v51_v25, %v34_v30 }
  0x85   :  { %v71_v45 = vpop.permute.xlu1 %70  ;;  %v46_v46 = vpop.permute.xlu0 %45 }
  0x86   :  { %v83_v51 = vadd.f32 %v71_v45, %v53_v41  ;;  %v84_v52 = vadd.f32 %v71_v45, %v54_v42  ;;  %v85_v53 = vadd.f32 %v71_v45, %v55_v43  ;;  %v86_v54 = vadd.f32 %v71_v45, %v56_v44 }
  0x87   :  { %v57_v1 = vmul.f32 %v46_v46, %v27_v33  ;;  %v58_v2 = vmul.f32 %v46_v46, %v28_v34  ;;  %v59_v3 = vmul.f32 %v46_v46, %v29_v35  ;;  %v60_v4 = vmul.f32 %v46_v46, %v30_v36 }
  0x88   :  { %v113_v59 = vadd.f32 %v101_v19, %v83_v51  ;;  %v114_v60 = vadd.f32 %v102_v20, %v84_v52  ;;  %v115_v61 = vadd.f32 %v103_v21, %v85_v53  ;;  %v116_v62 = vadd.f32 %v104_v22, %v86_v54 }
  0x89   :  { %v81_v63 = vpop.permute.xlu1 %80  ;;  %v76_v0 = vpop.permute.xlu0 %75 }
  0x8a   :  { %v181_v5 = vpack.c.bf16 %v114_v60, %v113_v59  ;;  %v182_v6 = vpack.c.bf16 %v116_v62, %v115_v61  ;;  %v91_v7 = vadd.f32 %v81_v63, %v61_v55  ;;  %v92_v8 = vadd.f32 %v81_v63, %v62_v56 }
  0x8b   :  { %v93_v9 = vadd.f32 %v81_v63, %v63_v57  ;;  %v94_v10 = vadd.f32 %v81_v63, %v64_v58  ;;  %v87_v11 = vadd.f32 %v76_v0, %v57_v1  ;;  %v88_v12 = vadd.f32 %v76_v0, %v58_v2 }
  0x8c   :  { %165 = vst [vmem:[%s292_s4] sm:$0xff] %v181_v5  ;;  %166 = vst [vmem:[%s292_s4 + $0x8] sm:$0xff] %v182_v6  ;;  %v121_v13 = vadd.f32 %v109_v37, %v91_v7  ;;  %v122_v14 = vadd.f32 %v110_v38, %v92_v8  ;;  %v89_v15 = vadd.f32 %v76_v0, %v59_v3 }
  0x8d   :  { %v90_v16 = vadd.f32 %v76_v0, %v60_v4  ;;  %v123_v17 = vadd.f32 %v111_v39, %v93_v9  ;;  %v124_v18 = vadd.f32 %v112_v40, %v94_v10  ;;  %v117_v19 = vadd.f32 %v105_v47, %v87_v11 }
  0x8e   :  { %v118_v20 = vadd.f32 %v106_v48, %v88_v12  ;;  %v185_v21 = vpack.c.bf16 %v122_v14, %v121_v13  ;;  %v119_v22 = vadd.f32 %v107_v49, %v89_v15 }
  0x8f   :  { %v120_v23 = vadd.f32 %v108_v50, %v90_v16  ;;  %v186_v24 = vpack.c.bf16 %v124_v18, %v123_v17 }
  0x90   :  { %v183_v25 = vpack.c.bf16 %v118_v20, %v117_v19  ;;  %169 = vst [vmem:[%s292_s4 + $0x20] sm:$0xff] %v185_v21 }
  0x91   :  { %v184_v26 = vpack.c.bf16 %v120_v23, %v119_v22  ;;  %170 = vst [vmem:[%s292_s4 + $0x28] sm:$0xff] %v186_v24 }
  0x92   :  { %167 = vst [vmem:[%s292_s4 + $0x10] sm:$0xff] %v183_v25 }
  0x93   :  { %168 = vst [vmem:[%s292_s4 + $0x18] sm:$0xff] %v184_v26 }

// kernel: generator_forward.48
= control target key start
LH: loop header
LB: loop body
LE: loop exit
PB: predicated region body
PF: predicated region fallthrough
CT: control target
= control target key end

     0   :  { %vm357_vm0 = vcmask 719872   ;;  %vm364_vm1 = vcmask 1043456   ;;  %vm529_vm2 = vcmask 7168   ;;  %s1066_s1 = inlined_call_operand.vmem [shape: bf16[216,512], index: 1, kind: input, shape index: {}]   ;;  %s1067_s0 = inlined_call_operand.vmem [shape: bf16[24,216], index: 0, kind: input, shape index: {}]   ;;  %s1068_s3 = inlined_call_operand.vmem [shape: f32[24,1], index: 3, kind: output, shape index: {1}]   ;;  %s1069_s2 = inlined_call_operand.vmem [shape: bf16[24,512], index: 2, kind: output, shape index: {0}]   ;;  %s1070_s4 = inlined_call_operand.vmem [shape: f32[24,1], index: 4, kind: output, shape index: {2}]  }
   0x1   :  { %v688_v0 = vld [vmem:[%s1066_s1 + $0x4] ss:$16 sps:$4 sm:$0xff]   ;;  %v690_v1 = vld [vmem:[%s1066_s1 + $0xc] ss:$16 sps:$4 sm:$0xff]   ;;  %v692_v2 = vld [vmem:[%s1066_s1] ss:$16 sps:$4 sm:$0xff]  }
   0x2   :  { %377 = vmatprep.subr.bf16.mxu0 %v688_v0  ;;  %v693_v3 = vld [vmem:[%s1066_s1 + $0x8] ss:$16 sps:$4 sm:$0xff]   ;;  %428 = vmatprep.subr.bf16.mxu1 %v690_v1  ;;  %v694_v4 = vld [vmem:[%s1066_s1 + $0x24] ss:$16 sps:$4 sm:$0xff]   ;;  %v696_v5 = vld [vmem:[%s1066_s1 + $0x2c] ss:$16 sps:$4 sm:$0xff]  }
   0x3   :  { %378 = vmatpush1.bf16.msra.mxu0 %v692_v2  ;;  %429 = vmatpush1.bf16.msra.mxu1 %v693_v3  ;;  %v698_v6 = vld [vmem:[%s1066_s1 + $0x20] ss:$16 sps:$4 sm:$0xff]   ;;  %v699_v7 = vld [vmem:[%s1066_s1 + $0x28] ss:$16 sps:$4 sm:$0xff]   ;;  %v700_v8 = vld [vmem:[%s1066_s1 + $0x44] ss:$16 sps:$4 sm:$0xff]  }
   0x4   :  { %379 = vmatprep.subr.bf16.mxu0 %v694_v4  ;;  %430 = vmatprep.subr.bf16.mxu1 %v696_v5  ;;  %v702_v9 = vld [vmem:[%s1066_s1 + $0x4c] ss:$16 sps:$4 sm:$0xff]   ;;  %v704_v10 = vld [vmem:[%s1066_s1 + $0x40] ss:$16 sps:$4 sm:$0xff]   ;;  %v705_v11 = vld [vmem:[%s1066_s1 + $0x48] ss:$16 sps:$4 sm:$0xff]  }
   0x5   :  { %v706_v12 = vld [vmem:[%s1066_s1 + $0x64] ss:$16 sps:$4 sm:$0xff]   ;;  %v708_v13 = vld [vmem:[%s1066_s1 + $0x6c] ss:$16 sps:$4 sm:$0xff]   ;;  %v710_v14 = vld [vmem:[%s1066_s1 + $0x60] ss:$16 sps:$4 sm:$0xff]  }
   0x6   :  { %v711_v15 = vld [vmem:[%s1066_s1 + $0x68] ss:$16 sps:$4 sm:$0xff]   ;;  %v712_v16 = vld [vmem:[%s1066_s1 + $0x84] ss:$16 sps:$4 sm:$0xff]   ;;  %v714_v17 = vld [vmem:[%s1066_s1 + $0x8c] ss:$16 sps:$4 sm:$0xff]  }
   0x7   :  { %380 = vmatpush1.bf16.msra.mxu0 %v698_v6  ;;  %431 = vmatpush1.bf16.msra.mxu1 %v699_v7  ;;  %v716_v18 = vld [vmem:[%s1066_s1 + $0x80] ss:$16 sps:$4 sm:$0xff]   ;;  %v717_v19 = vld [vmem:[%s1066_s1 + $0x88] ss:$16 sps:$4 sm:$0xff]   ;;  %v718_v20 = vld [vmem:[%s1066_s1 + $0xa4] ss:$16 sps:$4 sm:$0xff]  }
   0x8   :  { %381 = vmatprep.subr.bf16.mxu0 %v700_v8  ;;  %432 = vmatprep.subr.bf16.mxu1 %v702_v9  ;;  %v720_v21 = vld [vmem:[%s1066_s1 + $0xac] ss:$16 sps:$4 sm:$0xff]   ;;  %v722_v22 = vld [vmem:[%s1066_s1 + $0xa0] ss:$16 sps:$4 sm:$0xff]   ;;  %v723_v23 = vld [vmem:[%s1066_s1 + $0xa8] ss:$16 sps:$4 sm:$0xff]  }
   0x9   :  { %v724_v24 = vld [vmem:[%s1066_s1 + $0xc4] ss:$16 sps:$4 sm:$0xff]   ;;  %v726_v25 = vld [vmem:[%s1066_s1 + $0xcc] ss:$16 sps:$4 sm:$0xff]   ;;  %v728_v26 = vld [vmem:[%s1066_s1 + $0xc0] ss:$16 sps:$4 sm:$0xff]  }
   0xa   :  { %v729_v27 = vld [vmem:[%s1066_s1 + $0xc8] ss:$16 sps:$4 sm:$0xff]   ;;  %v730_v28 = vld [vmem:[%s1066_s1 + $0xe4] ss:$16 sps:$4 sm:$0xff]   ;;  %v732_v29 = vld [vmem:[%s1066_s1 + $0xec] ss:$16 sps:$4 sm:$0xff]  }
   0xb   :  { %382 = vmatpush1.bf16.msra.mxu0 %v704_v10  ;;  %433 = vmatpush1.bf16.msra.mxu1 %v705_v11  ;;  %v734_v30 = vld [vmem:[%s1066_s1 + $0xe0] ss:$16 sps:$4 sm:$0xff]   ;;  %v735_v31 = vld [vmem:[%s1066_s1 + $0xe8] ss:$16 sps:$4 sm:$0xff]   ;;  %v736_v32 = vld [vmem:[%s1066_s1 + $0x104] ss:$16 sps:$4 sm:$0xff]  }
   0xc   :  { %383 = vmatprep.subr.bf16.mxu0 %v706_v12  ;;  %434 = vmatprep.subr.bf16.mxu1 %v708_v13  ;;  %v738_v33 = vld [vmem:[%s1066_s1 + $0x10c] ss:$16 sps:$4 sm:$0xff]   ;;  %v740_v34 = vld [vmem:[%s1066_s1 + $0x100] ss:$16 sps:$4 sm:$0xff]   ;;  %v741_v35 = vld [vmem:[%s1066_s1 + $0x108] ss:$16 sps:$4 sm:$0xff]  }
   0xd   :  { %v742_v36 = vld [vmem:[%s1066_s1 + $0x124] ss:$16 sps:$4 sm:$0xff]   ;;  %v744_v37 = vld [vmem:[%s1066_s1 + $0x12c] ss:$16 sps:$4 sm:$0xff]   ;;  %v746_v38 = vld [vmem:[%s1066_s1 + $0x120] ss:$16 sps:$4 sm:$0xff]  }
   0xe   :  { %v747_v39 = vld [vmem:[%s1066_s1 + $0x128] ss:$16 sps:$4 sm:$0xff]   ;;  %v772_v40 = vld [vmem:[%s1067_s0 + $0x4] ss:$8 sps:$4 sm:$0xff]   ;;  %v752_v43 = vld [vmem:[%s1066_s1 + $0x140] ss:$16 sps:$4 sm:$0xff]  }
   0xf   :  { %384 = vmatpush1.bf16.msra.mxu0 %v710_v14  ;;  %435 = vmatpush1.bf16.msra.mxu1 %v711_v15  ;;  %v748_v41 = vld [vmem:[%s1066_s1 + $0x144] ss:$16 sps:$4 sm:$0xff]   ;;  %v750_v42 = vld [vmem:[%s1066_s1 + $0x14c] ss:$16 sps:$4 sm:$0xff]   ;;  %v753_v44 = vld [vmem:[%s1066_s1 + $0x148] ss:$16 sps:$4 sm:$0xff]  }
  0x10   :  { %385 = vmatprep.subr.bf16.mxu0 %v712_v16  ;;  %436 = vmatprep.subr.bf16.mxu1 %v714_v17  ;;  %v754_v45 = vld [vmem:[%s1066_s1 + $0x164] ss:$16 sps:$4 sm:$0xff]   ;;  %v756_v46 = vld [vmem:[%s1066_s1 + $0x16c] ss:$16 sps:$4 sm:$0xff]   ;;  %v758_v47 = vld [vmem:[%s1066_s1 + $0x160] ss:$16 sps:$4 sm:$0xff]  }
  0x11   :  { %670 = vmatprep.mubr.msk.bf16.mxu0 %vm357_vm0, %v772_v40  ;;  %673 = vmatprep.mubr.msk.bf16.mxu1 %vm357_vm0, %v772_v40  ;;  %v759_v48 = vld [vmem:[%s1066_s1 + $0x168] ss:$16 sps:$4 sm:$0xff]   ;;  %v760_v49 = vld [vmem:[%s1066_s1 + $0x184] ss:$16 sps:$4 sm:$0xff]   ;;  %v762_v50 = vld [vmem:[%s1066_s1 + $0x18c] ss:$16 sps:$4 sm:$0xff]  }
  0x12   :  { %v70_v51 = vld [vmem:[%s1066_s1 + $0x1a0] sm:$0xff]  ;;  %v71_v52 = vld [vmem:[%s1066_s1 + $0x1a8] sm:$0xff]  ;;  %v17_v61 = vld [vmem:[%s1067_s0 + $0x10] sm:$0xff]  ;;  %v775_v1 = vmov 0.0  }
  0x13   :  { %386 = vmatpush1.bf16.msra.mxu0 %v716_v18  ;;  %437 = vmatpush1.bf16.msra.mxu1 %v717_v19  ;;  %v764_v53 = vld [vmem:[%s1066_s1 + $0x180] ss:$16 sps:$4 sm:$0xff]   ;;  %v765_v54 = vld [vmem:[%s1066_s1 + $0x188] ss:$16 sps:$4 sm:$0xff]   ;;  %v666_v55 = vcombine.high %v70_v51, %v70_v51  ;;  %v668_v56 = vcombine.high %v71_v52, %v71_v52  ;;  %v665_v57 = vcombine.low %v70_v51, %v70_v51 }
  0x14   :  { %387 = vmatprep.subr.bf16.mxu0 %v718_v20  ;;  %438 = vmatprep.subr.bf16.mxu1 %v720_v21  ;;  %v667_v58 = vcombine.low %v71_v52, %v71_v52  ;;  %v770_v62 = vld [vmem:[%s1067_s0] ss:$8 sps:$4 sm:$0xff]   ;;  %v612_v63 = vcombine.high %v17_v61, %v17_v61  ;;  %v611_v0 = vcombine.low %v17_v61, %v17_v61 }
  0x15   :  { %v366_v59 = vsel %vm364_vm1, %v665_v57, 0  ;;  %530 = vst.msk [vmem:[%s1068_s3] sm:$0xff] %vm529_vm2, %v775_v1  ;;  %531 = vst.msk [vmem:[%s1068_s3 + $0x8] sm:$0xff] %vm529_vm2, %v775_v1 }
  0x16   :  { %v372_v60 = vsel %vm364_vm1, %v667_v58, 0  ;;  %532 = vst.msk [vmem:[%s1068_s3 + $0x10] sm:$0xff] %vm529_vm2, %v775_v1  ;;  %533 = vst.msk [vmem:[%s1070_s4] sm:$0xff] %vm529_vm2, %v775_v1 }
  0x17   :  { %388 = vmatpush1.bf16.msra.mxu0 %v722_v22  ;;  %439 = vmatpush1.bf16.msra.mxu1 %v723_v23  ;;  %534 = vst.msk [vmem:[%s1070_s4 + $0x8] sm:$0xff] %vm529_vm2, %v775_v1  ;;  %535 = vst.msk [vmem:[%s1070_s4 + $0x10] sm:$0xff] %vm529_vm2, %v775_v1 }
  0x18   :  { %389 = vmatprep.subr.bf16.mxu0 %v724_v24  ;;  %440 = vmatprep.subr.bf16.mxu1 %v726_v25 }
  0x1b   :  { %390 = vmatpush1.bf16.msra.mxu0 %v728_v26  ;;  %441 = vmatpush1.bf16.msra.mxu1 %v729_v27 }
  0x1c   :  { %391 = vmatprep.subr.bf16.mxu0 %v730_v28  ;;  %442 = vmatprep.subr.bf16.mxu1 %v732_v29 }
  0x1f   :  { %392 = vmatpush1.bf16.msra.mxu0 %v734_v30  ;;  %443 = vmatpush1.bf16.msra.mxu1 %v735_v31 }
  0x20   :  { %393 = vmatprep.subr.bf16.mxu0 %v736_v32  ;;  %444 = vmatprep.subr.bf16.mxu1 %v738_v33 }
  0x23   :  { %394 = vmatpush1.bf16.msra.mxu0 %v740_v34  ;;  %445 = vmatpush1.bf16.msra.mxu1 %v741_v35 }
  0x24   :  { %395 = vmatprep.subr.bf16.mxu0 %v742_v36  ;;  %446 = vmatprep.subr.bf16.mxu1 %v744_v37 }
  0x27   :  { %396 = vmatpush1.bf16.msra.mxu0 %v746_v38  ;;  %447 = vmatpush1.bf16.msra.mxu1 %v747_v39 }
  0x28   :  { %397 = vmatprep.subr.bf16.mxu0 %v748_v41  ;;  %448 = vmatprep.subr.bf16.mxu1 %v750_v42 }
  0x2b   :  { %398 = vmatpush1.bf16.msra.mxu0 %v752_v43  ;;  %449 = vmatpush1.bf16.msra.mxu1 %v753_v44 }
  0x2c   :  { %399 = vmatprep.subr.bf16.mxu0 %v754_v45  ;;  %450 = vmatprep.subr.bf16.mxu1 %v756_v46 }
  0x2f   :  { %400 = vmatpush1.bf16.msra.mxu0 %v758_v47  ;;  %451 = vmatpush1.bf16.msra.mxu1 %v759_v48 }
  0x30   :  { %401 = vmatprep.subr.bf16.mxu0 %v760_v49  ;;  %452 = vmatprep.subr.bf16.mxu1 %v762_v50 }
  0x33   :  { %402 = vmatpush1.bf16.msra.mxu0 %v764_v53  ;;  %453 = vmatpush1.bf16.msra.mxu1 %v765_v54  ;;  %v536_v54 = vld [vmem:[%s1068_s3] sm:$0xff] }
  0x34   :  { %669 = vmatprep.subr.msk.bf16.mxu0 %vm364_vm1, %v666_v55  ;;  %672 = vmatprep.subr.msk.bf16.mxu1 %vm364_vm1, %v668_v56  ;;  %v561_v56 = vld [vmem:[%s1070_s4] sm:$0xff] }
  0x37   :  { %404 = vmatpush1.bf16.msra.mxu0 %v366_v59  ;;  %455 = vmatpush1.bf16.msra.mxu1 %v372_v60  ;;  %v537_v59 = vld [vmem:[%s1068_s3 + $0x8] sm:$0xff] }
  0x3a   :  { %410 = vmatmul.mubr.bf16.vlgmr.msra.gmra.mrb[0].mxu0 %v770_v62  ;;  %461 = vmatmul.mubr.bf16.vlgmr.msra.gmra.mrb[0].mxu1 %v770_v62 }
  0x3b   :  { %671 = vmatprep.mubr.msk.bf16.mxu0 %vm357_vm0, %v612_v63  ;;  %674 = vmatprep.mubr.msk.bf16.mxu1 %vm357_vm0, %v612_v63  ;;  %v538_v63 = vld [vmem:[%s1068_s3 + $0x10] sm:$0xff] }
  0x42   :  { %420 = vmatmul.mubr.bf16.gmra.mrb[4].mxu0 %v611_v0  ;;  %471 = vmatmul.mubr.bf16.gmra.mrb[4].mxu1 %v611_v0  ;;  %v562_v0 = vld [vmem:[%s1070_s4 + $0x8] sm:$0xff] }
 0x10d   :  { %v411_v2 = vpop.f32.mrb[0].mxu0  ;;  %v462_v3 = vpop.f32.mrb[0].mxu1 }
 0x10e   :  { %v564_v4 = vmul.f32 %v411_v2, %v411_v2  ;;  %v413_v5 = vpop.f32.mrb[1].mxu0  ;;  %v464_v6 = vpop.f32.mrb[1].mxu1  ;;  %v566_v13 = vmul.f32 %v462_v3, %v462_v3 }
 0x10f   :  { %v681_v7 = vpack.c.bf16 %v413_v5, %v411_v2  ;;  %v539_v8 = vadd.f32 %v413_v5, %v411_v2  ;;  %v565_v9 = vmul.f32 %v413_v5, %v413_v5  ;;  %v682_v10 = vpack.c.bf16 %v464_v6, %v462_v3  ;;  %v415_v11 = vpop.f32.mrb[2].mxu0  ;;  %v466_v12 = vpop.f32.mrb[2].mxu1  ;;  %v563_v5 = vld [vmem:[%s1070_s4 + $0x10] sm:$0xff] }
 0x110   :  { %v568_v14 = vmul.f32 %v415_v11, %v415_v11  ;;  %v417_v15 = vpop.f32.mrb[3].mxu0  ;;  %v468_v16 = vpop.f32.mrb[3].mxu1  ;;  %v570_v23 = vmul.f32 %v466_v12, %v466_v12  ;;  %v567_v27 = vmul.f32 %v464_v6, %v464_v6 }
 0x111   :  { %519 = vst [vmem:[%s1069_s2] sm:$0xff] %v681_v7  ;;  %520 = vst [vmem:[%s1069_s2 + $0x8] sm:$0xff] %v682_v10  ;;  %v683_v17 = vpack.c.bf16 %v417_v15, %v415_v11  ;;  %v544_v18 = vadd.f32 %v417_v15, %v415_v11  ;;  %v569_v19 = vmul.f32 %v417_v15, %v417_v15 }
 0x112   :  { %v684_v20 = vpack.c.bf16 %v468_v16, %v466_v12  ;;  %v540_v21 = vadd.f32 %v539_v8, %v462_v3  ;;  %v576_v22 = vadd.f32 %v565_v9, %v564_v4  ;;  %v571_v38 = vmul.f32 %v468_v16, %v468_v16 }
 0x113   :  { %521 = vst [vmem:[%s1069_s2 + $0x10] sm:$0xff] %v683_v17  ;;  %v545_v24 = vadd.f32 %v544_v18, %v466_v12  ;;  %v581_v25 = vadd.f32 %v569_v19, %v568_v14 }
 0x114   :  { %522 = vst [vmem:[%s1069_s2 + $0x18] sm:$0xff] %v684_v20  ;;  %v541_v26 = vadd.f32 %v540_v21, %v464_v6  ;;  %v577_v28 = vadd.f32 %v576_v22, %v566_v13 }
 0x115   :  { %v472_v29 = vpop.f32.mrb[4].mxu1  ;;  %v421_v30 = vpop.f32.mrb[4].mxu0  ;;  %v546_v31 = vadd.f32 %v545_v24, %v468_v16  ;;  %v582_v32 = vadd.f32 %v581_v25, %v570_v23 }
 0x116   :  { %v574_v33 = vmul.f32 %v472_v29, %v472_v29  ;;  %542 = vadd.xlane.f32.xlu0 %v541_v26  ;;  %v572_v34 = vmul.f32 %v421_v30, %v421_v30  ;;  %v423_v35 = vpop.f32.mrb[5].mxu0  ;;  %v474_v36 = vpop.f32.mrb[5].mxu1  ;;  %v578_v37 = vadd.f32 %v577_v28, %v567_v27 }
 0x117   :  { %v685_v39 = vpack.c.bf16 %v423_v35, %v421_v30  ;;  %v549_v40 = vadd.f32 %v423_v35, %v421_v30  ;;  %v573_v41 = vmul.f32 %v423_v35, %v423_v35  ;;  %v686_v42 = vpack.c.bf16 %v474_v36, %v472_v29  ;;  %v476_v43 = vpop.f32.mrb[6].mxu1  ;;  %v425_v44 = vpop.f32.mrb[6].mxu0 }
 0x118   :  { %579 = vadd.xlane.f32.xlu1 %v578_v37  ;;  %v426_v45 = vpop.f32.mrb[7].mxu0  ;;  %v477_v46 = vpop.f32.mrb[7].mxu1  ;;  %v583_v47 = vadd.f32 %v582_v32, %v571_v38  ;;  %v575_v51 = vmul.f32 %v474_v36, %v474_v36 }
 0x119   :  { %523 = vst [vmem:[%s1069_s2 + $0x20] sm:$0xff] %v685_v39  ;;  %524 = vst [vmem:[%s1069_s2 + $0x28] sm:$0xff] %v686_v42  ;;  %v550_v48 = vadd.f32 %v549_v40, %v472_v29  ;;  %v586_v49 = vadd.f32 %v573_v41, %v572_v34 }
 0x11a   :  { %547 = vadd.xlane.f32.xlu0 %v546_v31 }
 0x11b   :  { %v551_v50 = vadd.f32 %v550_v48, %v474_v36  ;;  %v587_v52 = vadd.f32 %v586_v49, %v574_v33 }
 0x11d   :  { %552 = vadd.xlane.f32.xlu1 %v551_v50  ;;  %v588_v53 = vadd.f32 %v587_v52, %v575_v51 }
 0x11e   :  { %584 = vadd.xlane.f32.xlu0 %v583_v47 }
 0x121   :  { %589 = vadd.xlane.f32.xlu1 %v588_v53 }
 0x1a3   :  { %v543_v55 = vpop.xlane.xlu0 %542 }
 0x1a4   :  { %v554_v57 = vadd.f32 %v543_v55, %v536_v54 }
 0x1a5   :  { %v580_v58 = vpop.xlane.xlu1 %579 }
 0x1a6   :  { %558 = vst.msk [vmem:[%s1068_s3] sm:$0xff] %vm529_vm2, %v554_v57  ;;  %v591_v60 = vadd.f32 %v580_v58, %v561_v56 }
 0x1a7   :  { %v548_v61 = vpop.xlane.xlu0 %547 }
 0x1a8   :  { %594 = vst.msk [vmem:[%s1070_s4] sm:$0xff] %vm529_vm2, %v591_v60  ;;  %v555_v62 = vadd.f32 %v548_v61, %v537_v59 }
 0x1aa   :  { %559 = vst.msk [vmem:[%s1068_s3 + $0x8] sm:$0xff] %vm529_vm2, %v555_v62  ;;  %v553_v1 = vpop.xlane.xlu1 %552 }
 0x1ab   :  { %v585_v2 = vpop.xlane.xlu0 %584  ;;  %v556_v3 = vadd.f32 %v553_v1, %v538_v63 }
 0x1ac   :  { %v592_v4 = vadd.f32 %v585_v2, %v562_v0 }
 0x1ad   :  { %560 = vst.msk [vmem:[%s1068_s3 + $0x10] sm:$0xff] %vm529_vm2, %v556_v3 }
 0x1ae   :  { %595 = vst.msk [vmem:[%s1070_s4 + $0x8] sm:$0xff] %vm529_vm2, %v592_v4  ;;  %v590_v6 = vpop.xlane.xlu1 %589 }
 0x1af   :  { %v593_v7 = vadd.f32 %v590_v6, %v563_v5 }
 0x1b1   :  { %596 = vst.msk [vmem:[%s1070_s4 + $0x10] sm:$0xff] %vm529_vm2, %v593_v7 }

// kernel: generator_forward.53
= control target key start
LH: loop header
LB: loop body
LE: loop exit
PB: predicated region body
PF: predicated region fallthrough
CT: control target
= control target key end

     0   :  { %v196_v0 = vmov 0   ;;  %s271_s1 = inlined_call_operand.vmem [shape: f32[48,1], index: 1, kind: input, shape index: {}]   ;;  %s272_s2 = inlined_call_operand.vmem [shape: f32[48,1], index: 2, kind: input, shape index: {}]   ;;  %s273_s0 = inlined_call_operand.vmem [shape: bf16[48,128], index: 0, kind: input, shape index: {}]   ;;  %s274_s3 = inlined_call_operand.vmem [shape: bf16[48,128], index: 3, kind: output, shape index: {}]  }
   0x1   :  { %195 = vset.pattern.permute.xlu1 %v196_v0  ;;  %194 = vset.pattern.permute.xlu0 %v196_v0  ;;  %v28_v1 = vld [vmem:[%s271_s1 + $0x10] sm:$0xff]  ;;  %v26_v2 = vld [vmem:[%s271_s1] sm:$0xff]  ;;  %v29_v3 = vld [vmem:[%s271_s1 + $0x18] sm:$0xff] }
   0x2   :  { %44 = vperm.xlu1 %195, %v28_v1   ;;  %34 = vperm.xlu0 %194, %v26_v2   ;;  %v27_v4 = vld [vmem:[%s271_s1 + $0x8] sm:$0xff]  ;;  %v30_v6 = vld [vmem:[%s271_s1 + $0x20] sm:$0xff]  ;;  %v71_v9 = vld [vmem:[%s272_s2 + $0x18] sm:$0xff] }
   0x3   :  { %v31_v5 = vld [vmem:[%s271_s1 + $0x28] sm:$0xff]  ;;  %v68_v8 = vld [vmem:[%s272_s2] sm:$0xff]  ;;  %v70_v10 = vld [vmem:[%s272_s2 + $0x10] sm:$0xff] }
   0x4   :  { %v69_v7 = vld [vmem:[%s272_s2 + $0x8] sm:$0xff]  ;;  %v72_v12 = vld [vmem:[%s272_s2 + $0x20] sm:$0xff]  ;;  %v190_v27 = vld [vmem:[%s273_s0 + $0x10] sm:$0xff]  }
   0x5   :  { %v73_v11 = vld [vmem:[%s272_s2 + $0x28] sm:$0xff]  ;;  %v163_v15 = vld [vmem:[%s273_s0] sm:$0xff]   ;;  %v173_v32 = vunpack.c.h.bf16 %v190_v27  ;;  %v172_v33 = vunpack.c.l.bf16 %v190_v27 }
   0x6   :  { %49 = vperm.xlu1 %195, %v29_v3   ;;  %39 = vperm.xlu0 %194, %v27_v4   ;;  %v164_v18 = vunpack.c.l.bf16 %v163_v15  ;;  %v165_v19 = vunpack.c.h.bf16 %v163_v15  ;;  %v189_v20 = vld [vmem:[%s273_s0 + $0x8] sm:$0xff]  }
   0x7   :  { %v168_v23 = vunpack.c.l.bf16 %v189_v20  ;;  %v169_v25 = vunpack.c.h.bf16 %v189_v20 }
   0xa   :  { %59 = vperm.xlu1 %195, %v31_v5   ;;  %54 = vperm.xlu0 %194, %v30_v6  }
   0xe   :  { %81 = vperm.xlu1 %195, %v69_v7   ;;  %76 = vperm.xlu0 %194, %v68_v8  }
  0x12   :  { %91 = vperm.xlu1 %195, %v71_v9   ;;  %86 = vperm.xlu0 %194, %v70_v10  }
  0x16   :  { %101 = vperm.xlu1 %195, %v73_v11   ;;  %96 = vperm.xlu0 %194, %v72_v12  }
  0x81   :  { %v45_v13 = vpop.permute.xlu1 %44  ;;  %v35_v14 = vpop.permute.xlu0 %34 }
  0x82   :  { %v62_v24 = vmul.f32 %v164_v18, %v35_v14  ;;  %v64_v34 = vmul.f32 %v168_v23, %v45_v13 }
  0x85   :  { %v50_v16 = vpop.permute.xlu1 %49  ;;  %v40_v17 = vpop.permute.xlu0 %39 }
  0x86   :  { %v63_v26 = vmul.f32 %v165_v19, %v40_v17  ;;  %v65_v35 = vmul.f32 %v169_v25, %v50_v16 }
  0x89   :  { %v60_v21 = vpop.permute.xlu1 %59  ;;  %v55_v22 = vpop.permute.xlu0 %54 }
  0x8a   :  { %v67_v43 = vmul.f32 %v173_v32, %v60_v21  ;;  %v66_v44 = vmul.f32 %v172_v33, %v55_v22 }
  0x8d   :  { %v82_v28 = vpop.permute.xlu1 %81  ;;  %v77_v29 = vpop.permute.xlu0 %76 }
  0x8e   :  { %v105_v30 = vadd.f32 %v82_v28, %v63_v26  ;;  %v104_v31 = vadd.f32 %v77_v29, %v62_v24 }
  0x90   :  { %v111_v36 = vmax.f32 %v105_v30, 0.0  ;;  %v110_v37 = vmax.f32 %v104_v31, 0.0 }
  0x91   :  { %v92_v38 = vpop.permute.xlu1 %91  ;;  %v87_v39 = vpop.permute.xlu0 %86 }
  0x92   :  { %v177_v40 = vpack.c.bf16 %v111_v36, %v110_v37  ;;  %v107_v41 = vadd.f32 %v92_v38, %v65_v35  ;;  %v106_v42 = vadd.f32 %v87_v39, %v64_v34 }
  0x94   :  { %178 = vst [vmem:[%s274_s3] sm:$0xff] %v177_v40   ;;  %v113_v45 = vmax.f32 %v107_v41, 0.0  ;;  %v112_v46 = vmax.f32 %v106_v42, 0.0 }
  0x95   :  { %v102_v47 = vpop.permute.xlu1 %101  ;;  %v97_v48 = vpop.permute.xlu0 %96 }
  0x96   :  { %v182_v49 = vpack.c.bf16 %v113_v45, %v112_v46  ;;  %v109_v50 = vadd.f32 %v102_v47, %v67_v43  ;;  %v108_v51 = vadd.f32 %v97_v48, %v66_v44 }
  0x98   :  { %191 = vst [vmem:[%s274_s3 + $0x8] sm:$0xff] %v182_v49   ;;  %v115_v52 = vmax.f32 %v109_v50, 0.0  ;;  %v114_v53 = vmax.f32 %v108_v51, 0.0 }
  0x9a   :  { %v187_v54 = vpack.c.bf16 %v115_v52, %v114_v53 }
  0x9c   :  { %192 = vst [vmem:[%s274_s3 + $0x10] sm:$0xff] %v187_v54  }

// kernel: generator_forward.52
= control target key start
LH: loop header
LB: loop body
LE: loop exit
PB: predicated region body
PF: predicated region fallthrough
CT: control target
= control target key end

     0   :  { %v458_v0 = vmov 0   ;;  %vm156_vm0 = vcmask 719872   ;;  %vm166_vm1 = vcmask 1043456   ;;  %vm261_vm2 = vcmask 7168   ;;  %s717_s1 = inlined_call_operand.vmem [shape: bf16[216,128], index: 1, kind: input, shape index: {}]   ;;  %s718_s0 = inlined_call_operand.vmem [shape: bf16[48,216], index: 0, kind: input, shape index: {}]   ;;  %s719_s3 = inlined_call_operand.vmem [shape: f32[48,1], index: 3, kind: output, shape index: {1}]   ;;  %s720_s2 = inlined_call_operand.vmem [shape: bf16[48,128], index: 2, kind: output, shape index: {0}]   ;;  %s721_s4 = inlined_call_operand.vmem [shape: f32[48,1], index: 4, kind: output, shape index: {2}]  }
   0x1   :  { %170 = vmatprep.subr.bf16.mxu0 %v458_v0  ;;  %405 = vmatprep.subr.bf16.mxu1 %v458_v0  ;;  %v435_v1 = vld [vmem:[%s717_s1] sm:$0xff]   ;;  %v436_v2 = vld [vmem:[%s717_s1 + $0x8] sm:$0xff]   ;;  %v437_v3 = vld [vmem:[%s717_s1 + $0x10] sm:$0xff]   ;;  %v459_v22 = vmov 0.0  }
   0x2   :  { %171 = vmatpush1.bf16.msra.mxu0 %v435_v1  ;;  %419 = vmatpush1.bf16.msra.mxu1 %v435_v1  ;;  %v438_v4 = vld [vmem:[%s717_s1 + $0x18] sm:$0xff]   ;;  %v439_v5 = vld [vmem:[%s717_s1 + $0x20] sm:$0xff]   ;;  %v440_v8 = vld [vmem:[%s717_s1 + $0x28] sm:$0xff]   ;;  %264 = vst.msk [vmem:[%s719_s3 + $0x10] sm:$0xff] %vm261_vm2, %v459_v22 }
   0x3   :  { %172 = vmatprep.subr.bf16.mxu0 %v458_v0  ;;  %406 = vmatprep.subr.bf16.mxu1 %v458_v0  ;;  %v451_v6 = vld [vmem:[%s718_s0 + $0x4] ss:$8 sps:$4 sm:$0xff]   ;;  %v454_v7 = vld [vmem:[%s718_s0 + $0x14] ss:$8 sps:$4 sm:$0xff]   ;;  %v448_v16 = vld [vmem:[%s717_s1 + $0x68] ss:$0 sps:$4 sm:$0xff]  }
   0x4   :  { %373 = vmatprep.mubr.msk.bf16.mxu0 %vm156_vm0, %v451_v6  ;;  %374 = vmatprep.mubr.msk.bf16.mxu1 %vm156_vm0, %v454_v7  ;;  %v441_v9 = vld [vmem:[%s717_s1 + $0x30] sm:$0xff]   ;;  %v442_v10 = vld [vmem:[%s717_s1 + $0x38] sm:$0xff]   ;;  %v443_v11 = vld [vmem:[%s717_s1 + $0x40] sm:$0xff]   ;;  %v168_v17 = vsel %vm166_vm1, %v448_v16, 0  ;;  %262 = vst.msk [vmem:[%s719_s3] sm:$0xff] %vm261_vm2, %v459_v22 }
   0x5   :  { %v444_v12 = vld [vmem:[%s717_s1 + $0x48] sm:$0xff]   ;;  %v445_v13 = vld [vmem:[%s717_s1 + $0x50] sm:$0xff]   ;;  %v446_v14 = vld [vmem:[%s717_s1 + $0x58] sm:$0xff]   ;;  %263 = vst.msk [vmem:[%s719_s3 + $0x8] sm:$0xff] %vm261_vm2, %v459_v22 }
   0x6   :  { %173 = vmatpush1.bf16.msra.mxu0 %v436_v2  ;;  %420 = vmatpush1.bf16.msra.mxu1 %v436_v2  ;;  %v447_v15 = vld [vmem:[%s717_s1 + $0x60] sm:$0xff]   ;;  %v452_v19 = vld [vmem:[%s718_s0 + $0x10] ss:$8 sps:$4 sm:$0xff]   ;;  %265 = vst.msk [vmem:[%s719_s3 + $0x18] sm:$0xff] %vm261_vm2, %v459_v22  ;;  %266 = vst.msk [vmem:[%s719_s3 + $0x20] sm:$0xff] %vm261_vm2, %v459_v22 }
   0x7   :  { %174 = vmatprep.subr.bf16.mxu0 %v458_v0  ;;  %407 = vmatprep.subr.bf16.mxu1 %v458_v0  ;;  %v449_v18 = vld [vmem:[%s718_s0] ss:$8 sps:$4 sm:$0xff]   ;;  %v455_v20 = vld [vmem:[%s718_s0 + $0x24] ss:$8 sps:$4 sm:$0xff]   ;;  %267 = vst.msk [vmem:[%s719_s3 + $0x28] sm:$0xff] %vm261_vm2, %v459_v22  ;;  %268 = vst.msk [vmem:[%s721_s4] sm:$0xff] %vm261_vm2, %v459_v22 }
   0x8   :  { %v457_v21 = vld [vmem:[%s718_s0 + $0x20] ss:$8 sps:$4 sm:$0xff]   ;;  %269 = vst.msk [vmem:[%s721_s4 + $0x8] sm:$0xff] %vm261_vm2, %v459_v22  ;;  %270 = vst.msk [vmem:[%s721_s4 + $0x10] sm:$0xff] %vm261_vm2, %v459_v22 }
   0x9   :  { %271 = vst.msk [vmem:[%s721_s4 + $0x18] sm:$0xff] %vm261_vm2, %v459_v22  ;;  %272 = vst.msk [vmem:[%s721_s4 + $0x20] sm:$0xff] %vm261_vm2, %v459_v22  ;;  %v276_v44 = vld [vmem:[%s719_s3 + $0x10] sm:$0xff] }
   0xa   :  { %175 = vmatpush1.bf16.msra.mxu0 %v437_v3  ;;  %421 = vmatpush1.bf16.msra.mxu1 %v437_v3  ;;  %273 = vst.msk [vmem:[%s721_s4 + $0x28] sm:$0xff] %vm261_vm2, %v459_v22 }
   0xb   :  { %176 = vmatprep.subr.bf16.mxu0 %v458_v0  ;;  %408 = vmatprep.subr.bf16.mxu1 %v458_v0  ;;  %v274_v45 = vld [vmem:[%s719_s3] sm:$0xff] }
   0xc   :  { %v275_v51 = vld [vmem:[%s719_s3 + $0x8] sm:$0xff] }
   0xd   :  { %v277_v50 = vld [vmem:[%s719_s3 + $0x18] sm:$0xff] }
   0xe   :  { %177 = vmatpush1.bf16.msra.mxu0 %v438_v4  ;;  %422 = vmatpush1.bf16.msra.mxu1 %v438_v4  ;;  %v305_v56 = vld [vmem:[%s721_s4] sm:$0xff] }
   0xf   :  { %178 = vmatprep.subr.bf16.mxu0 %v458_v0  ;;  %409 = vmatprep.subr.bf16.mxu1 %v458_v0  ;;  %v306_v57 = vld [vmem:[%s721_s4 + $0x8] sm:$0xff]  ;;  %v307_v62 = vld [vmem:[%s721_s4 + $0x10] sm:$0xff]  ;;  %v278_v4 = vld [vmem:[%s719_s3 + $0x20] sm:$0xff] }
  0x10   :  { %v308_v63 = vld [vmem:[%s721_s4 + $0x18] sm:$0xff] }
  0x12   :  { %179 = vmatpush1.bf16.msra.mxu0 %v439_v5  ;;  %423 = vmatpush1.bf16.msra.mxu1 %v439_v5  ;;  %v279_v5 = vld [vmem:[%s719_s3 + $0x28] sm:$0xff] }
  0x13   :  { %180 = vmatprep.subr.bf16.mxu0 %v458_v0  ;;  %410 = vmatprep.subr.bf16.mxu1 %v458_v0 }
  0x16   :  { %181 = vmatpush1.bf16.msra.mxu0 %v440_v8  ;;  %424 = vmatpush1.bf16.msra.mxu1 %v440_v8 }
  0x17   :  { %182 = vmatprep.subr.bf16.mxu0 %v458_v0  ;;  %411 = vmatprep.subr.bf16.mxu1 %v458_v0 }
  0x1a   :  { %183 = vmatpush1.bf16.msra.mxu0 %v441_v9  ;;  %425 = vmatpush1.bf16.msra.mxu1 %v441_v9 }
  0x1b   :  { %184 = vmatprep.subr.bf16.mxu0 %v458_v0  ;;  %412 = vmatprep.subr.bf16.mxu1 %v458_v0 }
  0x1e   :  { %185 = vmatpush1.bf16.msra.mxu0 %v442_v10  ;;  %426 = vmatpush1.bf16.msra.mxu1 %v442_v10  ;;  %v309_v10 = vld [vmem:[%s721_s4 + $0x20] sm:$0xff] }
  0x1f   :  { %186 = vmatprep.subr.bf16.mxu0 %v458_v0  ;;  %413 = vmatprep.subr.bf16.mxu1 %v458_v0 }
  0x22   :  { %187 = vmatpush1.bf16.msra.mxu0 %v443_v11  ;;  %427 = vmatpush1.bf16.msra.mxu1 %v443_v11  ;;  %v310_v11 = vld [vmem:[%s721_s4 + $0x28] sm:$0xff] }
  0x23   :  { %188 = vmatprep.subr.bf16.mxu0 %v458_v0  ;;  %414 = vmatprep.subr.bf16.mxu1 %v458_v0 }
  0x26   :  { %189 = vmatpush1.bf16.msra.mxu0 %v444_v12  ;;  %428 = vmatpush1.bf16.msra.mxu1 %v444_v12 }
  0x27   :  { %190 = vmatprep.subr.bf16.mxu0 %v458_v0  ;;  %415 = vmatprep.subr.bf16.mxu1 %v458_v0 }
  0x2a   :  { %191 = vmatpush1.bf16.msra.mxu0 %v445_v13  ;;  %429 = vmatpush1.bf16.msra.mxu1 %v445_v13 }
  0x2b   :  { %192 = vmatprep.subr.bf16.mxu0 %v458_v0  ;;  %416 = vmatprep.subr.bf16.mxu1 %v458_v0 }
  0x2e   :  { %193 = vmatpush1.bf16.msra.mxu0 %v446_v14  ;;  %430 = vmatpush1.bf16.msra.mxu1 %v446_v14 }
  0x2f   :  { %194 = vmatprep.subr.bf16.mxu0 %v458_v0  ;;  %417 = vmatprep.subr.bf16.mxu1 %v458_v0 }
  0x32   :  { %195 = vmatpush1.bf16.msra.mxu0 %v447_v15  ;;  %431 = vmatpush1.bf16.msra.mxu1 %v447_v15 }
  0x33   :  { %196 = vmatprep.subr.bf16.mxu0 %v458_v0  ;;  %418 = vmatprep.subr.bf16.mxu1 %v458_v0 }
  0x36   :  { %197 = vmatpush1.bf16.msra.mxu0 %v168_v17  ;;  %432 = vmatpush1.bf16.msra.mxu1 %v168_v17 }
  0x39   :  { %203 = vmatmul.mubr.bf16.vlgmr.msra.gmra.mrb[0].mxu0 %v449_v18  ;;  %211 = vmatmul.mubr.bf16.vlgmr.msra.gmra.mrb[0].mxu1 %v452_v19 }
  0x3a   :  { %375 = vmatprep.mubr.msk.bf16.mxu1 %vm156_vm0, %v455_v20 }
  0x41   :  { %219 = vmatmul.mubr.bf16.gmra.mrb[4].mxu1 %v457_v21 }
 0x10c   :  { %v204_v23 = vpop.f32.mrb[0].mxu0  ;;  %v212_v24 = vpop.f32.mrb[0].mxu1 }
 0x10d   :  { %284 = vadd.xlane.f32.xlu1 %v212_v24  ;;  %v214_v25 = vpop.f32.mrb[1].mxu1  ;;  %280 = vadd.xlane.f32.xlu0 %v204_v23  ;;  %v206_v26 = vpop.f32.mrb[1].mxu0  ;;  %v311_v33 = vmul.f32 %v204_v23, %v204_v23  ;;  %v313_v39 = vmul.f32 %v212_v24, %v212_v24 }
 0x10e   :  { %v207_v27 = vpop.f32.mrb[2].mxu0  ;;  %v215_v28 = vpop.f32.mrb[2].mxu1 }
 0x10f   :  { %v391_v29 = vpack.c.bf16 %v207_v27, %v204_v23  ;;  %v396_v30 = vpack.c.bf16 %v215_v28, %v212_v24  ;;  %v209_v31 = vpop.f32.mrb[3].mxu0  ;;  %v217_v32 = vpop.f32.mrb[3].mxu1  ;;  %v312_v34 = vmul.f32 %v207_v27, %v207_v27  ;;  %v314_v40 = vmul.f32 %v215_v28, %v215_v28 }
 0x111   :  { %392 = vst [vmem:[%s720_s2] sm:$0xff] %v391_v29   ;;  %403 = vst [vmem:[%s720_s2 + $0x8] sm:$0xff] %v396_v30   ;;  %286 = vadd.xlane.f32.xlu1 %v215_v28  ;;  %282 = vadd.xlane.f32.xlu0 %v207_v27 }
 0x114   :  { %v220_v35 = vpop.f32.mrb[4].mxu1 }
 0x115   :  { %317 = vadd.xlane.f32.xlu0 %v311_v33  ;;  %319 = vadd.xlane.f32.xlu1 %v312_v34  ;;  %v222_v36 = vpop.f32.mrb[5].mxu1  ;;  %v315_v42 = vmul.f32 %v220_v35, %v220_v35 }
 0x116   :  { %v223_v37 = vpop.f32.mrb[6].mxu1 }
 0x117   :  { %v401_v38 = vpack.c.bf16 %v223_v37, %v220_v35  ;;  %v225_v41 = vpop.f32.mrb[7].mxu1  ;;  %v316_v43 = vmul.f32 %v223_v37, %v223_v37 }
 0x119   :  { %404 = vst [vmem:[%s720_s2 + $0x10] sm:$0xff] %v401_v38   ;;  %321 = vadd.xlane.f32.xlu0 %v313_v39  ;;  %323 = vadd.xlane.f32.xlu1 %v314_v40 }
 0x11d   :  { %288 = vadd.xlane.f32.xlu0 %v220_v35  ;;  %290 = vadd.xlane.f32.xlu1 %v223_v37 }
 0x121   :  { %325 = vadd.xlane.f32.xlu0 %v315_v42  ;;  %327 = vadd.xlane.f32.xlu1 %v316_v43 }
 0x19a   :  { %v285_v46 = vpop.xlane.xlu1 %284  ;;  %v281_v47 = vpop.xlane.xlu0 %280 }
 0x19b   :  { %v294_v48 = vadd.f32 %v285_v46, %v276_v44  ;;  %v292_v49 = vadd.f32 %v281_v47, %v274_v45 }
 0x19d   :  { %301 = vst.msk [vmem:[%s719_s3 + $0x10] sm:$0xff] %vm261_vm2, %v294_v48  ;;  %299 = vst.msk [vmem:[%s719_s3] sm:$0xff] %vm261_vm2, %v292_v49 }
 0x19e   :  { %v287_v52 = vpop.xlane.xlu1 %286  ;;  %v283_v53 = vpop.xlane.xlu0 %282 }
 0x19f   :  { %v295_v54 = vadd.f32 %v287_v52, %v277_v50  ;;  %v293_v55 = vadd.f32 %v283_v53, %v275_v51 }
 0x1a1   :  { %302 = vst.msk [vmem:[%s719_s3 + $0x18] sm:$0xff] %vm261_vm2, %v295_v54  ;;  %300 = vst.msk [vmem:[%s719_s3 + $0x8] sm:$0xff] %vm261_vm2, %v293_v55 }
 0x1a2   :  { %v318_v58 = vpop.xlane.xlu0 %317  ;;  %v320_v59 = vpop.xlane.xlu1 %319 }
 0x1a3   :  { %v329_v60 = vadd.f32 %v318_v58, %v305_v56  ;;  %v330_v61 = vadd.f32 %v320_v59, %v306_v57 }
 0x1a5   :  { %335 = vst.msk [vmem:[%s721_s4] sm:$0xff] %vm261_vm2, %v329_v60  ;;  %336 = vst.msk [vmem:[%s721_s4 + $0x8] sm:$0xff] %vm261_vm2, %v330_v61 }
 0x1a6   :  { %v322_v0 = vpop.xlane.xlu0 %321  ;;  %v324_v1 = vpop.xlane.xlu1 %323 }
 0x1a7   :  { %v331_v2 = vadd.f32 %v322_v0, %v307_v62  ;;  %v332_v3 = vadd.f32 %v324_v1, %v308_v63 }
 0x1a9   :  { %337 = vst.msk [vmem:[%s721_s4 + $0x10] sm:$0xff] %vm261_vm2, %v331_v2  ;;  %338 = vst.msk [vmem:[%s721_s4 + $0x18] sm:$0xff] %vm261_vm2, %v332_v3 }
 0x1aa   :  { %v289_v6 = vpop.xlane.xlu0 %288  ;;  %v291_v7 = vpop.xlane.xlu1 %290 }
 0x1ab   :  { %v296_v8 = vadd.f32 %v289_v6, %v278_v4  ;;  %v297_v9 = vadd.f32 %v291_v7, %v279_v5 }
 0x1ad   :  { %303 = vst.msk [vmem:[%s719_s3 + $0x20] sm:$0xff] %vm261_vm2, %v296_v8  ;;  %304 = vst.msk [vmem:[%s719_s3 + $0x28] sm:$0xff] %vm261_vm2, %v297_v9 }
 0x1ae   :  { %v326_v12 = vpop.xlane.xlu0 %325  ;;  %v328_v13 = vpop.xlane.xlu1 %327 }
 0x1af   :  { %v333_v14 = vadd.f32 %v326_v12, %v309_v10  ;;  %v334_v15 = vadd.f32 %v328_v13, %v310_v11 }
 0x1b1   :  { %339 = vst.msk [vmem:[%s721_s4 + $0x20] sm:$0xff] %vm261_vm2, %v333_v14  ;;  %340 = vst.msk [vmem:[%s721_s4 + $0x28] sm:$0xff] %vm261_vm2, %v334_v15 }

// kernel: generator_forward.54
= control target key start
LH: loop header
LB: loop body
LE: loop exit
PB: predicated region body
PF: predicated region fallthrough
CT: control target
= control target key end

     0   :  { %v702_v0 = vmov 0   ;;  %vm300_vm0 = vcmask 392192   ;;  %vm458_vm1 = vcmask 7168   ;;  %v703_v40 = vmov 0.0   ;;  %s1001_s1 = inlined_call_operand.vmem [shape: bf16[432,128], index: 1, kind: input, shape index: {}]   ;;  %s1002_s0 = inlined_call_operand.vmem [shape: bf16[48,432], index: 0, kind: input, shape index: {}]   ;;  %s1003_s3 = inlined_call_operand.vmem [shape: f32[48,1], index: 3, kind: output, shape index: {1}]   ;;  %s1004_s2 = inlined_call_operand.vmem [shape: bf16[48,128], index: 2, kind: output, shape index: {0}]   ;;  %s1005_s4 = inlined_call_operand.vmem [shape: f32[48,1], index: 4, kind: output, shape index: {2}]  }
   0x1   :  { %367 = vmatprep.subr.bf16.mxu1 %v702_v0  ;;  %v657_v1 = vld [vmem:[%s1001_s1 + $0x80] sm:$0xff]   ;;  %v658_v2 = vld [vmem:[%s1001_s1 + $0x88] sm:$0xff]   ;;  %v661_v5 = vld [vmem:[%s1001_s1 + $0x90] sm:$0xff]   ;;  %459 = vst.msk [vmem:[%s1003_s3] sm:$0xff] %vm458_vm1, %v703_v40 }
   0x2   :  { %368 = vmatpush1.bf16.msra.mxu1 %v657_v1  ;;  %v659_v3 = vld [vmem:[%s1001_s1 + $0x40] sm:$0xff]   ;;  %v662_v6 = vld [vmem:[%s1001_s1 + $0x48] sm:$0xff]   ;;  %v665_v8 = vld [vmem:[%s1001_s1 + $0x50] sm:$0xff]   ;;  %460 = vst.msk [vmem:[%s1003_s3 + $0x8] sm:$0xff] %vm458_vm1, %v703_v40 }
   0x3   :  { %369 = vmatprep.subr.bf16.mxu1 %v702_v0  ;;  %v660_v4 = vld [vmem:[%s1001_s1] sm:$0xff]   ;;  %621 = vmatprep.subr.bf16.mxu0 %v659_v3  ;;  %v663_v7 = vld [vmem:[%s1001_s1 + $0x8] sm:$0xff]   ;;  %v666_v9 = vld [vmem:[%s1001_s1 + $0x10] sm:$0xff]   ;;  %461 = vst.msk [vmem:[%s1003_s3 + $0x10] sm:$0xff] %vm458_vm1, %v703_v40 }
   0x4   :  { %622 = vmatpush3.bf16.msra.mxu0 %v660_v4  ;;  %v664_v10 = vld [vmem:[%s1001_s1 + $0x98] sm:$0xff]   ;;  %v667_v12 = vld [vmem:[%s1001_s1 + $0xa0] sm:$0xff]   ;;  %v670_v15 = vld [vmem:[%s1001_s1 + $0xa8] sm:$0xff]   ;;  %462 = vst.msk [vmem:[%s1003_s3 + $0x18] sm:$0xff] %vm458_vm1, %v703_v40 }
   0x5   :  { %623 = vmatprep.subr.bf16.mxu0 %v662_v6  ;;  %v668_v11 = vld [vmem:[%s1001_s1 + $0x58] sm:$0xff]   ;;  %v671_v14 = vld [vmem:[%s1001_s1 + $0x60] sm:$0xff]   ;;  %v674_v17 = vld [vmem:[%s1001_s1 + $0x68] sm:$0xff]   ;;  %463 = vst.msk [vmem:[%s1003_s3 + $0x20] sm:$0xff] %vm458_vm1, %v703_v40 }
   0x6   :  { %370 = vmatpush1.bf16.msra.mxu1 %v658_v2  ;;  %v669_v13 = vld [vmem:[%s1001_s1 + $0x18] sm:$0xff]   ;;  %v672_v16 = vld [vmem:[%s1001_s1 + $0x20] sm:$0xff]   ;;  %v673_v18 = vld [vmem:[%s1001_s1 + $0xb0] sm:$0xff]   ;;  %464 = vst.msk [vmem:[%s1003_s3 + $0x28] sm:$0xff] %vm458_vm1, %v703_v40 }
   0x7   :  { %371 = vmatprep.subr.bf16.mxu1 %v702_v0  ;;  %v675_v19 = vld [vmem:[%s1001_s1 + $0x28] sm:$0xff]   ;;  %v677_v20 = vld [vmem:[%s1001_s1 + $0x70] sm:$0xff]   ;;  %v676_v21 = vld [vmem:[%s1001_s1 + $0xb8] sm:$0xff]   ;;  %466 = vst.msk [vmem:[%s1005_s4 + $0x8] sm:$0xff] %vm458_vm1, %v703_v40 }
   0x8   :  { %624 = vmatpush3.bf16.msra.mxu0 %v663_v7  ;;  %v678_v22 = vld [vmem:[%s1001_s1 + $0x30] sm:$0xff]   ;;  %v680_v23 = vld [vmem:[%s1001_s1 + $0x78] sm:$0xff]   ;;  %v679_v27 = vld [vmem:[%s1001_s1 + $0xc0] sm:$0xff]   ;;  %465 = vst.msk [vmem:[%s1005_s4] sm:$0xff] %vm458_vm1, %v703_v40 }
   0x9   :  { %625 = vmatprep.subr.bf16.mxu0 %v665_v8  ;;  %v684_v24 = vld [vmem:[%s1002_s0 + $0x4] ss:$16 sps:$4 sm:$0xff]   ;;  %v681_v25 = vld [vmem:[%s1001_s1 + $0x38] sm:$0xff]   ;;  %v682_v28 = vld [vmem:[%s1002_s0] ss:$16 sps:$4 sm:$0xff]   ;;  %467 = vst.msk [vmem:[%s1005_s4 + $0x10] sm:$0xff] %vm458_vm1, %v703_v40 }
   0xa   :  { %372 = vmatpush1.bf16.msra.mxu1 %v661_v5  ;;  %342 = vmatprep.mubr.bf16.mxu0 %v684_v24  ;;  %v689_v26 = vld [vmem:[%s1002_s0 + $0xc] ss:$16 sps:$4 sm:$0xff]   ;;  %v690_v29 = vld [vmem:[%s1002_s0 + $0x24] ss:$16 sps:$4 sm:$0xff]   ;;  %v692_v32 = vld [vmem:[%s1002_s0 + $0x20] ss:$16 sps:$4 sm:$0xff]  }
   0xb   :  { %373 = vmatprep.subr.bf16.mxu1 %v702_v0  ;;  %589 = vmatprep.mubr.msk.bf16.mxu1 %vm300_vm0, %v689_v26  ;;  %v685_v30 = vld [vmem:[%s1001_s1 + $0xc8] sm:$0xff]   ;;  %v686_v31 = vld [vmem:[%s1001_s1 + $0xd0] sm:$0xff]   ;;  %468 = vst.msk [vmem:[%s1005_s4 + $0x18] sm:$0xff] %vm458_vm1, %v703_v40  ;;  %469 = vst.msk [vmem:[%s1005_s4 + $0x20] sm:$0xff] %vm458_vm1, %v703_v40 }
   0xc   :  { %626 = vmatpush3.bf16.msra.mxu0 %v666_v9  ;;  %v687_v33 = vld [vmem:[%s1002_s0 + $0x8] ss:$16 sps:$4 sm:$0xff]   ;;  %v696_v34 = vld [vmem:[%s1002_s0 + $0x44] ss:$16 sps:$4 sm:$0xff]   ;;  %v693_v35 = vld [vmem:[%s1002_s0 + $0x2c] ss:$16 sps:$4 sm:$0xff]  }
   0xd   :  { %627 = vmatprep.subr.bf16.mxu0 %v668_v11  ;;  %v698_v36 = vld [vmem:[%s1002_s0 + $0x40] ss:$16 sps:$4 sm:$0xff]   ;;  %v695_v37 = vld [vmem:[%s1002_s0 + $0x28] ss:$16 sps:$4 sm:$0xff]   ;;  %v699_v38 = vld [vmem:[%s1002_s0 + $0x4c] ss:$16 sps:$4 sm:$0xff]  }
   0xe   :  { %374 = vmatpush1.bf16.msra.mxu1 %v664_v10  ;;  %v701_v39 = vld [vmem:[%s1002_s0 + $0x48] ss:$16 sps:$4 sm:$0xff]   ;;  %470 = vst.msk [vmem:[%s1005_s4 + $0x28] sm:$0xff] %vm458_vm1, %v703_v40 }
   0xf   :  { %375 = vmatprep.subr.bf16.mxu1 %v702_v0  ;;  %v472_v26 = vld [vmem:[%s1003_s3 + $0x8] sm:$0xff] }
  0x10   :  { %628 = vmatpush3.bf16.msra.mxu0 %v669_v13 }
  0x11   :  { %629 = vmatprep.subr.bf16.mxu0 %v671_v14 }
  0x12   :  { %376 = vmatpush1.bf16.msra.mxu1 %v667_v12 }
  0x13   :  { %377 = vmatprep.subr.bf16.mxu1 %v702_v0 }
  0x14   :  { %630 = vmatpush3.bf16.msra.mxu0 %v672_v16 }
  0x15   :  { %631 = vmatprep.subr.bf16.mxu0 %v674_v17 }
  0x16   :  { %378 = vmatpush1.bf16.msra.mxu1 %v670_v15 }
  0x17   :  { %379 = vmatprep.subr.bf16.mxu1 %v702_v0 }
  0x18   :  { %632 = vmatpush3.bf16.msra.mxu0 %v675_v19 }
  0x19   :  { %633 = vmatprep.subr.bf16.mxu0 %v677_v20 }
  0x1a   :  { %380 = vmatpush1.bf16.msra.mxu1 %v673_v18 }
  0x1b   :  { %381 = vmatprep.subr.bf16.mxu1 %v702_v0 }
  0x1c   :  { %634 = vmatpush3.bf16.msra.mxu0 %v678_v22  ;;  %v471_v22 = vld [vmem:[%s1003_s3] sm:$0xff] }
  0x1d   :  { %635 = vmatprep.subr.bf16.mxu0 %v680_v23 }
  0x1e   :  { %382 = vmatpush1.bf16.msra.mxu1 %v676_v21 }
  0x1f   :  { %383 = vmatprep.subr.bf16.mxu1 %v702_v0 }
  0x20   :  { %636 = vmatpush3.bf16.msra.mxu0 %v681_v25  ;;  %v503_v25 = vld [vmem:[%s1005_s4 + $0x8] sm:$0xff] }
  0x22   :  { %384 = vmatpush1.bf16.msra.mxu1 %v679_v27 }
  0x23   :  { %385 = vmatprep.subr.bf16.mxu1 %v702_v0  ;;  %343 = vmatmul.mubr.bf16.vlgmr.msra.gmra.mrb[0].mxu0 %v682_v28 }
  0x24   :  { %350 = vmatprep.mubr.bf16.mxu0 %v690_v29 }
  0x26   :  { %386 = vmatpush1.bf16.msra.mxu1 %v685_v30 }
  0x27   :  { %387 = vmatprep.subr.bf16.mxu1 %v702_v0 }
  0x2a   :  { %388 = vmatpush1.bf16.msra.mxu1 %v686_v31  ;;  %v473_v31 = vld [vmem:[%s1003_s3 + $0x10] sm:$0xff] }
  0x2b   :  { %351 = vmatmul.mubr.bf16.gmra.mrb[4].mxu0 %v692_v32  ;;  %v502_v32 = vld [vmem:[%s1005_s4] sm:$0xff] }
  0x2c   :  { %358 = vmatprep.mubr.bf16.mxu0 %v696_v34 }
  0x2d   :  { %400 = vmatmul.mubr.bf16.vlgmr.msra.gmra.mrb[0].mxu1 %v687_v33 }
  0x2e   :  { %590 = vmatprep.mubr.msk.bf16.mxu1 %vm300_vm0, %v693_v35 }
  0x33   :  { %359 = vmatmul.mubr.bf16.gmra.mrb[8].mxu0 %v698_v36 }
  0x35   :  { %408 = vmatmul.mubr.bf16.gmra.mrb[4].mxu1 %v695_v37  ;;  %v474_v37 = vld [vmem:[%s1003_s3 + $0x18] sm:$0xff] }
  0x36   :  { %591 = vmatprep.mubr.msk.bf16.mxu1 %vm300_vm0, %v699_v38  ;;  %v504_v38 = vld [vmem:[%s1005_s4 + $0x10] sm:$0xff] }
  0x3d   :  { %416 = vmatmul.mubr.bf16.gmra.mrb[8].mxu1 %v701_v39 }
  0xf6   :  { %v637_v41 = vpop.f32.mrb[0].mxu0 }
  0xf7   :  { %v638_v42 = vpop.f32.mrb[1].mxu0 }
  0xf8   :  { %v639_v43 = vadd.f32 %v638_v42, %v637_v41  ;;  %v640_v44 = vpop.f32.mrb[2].mxu0 }
  0xf9   :  { %v641_v45 = vpop.f32.mrb[3].mxu0 }
  0xfa   :  { %v642_v46 = vadd.f32 %v641_v45, %v640_v44  ;;  %v475_v44 = vld [vmem:[%s1003_s3 + $0x20] sm:$0xff] }
  0xfe   :  { %v643_v47 = vpop.f32.mrb[4].mxu0 }
  0xff   :  { %v644_v49 = vpop.f32.mrb[5].mxu0 }
 0x100   :  { %v401_v48 = vpop.f32.mrb[0].mxu1  ;;  %v645_v52 = vadd.f32 %v644_v49, %v643_v47  ;;  %v646_v53 = vpop.f32.mrb[6].mxu0  ;;  %v476_v49 = vld [vmem:[%s1003_s3 + $0x28] sm:$0xff] }
 0x101   :  { %v402_v50 = vadd.f32 %v639_v43, %v401_v48  ;;  %v403_v51 = vpop.f32.mrb[1].mxu1  ;;  %v647_v55 = vpop.f32.mrb[7].mxu0  ;;  %v505_v43 = vld [vmem:[%s1005_s4 + $0x18] sm:$0xff] }
 0x102   :  { %v404_v54 = vpop.f32.mrb[2].mxu1  ;;  %v648_v58 = vadd.f32 %v647_v55, %v646_v53  ;;  %v507_v55 = vld [vmem:[%s1005_s4 + $0x28] sm:$0xff] }
 0x103   :  { %v405_v56 = vadd.f32 %v642_v46, %v404_v54  ;;  %v406_v57 = vpop.f32.mrb[3].mxu1  ;;  %477 = vadd.xlane.f32.xlu0 %v402_v50  ;;  %v508_v2 = vmul.f32 %v402_v50, %v402_v50 }
 0x105   :  { %v607_v59 = vpack.c.bf16 %v405_v56, %v402_v50  ;;  %v509_v60 = vmul.f32 %v405_v56, %v405_v56  ;;  %v506_v50 = vld [vmem:[%s1005_s4 + $0x20] sm:$0xff] }
 0x106   :  { %v649_v61 = vpop.f32.mrb[8].mxu0 }
 0x107   :  { %608 = vst [vmem:[%s1004_s2] sm:$0xff] %v607_v59   ;;  %516 = vadd.xlane.f32.xlu1 %v509_v60  ;;  %479 = vadd.xlane.f32.xlu0 %v405_v56  ;;  %v650_v63 = vpop.f32.mrb[9].mxu0 }
 0x108   :  { %v409_v62 = vpop.f32.mrb[4].mxu1  ;;  %v651_v3 = vadd.f32 %v650_v63, %v649_v61  ;;  %v652_v4 = vpop.f32.mrb[10].mxu0 }
 0x109   :  { %v410_v0 = vadd.f32 %v645_v52, %v409_v62  ;;  %v411_v1 = vpop.f32.mrb[5].mxu1  ;;  %v653_v6 = vpop.f32.mrb[11].mxu0 }
 0x10a   :  { %v412_v5 = vpop.f32.mrb[6].mxu1  ;;  %v654_v9 = vadd.f32 %v653_v6, %v652_v4 }
 0x10b   :  { %v413_v7 = vadd.f32 %v648_v58, %v412_v5  ;;  %v414_v8 = vpop.f32.mrb[7].mxu1  ;;  %481 = vadd.xlane.f32.xlu1 %v410_v0  ;;  %514 = vadd.xlane.f32.xlu0 %v508_v2  ;;  %v510_v11 = vmul.f32 %v410_v0, %v410_v0 }
 0x10d   :  { %v612_v10 = vpack.c.bf16 %v413_v7, %v410_v0  ;;  %v511_v15 = vmul.f32 %v413_v7, %v413_v7 }
 0x10f   :  { %619 = vst [vmem:[%s1004_s2 + $0x8] sm:$0xff] %v612_v10   ;;  %483 = vadd.xlane.f32.xlu1 %v413_v7  ;;  %518 = vadd.xlane.f32.xlu0 %v510_v11 }
 0x110   :  { %v417_v12 = vpop.f32.mrb[8].mxu1 }
 0x111   :  { %v418_v13 = vadd.f32 %v651_v3, %v417_v12  ;;  %v419_v14 = vpop.f32.mrb[9].mxu1 }
 0x112   :  { %v420_v16 = vpop.f32.mrb[10].mxu1 }
 0x113   :  { %v421_v17 = vadd.f32 %v654_v9, %v420_v16  ;;  %v422_v18 = vpop.f32.mrb[11].mxu1  ;;  %520 = vadd.xlane.f32.xlu1 %v511_v15  ;;  %485 = vadd.xlane.f32.xlu0 %v418_v13  ;;  %v512_v19 = vmul.f32 %v418_v13, %v418_v13 }
 0x115   :  { %v617_v20 = vpack.c.bf16 %v421_v17, %v418_v13  ;;  %v513_v21 = vmul.f32 %v421_v17, %v421_v17 }
 0x117   :  { %620 = vst [vmem:[%s1004_s2 + $0x10] sm:$0xff] %v617_v20   ;;  %487 = vadd.xlane.f32.xlu1 %v421_v17  ;;  %522 = vadd.xlane.f32.xlu0 %v512_v19 }
 0x11b   :  { %524 = vadd.xlane.f32.xlu1 %v513_v21 }
 0x190   :  { %v478_v23 = vpop.xlane.xlu0 %477 }
 0x191   :  { %v489_v24 = vadd.f32 %v478_v23, %v471_v22 }
 0x193   :  { %496 = vst.msk [vmem:[%s1003_s3] sm:$0xff] %vm458_vm1, %v489_v24 }
 0x194   :  { %v517_v27 = vpop.xlane.xlu1 %516  ;;  %v480_v28 = vpop.xlane.xlu0 %479 }
 0x195   :  { %v527_v29 = vadd.f32 %v517_v27, %v503_v25  ;;  %v490_v30 = vadd.f32 %v480_v28, %v472_v26 }
 0x197   :  { %533 = vst.msk [vmem:[%s1005_s4 + $0x8] sm:$0xff] %vm458_vm1, %v527_v29  ;;  %497 = vst.msk [vmem:[%s1003_s3 + $0x8] sm:$0xff] %vm458_vm1, %v490_v30 }
 0x198   :  { %v482_v33 = vpop.xlane.xlu1 %481  ;;  %v515_v34 = vpop.xlane.xlu0 %514 }
 0x199   :  { %v491_v35 = vadd.f32 %v482_v33, %v473_v31  ;;  %v526_v36 = vadd.f32 %v515_v34, %v502_v32 }
 0x19b   :  { %498 = vst.msk [vmem:[%s1003_s3 + $0x10] sm:$0xff] %vm458_vm1, %v491_v35  ;;  %532 = vst.msk [vmem:[%s1005_s4] sm:$0xff] %vm458_vm1, %v526_v36 }
 0x19c   :  { %v484_v39 = vpop.xlane.xlu1 %483  ;;  %v519_v40 = vpop.xlane.xlu0 %518 }
 0x19d   :  { %v492_v41 = vadd.f32 %v484_v39, %v474_v37  ;;  %v528_v42 = vadd.f32 %v519_v40, %v504_v38 }
 0x19f   :  { %499 = vst.msk [vmem:[%s1003_s3 + $0x18] sm:$0xff] %vm458_vm1, %v492_v41  ;;  %534 = vst.msk [vmem:[%s1005_s4 + $0x10] sm:$0xff] %vm458_vm1, %v528_v42 }
 0x1a0   :  { %v521_v45 = vpop.xlane.xlu1 %520  ;;  %v486_v46 = vpop.xlane.xlu0 %485 }
 0x1a1   :  { %v529_v47 = vadd.f32 %v521_v45, %v505_v43  ;;  %v493_v48 = vadd.f32 %v486_v46, %v475_v44 }
 0x1a3   :  { %535 = vst.msk [vmem:[%s1005_s4 + $0x18] sm:$0xff] %vm458_vm1, %v529_v47  ;;  %500 = vst.msk [vmem:[%s1003_s3 + $0x20] sm:$0xff] %vm458_vm1, %v493_v48 }
 0x1a4   :  { %v488_v51 = vpop.xlane.xlu1 %487  ;;  %v523_v52 = vpop.xlane.xlu0 %522 }
 0x1a5   :  { %v494_v53 = vadd.f32 %v488_v51, %v476_v49  ;;  %v530_v54 = vadd.f32 %v523_v52, %v506_v50 }
 0x1a7   :  { %501 = vst.msk [vmem:[%s1003_s3 + $0x28] sm:$0xff] %vm458_vm1, %v494_v53  ;;  %536 = vst.msk [vmem:[%s1005_s4 + $0x20] sm:$0xff] %vm458_vm1, %v530_v54 }
 0x1a8   :  { %v525_v56 = vpop.xlane.xlu1 %524 }
 0x1a9   :  { %v531_v57 = vadd.f32 %v525_v56, %v507_v55 }
 0x1ab   :  { %537 = vst.msk [vmem:[%s1005_s4 + $0x28] sm:$0xff] %vm458_vm1, %v531_v57 }

// kernel: generator_forward.57
= control target key start
LH: loop header
LB: loop body
LE: loop exit
PB: predicated region body
PF: predicated region fallthrough
CT: control target
= control target key end

     0   :  { %v225_v0 = vmov 0   ;;  %s314_s1 = inlined_call_operand.vmem [shape: f32[48,1], index: 1, kind: input, shape index: {}]   ;;  %s315_s2 = inlined_call_operand.vmem [shape: f32[48,1], index: 2, kind: input, shape index: {}]   ;;  %s316_s0 = inlined_call_operand.vmem [shape: bf16[48,128], index: 0, kind: input, shape index: {}]   ;;  %s317_s3 = inlined_call_operand.vmem [shape: bf16[48,128], index: 3, kind: input, shape index: {}]   ;;  %s318_s4 = inlined_call_operand.vmem [shape: bf16[48,128], index: 4, kind: output, shape index: {}]  }
   0x1   :  { %224 = vset.pattern.permute.xlu1 %v225_v0  ;;  %223 = vset.pattern.permute.xlu0 %v225_v0  ;;  %v31_v1 = vld [vmem:[%s314_s1 + $0x10] sm:$0xff]  ;;  %v29_v2 = vld [vmem:[%s314_s1] sm:$0xff]  ;;  %v32_v3 = vld [vmem:[%s314_s1 + $0x18] sm:$0xff] }
   0x2   :  { %47 = vperm.xlu1 %224, %v31_v1   ;;  %37 = vperm.xlu0 %223, %v29_v2   ;;  %v30_v4 = vld [vmem:[%s314_s1 + $0x8] sm:$0xff]  ;;  %v33_v6 = vld [vmem:[%s314_s1 + $0x20] sm:$0xff]  ;;  %v74_v9 = vld [vmem:[%s315_s2 + $0x18] sm:$0xff] }
   0x3   :  { %v34_v5 = vld [vmem:[%s314_s1 + $0x28] sm:$0xff]  ;;  %v71_v8 = vld [vmem:[%s315_s2] sm:$0xff]  ;;  %v73_v10 = vld [vmem:[%s315_s2 + $0x10] sm:$0xff] }
   0x4   :  { %v72_v7 = vld [vmem:[%s315_s2 + $0x8] sm:$0xff]  ;;  %v75_v12 = vld [vmem:[%s315_s2 + $0x20] sm:$0xff]  ;;  %v217_v28 = vld [vmem:[%s316_s0 + $0x10] sm:$0xff]  }
   0x5   :  { %v76_v11 = vld [vmem:[%s315_s2 + $0x28] sm:$0xff]  ;;  %v178_v15 = vld [vmem:[%s316_s0] sm:$0xff]   ;;  %v188_v36 = vunpack.c.h.bf16 %v217_v28  ;;  %v187_v37 = vunpack.c.l.bf16 %v217_v28  ;;  %v219_v44 = vld [vmem:[%s317_s3 + $0x10] sm:$0xff]  }
   0x6   :  { %52 = vperm.xlu1 %224, %v32_v3   ;;  %42 = vperm.xlu0 %223, %v30_v4   ;;  %v216_v18 = vld [vmem:[%s316_s0 + $0x8] sm:$0xff]   ;;  %v179_v19 = vunpack.c.l.bf16 %v178_v15  ;;  %v180_v20 = vunpack.c.h.bf16 %v178_v15  ;;  %v190_v23 = vld [vmem:[%s317_s3] sm:$0xff]   ;;  %v200_v50 = vunpack.c.h.bf16 %v219_v44  ;;  %v199_v51 = vunpack.c.l.bf16 %v219_v44 }
   0x7   :  { %v183_v24 = vunpack.c.l.bf16 %v216_v18  ;;  %v184_v25 = vunpack.c.h.bf16 %v216_v18  ;;  %v192_v29 = vunpack.c.h.bf16 %v190_v23  ;;  %v191_v30 = vunpack.c.l.bf16 %v190_v23  ;;  %v218_v31 = vld [vmem:[%s317_s3 + $0x8] sm:$0xff]  }
   0x8   :  { %v196_v38 = vunpack.c.h.bf16 %v218_v31  ;;  %v195_v39 = vunpack.c.l.bf16 %v218_v31 }
   0xa   :  { %62 = vperm.xlu1 %224, %v34_v5   ;;  %57 = vperm.xlu0 %223, %v33_v6  }
   0xe   :  { %84 = vperm.xlu1 %224, %v72_v7   ;;  %79 = vperm.xlu0 %223, %v71_v8  }
  0x12   :  { %94 = vperm.xlu1 %224, %v74_v9   ;;  %89 = vperm.xlu0 %223, %v73_v10  }
  0x16   :  { %104 = vperm.xlu1 %224, %v76_v11   ;;  %99 = vperm.xlu0 %223, %v75_v12  }
  0x81   :  { %v48_v13 = vpop.permute.xlu1 %47  ;;  %v38_v14 = vpop.permute.xlu0 %37 }
  0x82   :  { %v65_v26 = vmul.f32 %v179_v19, %v38_v14  ;;  %v67_v40 = vmul.f32 %v183_v24, %v48_v13 }
  0x85   :  { %v53_v16 = vpop.permute.xlu1 %52  ;;  %v43_v17 = vpop.permute.xlu0 %42 }
  0x86   :  { %v66_v27 = vmul.f32 %v180_v20, %v43_v17  ;;  %v68_v41 = vmul.f32 %v184_v25, %v53_v16 }
  0x89   :  { %v63_v21 = vpop.permute.xlu1 %62  ;;  %v58_v22 = vpop.permute.xlu0 %57 }
  0x8a   :  { %v70_v52 = vmul.f32 %v188_v36, %v63_v21  ;;  %v69_v53 = vmul.f32 %v187_v37, %v58_v22 }
  0x8d   :  { %v85_v32 = vpop.permute.xlu1 %84  ;;  %v80_v33 = vpop.permute.xlu0 %79 }
  0x8e   :  { %v108_v34 = vadd.f32 %v85_v32, %v66_v27  ;;  %v107_v35 = vadd.f32 %v80_v33, %v65_v26 }
  0x90   :  { %v126_v42 = vadd.f32 %v192_v29, %v108_v34  ;;  %v125_v43 = vadd.f32 %v191_v30, %v107_v35 }
  0x91   :  { %v95_v45 = vpop.permute.xlu1 %94  ;;  %v90_v46 = vpop.permute.xlu0 %89 }
  0x92   :  { %v204_v47 = vpack.c.bf16 %v126_v42, %v125_v43  ;;  %v110_v48 = vadd.f32 %v95_v45, %v68_v41  ;;  %v109_v49 = vadd.f32 %v90_v46, %v67_v40 }
  0x94   :  { %205 = vst [vmem:[%s318_s4] sm:$0xff] %v204_v47   ;;  %v128_v54 = vadd.f32 %v196_v38, %v110_v48  ;;  %v127_v55 = vadd.f32 %v195_v39, %v109_v49 }
  0x95   :  { %v105_v56 = vpop.permute.xlu1 %104  ;;  %v100_v57 = vpop.permute.xlu0 %99 }
  0x96   :  { %v209_v58 = vpack.c.bf16 %v128_v54, %v127_v55  ;;  %v112_v59 = vadd.f32 %v105_v56, %v70_v52  ;;  %v111_v60 = vadd.f32 %v100_v57, %v69_v53 }
  0x98   :  { %220 = vst [vmem:[%s318_s4 + $0x8] sm:$0xff] %v209_v58   ;;  %v130_v61 = vadd.f32 %v200_v50, %v112_v59  ;;  %v129_v62 = vadd.f32 %v199_v51, %v111_v60 }
  0x9a   :  { %v214_v63 = vpack.c.bf16 %v130_v61, %v129_v62 }
  0x9c   :  { %221 = vst [vmem:[%s318_s4 + $0x10] sm:$0xff] %v214_v63  }

// kernel: generator_forward.59
= control target key start
LH: loop header
LB: loop body
LE: loop exit
PB: predicated region body
PF: predicated region fallthrough
CT: control target
= control target key end

     0   :  { %v373_v0 = vmov 0   ;;  %s502_s1 = inlined_call_operand.vmem [shape: f32[96,1], index: 1, kind: input, shape index: {}]   ;;  %s503_s2 = inlined_call_operand.vmem [shape: f32[96,1], index: 2, kind: input, shape index: {}]   ;;  %s504_s0 = inlined_call_operand.vmem [shape: bf16[96,128], index: 0, kind: input, shape index: {}]   ;;  %s505_s3 = inlined_call_operand.vmem [shape: bf16[96,128], index: 3, kind: output, shape index: {}]  }
   0x1   :  { %372 = vset.pattern.permute.xlu1 %v373_v0  ;;  %371 = vset.pattern.permute.xlu0 %v373_v0  ;;  %v40_v1 = vld [vmem:[%s502_s1 + $0x10] sm:$0xff]  ;;  %v38_v2 = vld [vmem:[%s502_s1] sm:$0xff]  ;;  %v41_v3 = vld [vmem:[%s502_s1 + $0x18] sm:$0xff] }
   0x2   :  { %62 = vperm.xlu1 %372, %v40_v1   ;;  %52 = vperm.xlu0 %371, %v38_v2   ;;  %v39_v4 = vld [vmem:[%s502_s1 + $0x8] sm:$0xff]  ;;  %v42_v6 = vld [vmem:[%s502_s1 + $0x20] sm:$0xff]  ;;  %v45_v7 = vld [vmem:[%s502_s1 + $0x38] sm:$0xff] }
   0x3   :  { %v43_v5 = vld [vmem:[%s502_s1 + $0x28] sm:$0xff]  ;;  %v44_v8 = vld [vmem:[%s502_s1 + $0x30] sm:$0xff]  ;;  %v46_v10 = vld [vmem:[%s502_s1 + $0x40] sm:$0xff] }
   0x4   :  { %v47_v9 = vld [vmem:[%s502_s1 + $0x48] sm:$0xff]  ;;  %v49_v11 = vld [vmem:[%s502_s1 + $0x58] sm:$0xff]  ;;  %v48_v12 = vld [vmem:[%s502_s1 + $0x50] sm:$0xff] }
   0x5   :  { %v123_v13 = vld [vmem:[%s503_s2 + $0x8] sm:$0xff]  ;;  %v122_v14 = vld [vmem:[%s503_s2] sm:$0xff]  ;;  %v125_v15 = vld [vmem:[%s503_s2 + $0x18] sm:$0xff] }
   0x6   :  { %67 = vperm.xlu1 %372, %v41_v3   ;;  %57 = vperm.xlu0 %371, %v39_v4   ;;  %v124_v16 = vld [vmem:[%s503_s2 + $0x10] sm:$0xff]  ;;  %v127_v17 = vld [vmem:[%s503_s2 + $0x28] sm:$0xff]  ;;  %v126_v18 = vld [vmem:[%s503_s2 + $0x20] sm:$0xff] }
   0x7   :  { %v129_v19 = vld [vmem:[%s503_s2 + $0x38] sm:$0xff]  ;;  %v128_v20 = vld [vmem:[%s503_s2 + $0x30] sm:$0xff]  ;;  %v131_v21 = vld [vmem:[%s503_s2 + $0x48] sm:$0xff] }
   0x8   :  { %v130_v22 = vld [vmem:[%s503_s2 + $0x40] sm:$0xff]  ;;  %v133_v23 = vld [vmem:[%s503_s2 + $0x58] sm:$0xff]  ;;  %v132_v24 = vld [vmem:[%s503_s2 + $0x50] sm:$0xff] }
   0x9   :  { %v307_v33 = vld [vmem:[%s504_s0] sm:$0xff]   ;;  %v360_v38 = vld [vmem:[%s504_s0 + $0x8] sm:$0xff]   ;;  %v361_v45 = vld [vmem:[%s504_s0 + $0x10] sm:$0xff]  }
   0xa   :  { %77 = vperm.xlu1 %372, %v43_v5   ;;  %72 = vperm.xlu0 %371, %v42_v6   ;;  %v308_v36 = vunpack.c.l.bf16 %v307_v33  ;;  %v309_v37 = vunpack.c.h.bf16 %v307_v33  ;;  %v312_v41 = vunpack.c.l.bf16 %v360_v38  ;;  %v313_v43 = vunpack.c.h.bf16 %v360_v38  ;;  %v362_v54 = vld [vmem:[%s504_s0 + $0x18] sm:$0xff]   ;;  %v363_v2 = vld [vmem:[%s504_s0 + $0x20] sm:$0xff]  }
   0xb   :  { %v317_v50 = vunpack.c.h.bf16 %v361_v45  ;;  %v316_v51 = vunpack.c.l.bf16 %v361_v45  ;;  %v321_v62 = vunpack.c.h.bf16 %v362_v54  ;;  %v320_v63 = vunpack.c.l.bf16 %v362_v54 }
   0xe   :  { %87 = vperm.xlu1 %372, %v45_v7   ;;  %82 = vperm.xlu0 %371, %v44_v8  }
  0x12   :  { %97 = vperm.xlu1 %372, %v47_v9   ;;  %92 = vperm.xlu0 %371, %v46_v10   ;;  %v325_v10 = vunpack.c.h.bf16 %v363_v2 }
  0x16   :  { %107 = vperm.xlu1 %372, %v49_v11   ;;  %102 = vperm.xlu0 %371, %v48_v12   ;;  %v324_v11 = vunpack.c.l.bf16 %v363_v2 }
  0x1a   :  { %141 = vperm.xlu1 %372, %v123_v13   ;;  %136 = vperm.xlu0 %371, %v122_v14   ;;  %v364_v14 = vld [vmem:[%s504_s0 + $0x28] sm:$0xff]  }
  0x1e   :  { %151 = vperm.xlu1 %372, %v125_v15   ;;  %146 = vperm.xlu0 %371, %v124_v16  }
  0x22   :  { %161 = vperm.xlu1 %372, %v127_v17   ;;  %156 = vperm.xlu0 %371, %v126_v18  }
  0x26   :  { %171 = vperm.xlu1 %372, %v129_v19   ;;  %166 = vperm.xlu0 %371, %v128_v20  }
  0x2a   :  { %181 = vperm.xlu1 %372, %v131_v21   ;;  %176 = vperm.xlu0 %371, %v130_v22   ;;  %v329_v22 = vunpack.c.h.bf16 %v364_v14 }
  0x2e   :  { %191 = vperm.xlu1 %372, %v133_v23   ;;  %186 = vperm.xlu0 %371, %v132_v24   ;;  %v328_v23 = vunpack.c.l.bf16 %v364_v14 }
  0x81   :  { %v63_v25 = vpop.permute.xlu1 %62  ;;  %v53_v26 = vpop.permute.xlu0 %52 }
  0x82   :  { %v110_v42 = vmul.f32 %v308_v36, %v53_v26  ;;  %v112_v52 = vmul.f32 %v312_v41, %v63_v25 }
  0x85   :  { %v68_v27 = vpop.permute.xlu1 %67  ;;  %v58_v28 = vpop.permute.xlu0 %57 }
  0x86   :  { %v111_v44 = vmul.f32 %v309_v37, %v58_v28  ;;  %v113_v53 = vmul.f32 %v313_v43, %v68_v27 }
  0x89   :  { %v78_v29 = vpop.permute.xlu1 %77  ;;  %v73_v30 = vpop.permute.xlu0 %72 }
  0x8a   :  { %v115_v0 = vmul.f32 %v317_v50, %v78_v29  ;;  %v114_v1 = vmul.f32 %v316_v51, %v73_v30 }
  0x8d   :  { %v88_v31 = vpop.permute.xlu1 %87  ;;  %v83_v32 = vpop.permute.xlu0 %82 }
  0x8e   :  { %v117_v12 = vmul.f32 %v321_v62, %v88_v31  ;;  %v116_v13 = vmul.f32 %v320_v63, %v83_v32 }
  0x91   :  { %v98_v34 = vpop.permute.xlu1 %97  ;;  %v93_v35 = vpop.permute.xlu0 %92 }
  0x92   :  { %v119_v24 = vmul.f32 %v325_v10, %v98_v34  ;;  %v118_v25 = vmul.f32 %v324_v11, %v93_v35 }
  0x95   :  { %v108_v39 = vpop.permute.xlu1 %107  ;;  %v103_v40 = vpop.permute.xlu0 %102 }
  0x96   :  { %v121_v33 = vmul.f32 %v329_v22, %v108_v39  ;;  %v120_v36 = vmul.f32 %v328_v23, %v103_v40 }
  0x99   :  { %v142_v46 = vpop.permute.xlu1 %141  ;;  %v137_v47 = vpop.permute.xlu0 %136 }
  0x9a   :  { %v195_v48 = vadd.f32 %v142_v46, %v111_v44  ;;  %v194_v49 = vadd.f32 %v137_v47, %v110_v42 }
  0x9c   :  { %v207_v55 = vmax.f32 %v195_v48, 0.0  ;;  %v206_v56 = vmax.f32 %v194_v49, 0.0 }
  0x9d   :  { %v152_v57 = vpop.permute.xlu1 %151  ;;  %v147_v58 = vpop.permute.xlu0 %146 }
  0x9e   :  { %v333_v59 = vpack.c.bf16 %v207_v55, %v206_v56  ;;  %v197_v60 = vadd.f32 %v152_v57, %v113_v53  ;;  %v196_v61 = vadd.f32 %v147_v58, %v112_v52 }
  0xa0   :  { %334 = vst [vmem:[%s505_s3] sm:$0xff] %v333_v59   ;;  %v209_v3 = vmax.f32 %v197_v60, 0.0  ;;  %v208_v4 = vmax.f32 %v196_v61, 0.0 }
  0xa1   :  { %v162_v5 = vpop.permute.xlu1 %161  ;;  %v157_v6 = vpop.permute.xlu0 %156 }
  0xa2   :  { %v338_v7 = vpack.c.bf16 %v209_v3, %v208_v4  ;;  %v199_v8 = vadd.f32 %v162_v5, %v115_v0  ;;  %v198_v9 = vadd.f32 %v157_v6, %v114_v1 }
  0xa4   :  { %365 = vst [vmem:[%s505_s3 + $0x8] sm:$0xff] %v338_v7   ;;  %v211_v15 = vmax.f32 %v199_v8, 0.0  ;;  %v210_v16 = vmax.f32 %v198_v9, 0.0 }
  0xa5   :  { %v172_v17 = vpop.permute.xlu1 %171  ;;  %v167_v18 = vpop.permute.xlu0 %166 }
  0xa6   :  { %v343_v19 = vpack.c.bf16 %v211_v15, %v210_v16  ;;  %v201_v20 = vadd.f32 %v172_v17, %v117_v12  ;;  %v200_v21 = vadd.f32 %v167_v18, %v116_v13 }
  0xa8   :  { %366 = vst [vmem:[%s505_s3 + $0x10] sm:$0xff] %v343_v19   ;;  %v213_v26 = vmax.f32 %v201_v20, 0.0  ;;  %v212_v27 = vmax.f32 %v200_v21, 0.0 }
  0xa9   :  { %v182_v28 = vpop.permute.xlu1 %181  ;;  %v177_v29 = vpop.permute.xlu0 %176 }
  0xaa   :  { %v348_v30 = vpack.c.bf16 %v213_v26, %v212_v27  ;;  %v203_v31 = vadd.f32 %v182_v28, %v119_v24  ;;  %v202_v32 = vadd.f32 %v177_v29, %v118_v25 }
  0xac   :  { %367 = vst [vmem:[%s505_s3 + $0x18] sm:$0xff] %v348_v30   ;;  %v215_v37 = vmax.f32 %v203_v31, 0.0  ;;  %v214_v34 = vmax.f32 %v202_v32, 0.0 }
  0xad   :  { %v192_v35 = vpop.permute.xlu1 %191  ;;  %v187_v38 = vpop.permute.xlu0 %186 }
  0xae   :  { %v353_v41 = vpack.c.bf16 %v215_v37, %v214_v34  ;;  %v205_v42 = vadd.f32 %v192_v35, %v121_v33  ;;  %v204_v43 = vadd.f32 %v187_v38, %v120_v36 }
  0xb0   :  { %368 = vst [vmem:[%s505_s3 + $0x20] sm:$0xff] %v353_v41   ;;  %v217_v44 = vmax.f32 %v205_v42, 0.0  ;;  %v216_v45 = vmax.f32 %v204_v43, 0.0 }
  0xb2   :  { %v358_v46 = vpack.c.bf16 %v217_v44, %v216_v45 }
  0xb4   :  { %369 = vst [vmem:[%s505_s3 + $0x28] sm:$0xff] %v358_v46  }

// kernel: generator_forward.58
= control target key start
LH: loop header
LB: loop body
LE: loop exit
PB: predicated region body
PF: predicated region fallthrough
CT: control target
= control target key end

     0   :  { %v1017_v0 = vmov 0   ;;  %vm369_vm0 = vcmask 392192   ;;  %vm614_vm1 = vcmask 7168   ;;  %v1018_v52 = vmov 0.0   ;;  %s1520_s1 = inlined_call_operand.vmem [shape: bf16[432,128], index: 1, kind: input, shape index: {}]   ;;  %s1521_s0 = inlined_call_operand.vmem [shape: bf16[96,432], index: 0, kind: input, shape index: {}]   ;;  %s1522_s3 = inlined_call_operand.vmem [shape: f32[96,1], index: 3, kind: output, shape index: {1}]   ;;  %s1523_s2 = inlined_call_operand.vmem [shape: bf16[96,128], index: 2, kind: output, shape index: {0}]   ;;  %s1524_s4 = inlined_call_operand.vmem [shape: f32[96,1], index: 4, kind: output, shape index: {2}]  }
   0x1   :  { %469 = vmatprep.subr.bf16.mxu1 %v1017_v0  ;;  %v954_v1 = vld [vmem:[%s1520_s1 + $0x80] sm:$0xff]   ;;  %v955_v2 = vld [vmem:[%s1520_s1 + $0x88] sm:$0xff]   ;;  %v958_v5 = vld [vmem:[%s1520_s1 + $0x90] sm:$0xff]   ;;  %615 = vst.msk [vmem:[%s1522_s3] sm:$0xff] %vm614_vm1, %v1018_v52 }
   0x2   :  { %470 = vmatpush1.bf16.msra.mxu1 %v954_v1  ;;  %v956_v3 = vld [vmem:[%s1520_s1 + $0x40] sm:$0xff]   ;;  %v959_v6 = vld [vmem:[%s1520_s1 + $0x48] sm:$0xff]   ;;  %v962_v8 = vld [vmem:[%s1520_s1 + $0x50] sm:$0xff]   ;;  %616 = vst.msk [vmem:[%s1522_s3 + $0x8] sm:$0xff] %vm614_vm1, %v1018_v52 }
   0x3   :  { %471 = vmatprep.subr.bf16.mxu1 %v1017_v0  ;;  %v957_v4 = vld [vmem:[%s1520_s1] sm:$0xff]   ;;  %900 = vmatprep.subr.bf16.mxu0 %v956_v3  ;;  %v960_v7 = vld [vmem:[%s1520_s1 + $0x8] sm:$0xff]   ;;  %v963_v9 = vld [vmem:[%s1520_s1 + $0x10] sm:$0xff]   ;;  %617 = vst.msk [vmem:[%s1522_s3 + $0x10] sm:$0xff] %vm614_vm1, %v1018_v52 }
   0x4   :  { %901 = vmatpush3.bf16.msra.mxu0 %v957_v4  ;;  %v961_v10 = vld [vmem:[%s1520_s1 + $0x98] sm:$0xff]   ;;  %v964_v12 = vld [vmem:[%s1520_s1 + $0xa0] sm:$0xff]   ;;  %v967_v15 = vld [vmem:[%s1520_s1 + $0xa8] sm:$0xff]   ;;  %618 = vst.msk [vmem:[%s1522_s3 + $0x18] sm:$0xff] %vm614_vm1, %v1018_v52 }
   0x5   :  { %902 = vmatprep.subr.bf16.mxu0 %v959_v6  ;;  %v965_v11 = vld [vmem:[%s1520_s1 + $0x58] sm:$0xff]   ;;  %v968_v14 = vld [vmem:[%s1520_s1 + $0x60] sm:$0xff]   ;;  %v971_v17 = vld [vmem:[%s1520_s1 + $0x68] sm:$0xff]   ;;  %619 = vst.msk [vmem:[%s1522_s3 + $0x20] sm:$0xff] %vm614_vm1, %v1018_v52 }
   0x6   :  { %472 = vmatpush1.bf16.msra.mxu1 %v955_v2  ;;  %v966_v13 = vld [vmem:[%s1520_s1 + $0x18] sm:$0xff]   ;;  %v969_v16 = vld [vmem:[%s1520_s1 + $0x20] sm:$0xff]   ;;  %v970_v18 = vld [vmem:[%s1520_s1 + $0xb0] sm:$0xff]   ;;  %620 = vst.msk [vmem:[%s1522_s3 + $0x28] sm:$0xff] %vm614_vm1, %v1018_v52 }
   0x7   :  { %473 = vmatprep.subr.bf16.mxu1 %v1017_v0  ;;  %v972_v19 = vld [vmem:[%s1520_s1 + $0x28] sm:$0xff]   ;;  %v974_v20 = vld [vmem:[%s1520_s1 + $0x70] sm:$0xff]   ;;  %v973_v21 = vld [vmem:[%s1520_s1 + $0xb8] sm:$0xff]   ;;  %621 = vst.msk [vmem:[%s1522_s3 + $0x30] sm:$0xff] %vm614_vm1, %v1018_v52 }
   0x8   :  { %903 = vmatpush3.bf16.msra.mxu0 %v960_v7  ;;  %v975_v22 = vld [vmem:[%s1520_s1 + $0x30] sm:$0xff]   ;;  %v977_v23 = vld [vmem:[%s1520_s1 + $0x78] sm:$0xff]   ;;  %v976_v27 = vld [vmem:[%s1520_s1 + $0xc0] sm:$0xff]   ;;  %622 = vst.msk [vmem:[%s1522_s3 + $0x38] sm:$0xff] %vm614_vm1, %v1018_v52 }
   0x9   :  { %904 = vmatprep.subr.bf16.mxu0 %v962_v8  ;;  %v981_v24 = vld [vmem:[%s1521_s0 + $0x4] ss:$16 sps:$4 sm:$0xff]   ;;  %v978_v25 = vld [vmem:[%s1520_s1 + $0x38] sm:$0xff]   ;;  %v979_v28 = vld [vmem:[%s1521_s0] ss:$16 sps:$4 sm:$0xff]   ;;  %623 = vst.msk [vmem:[%s1522_s3 + $0x40] sm:$0xff] %vm614_vm1, %v1018_v52 }
   0xa   :  { %474 = vmatpush1.bf16.msra.mxu1 %v958_v5  ;;  %420 = vmatprep.mubr.bf16.mxu0 %v981_v24  ;;  %v986_v26 = vld [vmem:[%s1521_s0 + $0xc] ss:$16 sps:$4 sm:$0xff]   ;;  %v987_v29 = vld [vmem:[%s1521_s0 + $0x24] ss:$16 sps:$4 sm:$0xff]   ;;  %v989_v32 = vld [vmem:[%s1521_s0 + $0x20] ss:$16 sps:$4 sm:$0xff]  }
   0xb   :  { %475 = vmatprep.subr.bf16.mxu1 %v1017_v0  ;;  %835 = vmatprep.mubr.msk.bf16.mxu1 %vm369_vm0, %v986_v26  ;;  %v982_v30 = vld [vmem:[%s1520_s1 + $0xc8] sm:$0xff]   ;;  %v983_v31 = vld [vmem:[%s1520_s1 + $0xd0] sm:$0xff]   ;;  %624 = vst.msk [vmem:[%s1522_s3 + $0x48] sm:$0xff] %vm614_vm1, %v1018_v52  ;;  %625 = vst.msk [vmem:[%s1522_s3 + $0x50] sm:$0xff] %vm614_vm1, %v1018_v52 }
   0xc   :  { %905 = vmatpush3.bf16.msra.mxu0 %v963_v9  ;;  %v984_v33 = vld [vmem:[%s1521_s0 + $0x8] ss:$16 sps:$4 sm:$0xff]   ;;  %v993_v34 = vld [vmem:[%s1521_s0 + $0x44] ss:$16 sps:$4 sm:$0xff]   ;;  %v990_v35 = vld [vmem:[%s1521_s0 + $0x2c] ss:$16 sps:$4 sm:$0xff]  }
   0xd   :  { %906 = vmatprep.subr.bf16.mxu0 %v965_v11  ;;  %v995_v36 = vld [vmem:[%s1521_s0 + $0x40] ss:$16 sps:$4 sm:$0xff]   ;;  %v992_v37 = vld [vmem:[%s1521_s0 + $0x28] ss:$16 sps:$4 sm:$0xff]   ;;  %v999_v38 = vld [vmem:[%s1521_s0 + $0x64] ss:$16 sps:$4 sm:$0xff]  }
   0xe   :  { %476 = vmatpush1.bf16.msra.mxu1 %v961_v10  ;;  %v996_v39 = vld [vmem:[%s1521_s0 + $0x4c] ss:$16 sps:$4 sm:$0xff]   ;;  %v1001_v40 = vld [vmem:[%s1521_s0 + $0x60] ss:$16 sps:$4 sm:$0xff]   ;;  %v998_v41 = vld [vmem:[%s1521_s0 + $0x48] ss:$16 sps:$4 sm:$0xff]  }
   0xf   :  { %477 = vmatprep.subr.bf16.mxu1 %v1017_v0  ;;  %v1005_v42 = vld [vmem:[%s1521_s0 + $0x84] ss:$16 sps:$4 sm:$0xff]   ;;  %v1002_v43 = vld [vmem:[%s1521_s0 + $0x6c] ss:$16 sps:$4 sm:$0xff]   ;;  %v1007_v44 = vld [vmem:[%s1521_s0 + $0x80] ss:$16 sps:$4 sm:$0xff]  }
  0x10   :  { %907 = vmatpush3.bf16.msra.mxu0 %v966_v13  ;;  %v1004_v45 = vld [vmem:[%s1521_s0 + $0x68] ss:$16 sps:$4 sm:$0xff]   ;;  %v1011_v46 = vld [vmem:[%s1521_s0 + $0xa4] ss:$16 sps:$4 sm:$0xff]   ;;  %v1008_v47 = vld [vmem:[%s1521_s0 + $0x8c] ss:$16 sps:$4 sm:$0xff]  }
  0x11   :  { %908 = vmatprep.subr.bf16.mxu0 %v968_v14  ;;  %v1013_v48 = vld [vmem:[%s1521_s0 + $0xa0] ss:$16 sps:$4 sm:$0xff]   ;;  %v1010_v49 = vld [vmem:[%s1521_s0 + $0x88] ss:$16 sps:$4 sm:$0xff]   ;;  %v1014_v50 = vld [vmem:[%s1521_s0 + $0xac] ss:$16 sps:$4 sm:$0xff]  }
  0x12   :  { %478 = vmatpush1.bf16.msra.mxu1 %v964_v12  ;;  %v1016_v51 = vld [vmem:[%s1521_s0 + $0xa8] ss:$16 sps:$4 sm:$0xff]   ;;  %626 = vst.msk [vmem:[%s1522_s3 + $0x58] sm:$0xff] %vm614_vm1, %v1018_v52  ;;  %628 = vst.msk [vmem:[%s1524_s4 + $0x8] sm:$0xff] %vm614_vm1, %v1018_v52 }
  0x13   :  { %479 = vmatprep.subr.bf16.mxu1 %v1017_v0  ;;  %627 = vst.msk [vmem:[%s1524_s4] sm:$0xff] %vm614_vm1, %v1018_v52  ;;  %629 = vst.msk [vmem:[%s1524_s4 + $0x10] sm:$0xff] %vm614_vm1, %v1018_v52 }
  0x14   :  { %909 = vmatpush3.bf16.msra.mxu0 %v969_v16  ;;  %630 = vst.msk [vmem:[%s1524_s4 + $0x18] sm:$0xff] %vm614_vm1, %v1018_v52  ;;  %631 = vst.msk [vmem:[%s1524_s4 + $0x20] sm:$0xff] %vm614_vm1, %v1018_v52 }
  0x15   :  { %910 = vmatprep.subr.bf16.mxu0 %v971_v17  ;;  %632 = vst.msk [vmem:[%s1524_s4 + $0x28] sm:$0xff] %vm614_vm1, %v1018_v52  ;;  %633 = vst.msk [vmem:[%s1524_s4 + $0x30] sm:$0xff] %vm614_vm1, %v1018_v52 }
  0x16   :  { %480 = vmatpush1.bf16.msra.mxu1 %v967_v15  ;;  %634 = vst.msk [vmem:[%s1524_s4 + $0x38] sm:$0xff] %vm614_vm1, %v1018_v52  ;;  %635 = vst.msk [vmem:[%s1524_s4 + $0x40] sm:$0xff] %vm614_vm1, %v1018_v52 }
  0x17   :  { %481 = vmatprep.subr.bf16.mxu1 %v1017_v0  ;;  %636 = vst.msk [vmem:[%s1524_s4 + $0x48] sm:$0xff] %vm614_vm1, %v1018_v52  ;;  %637 = vst.msk [vmem:[%s1524_s4 + $0x50] sm:$0xff] %vm614_vm1, %v1018_v52 }
  0x18   :  { %911 = vmatpush3.bf16.msra.mxu0 %v972_v19  ;;  %638 = vst.msk [vmem:[%s1524_s4 + $0x58] sm:$0xff] %vm614_vm1, %v1018_v52 }
  0x19   :  { %912 = vmatprep.subr.bf16.mxu0 %v974_v20 }
  0x1a   :  { %482 = vmatpush1.bf16.msra.mxu1 %v970_v18 }
  0x1b   :  { %483 = vmatprep.subr.bf16.mxu1 %v1017_v0 }
  0x1c   :  { %913 = vmatpush3.bf16.msra.mxu0 %v975_v22 }
  0x1d   :  { %914 = vmatprep.subr.bf16.mxu0 %v977_v23 }
  0x1e   :  { %484 = vmatpush1.bf16.msra.mxu1 %v973_v21 }
  0x1f   :  { %485 = vmatprep.subr.bf16.mxu1 %v1017_v0 }
  0x20   :  { %915 = vmatpush3.bf16.msra.mxu0 %v978_v25 }
  0x22   :  { %486 = vmatpush1.bf16.msra.mxu1 %v976_v27 }
  0x23   :  { %487 = vmatprep.subr.bf16.mxu1 %v1017_v0  ;;  %421 = vmatmul.mubr.bf16.vlgmr.msra.gmra.mrb[0].mxu0 %v979_v28 }
  0x24   :  { %428 = vmatprep.mubr.bf16.mxu0 %v987_v29 }
  0x26   :  { %488 = vmatpush1.bf16.msra.mxu1 %v982_v30 }
  0x27   :  { %489 = vmatprep.subr.bf16.mxu1 %v1017_v0 }
  0x2a   :  { %490 = vmatpush1.bf16.msra.mxu1 %v983_v31 }
  0x2b   :  { %429 = vmatmul.mubr.bf16.gmra.mrb[4].mxu0 %v989_v32 }
  0x2c   :  { %436 = vmatprep.mubr.bf16.mxu0 %v993_v34 }
  0x2d   :  { %502 = vmatmul.mubr.bf16.vlgmr.msra.gmra.mrb[0].mxu1 %v984_v33 }
  0x2e   :  { %836 = vmatprep.mubr.msk.bf16.mxu1 %vm369_vm0, %v990_v35 }
  0x33   :  { %437 = vmatmul.mubr.bf16.gmra.mrb[8].mxu0 %v995_v36 }
  0x34   :  { %444 = vmatprep.mubr.bf16.mxu0 %v999_v38 }
  0x35   :  { %510 = vmatmul.mubr.bf16.gmra.mrb[4].mxu1 %v992_v37 }
  0x36   :  { %837 = vmatprep.mubr.msk.bf16.mxu1 %vm369_vm0, %v996_v39 }
  0x3b   :  { %445 = vmatmul.mubr.bf16.gmra.mrb[12].mxu0 %v1001_v40 }
  0x3c   :  { %452 = vmatprep.mubr.bf16.mxu0 %v1005_v42 }
  0x3d   :  { %518 = vmatmul.mubr.bf16.gmra.mrb[8].mxu1 %v998_v41 }
  0x3e   :  { %838 = vmatprep.mubr.msk.bf16.mxu1 %vm369_vm0, %v1002_v43 }
  0x43   :  { %453 = vmatmul.mubr.bf16.gmra.mrb[16].mxu0 %v1007_v44 }
  0x44   :  { %460 = vmatprep.mubr.bf16.mxu0 %v1011_v46 }
  0x45   :  { %526 = vmatmul.mubr.bf16.gmra.mrb[12].mxu1 %v1004_v45 }
  0x46   :  { %839 = vmatprep.mubr.msk.bf16.mxu1 %vm369_vm0, %v1008_v47 }
  0x4b   :  { %461 = vmatmul.mubr.bf16.gmra.mrb[20].mxu0 %v1013_v48 }
  0x4d   :  { %534 = vmatmul.mubr.bf16.gmra.mrb[16].mxu1 %v1010_v49 }
  0x4e   :  { %840 = vmatprep.mubr.msk.bf16.mxu1 %vm369_vm0, %v1014_v50 }
  0x55   :  { %542 = vmatmul.mubr.bf16.gmra.mrb[20].mxu1 %v1016_v51 }
  0xf6   :  { %v916_v53 = vpop.f32.mrb[0].mxu0 }
  0xf7   :  { %v917_v54 = vpop.f32.mrb[1].mxu0 }
  0xf8   :  { %v918_v55 = vadd.f32 %v917_v54, %v916_v53  ;;  %v919_v56 = vpop.f32.mrb[2].mxu0 }
  0xf9   :  { %v920_v57 = vpop.f32.mrb[3].mxu0 }
  0xfa   :  { %v921_v58 = vadd.f32 %v920_v57, %v919_v56 }
  0xfe   :  { %v922_v59 = vpop.f32.mrb[4].mxu0 }
  0xff   :  { %v923_v61 = vpop.f32.mrb[5].mxu0 }
 0x100   :  { %v503_v60 = vpop.f32.mrb[0].mxu1  ;;  %v924_v0 = vadd.f32 %v923_v61, %v922_v59  ;;  %v925_v1 = vpop.f32.mrb[6].mxu0 }
 0x101   :  { %v504_v62 = vadd.f32 %v918_v55, %v503_v60  ;;  %v505_v63 = vpop.f32.mrb[1].mxu1  ;;  %v926_v3 = vpop.f32.mrb[7].mxu0 }
 0x102   :  { %v506_v2 = vpop.f32.mrb[2].mxu1  ;;  %v927_v6 = vadd.f32 %v926_v3, %v925_v1 }
 0x103   :  { %v507_v4 = vadd.f32 %v921_v58, %v506_v2  ;;  %v508_v5 = vpop.f32.mrb[3].mxu1  ;;  %651 = vadd.xlane.f32.xlu0 %v504_v62  ;;  %v712_v14 = vmul.f32 %v504_v62, %v504_v62 }
 0x105   :  { %v868_v7 = vpack.c.bf16 %v507_v4, %v504_v62  ;;  %v713_v8 = vmul.f32 %v507_v4, %v507_v4 }
 0x106   :  { %v928_v9 = vpop.f32.mrb[8].mxu0 }
 0x107   :  { %869 = vst [vmem:[%s1523_s2] sm:$0xff] %v868_v7   ;;  %726 = vadd.xlane.f32.xlu1 %v713_v8  ;;  %653 = vadd.xlane.f32.xlu0 %v507_v4  ;;  %v929_v11 = vpop.f32.mrb[9].mxu0 }
 0x108   :  { %v511_v10 = vpop.f32.mrb[4].mxu1  ;;  %v930_v15 = vadd.f32 %v929_v11, %v928_v9  ;;  %v931_v16 = vpop.f32.mrb[10].mxu0 }
 0x109   :  { %v512_v12 = vadd.f32 %v924_v0, %v511_v10  ;;  %v513_v13 = vpop.f32.mrb[5].mxu1  ;;  %v932_v18 = vpop.f32.mrb[11].mxu0 }
 0x10a   :  { %v514_v17 = vpop.f32.mrb[6].mxu1  ;;  %v933_v21 = vadd.f32 %v932_v18, %v931_v16  ;;  %v701_v18 = vld [vmem:[%s1524_s4 + $0x8] sm:$0xff] }
 0x10b   :  { %v515_v19 = vadd.f32 %v927_v6, %v514_v17  ;;  %v516_v20 = vpop.f32.mrb[7].mxu1  ;;  %655 = vadd.xlane.f32.xlu1 %v512_v12  ;;  %724 = vadd.xlane.f32.xlu0 %v712_v14  ;;  %v714_v23 = vmul.f32 %v512_v12, %v512_v12 }
 0x10d   :  { %v873_v22 = vpack.c.bf16 %v515_v19, %v512_v12  ;;  %v715_v29 = vmul.f32 %v515_v19, %v515_v19 }
 0x10e   :  { %v934_v24 = vpop.f32.mrb[12].mxu0 }
 0x10f   :  { %895 = vst [vmem:[%s1523_s2 + $0x8] sm:$0xff] %v873_v22   ;;  %657 = vadd.xlane.f32.xlu1 %v515_v19  ;;  %728 = vadd.xlane.f32.xlu0 %v714_v23  ;;  %v935_v26 = vpop.f32.mrb[13].mxu0  ;;  %v640_v19 = vld [vmem:[%s1522_s3 + $0x8] sm:$0xff] }
 0x110   :  { %v519_v25 = vpop.f32.mrb[8].mxu1  ;;  %v936_v30 = vadd.f32 %v935_v26, %v934_v24  ;;  %v937_v31 = vpop.f32.mrb[14].mxu0  ;;  %v641_v24 = vld [vmem:[%s1522_s3 + $0x10] sm:$0xff] }
 0x111   :  { %v520_v27 = vadd.f32 %v930_v15, %v519_v25  ;;  %v521_v28 = vpop.f32.mrb[9].mxu1  ;;  %v938_v33 = vpop.f32.mrb[15].mxu0  ;;  %v639_v15 = vld [vmem:[%s1522_s3] sm:$0xff] }
 0x112   :  { %v522_v32 = vpop.f32.mrb[10].mxu1  ;;  %v939_v36 = vadd.f32 %v938_v33, %v937_v31  ;;  %v700_v25 = vld [vmem:[%s1524_s4] sm:$0xff]  ;;  %v702_v31 = vld [vmem:[%s1524_s4 + $0x10] sm:$0xff] }
 0x113   :  { %v523_v34 = vadd.f32 %v933_v21, %v522_v32  ;;  %v524_v35 = vpop.f32.mrb[11].mxu1  ;;  %730 = vadd.xlane.f32.xlu1 %v715_v29  ;;  %659 = vadd.xlane.f32.xlu0 %v520_v27  ;;  %v716_v37 = vmul.f32 %v520_v27, %v520_v27 }
 0x115   :  { %v878_v38 = vpack.c.bf16 %v523_v34, %v520_v27  ;;  %v717_v44 = vmul.f32 %v523_v34, %v523_v34 }
 0x116   :  { %v940_v39 = vpop.f32.mrb[16].mxu0 }
 0x117   :  { %896 = vst [vmem:[%s1523_s2 + $0x10] sm:$0xff] %v878_v38   ;;  %661 = vadd.xlane.f32.xlu1 %v523_v34  ;;  %732 = vadd.xlane.f32.xlu0 %v716_v37  ;;  %v941_v41 = vpop.f32.mrb[17].mxu0  ;;  %v643_v37 = vld [vmem:[%s1522_s3 + $0x20] sm:$0xff] }
 0x118   :  { %v527_v40 = vpop.f32.mrb[12].mxu1  ;;  %v942_v45 = vadd.f32 %v941_v41, %v940_v39  ;;  %v943_v46 = vpop.f32.mrb[18].mxu0 }
 0x119   :  { %v528_v42 = vadd.f32 %v936_v30, %v527_v40  ;;  %v529_v43 = vpop.f32.mrb[13].mxu1  ;;  %v944_v48 = vpop.f32.mrb[19].mxu0  ;;  %v642_v30 = vld [vmem:[%s1522_s3 + $0x18] sm:$0xff] }
 0x11a   :  { %v530_v47 = vpop.f32.mrb[14].mxu1  ;;  %v945_v51 = vadd.f32 %v944_v48, %v943_v46  ;;  %v704_v43 = vld [vmem:[%s1524_s4 + $0x20] sm:$0xff]  ;;  %v705_v48 = vld [vmem:[%s1524_s4 + $0x28] sm:$0xff] }
 0x11b   :  { %v531_v49 = vadd.f32 %v939_v36, %v530_v47  ;;  %v532_v50 = vpop.f32.mrb[15].mxu1  ;;  %734 = vadd.xlane.f32.xlu1 %v717_v44  ;;  %663 = vadd.xlane.f32.xlu0 %v528_v42  ;;  %v718_v52 = vmul.f32 %v528_v42, %v528_v42  ;;  %v703_v36 = vld [vmem:[%s1524_s4 + $0x18] sm:$0xff] }
 0x11d   :  { %v883_v53 = vpack.c.bf16 %v531_v49, %v528_v42  ;;  %v719_v59 = vmul.f32 %v531_v49, %v531_v49  ;;  %v644_v42 = vld [vmem:[%s1522_s3 + $0x28] sm:$0xff] }
 0x11e   :  { %v946_v54 = vpop.f32.mrb[20].mxu0 }
 0x11f   :  { %897 = vst [vmem:[%s1523_s2 + $0x18] sm:$0xff] %v883_v53   ;;  %665 = vadd.xlane.f32.xlu1 %v531_v49  ;;  %736 = vadd.xlane.f32.xlu0 %v718_v52  ;;  %v947_v56 = vpop.f32.mrb[21].mxu0  ;;  %v645_v49 = vld [vmem:[%s1522_s3 + $0x30] sm:$0xff] }
 0x120   :  { %v535_v55 = vpop.f32.mrb[16].mxu1  ;;  %v948_v60 = vadd.f32 %v947_v56, %v946_v54  ;;  %v949_v61 = vpop.f32.mrb[22].mxu0  ;;  %v646_v54 = vld [vmem:[%s1522_s3 + $0x38] sm:$0xff] }
 0x121   :  { %v536_v57 = vadd.f32 %v942_v45, %v535_v55  ;;  %v537_v58 = vpop.f32.mrb[17].mxu1  ;;  %v950_v63 = vpop.f32.mrb[23].mxu0  ;;  %v706_v55 = vld [vmem:[%s1524_s4 + $0x30] sm:$0xff] }
 0x122   :  { %v538_v62 = vpop.f32.mrb[18].mxu1  ;;  %v951_v2 = vadd.f32 %v950_v63, %v949_v61  ;;  %v647_v61 = vld [vmem:[%s1522_s3 + $0x40] sm:$0xff] }
 0x123   :  { %v539_v0 = vadd.f32 %v945_v51, %v538_v62  ;;  %v540_v1 = vpop.f32.mrb[19].mxu1  ;;  %738 = vadd.xlane.f32.xlu1 %v719_v59  ;;  %667 = vadd.xlane.f32.xlu0 %v536_v57  ;;  %v720_v3 = vmul.f32 %v536_v57, %v536_v57 }
 0x125   :  { %v888_v4 = vpack.c.bf16 %v539_v0, %v536_v57  ;;  %v721_v8 = vmul.f32 %v539_v0, %v539_v0 }
 0x127   :  { %898 = vst [vmem:[%s1523_s2 + $0x20] sm:$0xff] %v888_v4   ;;  %669 = vadd.xlane.f32.xlu1 %v539_v0  ;;  %740 = vadd.xlane.f32.xlu0 %v720_v3  ;;  %v708_v3 = vld [vmem:[%s1524_s4 + $0x40] sm:$0xff] }
 0x128   :  { %v543_v5 = vpop.f32.mrb[20].mxu1 }
 0x129   :  { %v544_v6 = vadd.f32 %v948_v60, %v543_v5  ;;  %v545_v7 = vpop.f32.mrb[21].mxu1  ;;  %v707_v60 = vld [vmem:[%s1524_s4 + $0x38] sm:$0xff] }
 0x12a   :  { %v546_v9 = vpop.f32.mrb[22].mxu1 }
 0x12b   :  { %v547_v10 = vadd.f32 %v951_v2, %v546_v9  ;;  %v548_v11 = vpop.f32.mrb[23].mxu1  ;;  %742 = vadd.xlane.f32.xlu1 %v721_v8  ;;  %671 = vadd.xlane.f32.xlu0 %v544_v6  ;;  %v722_v12 = vmul.f32 %v544_v6, %v544_v6  ;;  %v648_v2 = vld [vmem:[%s1522_s3 + $0x48] sm:$0xff]  ;;  %v649_v9 = vld [vmem:[%s1522_s3 + $0x50] sm:$0xff] }
 0x12c   :  { %v709_v8 = vld [vmem:[%s1524_s4 + $0x48] sm:$0xff] }
 0x12d   :  { %v893_v13 = vpack.c.bf16 %v547_v10, %v544_v6  ;;  %v723_v14 = vmul.f32 %v547_v10, %v547_v10 }
 0x12f   :  { %899 = vst [vmem:[%s1523_s2 + $0x28] sm:$0xff] %v893_v13   ;;  %673 = vadd.xlane.f32.xlu1 %v547_v10  ;;  %744 = vadd.xlane.f32.xlu0 %v722_v12 }
 0x133   :  { %746 = vadd.xlane.f32.xlu1 %v723_v14  ;;  %v650_v14 = vld [vmem:[%s1522_s3 + $0x58] sm:$0xff] }
 0x190   :  { %v652_v16 = vpop.xlane.xlu0 %651 }
 0x191   :  { %v675_v17 = vadd.f32 %v652_v16, %v639_v15  ;;  %v710_v15 = vld [vmem:[%s1524_s4 + $0x50] sm:$0xff] }
 0x193   :  { %688 = vst.msk [vmem:[%s1522_s3] sm:$0xff] %vm614_vm1, %v675_v17 }
 0x194   :  { %v727_v20 = vpop.xlane.xlu1 %726  ;;  %v654_v21 = vpop.xlane.xlu0 %653 }
 0x195   :  { %v749_v22 = vadd.f32 %v727_v20, %v701_v18  ;;  %v676_v23 = vadd.f32 %v654_v21, %v640_v19  ;;  %v711_v20 = vld [vmem:[%s1524_s4 + $0x58] sm:$0xff] }
 0x197   :  { %761 = vst.msk [vmem:[%s1524_s4 + $0x8] sm:$0xff] %vm614_vm1, %v749_v22  ;;  %689 = vst.msk [vmem:[%s1522_s3 + $0x8] sm:$0xff] %vm614_vm1, %v676_v23 }
 0x198   :  { %v656_v26 = vpop.xlane.xlu1 %655  ;;  %v725_v27 = vpop.xlane.xlu0 %724 }
 0x199   :  { %v677_v28 = vadd.f32 %v656_v26, %v641_v24  ;;  %v748_v29 = vadd.f32 %v725_v27, %v700_v25 }
 0x19b   :  { %690 = vst.msk [vmem:[%s1522_s3 + $0x10] sm:$0xff] %vm614_vm1, %v677_v28  ;;  %760 = vst.msk [vmem:[%s1524_s4] sm:$0xff] %vm614_vm1, %v748_v29 }
 0x19c   :  { %v658_v32 = vpop.xlane.xlu1 %657  ;;  %v729_v33 = vpop.xlane.xlu0 %728 }
 0x19d   :  { %v678_v34 = vadd.f32 %v658_v32, %v642_v30  ;;  %v750_v35 = vadd.f32 %v729_v33, %v702_v31 }
 0x19f   :  { %691 = vst.msk [vmem:[%s1522_s3 + $0x18] sm:$0xff] %vm614_vm1, %v678_v34  ;;  %762 = vst.msk [vmem:[%s1524_s4 + $0x10] sm:$0xff] %vm614_vm1, %v750_v35 }
 0x1a0   :  { %v731_v38 = vpop.xlane.xlu1 %730  ;;  %v660_v39 = vpop.xlane.xlu0 %659 }
 0x1a1   :  { %v751_v40 = vadd.f32 %v731_v38, %v703_v36  ;;  %v679_v41 = vadd.f32 %v660_v39, %v643_v37 }
 0x1a3   :  { %763 = vst.msk [vmem:[%s1524_s4 + $0x18] sm:$0xff] %vm614_vm1, %v751_v40  ;;  %692 = vst.msk [vmem:[%s1522_s3 + $0x20] sm:$0xff] %vm614_vm1, %v679_v41 }
 0x1a4   :  { %v662_v44 = vpop.xlane.xlu1 %661  ;;  %v733_v45 = vpop.xlane.xlu0 %732 }
 0x1a5   :  { %v680_v46 = vadd.f32 %v662_v44, %v644_v42  ;;  %v752_v47 = vadd.f32 %v733_v45, %v704_v43 }
 0x1a7   :  { %693 = vst.msk [vmem:[%s1522_s3 + $0x28] sm:$0xff] %vm614_vm1, %v680_v46  ;;  %764 = vst.msk [vmem:[%s1524_s4 + $0x20] sm:$0xff] %vm614_vm1, %v752_v47 }
 0x1a8   :  { %v735_v50 = vpop.xlane.xlu1 %734  ;;  %v664_v51 = vpop.xlane.xlu0 %663 }
 0x1a9   :  { %v753_v52 = vadd.f32 %v735_v50, %v705_v48  ;;  %v681_v53 = vadd.f32 %v664_v51, %v645_v49 }
 0x1ab   :  { %765 = vst.msk [vmem:[%s1524_s4 + $0x28] sm:$0xff] %vm614_vm1, %v753_v52  ;;  %694 = vst.msk [vmem:[%s1522_s3 + $0x30] sm:$0xff] %vm614_vm1, %v681_v53 }
 0x1ac   :  { %v666_v56 = vpop.xlane.xlu1 %665  ;;  %v737_v57 = vpop.xlane.xlu0 %736 }
 0x1ad   :  { %v682_v58 = vadd.f32 %v666_v56, %v646_v54  ;;  %v754_v59 = vadd.f32 %v737_v57, %v706_v55 }
 0x1af   :  { %695 = vst.msk [vmem:[%s1522_s3 + $0x38] sm:$0xff] %vm614_vm1, %v682_v58  ;;  %766 = vst.msk [vmem:[%s1524_s4 + $0x30] sm:$0xff] %vm614_vm1, %v754_v59 }
 0x1b0   :  { %v739_v62 = vpop.xlane.xlu1 %738  ;;  %v668_v63 = vpop.xlane.xlu0 %667 }
 0x1b1   :  { %v755_v0 = vadd.f32 %v739_v62, %v707_v60  ;;  %v683_v1 = vadd.f32 %v668_v63, %v647_v61 }
 0x1b3   :  { %767 = vst.msk [vmem:[%s1524_s4 + $0x38] sm:$0xff] %vm614_vm1, %v755_v0  ;;  %696 = vst.msk [vmem:[%s1522_s3 + $0x40] sm:$0xff] %vm614_vm1, %v683_v1 }
 0x1b4   :  { %v670_v4 = vpop.xlane.xlu1 %669  ;;  %v741_v5 = vpop.xlane.xlu0 %740 }
 0x1b5   :  { %v684_v6 = vadd.f32 %v670_v4, %v648_v2  ;;  %v756_v7 = vadd.f32 %v741_v5, %v708_v3 }
 0x1b7   :  { %697 = vst.msk [vmem:[%s1522_s3 + $0x48] sm:$0xff] %vm614_vm1, %v684_v6  ;;  %768 = vst.msk [vmem:[%s1524_s4 + $0x40] sm:$0xff] %vm614_vm1, %v756_v7 }
 0x1b8   :  { %v743_v10 = vpop.xlane.xlu1 %742  ;;  %v672_v11 = vpop.xlane.xlu0 %671 }
 0x1b9   :  { %v757_v12 = vadd.f32 %v743_v10, %v709_v8  ;;  %v685_v13 = vadd.f32 %v672_v11, %v649_v9 }
 0x1bb   :  { %769 = vst.msk [vmem:[%s1524_s4 + $0x48] sm:$0xff] %vm614_vm1, %v757_v12  ;;  %698 = vst.msk [vmem:[%s1522_s3 + $0x50] sm:$0xff] %vm614_vm1, %v685_v13 }
 0x1bc   :  { %v674_v16 = vpop.xlane.xlu1 %673  ;;  %v745_v17 = vpop.xlane.xlu0 %744 }
 0x1bd   :  { %v686_v18 = vadd.f32 %v674_v16, %v650_v14  ;;  %v758_v19 = vadd.f32 %v745_v17, %v710_v15 }
 0x1bf   :  { %699 = vst.msk [vmem:[%s1522_s3 + $0x58] sm:$0xff] %vm614_vm1, %v686_v18  ;;  %770 = vst.msk [vmem:[%s1524_s4 + $0x50] sm:$0xff] %vm614_vm1, %v758_v19 }
 0x1c0   :  { %v747_v21 = vpop.xlane.xlu1 %746 }
 0x1c1   :  { %v759_v22 = vadd.f32 %v747_v21, %v711_v20 }
 0x1c3   :  { %771 = vst.msk [vmem:[%s1524_s4 + $0x58] sm:$0xff] %vm614_vm1, %v759_v22 }

// kernel: generator_forward.63
= control target key start
LH: loop header
LB: loop body
LE: loop exit
PB: predicated region body
PF: predicated region fallthrough
CT: control target
= control target key end

     0   :  { %v429_v0 = vmov 0   ;;  %s593_s1 = inlined_call_operand.vmem [shape: f32[96,1], index: 1, kind: input, shape index: {}]   ;;  %s594_s2 = inlined_call_operand.vmem [shape: f32[96,1], index: 2, kind: input, shape index: {}]   ;;  %s595_s0 = inlined_call_operand.vmem [shape: bf16[96,128], index: 0, kind: input, shape index: {}]   ;;  %s596_s3 = inlined_call_operand.vmem [shape: bf16[96,128], index: 3, kind: input, shape index: {}]   ;;  %s597_s4 = inlined_call_operand.vmem [shape: bf16[96,128], index: 4, kind: output, shape index: {}]  }
   0x1   :  { %428 = vset.pattern.permute.xlu1 %v429_v0  ;;  %427 = vset.pattern.permute.xlu0 %v429_v0  ;;  %v43_v1 = vld [vmem:[%s593_s1 + $0x10] sm:$0xff]  ;;  %v41_v2 = vld [vmem:[%s593_s1] sm:$0xff]  ;;  %v44_v3 = vld [vmem:[%s593_s1 + $0x18] sm:$0xff] }
   0x2   :  { %65 = vperm.xlu1 %428, %v43_v1   ;;  %55 = vperm.xlu0 %427, %v41_v2   ;;  %v42_v4 = vld [vmem:[%s593_s1 + $0x8] sm:$0xff]  ;;  %v45_v6 = vld [vmem:[%s593_s1 + $0x20] sm:$0xff]  ;;  %v48_v7 = vld [vmem:[%s593_s1 + $0x38] sm:$0xff] }
   0x3   :  { %v46_v5 = vld [vmem:[%s593_s1 + $0x28] sm:$0xff]  ;;  %v47_v8 = vld [vmem:[%s593_s1 + $0x30] sm:$0xff]  ;;  %v49_v10 = vld [vmem:[%s593_s1 + $0x40] sm:$0xff] }
   0x4   :  { %v50_v9 = vld [vmem:[%s593_s1 + $0x48] sm:$0xff]  ;;  %v52_v11 = vld [vmem:[%s593_s1 + $0x58] sm:$0xff]  ;;  %v51_v12 = vld [vmem:[%s593_s1 + $0x50] sm:$0xff] }
   0x5   :  { %v126_v13 = vld [vmem:[%s594_s2 + $0x8] sm:$0xff]  ;;  %v125_v14 = vld [vmem:[%s594_s2] sm:$0xff]  ;;  %v128_v15 = vld [vmem:[%s594_s2 + $0x18] sm:$0xff] }
   0x6   :  { %70 = vperm.xlu1 %428, %v44_v3   ;;  %60 = vperm.xlu0 %427, %v42_v4   ;;  %v127_v16 = vld [vmem:[%s594_s2 + $0x10] sm:$0xff]  ;;  %v130_v17 = vld [vmem:[%s594_s2 + $0x28] sm:$0xff]  ;;  %v129_v18 = vld [vmem:[%s594_s2 + $0x20] sm:$0xff] }
   0x7   :  { %v132_v19 = vld [vmem:[%s594_s2 + $0x38] sm:$0xff]  ;;  %v131_v20 = vld [vmem:[%s594_s2 + $0x30] sm:$0xff]  ;;  %v134_v21 = vld [vmem:[%s594_s2 + $0x48] sm:$0xff] }
   0x8   :  { %v133_v22 = vld [vmem:[%s594_s2 + $0x40] sm:$0xff]  ;;  %v136_v23 = vld [vmem:[%s594_s2 + $0x58] sm:$0xff]  ;;  %v135_v24 = vld [vmem:[%s594_s2 + $0x50] sm:$0xff] }
   0x9   :  { %v334_v33 = vld [vmem:[%s595_s0] sm:$0xff]   ;;  %v411_v36 = vld [vmem:[%s595_s0 + $0x8] sm:$0xff]   ;;  %v412_v46 = vld [vmem:[%s595_s0 + $0x10] sm:$0xff]  }
   0xa   :  { %80 = vperm.xlu1 %428, %v46_v5   ;;  %75 = vperm.xlu0 %427, %v45_v6   ;;  %v335_v37 = vunpack.c.l.bf16 %v334_v33  ;;  %v336_v38 = vunpack.c.h.bf16 %v334_v33  ;;  %v358_v41 = vld [vmem:[%s596_s3] sm:$0xff]   ;;  %v339_v42 = vunpack.c.l.bf16 %v411_v36  ;;  %v340_v43 = vunpack.c.h.bf16 %v411_v36  ;;  %v416_v49 = vld [vmem:[%s596_s3 + $0x8] sm:$0xff]   ;;  %v413_v60 = vld [vmem:[%s595_s0 + $0x18] sm:$0xff]  }
   0xb   :  { %v360_v47 = vunpack.c.h.bf16 %v358_v41  ;;  %v359_v48 = vunpack.c.l.bf16 %v358_v41  ;;  %v344_v54 = vunpack.c.h.bf16 %v412_v46  ;;  %v343_v55 = vunpack.c.l.bf16 %v412_v46  ;;  %v417_v63 = vld [vmem:[%s596_s3 + $0x10] sm:$0xff]  }
   0xc   :  { %v364_v56 = vunpack.c.h.bf16 %v416_v49  ;;  %v363_v57 = vunpack.c.l.bf16 %v416_v49  ;;  %v348_v5 = vunpack.c.h.bf16 %v413_v60  ;;  %v347_v6 = vunpack.c.l.bf16 %v413_v60 }
   0xe   :  { %90 = vperm.xlu1 %428, %v48_v7   ;;  %85 = vperm.xlu0 %427, %v47_v8   ;;  %v368_v7 = vunpack.c.h.bf16 %v417_v63  ;;  %v367_v8 = vunpack.c.l.bf16 %v417_v63 }
  0x12   :  { %100 = vperm.xlu1 %428, %v50_v9   ;;  %95 = vperm.xlu0 %427, %v49_v10  }
  0x16   :  { %110 = vperm.xlu1 %428, %v52_v11   ;;  %105 = vperm.xlu0 %427, %v51_v12   ;;  %v414_v11 = vld [vmem:[%s595_s0 + $0x20] sm:$0xff]  }
  0x1a   :  { %144 = vperm.xlu1 %428, %v126_v13   ;;  %139 = vperm.xlu0 %427, %v125_v14   ;;  %v418_v14 = vld [vmem:[%s596_s3 + $0x18] sm:$0xff]  }
  0x1e   :  { %154 = vperm.xlu1 %428, %v128_v15   ;;  %149 = vperm.xlu0 %427, %v127_v16  }
  0x22   :  { %164 = vperm.xlu1 %428, %v130_v17   ;;  %159 = vperm.xlu0 %427, %v129_v18  }
  0x26   :  { %174 = vperm.xlu1 %428, %v132_v19   ;;  %169 = vperm.xlu0 %427, %v131_v20   ;;  %v352_v20 = vunpack.c.h.bf16 %v414_v11 }
  0x2a   :  { %184 = vperm.xlu1 %428, %v134_v21   ;;  %179 = vperm.xlu0 %427, %v133_v22   ;;  %v351_v21 = vunpack.c.l.bf16 %v414_v11  ;;  %v372_v22 = vunpack.c.h.bf16 %v418_v14 }
  0x2e   :  { %194 = vperm.xlu1 %428, %v136_v23   ;;  %189 = vperm.xlu0 %427, %v135_v24   ;;  %v371_v23 = vunpack.c.l.bf16 %v418_v14 }
  0x81   :  { %v66_v25 = vpop.permute.xlu1 %65  ;;  %v56_v26 = vpop.permute.xlu0 %55 }
  0x82   :  { %v113_v44 = vmul.f32 %v335_v37, %v56_v26  ;;  %v115_v58 = vmul.f32 %v339_v42, %v66_v25  ;;  %v415_v26 = vld [vmem:[%s595_s0 + $0x28] sm:$0xff]  }
  0x85   :  { %v71_v27 = vpop.permute.xlu1 %70  ;;  %v61_v28 = vpop.permute.xlu0 %60 }
  0x86   :  { %v114_v45 = vmul.f32 %v336_v38, %v61_v28  ;;  %v116_v59 = vmul.f32 %v340_v43, %v71_v27  ;;  %v355_v38 = vunpack.c.l.bf16 %v415_v26 }
  0x89   :  { %v81_v29 = vpop.permute.xlu1 %80  ;;  %v76_v30 = vpop.permute.xlu0 %75 }
  0x8a   :  { %v118_v9 = vmul.f32 %v344_v54, %v81_v29  ;;  %v117_v10 = vmul.f32 %v343_v55, %v76_v30  ;;  %v419_v29 = vld [vmem:[%s596_s3 + $0x20] sm:$0xff]  }
  0x8b   :  { %v376_v41 = vunpack.c.h.bf16 %v419_v29  ;;  %v375_v42 = vunpack.c.l.bf16 %v419_v29 }
  0x8d   :  { %v91_v31 = vpop.permute.xlu1 %90  ;;  %v86_v32 = vpop.permute.xlu0 %85 }
  0x8e   :  { %v120_v24 = vmul.f32 %v348_v5, %v91_v31  ;;  %v119_v25 = vmul.f32 %v347_v6, %v86_v32  ;;  %v356_v32 = vunpack.c.h.bf16 %v415_v26 }
  0x91   :  { %v530_v34 = vpop.permute.xlu1 %100  ;;  %v532_v35 = vpop.permute.xlu0 %95 }
  0x92   :  { %v122_v43 = vmul.f32 %v352_v20, %v530_v34 }
  0x95   :  { %v537_v39 = vpop.permute.xlu1 %110  ;;  %v539_v40 = vpop.permute.xlu0 %105 }
  0x96   :  { %v124_v34 = vmul.f32 %v356_v32, %v537_v39 }
  0x99   :  { %v145_v50 = vpop.permute.xlu1 %144  ;;  %v140_v51 = vpop.permute.xlu0 %139 }
  0x9a   :  { %v198_v52 = vadd.f32 %v145_v50, %v114_v45  ;;  %v197_v53 = vadd.f32 %v140_v51, %v113_v44  ;;  %v121_v44 = vmul.f32 %v351_v21, %v532_v35  ;;  %v123_v35 = vmul.f32 %v355_v38, %v539_v40 }
  0x9c   :  { %v234_v61 = vadd.f32 %v360_v47, %v198_v52  ;;  %v233_v62 = vadd.f32 %v359_v48, %v197_v53  ;;  %v420_v47 = vld [vmem:[%s596_s3 + $0x28] sm:$0xff]  }
  0x9d   :  { %v155_v0 = vpop.permute.xlu1 %154  ;;  %v150_v1 = vpop.permute.xlu0 %149  ;;  %v380_v53 = vunpack.c.h.bf16 %v420_v47  ;;  %v379_v54 = vunpack.c.l.bf16 %v420_v47 }
  0x9e   :  { %v384_v2 = vpack.c.bf16 %v234_v61, %v233_v62  ;;  %v200_v3 = vadd.f32 %v155_v0, %v116_v59  ;;  %v199_v4 = vadd.f32 %v150_v1, %v115_v58 }
  0xa0   :  { %385 = vst [vmem:[%s597_s4] sm:$0xff] %v384_v2   ;;  %v236_v12 = vadd.f32 %v364_v56, %v200_v3  ;;  %v235_v13 = vadd.f32 %v363_v57, %v199_v4 }
  0xa1   :  { %v165_v15 = vpop.permute.xlu1 %164  ;;  %v160_v16 = vpop.permute.xlu0 %159 }
  0xa2   :  { %v389_v17 = vpack.c.bf16 %v236_v12, %v235_v13  ;;  %v202_v18 = vadd.f32 %v165_v15, %v118_v9  ;;  %v201_v19 = vadd.f32 %v160_v16, %v117_v10 }
  0xa4   :  { %421 = vst [vmem:[%s597_s4 + $0x8] sm:$0xff] %v389_v17   ;;  %v238_v27 = vadd.f32 %v368_v7, %v202_v18  ;;  %v237_v28 = vadd.f32 %v367_v8, %v201_v19 }
  0xa5   :  { %v175_v30 = vpop.permute.xlu1 %174  ;;  %v170_v33 = vpop.permute.xlu0 %169 }
  0xa6   :  { %v394_v36 = vpack.c.bf16 %v238_v27, %v237_v28  ;;  %v204_v37 = vadd.f32 %v175_v30, %v120_v24  ;;  %v203_v31 = vadd.f32 %v170_v33, %v119_v25 }
  0xa8   :  { %422 = vst [vmem:[%s597_s4 + $0x10] sm:$0xff] %v394_v36   ;;  %v240_v45 = vadd.f32 %v372_v22, %v204_v37  ;;  %v239_v46 = vadd.f32 %v371_v23, %v203_v31 }
  0xa9   :  { %v185_v48 = vpop.permute.xlu1 %184  ;;  %v180_v49 = vpop.permute.xlu0 %179 }
  0xaa   :  { %v399_v50 = vpack.c.bf16 %v240_v45, %v239_v46  ;;  %v206_v51 = vadd.f32 %v185_v48, %v122_v43  ;;  %v205_v52 = vadd.f32 %v180_v49, %v121_v44 }
  0xac   :  { %423 = vst [vmem:[%s597_s4 + $0x18] sm:$0xff] %v399_v50   ;;  %v242_v55 = vadd.f32 %v376_v41, %v206_v51  ;;  %v241_v56 = vadd.f32 %v375_v42, %v205_v52 }
  0xad   :  { %v195_v57 = vpop.permute.xlu1 %194  ;;  %v190_v58 = vpop.permute.xlu0 %189 }
  0xae   :  { %v404_v59 = vpack.c.bf16 %v242_v55, %v241_v56  ;;  %v208_v60 = vadd.f32 %v195_v57, %v124_v34  ;;  %v207_v61 = vadd.f32 %v190_v58, %v123_v35 }
  0xb0   :  { %424 = vst [vmem:[%s597_s4 + $0x20] sm:$0xff] %v404_v59   ;;  %v244_v62 = vadd.f32 %v380_v53, %v208_v60  ;;  %v243_v63 = vadd.f32 %v379_v54, %v207_v61 }
  0xb2   :  { %v409_v39 = vpack.c.bf16 %v244_v62, %v243_v63 }
  0xb4   :  { %425 = vst [vmem:[%s597_s4 + $0x28] sm:$0xff] %v409_v39  }

// kernel: generator_forward.60
= control target key start
LH: loop header
LB: loop body
LE: loop exit
PB: predicated region body
PF: predicated region fallthrough
CT: control target
= control target key end

     0   :  { %vm705_vm0 = vcmask 785408   ;;  %vm1112_vm1 = vcmask 7168   ;;  %s2424_s1 = inlined_call_operand.vmem [shape: bf16[864,128], index: 1, kind: input, shape index: {}]   ;;  %s2425_s0 = inlined_call_operand.vmem [shape: bf16[96,864], index: 0, kind: input, shape index: {}]   ;;  %s2426_s3 = inlined_call_operand.vmem [shape: f32[96,1], index: 3, kind: output, shape index: {1}]   ;;  %s2427_s2 = inlined_call_operand.vmem [shape: bf16[96,128], index: 2, kind: output, shape index: {0}]   ;;  %s2428_s4 = inlined_call_operand.vmem [shape: f32[96,1], index: 4, kind: output, shape index: {2}]  }
   0x1   :  { %v1636_v0 = vld [vmem:[%s2424_s1 + $0x40] sm:$0xff]   ;;  %v1640_v4 = vld [vmem:[%s2424_s1 + $0x48] sm:$0xff]   ;;  %v1644_v8 = vld [vmem:[%s2424_s1 + $0x50] sm:$0xff]  }
   0x2   :  { %v1637_v1 = vld [vmem:[%s2424_s1 + $0xc0] sm:$0xff]   ;;  %1443 = vmatprep.subr.bf16.mxu0 %v1636_v0  ;;  %v1641_v5 = vld [vmem:[%s2424_s1 + $0xc8] sm:$0xff]   ;;  %v1645_v9 = vld [vmem:[%s2424_s1 + $0xd0] sm:$0xff]  }
   0x3   :  { %v1638_v2 = vld [vmem:[%s2424_s1] sm:$0xff]   ;;  %1495 = vmatprep.subr.bf16.mxu1 %v1637_v1  ;;  %v1642_v6 = vld [vmem:[%s2424_s1 + $0x8] sm:$0xff]   ;;  %v1646_v10 = vld [vmem:[%s2424_s1 + $0x10] sm:$0xff]  }
   0x4   :  { %v1639_v3 = vld [vmem:[%s2424_s1 + $0x80] sm:$0xff]   ;;  %1444 = vmatpush3.bf16.msra.mxu0 %v1638_v2  ;;  %v1643_v7 = vld [vmem:[%s2424_s1 + $0x88] sm:$0xff]   ;;  %v1647_v11 = vld [vmem:[%s2424_s1 + $0x90] sm:$0xff]  }
   0x5   :  { %1496 = vmatpush3.bf16.msra.mxu1 %v1639_v3  ;;  %1445 = vmatprep.subr.bf16.mxu0 %v1640_v4  ;;  %v1648_v12 = vld [vmem:[%s2424_s1 + $0x58] sm:$0xff]   ;;  %v1652_v16 = vld [vmem:[%s2424_s1 + $0x60] sm:$0xff]   ;;  %v1656_v20 = vld [vmem:[%s2424_s1 + $0x68] sm:$0xff]  }
   0x6   :  { %1497 = vmatprep.subr.bf16.mxu1 %v1641_v5  ;;  %v1649_v13 = vld [vmem:[%s2424_s1 + $0xd8] sm:$0xff]   ;;  %v1653_v17 = vld [vmem:[%s2424_s1 + $0xe0] sm:$0xff]   ;;  %v1657_v21 = vld [vmem:[%s2424_s1 + $0xe8] sm:$0xff]  }
   0x7   :  { %v1650_v14 = vld [vmem:[%s2424_s1 + $0x18] sm:$0xff]   ;;  %v1654_v18 = vld [vmem:[%s2424_s1 + $0x20] sm:$0xff]   ;;  %v1658_v22 = vld [vmem:[%s2424_s1 + $0x28] sm:$0xff]  }
   0x8   :  { %1446 = vmatpush3.bf16.msra.mxu0 %v1642_v6  ;;  %v1651_v15 = vld [vmem:[%s2424_s1 + $0x98] sm:$0xff]   ;;  %v1655_v19 = vld [vmem:[%s2424_s1 + $0xa0] sm:$0xff]   ;;  %v1659_v23 = vld [vmem:[%s2424_s1 + $0xa8] sm:$0xff]  }
   0x9   :  { %1498 = vmatpush3.bf16.msra.mxu1 %v1643_v7  ;;  %1447 = vmatprep.subr.bf16.mxu0 %v1644_v8  ;;  %v1660_v24 = vld [vmem:[%s2424_s1 + $0x70] sm:$0xff]   ;;  %v1664_v28 = vld [vmem:[%s2424_s1 + $0x78] sm:$0xff]   ;;  %v1670_v33 = vld [vmem:[%s2425_s0 + $0x4] ss:$28 sps:$4 sm:$0xff]  }
   0xa   :  { %1499 = vmatprep.subr.bf16.mxu1 %v1645_v9  ;;  %v1661_v25 = vld [vmem:[%s2424_s1 + $0xf0] sm:$0xff]   ;;  %v1665_v29 = vld [vmem:[%s2424_s1 + $0xf8] sm:$0xff]   ;;  %v1671_v34 = vld [vmem:[%s2425_s0 + $0x8] ss:$28 sps:$4 sm:$0xff]   ;;  %756 = vmatprep.mubr.bf16.mxu0 %v1670_v33 }
   0xb   :  { %v1662_v26 = vld [vmem:[%s2424_s1 + $0x30] sm:$0xff]   ;;  %v1666_v30 = vld [vmem:[%s2424_s1 + $0x38] sm:$0xff]   ;;  %v1673_v35 = vld [vmem:[%s2425_s0 + $0xc] ss:$28 sps:$4 sm:$0xff]  }
   0xc   :  { %1448 = vmatpush3.bf16.msra.mxu0 %v1646_v10  ;;  %v1663_v27 = vld [vmem:[%s2424_s1 + $0xb0] sm:$0xff]   ;;  %v1667_v31 = vld [vmem:[%s2424_s1 + $0xb8] sm:$0xff]   ;;  %v1674_v36 = vld [vmem:[%s2424_s1 + $0x140] sm:$0xff]   ;;  %837 = vmatprep.mubr.bf16.mxu1 %v1673_v35 }
   0xd   :  { %1500 = vmatpush3.bf16.msra.mxu1 %v1647_v11  ;;  %1449 = vmatprep.subr.bf16.mxu0 %v1648_v12  ;;  %v1668_v32 = vld [vmem:[%s2425_s0] ss:$28 sps:$4 sm:$0xff]   ;;  %v1677_v39 = vld [vmem:[%s2424_s1 + $0x148] sm:$0xff]   ;;  %v1683_v43 = vld [vmem:[%s2425_s0 + $0x38] ss:$28 sps:$4 sm:$0xff]  }
   0xe   :  { %1501 = vmatprep.subr.bf16.mxu1 %v1649_v13  ;;  %v1675_v37 = vld [vmem:[%s2424_s1 + $0x100] sm:$0xff]   ;;  %v1678_v40 = vld [vmem:[%s2425_s0 + $0x3c] ss:$28 sps:$4 sm:$0xff]   ;;  %v1682_v42 = vld [vmem:[%s2424_s1 + $0x108] sm:$0xff]  }
   0xf   :  { %v1676_v38 = vld [vmem:[%s2424_s1 + $0x180] sm:$0xff]   ;;  %v1685_v45 = vld [vmem:[%s2424_s1 + $0x150] sm:$0xff]   ;;  %v1686_v46 = vld [vmem:[%s2424_s1 + $0x188] sm:$0xff]  }
  0x10   :  { %1450 = vmatpush3.bf16.msra.mxu0 %v1650_v14  ;;  %v1680_v41 = vld [vmem:[%s2425_s0 + $0x44] ss:$28 sps:$4 sm:$0xff]   ;;  %v1687_v47 = vld [vmem:[%s2424_s1 + $0x110] sm:$0xff]   ;;  %v1690_v49 = vld [vmem:[%s2425_s0 + $0x7c] ss:$28 sps:$4 sm:$0xff]  }
  0x11   :  { %1502 = vmatpush3.bf16.msra.mxu1 %v1651_v15  ;;  %1451 = vmatprep.subr.bf16.mxu0 %v1652_v16  ;;  %v1684_v44 = vld [vmem:[%s2425_s0 + $0x40] ss:$28 sps:$4 sm:$0xff]   ;;  %v1688_v48 = vld [vmem:[%s2425_s0 + $0x74] ss:$28 sps:$4 sm:$0xff]   ;;  %v1697_v55 = vld [vmem:[%s2425_s0 + $0xac] ss:$28 sps:$4 sm:$0xff]  }
  0x12   :  { %1503 = vmatprep.subr.bf16.mxu1 %v1653_v17  ;;  %v1692_v50 = vld [vmem:[%s2425_s0 + $0x70] ss:$28 sps:$4 sm:$0xff]   ;;  %v1693_v51 = vld [vmem:[%s2425_s0 + $0x78] ss:$28 sps:$4 sm:$0xff]   ;;  %v1701_v57 = vld [vmem:[%s2425_s0 + $0xa8] ss:$28 sps:$4 sm:$0xff]  }
  0x13   :  { %v1694_v52 = vld [vmem:[%s2424_s1 + $0x158] sm:$0xff]   ;;  %v1696_v54 = vld [vmem:[%s2424_s1 + $0x190] sm:$0xff]   ;;  %v1703_v58 = vld [vmem:[%s2424_s1 + $0x160] sm:$0xff]  }
  0x14   :  { %1452 = vmatpush3.bf16.msra.mxu0 %v1654_v18  ;;  %v1695_v53 = vld [vmem:[%s2424_s1 + $0x118] sm:$0xff]   ;;  %v1699_v56 = vld [vmem:[%s2425_s0 + $0xb4] ss:$28 sps:$4 sm:$0xff]   ;;  %v1704_v60 = vld [vmem:[%s2424_s1 + $0x120] sm:$0xff]  }
  0x15   :  { %1504 = vmatpush3.bf16.msra.mxu1 %v1655_v19  ;;  %1453 = vmatprep.subr.bf16.mxu0 %v1656_v20  ;;  %v1702_v59 = vld [vmem:[%s2425_s0 + $0xb0] ss:$28 sps:$4 sm:$0xff]   ;;  %v1705_v61 = vld [vmem:[%s2424_s1 + $0x198] sm:$0xff]   ;;  %v1707_v63 = vld [vmem:[%s2425_s0 + $0xe4] ss:$28 sps:$4 sm:$0xff]  }
  0x16   :  { %1505 = vmatprep.subr.bf16.mxu1 %v1657_v21  ;;  %v1706_v62 = vld [vmem:[%s2424_s1 + $0x168] sm:$0xff]   ;;  %v1712_v2 = vld [vmem:[%s2425_s0 + $0xe0] ss:$28 sps:$4 sm:$0xff]   ;;  %v1714_v3 = vld [vmem:[%s2424_s1 + $0x170] sm:$0xff]  }
  0x17   :  { %v1709_v0 = vld [vmem:[%s2425_s0 + $0xec] ss:$28 sps:$4 sm:$0xff]   ;;  %v1715_v5 = vld [vmem:[%s2424_s1 + $0x1a0] sm:$0xff]   ;;  %v1716_v6 = vld [vmem:[%s2424_s1 + $0x130] sm:$0xff]  }
  0x18   :  { %1454 = vmatpush3.bf16.msra.mxu0 %v1658_v22  ;;  %v1711_v1 = vld [vmem:[%s2424_s1 + $0x128] sm:$0xff]   ;;  %v1717_v7 = vld [vmem:[%s2425_s0 + $0x11c] ss:$28 sps:$4 sm:$0xff]   ;;  %v1719_v8 = vld [vmem:[%s2425_s0 + $0x124] ss:$28 sps:$4 sm:$0xff]  }
  0x19   :  { %1506 = vmatpush3.bf16.msra.mxu1 %v1659_v23  ;;  %1455 = vmatprep.subr.bf16.mxu0 %v1660_v24  ;;  %v1713_v4 = vld [vmem:[%s2425_s0 + $0xe8] ss:$28 sps:$4 sm:$0xff]   ;;  %v1723_v9 = vld [vmem:[%s2424_s1 + $0x178] sm:$0xff]   ;;  %v1728_v14 = vld [vmem:[%s2425_s0 + $0x14] ss:$28 sps:$4 sm:$0xff]  }
  0x1a   :  { %1507 = vmatprep.subr.bf16.mxu1 %v1661_v25  ;;  %v1724_v10 = vld [vmem:[%s2424_s1 + $0x138] sm:$0xff]   ;;  %v1725_v11 = vld [vmem:[%s2424_s1 + $0x1a8] sm:$0xff]   ;;  %v1734_v21 = vld [vmem:[%s2425_s0 + $0x84] ss:$28 sps:$4 sm:$0xff]  }
  0x1b   :  { %v1721_v12 = vld [vmem:[%s2425_s0 + $0x118] ss:$28 sps:$4 sm:$0xff]   ;;  %v1722_v13 = vld [vmem:[%s2425_s0 + $0x120] ss:$28 sps:$4 sm:$0xff]   ;;  %v1726_v16 = vld [vmem:[%s2425_s0 + $0x10] ss:$28 sps:$4 sm:$0xff]  }
  0x1c   :  { %1456 = vmatpush3.bf16.msra.mxu0 %v1662_v26  ;;  %v1729_v15 = vld [vmem:[%s2425_s0 + $0x18] ss:$28 sps:$4 sm:$0xff]   ;;  %v1730_v17 = vld [vmem:[%s2425_s0 + $0x50] ss:$28 sps:$4 sm:$0xff]   ;;  %v1737_v19 = vld [vmem:[%s2425_s0 + $0x88] ss:$28 sps:$4 sm:$0xff]  }
  0x1d   :  { %1508 = vmatpush3.bf16.msra.mxu1 %v1663_v27  ;;  %1457 = vmatprep.subr.bf16.mxu0 %v1664_v28  ;;  %v1731_v18 = vld [vmem:[%s2425_s0 + $0x4c] ss:$28 sps:$4 sm:$0xff]   ;;  %v1738_v22 = vld [vmem:[%s2425_s0 + $0xc0] ss:$28 sps:$4 sm:$0xff]   ;;  %v1745_v23 = vld [vmem:[%s2425_s0 + $0xf8] ss:$28 sps:$4 sm:$0xff]  }
  0x1e   :  { %1509 = vmatprep.subr.bf16.mxu1 %v1665_v29  ;;  %v1733_v20 = vld [vmem:[%s2425_s0 + $0x48] ss:$28 sps:$4 sm:$0xff]   ;;  %v1736_v24 = vld [vmem:[%s2425_s0 + $0x80] ss:$28 sps:$4 sm:$0xff]   ;;  %v1746_v26 = vld [vmem:[%s2425_s0 + $0x130] ss:$28 sps:$4 sm:$0xff]  }
  0x1f   :  { %v1739_v25 = vld [vmem:[%s2425_s0 + $0xbc] ss:$28 sps:$4 sm:$0xff]   ;;  %v1742_v28 = vld [vmem:[%s2425_s0 + $0xf4] ss:$28 sps:$4 sm:$0xff]  }
  0x20   :  { %1458 = vmatpush3.bf16.msra.mxu0 %v1666_v30  ;;  %v1741_v27 = vld [vmem:[%s2425_s0 + $0xb8] ss:$28 sps:$4 sm:$0xff]   ;;  %v1744_v29 = vld [vmem:[%s2425_s0 + $0xf0] ss:$28 sps:$4 sm:$0xff]  }
  0x21   :  { %1510 = vmatpush3.bf16.msra.mxu1 %v1667_v31  ;;  %1547 = vmatprep.subr.bf16.mxu0 %v1674_v36  ;;  %v1747_v30 = vld [vmem:[%s2425_s0 + $0x12c] ss:$28 sps:$4 sm:$0xff]  }
  0x22   :  { %1611 = vmatprep.subr.bf16.mxu1 %v1676_v38  ;;  %v1749_v31 = vld [vmem:[%s2425_s0 + $0x128] ss:$28 sps:$4 sm:$0xff]  }
  0x23   :  { %757 = vmatmul.mubr.bf16.vlgmr.msra.gmra.mrb[0].mxu0 %v1668_v32  ;;  %v1750_v32 = vmov 0.0  }
  0x24   :  { %838 = vmatmul.mubr.bf16.vlgmr.msra.gmra.mrb[0].mxu1 %v1671_v34  ;;  %1548 = vmatpush3.bf16.msra.mxu0 %v1675_v37  ;;  %1113 = vst.msk [vmem:[%s2426_s3] sm:$0xff] %vm1112_vm1, %v1750_v32  ;;  %1114 = vst.msk [vmem:[%s2426_s3 + $0x8] sm:$0xff] %vm1112_vm1, %v1750_v32 }
  0x25   :  { %1612 = vmatpush3.bf16.msra.mxu1 %v1676_v38  ;;  %1549 = vmatprep.subr.bf16.mxu0 %v1677_v39  ;;  %1115 = vst.msk [vmem:[%s2426_s3 + $0x10] sm:$0xff] %vm1112_vm1, %v1750_v32  ;;  %1116 = vst.msk [vmem:[%s2426_s3 + $0x18] sm:$0xff] %vm1112_vm1, %v1750_v32 }
  0x26   :  { %764 = vmatprep.mubr.bf16.mxu0 %v1678_v40  ;;  %845 = vmatprep.mubr.bf16.mxu1 %v1680_v41  ;;  %1117 = vst.msk [vmem:[%s2426_s3 + $0x20] sm:$0xff] %vm1112_vm1, %v1750_v32  ;;  %1118 = vst.msk [vmem:[%s2426_s3 + $0x28] sm:$0xff] %vm1112_vm1, %v1750_v32 }
  0x27   :  { %1613 = vmatprep.subr.bf16.mxu1 %v1686_v46  ;;  %1119 = vst.msk [vmem:[%s2426_s3 + $0x30] sm:$0xff] %vm1112_vm1, %v1750_v32  ;;  %1120 = vst.msk [vmem:[%s2426_s3 + $0x38] sm:$0xff] %vm1112_vm1, %v1750_v32 }
  0x28   :  { %1550 = vmatpush3.bf16.msra.mxu0 %v1682_v42  ;;  %1121 = vst.msk [vmem:[%s2426_s3 + $0x40] sm:$0xff] %vm1112_vm1, %v1750_v32  ;;  %1122 = vst.msk [vmem:[%s2426_s3 + $0x48] sm:$0xff] %vm1112_vm1, %v1750_v32 }
  0x29   :  { %1551 = vmatprep.subr.bf16.mxu0 %v1685_v45  ;;  %1614 = vmatpush3.bf16.msra.mxu1 %v1686_v46  ;;  %1123 = vst.msk [vmem:[%s2426_s3 + $0x50] sm:$0xff] %vm1112_vm1, %v1750_v32  ;;  %1124 = vst.msk [vmem:[%s2426_s3 + $0x58] sm:$0xff] %vm1112_vm1, %v1750_v32 }
  0x2a   :  { %1615 = vmatprep.subr.bf16.mxu1 %v1696_v54  ;;  %1126 = vst.msk [vmem:[%s2428_s4 + $0x8] sm:$0xff] %vm1112_vm1, %v1750_v32  ;;  %1125 = vst.msk [vmem:[%s2428_s4] sm:$0xff] %vm1112_vm1, %v1750_v32 }
  0x2b   :  { %765 = vmatmul.mubr.bf16.gmra.mrb[4].mxu0 %v1683_v43  ;;  %1127 = vst.msk [vmem:[%s2428_s4 + $0x10] sm:$0xff] %vm1112_vm1, %v1750_v32  ;;  %1128 = vst.msk [vmem:[%s2428_s4 + $0x18] sm:$0xff] %vm1112_vm1, %v1750_v32 }
  0x2c   :  { %846 = vmatmul.mubr.bf16.gmra.mrb[4].mxu1 %v1684_v44  ;;  %1552 = vmatpush3.bf16.msra.mxu0 %v1687_v47  ;;  %1129 = vst.msk [vmem:[%s2428_s4 + $0x20] sm:$0xff] %vm1112_vm1, %v1750_v32  ;;  %1130 = vst.msk [vmem:[%s2428_s4 + $0x28] sm:$0xff] %vm1112_vm1, %v1750_v32 }
  0x2d   :  { %772 = vmatprep.mubr.bf16.mxu0 %v1688_v48  ;;  %853 = vmatprep.mubr.bf16.mxu1 %v1690_v49  ;;  %1131 = vst.msk [vmem:[%s2428_s4 + $0x30] sm:$0xff] %vm1112_vm1, %v1750_v32  ;;  %1132 = vst.msk [vmem:[%s2428_s4 + $0x38] sm:$0xff] %vm1112_vm1, %v1750_v32 }
  0x2e   :  { %1553 = vmatprep.subr.bf16.mxu0 %v1694_v52  ;;  %1616 = vmatpush3.bf16.msra.mxu1 %v1696_v54  ;;  %1133 = vst.msk [vmem:[%s2428_s4 + $0x40] sm:$0xff] %vm1112_vm1, %v1750_v32  ;;  %1134 = vst.msk [vmem:[%s2428_s4 + $0x48] sm:$0xff] %vm1112_vm1, %v1750_v32 }
  0x2f   :  { %1617 = vmatprep.subr.bf16.mxu1 %v1705_v61  ;;  %1135 = vst.msk [vmem:[%s2428_s4 + $0x50] sm:$0xff] %vm1112_vm1, %v1750_v32  ;;  %1136 = vst.msk [vmem:[%s2428_s4 + $0x58] sm:$0xff] %vm1112_vm1, %v1750_v32 }
  0x30   :  { %1554 = vmatpush3.bf16.msra.mxu0 %v1695_v53 }
  0x31   :  { %1555 = vmatprep.subr.bf16.mxu0 %v1703_v58 }
  0x32   :  { %1618 = vmatpush3.bf16.msra.mxu1 %v1705_v61 }
  0x33   :  { %773 = vmatmul.mubr.bf16.gmra.mrb[8].mxu0 %v1692_v50  ;;  %1619 = vmatprep.subr.bf16.mxu1 %v1715_v5 }
  0x34   :  { %854 = vmatmul.mubr.bf16.gmra.mrb[8].mxu1 %v1693_v51  ;;  %780 = vmatprep.mubr.bf16.mxu0 %v1697_v55 }
  0x35   :  { %861 = vmatprep.mubr.bf16.mxu1 %v1699_v56  ;;  %1556 = vmatpush3.bf16.msra.mxu0 %v1704_v60 }
  0x36   :  { %1557 = vmatprep.subr.bf16.mxu0 %v1706_v62  ;;  %1620 = vmatpush3.bf16.msra.mxu1 %v1715_v5 }
  0x37   :  { %1621 = vmatprep.subr.bf16.mxu1 %v1725_v11 }
  0x39   :  { %1558 = vmatpush3.bf16.msra.mxu0 %v1711_v1 }
  0x3a   :  { %1559 = vmatprep.subr.bf16.mxu0 %v1714_v3  ;;  %1622 = vmatpush3.bf16.msra.mxu1 %v1725_v11 }
  0x3b   :  { %781 = vmatmul.mubr.bf16.gmra.mrb[12].mxu0 %v1701_v57 }
  0x3c   :  { %862 = vmatmul.mubr.bf16.gmra.mrb[12].mxu1 %v1702_v59  ;;  %788 = vmatprep.mubr.bf16.mxu0 %v1707_v63 }
  0x3d   :  { %869 = vmatprep.mubr.bf16.mxu1 %v1709_v0  ;;  %1560 = vmatpush3.bf16.msra.mxu0 %v1716_v6 }
  0x3e   :  { %1561 = vmatprep.subr.bf16.mxu0 %v1723_v9 }
  0x41   :  { %1562 = vmatpush3.bf16.msra.mxu0 %v1724_v10 }
  0x43   :  { %789 = vmatmul.mubr.bf16.gmra.mrb[16].mxu0 %v1712_v2 }
  0x44   :  { %870 = vmatmul.mubr.bf16.gmra.mrb[16].mxu1 %v1713_v4  ;;  %796 = vmatprep.mubr.bf16.mxu0 %v1717_v7 }
  0x45   :  { %877 = vmatprep.mubr.bf16.mxu1 %v1719_v8 }
  0x4b   :  { %797 = vmatmul.mubr.bf16.gmra.mrb[20].mxu0 %v1721_v12 }
  0x4c   :  { %878 = vmatmul.mubr.bf16.gmra.mrb[20].mxu1 %v1722_v13  ;;  %918 = vmatprep.mubr.bf16.mxu0 %v1728_v14 }
  0x4d   :  { %1623 = vmatprep.mubr.msk.bf16.mxu1 %vm705_vm0, %v1729_v15 }
  0x53   :  { %919 = vmatmul.mubr.bf16.vlgmr.msra.gmra.mrb[24].mxu0 %v1726_v16 }
  0x54   :  { %1624 = vmatmul.mubr.msk.bf16.vlgmr.msra.gmra.mrb[24].mxu1 %vm705_vm0, %v1730_v17  ;;  %926 = vmatprep.mubr.bf16.mxu0 %v1731_v18 }
  0x55   :  { %1627 = vmatprep.mubr.msk.bf16.mxu1 %vm705_vm0, %v1737_v19 }
  0x5b   :  { %927 = vmatmul.mubr.bf16.gmra.mrb[28].mxu0 %v1733_v20 }
  0x5c   :  { %934 = vmatprep.mubr.bf16.mxu0 %v1734_v21  ;;  %1628 = vmatmul.mubr.msk.bf16.gmra.mrb[28].mxu1 %vm705_vm0, %v1738_v22 }
  0x5d   :  { %1631 = vmatprep.mubr.msk.bf16.mxu1 %vm705_vm0, %v1745_v23 }
  0x63   :  { %935 = vmatmul.mubr.bf16.gmra.mrb[32].mxu0 %v1736_v24 }
  0x64   :  { %942 = vmatprep.mubr.bf16.mxu0 %v1739_v25  ;;  %1632 = vmatmul.mubr.msk.bf16.gmra.mrb[32].mxu1 %vm705_vm0, %v1746_v26 }
  0x6b   :  { %943 = vmatmul.mubr.bf16.gmra.mrb[36].mxu0 %v1741_v27 }
  0x6c   :  { %950 = vmatprep.mubr.bf16.mxu0 %v1742_v28 }
  0x73   :  { %951 = vmatmul.mubr.bf16.gmra.mrb[40].mxu0 %v1744_v29 }
  0x74   :  { %958 = vmatprep.mubr.bf16.mxu0 %v1747_v30 }
  0x7b   :  { %959 = vmatmul.mubr.bf16.gmra.mrb[44].mxu0 %v1749_v31 }
  0xf6   :  { %v1459_v33 = vpop.f32.mrb[0].mxu0 }
  0xf7   :  { %v1511_v34 = vpop.f32.mrb[0].mxu1  ;;  %v1460_v35 = vpop.f32.mrb[1].mxu0 }
  0xf8   :  { %v1461_v36 = vadd.f32 %v1460_v35, %v1459_v33  ;;  %v1512_v37 = vpop.f32.mrb[1].mxu1  ;;  %v1462_v38 = vpop.f32.mrb[2].mxu0 }
  0xf9   :  { %v1513_v39 = vadd.f32 %v1512_v37, %v1511_v34  ;;  %v1514_v40 = vpop.f32.mrb[2].mxu1  ;;  %v1463_v41 = vpop.f32.mrb[3].mxu0 }
  0xfa   :  { %v1464_v42 = vadd.f32 %v1463_v41, %v1462_v38  ;;  %v1515_v43 = vpop.f32.mrb[3].mxu1 }
  0xfb   :  { %v2130_v44 = vadd.f32 %v1513_v39, %v1461_v36  ;;  %v1516_v45 = vadd.f32 %v1515_v43, %v1514_v40 }
  0xfd   :  { %v2132_v46 = vadd.f32 %v1516_v45, %v1464_v42 }
  0xfe   :  { %v1465_v47 = vpop.f32.mrb[4].mxu0 }
  0xff   :  { %v1517_v48 = vpop.f32.mrb[4].mxu1  ;;  %v1466_v49 = vpop.f32.mrb[5].mxu0 }
 0x100   :  { %v1467_v50 = vadd.f32 %v1466_v49, %v1465_v47  ;;  %v1518_v51 = vpop.f32.mrb[5].mxu1  ;;  %v1468_v52 = vpop.f32.mrb[6].mxu0 }
 0x101   :  { %v1519_v53 = vadd.f32 %v1518_v51, %v1517_v48  ;;  %v1520_v54 = vpop.f32.mrb[6].mxu1  ;;  %v1469_v55 = vpop.f32.mrb[7].mxu0 }
 0x102   :  { %v1470_v56 = vadd.f32 %v1469_v55, %v1468_v52  ;;  %v1521_v57 = vpop.f32.mrb[7].mxu1 }
 0x103   :  { %v2134_v58 = vadd.f32 %v1519_v53, %v1467_v50  ;;  %v1522_v59 = vadd.f32 %v1521_v57, %v1520_v54 }
 0x105   :  { %v2136_v60 = vadd.f32 %v1522_v59, %v1470_v56 }
 0x106   :  { %v1471_v61 = vpop.f32.mrb[8].mxu0 }
 0x107   :  { %v1523_v62 = vpop.f32.mrb[8].mxu1  ;;  %v1472_v63 = vpop.f32.mrb[9].mxu0 }
 0x108   :  { %v1473_v0 = vadd.f32 %v1472_v63, %v1471_v61  ;;  %v1524_v1 = vpop.f32.mrb[9].mxu1  ;;  %v1474_v2 = vpop.f32.mrb[10].mxu0 }
 0x109   :  { %v1525_v3 = vadd.f32 %v1524_v1, %v1523_v62  ;;  %v1526_v4 = vpop.f32.mrb[10].mxu1  ;;  %v1475_v5 = vpop.f32.mrb[11].mxu0 }
 0x10a   :  { %v1476_v6 = vadd.f32 %v1475_v5, %v1474_v2  ;;  %v1527_v7 = vpop.f32.mrb[11].mxu1 }
 0x10b   :  { %v2138_v8 = vadd.f32 %v1525_v3, %v1473_v0  ;;  %v1528_v9 = vadd.f32 %v1527_v7, %v1526_v4 }
 0x10d   :  { %v2140_v10 = vadd.f32 %v1528_v9, %v1476_v6 }
 0x10e   :  { %v1477_v11 = vpop.f32.mrb[12].mxu0 }
 0x10f   :  { %v1529_v12 = vpop.f32.mrb[12].mxu1  ;;  %v1478_v13 = vpop.f32.mrb[13].mxu0 }
 0x110   :  { %v1479_v14 = vadd.f32 %v1478_v13, %v1477_v11  ;;  %v1530_v15 = vpop.f32.mrb[13].mxu1  ;;  %v1480_v16 = vpop.f32.mrb[14].mxu0 }
 0x111   :  { %v1531_v17 = vadd.f32 %v1530_v15, %v1529_v12  ;;  %v1532_v18 = vpop.f32.mrb[14].mxu1  ;;  %v1481_v19 = vpop.f32.mrb[15].mxu0 }
 0x112   :  { %v1482_v20 = vadd.f32 %v1481_v19, %v1480_v16  ;;  %v1533_v21 = vpop.f32.mrb[15].mxu1 }
 0x113   :  { %v2142_v22 = vadd.f32 %v1531_v17, %v1479_v14  ;;  %v1534_v23 = vadd.f32 %v1533_v21, %v1532_v18 }
 0x115   :  { %v2144_v24 = vadd.f32 %v1534_v23, %v1482_v20 }
 0x116   :  { %v1483_v25 = vpop.f32.mrb[16].mxu0 }
 0x117   :  { %v1535_v26 = vpop.f32.mrb[16].mxu1  ;;  %v1484_v27 = vpop.f32.mrb[17].mxu0 }
 0x118   :  { %v1485_v28 = vadd.f32 %v1484_v27, %v1483_v25  ;;  %v1536_v29 = vpop.f32.mrb[17].mxu1  ;;  %v1486_v30 = vpop.f32.mrb[18].mxu0 }
 0x119   :  { %v1537_v31 = vadd.f32 %v1536_v29, %v1535_v26  ;;  %v1538_v33 = vpop.f32.mrb[18].mxu1  ;;  %v1487_v34 = vpop.f32.mrb[19].mxu0 }
 0x11a   :  { %v1488_v35 = vadd.f32 %v1487_v34, %v1486_v30  ;;  %v1539_v36 = vpop.f32.mrb[19].mxu1 }
 0x11b   :  { %v2146_v37 = vadd.f32 %v1537_v31, %v1485_v28  ;;  %v1540_v38 = vadd.f32 %v1539_v36, %v1538_v33 }
 0x11d   :  { %v2148_v39 = vadd.f32 %v1540_v38, %v1488_v35 }
 0x11e   :  { %v1489_v40 = vpop.f32.mrb[20].mxu0 }
 0x11f   :  { %v1541_v41 = vpop.f32.mrb[20].mxu1  ;;  %v1490_v42 = vpop.f32.mrb[21].mxu0 }
 0x120   :  { %v1491_v43 = vadd.f32 %v1490_v42, %v1489_v40  ;;  %v1542_v45 = vpop.f32.mrb[21].mxu1  ;;  %v1492_v47 = vpop.f32.mrb[22].mxu0 }
 0x121   :  { %v1543_v48 = vadd.f32 %v1542_v45, %v1541_v41  ;;  %v1544_v49 = vpop.f32.mrb[22].mxu1  ;;  %v1493_v50 = vpop.f32.mrb[23].mxu0 }
 0x122   :  { %v1494_v51 = vadd.f32 %v1493_v50, %v1492_v47  ;;  %v1545_v52 = vpop.f32.mrb[23].mxu1 }
 0x123   :  { %v2150_v53 = vadd.f32 %v1543_v48, %v1491_v43  ;;  %v1546_v54 = vadd.f32 %v1545_v52, %v1544_v49 }
 0x125   :  { %v2152_v55 = vadd.f32 %v1546_v54, %v1494_v51 }
 0x126   :  { %v1563_v56 = vpop.f32.mrb[24].mxu0 }
 0x127   :  { %v1564_v57 = vpop.f32.mrb[25].mxu0  ;;  %v1625_v59 = vpop.f32.mrb[24].mxu1 }
 0x128   :  { %v1565_v61 = vadd.f32 %v1564_v57, %v1563_v56  ;;  %v1566_v62 = vpop.f32.mrb[26].mxu0  ;;  %v1001_v63 = vpop.f32.mrb[25].mxu1 }
 0x129   :  { %v1567_v0 = vpop.f32.mrb[27].mxu0  ;;  %v1626_v1 = vpop.f32.mrb[26].mxu1 }
 0x12a   :  { %v1568_v2 = vadd.f32 %v1567_v0, %v1566_v62  ;;  %v921_v3 = vadd.f32 %v1565_v61, %v2130_v44  ;;  %v1004_v4 = vpop.f32.mrb[27].mxu1 }
 0x12c   :  { %v1002_v5 = vadd.f32 %v1001_v63, %v921_v3  ;;  %v924_v6 = vadd.f32 %v1568_v2, %v2132_v46 }
 0x12e   :  { %v1005_v7 = vadd.f32 %v1004_v4, %v924_v6  ;;  %v1569_v9 = vpop.f32.mrb[28].mxu0  ;;  %1149 = vadd.xlane.f32.xlu0 %v1002_v5  ;;  %v1210_v25 = vmul.f32 %v1002_v5, %v1002_v5 }
 0x12f   :  { %v1570_v11 = vpop.f32.mrb[29].mxu0  ;;  %v2156_v12 = vpop.f32.mrb[28].mxu1 }
 0x130   :  { %v1411_v13 = vpack.c.bf16 %v1005_v7, %v1002_v5  ;;  %v1571_v14 = vadd.f32 %v1570_v11, %v1569_v9  ;;  %v1572_v15 = vpop.f32.mrb[30].mxu0  ;;  %v1211_v16 = vmul.f32 %v1005_v7, %v1005_v7  ;;  %v1017_v17 = vpop.f32.mrb[29].mxu1 }
 0x131   :  { %v1573_v18 = vpop.f32.mrb[31].mxu0  ;;  %v2158_v19 = vpop.f32.mrb[30].mxu1 }
 0x132   :  { %1412 = vst [vmem:[%s2427_s2] sm:$0xff] %v1411_v13   ;;  %v929_v44 = vadd.f32 %v1571_v14, %v2134_v58  ;;  %v1574_v46 = vadd.f32 %v1573_v18, %v1572_v15  ;;  %1224 = vadd.xlane.f32.xlu1 %v1211_v16  ;;  %1151 = vadd.xlane.f32.xlu0 %v1005_v7  ;;  %v1020_v20 = vpop.f32.mrb[31].mxu1 }
 0x134   :  { %v932_v21 = vadd.f32 %v1574_v46, %v2136_v60  ;;  %v1010_v23 = vadd.f32 %v1625_v59, %v929_v44 }
 0x136   :  { %v1575_v26 = vpop.f32.mrb[32].mxu0  ;;  %1153 = vadd.xlane.f32.xlu1 %v1010_v23  ;;  %1222 = vadd.xlane.f32.xlu0 %v1210_v25  ;;  %v1013_v27 = vadd.f32 %v1626_v1, %v932_v21  ;;  %v1212_v34 = vmul.f32 %v1010_v23, %v1010_v23  ;;  %v1199_v25 = vld [vmem:[%s2428_s4 + $0x8] sm:$0xff] }
 0x137   :  { %v1576_v28 = vpop.f32.mrb[33].mxu0  ;;  %v2165_v29 = vpop.f32.mrb[32].mxu1 }
 0x138   :  { %v1577_v30 = vadd.f32 %v1576_v28, %v1575_v26  ;;  %v1578_v31 = vpop.f32.mrb[34].mxu0  ;;  %v1416_v33 = vpack.c.bf16 %v1013_v27, %v1010_v23  ;;  %v1033_v58 = vpop.f32.mrb[33].mxu1  ;;  %v1213_v43 = vmul.f32 %v1013_v27, %v1013_v27  ;;  %v1138_v26 = vld [vmem:[%s2426_s3 + $0x8] sm:$0xff] }
 0x139   :  { %v1579_v35 = vpop.f32.mrb[35].mxu0  ;;  %v2167_v36 = vpop.f32.mrb[34].mxu1 }
 0x13a   :  { %v1580_v60 = vadd.f32 %v1579_v35, %v1578_v31  ;;  %1438 = vst [vmem:[%s2427_s2 + $0x8] sm:$0xff] %v1416_v33   ;;  %1155 = vadd.xlane.f32.xlu1 %v1013_v27  ;;  %1226 = vadd.xlane.f32.xlu0 %v1212_v34  ;;  %v937_v38 = vadd.f32 %v1577_v30, %v2138_v8  ;;  %v1036_v40 = vpop.f32.mrb[35].mxu1  ;;  %v1139_v31 = vld [vmem:[%s2426_s3 + $0x10] sm:$0xff]  ;;  %v1198_v33 = vld [vmem:[%s2428_s4] sm:$0xff] }
 0x13c   :  { %v1018_v41 = vadd.f32 %v1017_v17, %v937_v38  ;;  %v940_v42 = vadd.f32 %v1580_v60, %v2140_v10  ;;  %v1140_v60 = vld [vmem:[%s2426_s3 + $0x18] sm:$0xff]  ;;  %v1200_v38 = vld [vmem:[%s2428_s4 + $0x10] sm:$0xff] }
 0x13e   :  { %v1021_v45 = vadd.f32 %v1020_v20, %v940_v42  ;;  %v1581_v47 = vpop.f32.mrb[36].mxu0  ;;  %1228 = vadd.xlane.f32.xlu1 %v1213_v43  ;;  %1157 = vadd.xlane.f32.xlu0 %v1018_v41  ;;  %v1214_v51 = vmul.f32 %v1018_v41, %v1018_v41 }
 0x13f   :  { %v1582_v48 = vpop.f32.mrb[37].mxu0 }
 0x140   :  { %v1421_v32 = vpack.c.bf16 %v1021_v45, %v1018_v41  ;;  %v1583_v49 = vadd.f32 %v1582_v48, %v1581_v47  ;;  %v1584_v50 = vpop.f32.mrb[38].mxu0  ;;  %v1215_v56 = vmul.f32 %v1021_v45, %v1021_v45  ;;  %v1141_v47 = vld [vmem:[%s2426_s3 + $0x20] sm:$0xff] }
 0x141   :  { %v1585_v52 = vpop.f32.mrb[39].mxu0 }
 0x142   :  { %1439 = vst [vmem:[%s2427_s2 + $0x10] sm:$0xff] %v1421_v32   ;;  %v945_v8 = vadd.f32 %v1583_v49, %v2142_v22  ;;  %v1586_v54 = vadd.f32 %v1585_v52, %v1584_v50  ;;  %1159 = vadd.xlane.f32.xlu1 %v1021_v45  ;;  %1230 = vadd.xlane.f32.xlu0 %v1214_v51  ;;  %v1201_v45 = vld [vmem:[%s2428_s4 + $0x18] sm:$0xff]  ;;  %v1142_v51 = vld [vmem:[%s2426_s3 + $0x28] sm:$0xff]  ;;  %v1202_v52 = vld [vmem:[%s2428_s4 + $0x20] sm:$0xff] }
 0x144   :  { %v948_v10 = vadd.f32 %v1586_v54, %v2144_v24  ;;  %v1026_v57 = vadd.f32 %v2156_v12, %v945_v8 }
 0x146   :  { %v1587_v59 = vpop.f32.mrb[40].mxu0  ;;  %1232 = vadd.xlane.f32.xlu1 %v1215_v56  ;;  %1161 = vadd.xlane.f32.xlu0 %v1026_v57  ;;  %v1029_v61 = vadd.f32 %v2158_v19, %v948_v10  ;;  %v1216_v2 = vmul.f32 %v1026_v57, %v1026_v57 }
 0x147   :  { %v1588_v62 = vpop.f32.mrb[41].mxu0 }
 0x148   :  { %v1589_v63 = vadd.f32 %v1588_v62, %v1587_v59  ;;  %v1590_v0 = vpop.f32.mrb[42].mxu0  ;;  %v1426_v1 = vpack.c.bf16 %v1029_v61, %v1026_v57  ;;  %v1217_v6 = vmul.f32 %v1029_v61, %v1029_v61  ;;  %v1203_v57 = vld [vmem:[%s2428_s4 + $0x28] sm:$0xff]  ;;  %v1143_v59 = vld [vmem:[%s2426_s3 + $0x30] sm:$0xff] }
 0x149   :  { %v1591_v3 = vpop.f32.mrb[43].mxu0 }
 0x14a   :  { %v1592_v22 = vadd.f32 %v1591_v3, %v1590_v0  ;;  %1440 = vst [vmem:[%s2427_s2 + $0x18] sm:$0xff] %v1426_v1   ;;  %1163 = vadd.xlane.f32.xlu1 %v1029_v61  ;;  %1234 = vadd.xlane.f32.xlu0 %v1216_v2  ;;  %v953_v24 = vadd.f32 %v1589_v63, %v2146_v37  ;;  %v1144_v1 = vld [vmem:[%s2426_s3 + $0x38] sm:$0xff]  ;;  %v1204_v2 = vld [vmem:[%s2428_s4 + $0x30] sm:$0xff] }
 0x14c   :  { %v1034_v4 = vadd.f32 %v1033_v58, %v953_v24  ;;  %v956_v5 = vadd.f32 %v1592_v22, %v2148_v39 }
 0x14e   :  { %v1037_v7 = vadd.f32 %v1036_v40, %v956_v5  ;;  %v1593_v9 = vpop.f32.mrb[44].mxu0  ;;  %1236 = vadd.xlane.f32.xlu1 %v1217_v6  ;;  %1165 = vadd.xlane.f32.xlu0 %v1034_v4  ;;  %v1218_v15 = vmul.f32 %v1034_v4, %v1034_v4  ;;  %v1205_v5 = vld [vmem:[%s2428_s4 + $0x38] sm:$0xff]  ;;  %v1145_v6 = vld [vmem:[%s2426_s3 + $0x40] sm:$0xff] }
 0x14f   :  { %v1594_v11 = vpop.f32.mrb[45].mxu0 }
 0x150   :  { %v1431_v12 = vpack.c.bf16 %v1037_v7, %v1034_v4  ;;  %v1595_v13 = vadd.f32 %v1594_v11, %v1593_v9  ;;  %v1596_v14 = vpop.f32.mrb[46].mxu0  ;;  %v1219_v18 = vmul.f32 %v1037_v7, %v1037_v7 }
 0x151   :  { %v1597_v16 = vpop.f32.mrb[47].mxu0 }
 0x152   :  { %1441 = vst [vmem:[%s2427_s2 + $0x20] sm:$0xff] %v1431_v12   ;;  %v961_v37 = vadd.f32 %v1595_v13, %v2150_v53  ;;  %v1598_v17 = vadd.f32 %v1597_v16, %v1596_v14  ;;  %1167 = vadd.xlane.f32.xlu1 %v1037_v7  ;;  %1238 = vadd.xlane.f32.xlu0 %v1218_v15  ;;  %v1146_v13 = vld [vmem:[%s2426_s3 + $0x48] sm:$0xff]  ;;  %v1206_v14 = vld [vmem:[%s2428_s4 + $0x40] sm:$0xff] }
 0x154   :  { %v964_v39 = vadd.f32 %v1598_v17, %v2152_v55  ;;  %v1042_v19 = vadd.f32 %v2165_v29, %v961_v37  ;;  %v1137_v55 = vld [vmem:[%s2426_s3] sm:$0xff] }
 0x156   :  { %1240 = vadd.xlane.f32.xlu1 %v1219_v18  ;;  %1169 = vadd.xlane.f32.xlu0 %v1042_v19  ;;  %v1045_v44 = vadd.f32 %v2167_v36, %v964_v39  ;;  %v1220_v20 = vmul.f32 %v1042_v19, %v1042_v19  ;;  %v1207_v39 = vld [vmem:[%s2428_s4 + $0x48] sm:$0xff]  ;;  %v1147_v18 = vld [vmem:[%s2426_s3 + $0x50] sm:$0xff] }
 0x158   :  { %v1436_v46 = vpack.c.bf16 %v1045_v44, %v1042_v19  ;;  %v1221_v53 = vmul.f32 %v1045_v44, %v1045_v44 }
 0x15a   :  { %1442 = vst [vmem:[%s2427_s2 + $0x28] sm:$0xff] %v1436_v46   ;;  %1171 = vadd.xlane.f32.xlu1 %v1045_v44  ;;  %1242 = vadd.xlane.f32.xlu0 %v1220_v20 }
 0x15e   :  { %1244 = vadd.xlane.f32.xlu1 %v1221_v53  ;;  %v1148_v53 = vld [vmem:[%s2426_s3 + $0x58] sm:$0xff] }
 0x1bb   :  { %v1150_v21 = vpop.xlane.xlu0 %1149 }
 0x1bc   :  { %v1173_v23 = vadd.f32 %v1150_v21, %v1137_v55  ;;  %v1208_v55 = vld [vmem:[%s2428_s4 + $0x50] sm:$0xff] }
 0x1be   :  { %1186 = vst.msk [vmem:[%s2426_s3] sm:$0xff] %vm1112_vm1, %v1173_v23 }
 0x1bf   :  { %v1225_v27 = vpop.xlane.xlu1 %1224  ;;  %v1152_v28 = vpop.xlane.xlu0 %1151 }
 0x1c0   :  { %v1247_v29 = vadd.f32 %v1225_v27, %v1199_v25  ;;  %v1174_v30 = vadd.f32 %v1152_v28, %v1138_v26  ;;  %v1209_v27 = vld [vmem:[%s2428_s4 + $0x58] sm:$0xff] }
 0x1c2   :  { %1259 = vst.msk [vmem:[%s2428_s4 + $0x8] sm:$0xff] %vm1112_vm1, %v1247_v29  ;;  %1187 = vst.msk [vmem:[%s2426_s3 + $0x8] sm:$0xff] %vm1112_vm1, %v1174_v30 }
 0x1c3   :  { %v1154_v34 = vpop.xlane.xlu1 %1153  ;;  %v1223_v58 = vpop.xlane.xlu0 %1222 }
 0x1c4   :  { %v1175_v35 = vadd.f32 %v1154_v34, %v1139_v31  ;;  %v1246_v36 = vadd.f32 %v1223_v58, %v1198_v33 }
 0x1c6   :  { %1188 = vst.msk [vmem:[%s2426_s3 + $0x10] sm:$0xff] %vm1112_vm1, %v1175_v35  ;;  %1258 = vst.msk [vmem:[%s2428_s4] sm:$0xff] %vm1112_vm1, %v1246_v36 }
 0x1c7   :  { %v1156_v40 = vpop.xlane.xlu1 %1155  ;;  %v1227_v41 = vpop.xlane.xlu0 %1226 }
 0x1c8   :  { %v1176_v42 = vadd.f32 %v1156_v40, %v1140_v60  ;;  %v1248_v43 = vadd.f32 %v1227_v41, %v1200_v38 }
 0x1ca   :  { %1189 = vst.msk [vmem:[%s2426_s3 + $0x18] sm:$0xff] %vm1112_vm1, %v1176_v42  ;;  %1260 = vst.msk [vmem:[%s2428_s4 + $0x10] sm:$0xff] %vm1112_vm1, %v1248_v43 }
 0x1cb   :  { %v1229_v48 = vpop.xlane.xlu1 %1228  ;;  %v1158_v32 = vpop.xlane.xlu0 %1157 }
 0x1cc   :  { %v1249_v49 = vadd.f32 %v1229_v48, %v1201_v45  ;;  %v1177_v50 = vadd.f32 %v1158_v32, %v1141_v47 }
 0x1ce   :  { %1261 = vst.msk [vmem:[%s2428_s4 + $0x18] sm:$0xff] %vm1112_vm1, %v1249_v49  ;;  %1190 = vst.msk [vmem:[%s2426_s3 + $0x20] sm:$0xff] %vm1112_vm1, %v1177_v50 }
 0x1cf   :  { %v1160_v8 = vpop.xlane.xlu1 %1159  ;;  %v1231_v54 = vpop.xlane.xlu0 %1230 }
 0x1d0   :  { %v1178_v10 = vadd.f32 %v1160_v8, %v1142_v51  ;;  %v1250_v56 = vadd.f32 %v1231_v54, %v1202_v52 }
 0x1d2   :  { %1191 = vst.msk [vmem:[%s2426_s3 + $0x28] sm:$0xff] %vm1112_vm1, %v1178_v10  ;;  %1262 = vst.msk [vmem:[%s2428_s4 + $0x20] sm:$0xff] %vm1112_vm1, %v1250_v56 }
 0x1d3   :  { %v1233_v61 = vpop.xlane.xlu1 %1232  ;;  %v1162_v62 = vpop.xlane.xlu0 %1161 }
 0x1d4   :  { %v1251_v63 = vadd.f32 %v1233_v61, %v1203_v57  ;;  %v1179_v0 = vadd.f32 %v1162_v62, %v1143_v59 }
 0x1d6   :  { %1263 = vst.msk [vmem:[%s2428_s4 + $0x28] sm:$0xff] %vm1112_vm1, %v1251_v63  ;;  %1192 = vst.msk [vmem:[%s2426_s3 + $0x30] sm:$0xff] %vm1112_vm1, %v1179_v0 }
 0x1d7   :  { %v1164_v3 = vpop.xlane.xlu1 %1163  ;;  %v1235_v22 = vpop.xlane.xlu0 %1234 }
 0x1d8   :  { %v1180_v24 = vadd.f32 %v1164_v3, %v1144_v1  ;;  %v1252_v4 = vadd.f32 %v1235_v22, %v1204_v2 }
 0x1da   :  { %1193 = vst.msk [vmem:[%s2426_s3 + $0x38] sm:$0xff] %vm1112_vm1, %v1180_v24  ;;  %1264 = vst.msk [vmem:[%s2428_s4 + $0x30] sm:$0xff] %vm1112_vm1, %v1252_v4 }
 0x1db   :  { %v1237_v7 = vpop.xlane.xlu1 %1236  ;;  %v1166_v9 = vpop.xlane.xlu0 %1165 }
 0x1dc   :  { %v1253_v11 = vadd.f32 %v1237_v7, %v1205_v5  ;;  %v1181_v12 = vadd.f32 %v1166_v9, %v1145_v6 }
 0x1de   :  { %1265 = vst.msk [vmem:[%s2428_s4 + $0x38] sm:$0xff] %vm1112_vm1, %v1253_v11  ;;  %1194 = vst.msk [vmem:[%s2426_s3 + $0x40] sm:$0xff] %vm1112_vm1, %v1181_v12 }
 0x1df   :  { %v1168_v15 = vpop.xlane.xlu1 %1167  ;;  %v1239_v16 = vpop.xlane.xlu0 %1238 }
 0x1e0   :  { %v1182_v37 = vadd.f32 %v1168_v15, %v1146_v13  ;;  %v1254_v17 = vadd.f32 %v1239_v16, %v1206_v14 }
 0x1e2   :  { %1195 = vst.msk [vmem:[%s2426_s3 + $0x48] sm:$0xff] %vm1112_vm1, %v1182_v37  ;;  %1266 = vst.msk [vmem:[%s2428_s4 + $0x40] sm:$0xff] %vm1112_vm1, %v1254_v17 }
 0x1e3   :  { %v1241_v19 = vpop.xlane.xlu1 %1240  ;;  %v1170_v44 = vpop.xlane.xlu0 %1169 }
 0x1e4   :  { %v1255_v46 = vadd.f32 %v1241_v19, %v1207_v39  ;;  %v1183_v20 = vadd.f32 %v1170_v44, %v1147_v18 }
 0x1e6   :  { %1267 = vst.msk [vmem:[%s2428_s4 + $0x48] sm:$0xff] %vm1112_vm1, %v1255_v46  ;;  %1196 = vst.msk [vmem:[%s2426_s3 + $0x50] sm:$0xff] %vm1112_vm1, %v1183_v20 }
 0x1e7   :  { %v1172_v21 = vpop.xlane.xlu1 %1171  ;;  %v1243_v23 = vpop.xlane.xlu0 %1242 }
 0x1e8   :  { %v1184_v25 = vadd.f32 %v1172_v21, %v1148_v53  ;;  %v1256_v26 = vadd.f32 %v1243_v23, %v1208_v55 }
 0x1ea   :  { %1197 = vst.msk [vmem:[%s2426_s3 + $0x58] sm:$0xff] %vm1112_vm1, %v1184_v25  ;;  %1268 = vst.msk [vmem:[%s2428_s4 + $0x50] sm:$0xff] %vm1112_vm1, %v1256_v26 }
 0x1eb   :  { %v1245_v28 = vpop.xlane.xlu1 %1244 }
 0x1ec   :  { %v1257_v29 = vadd.f32 %v1245_v28, %v1209_v27 }
 0x1ee   :  { %1269 = vst.msk [vmem:[%s2428_s4 + $0x58] sm:$0xff] %vm1112_vm1, %v1257_v29 }

// kernel: generator_forward.68
= control target key start
LH: loop header
LB: loop body
LE: loop exit
PB: predicated region body
PF: predicated region fallthrough
CT: control target
= control target key end

     0   :  { %v680_v1 = vmov 0.0   ;;  %vm681_vm0 = vmmov 0   ;;  %vm415_vm1 = vcmask 7168   ;;  %s973_s1 = inlined_call_operand.vmem [shape: bf16[384,128], index: 1, kind: input, shape index: {}]   ;;  %s974_s0 = inlined_call_operand.vmem [shape: bf16[48,384], index: 0, kind: input, shape index: {}]   ;;  %s975_s3 = inlined_call_operand.vmem [shape: f32[48,1], index: 3, kind: output, shape index: {1}]   ;;  %s976_s2 = inlined_call_operand.vmem [shape: bf16[48,128], index: 2, kind: output, shape index: {0}]   ;;  %s977_s4 = inlined_call_operand.vmem [shape: f32[48,1], index: 4, kind: output, shape index: {2}]  }
   0x1   :  { %v644_v0 = vld [vmem:[%s973_s1 + $0x40] sm:$0xff]   ;;  %614 = vmatprep.subr.bf16.mxu1 %v680_v1  ;;  %630 = vmatprep.mubr.msk.bf16.mxu1 %vm681_vm0, %v680_v1  ;;  %v647_v4 = vld [vmem:[%s973_s1 + $0x48] sm:$0xff]   ;;  %v650_v7 = vld [vmem:[%s973_s1 + $0x50] sm:$0xff]   ;;  %416 = vst.msk [vmem:[%s975_s3] sm:$0xff] %vm415_vm1, %v680_v1 }
   0x2   :  { %v645_v2 = vld [vmem:[%s973_s1] sm:$0xff]   ;;  %569 = vmatprep.subr.bf16.mxu0 %v644_v0  ;;  %v648_v5 = vld [vmem:[%s973_s1 + $0x8] sm:$0xff]   ;;  %v651_v8 = vld [vmem:[%s973_s1 + $0x10] sm:$0xff]   ;;  %417 = vst.msk [vmem:[%s975_s3 + $0x8] sm:$0xff] %vm415_vm1, %v680_v1 }
   0x3   :  { %v646_v3 = vld [vmem:[%s973_s1 + $0x80] sm:$0xff]   ;;  %570 = vmatpush3.bf16.msra.mxu0 %v645_v2  ;;  %v649_v6 = vld [vmem:[%s973_s1 + $0x88] sm:$0xff]   ;;  %v652_v9 = vld [vmem:[%s973_s1 + $0x90] sm:$0xff]   ;;  %418 = vst.msk [vmem:[%s975_s3 + $0x10] sm:$0xff] %vm415_vm1, %v680_v1 }
   0x4   :  { %615 = vmatpush3.bf16.msra.mxu1 %v646_v3  ;;  %571 = vmatprep.subr.bf16.mxu0 %v647_v4  ;;  %v653_v10 = vld [vmem:[%s973_s1 + $0x58] sm:$0xff]   ;;  %v656_v13 = vld [vmem:[%s973_s1 + $0x60] sm:$0xff]   ;;  %v659_v16 = vld [vmem:[%s973_s1 + $0x68] sm:$0xff]   ;;  %419 = vst.msk [vmem:[%s975_s3 + $0x18] sm:$0xff] %vm415_vm1, %v680_v1 }
   0x5   :  { %616 = vmatprep.subr.bf16.mxu1 %v680_v1  ;;  %v654_v11 = vld [vmem:[%s973_s1 + $0x18] sm:$0xff]   ;;  %v657_v14 = vld [vmem:[%s973_s1 + $0x20] sm:$0xff]   ;;  %v660_v17 = vld [vmem:[%s973_s1 + $0x28] sm:$0xff]   ;;  %420 = vst.msk [vmem:[%s975_s3 + $0x20] sm:$0xff] %vm415_vm1, %v680_v1 }
   0x6   :  { %v655_v12 = vld [vmem:[%s973_s1 + $0x98] sm:$0xff]   ;;  %v658_v15 = vld [vmem:[%s973_s1 + $0xa0] sm:$0xff]   ;;  %v661_v18 = vld [vmem:[%s973_s1 + $0xa8] sm:$0xff]   ;;  %421 = vst.msk [vmem:[%s975_s3 + $0x28] sm:$0xff] %vm415_vm1, %v680_v1 }
   0x7   :  { %572 = vmatpush3.bf16.msra.mxu0 %v648_v5  ;;  %v662_v19 = vld [vmem:[%s973_s1 + $0x70] sm:$0xff]   ;;  %v665_v22 = vld [vmem:[%s973_s1 + $0x78] sm:$0xff]   ;;  %v668_v26 = vld [vmem:[%s974_s0] ss:$12 sps:$4 sm:$0xff]   ;;  %423 = vst.msk [vmem:[%s977_s4 + $0x8] sm:$0xff] %vm415_vm1, %v680_v1 }
   0x8   :  { %617 = vmatpush3.bf16.msra.mxu1 %v649_v6  ;;  %573 = vmatprep.subr.bf16.mxu0 %v650_v7  ;;  %v663_v20 = vld [vmem:[%s973_s1 + $0x30] sm:$0xff]   ;;  %v666_v24 = vld [vmem:[%s973_s1 + $0x38] sm:$0xff]   ;;  %v675_v30 = vld [vmem:[%s974_s0 + $0x20] ss:$12 sps:$4 sm:$0xff]   ;;  %422 = vst.msk [vmem:[%s977_s4] sm:$0xff] %vm415_vm1, %v680_v1 }
   0x9   :  { %618 = vmatprep.subr.bf16.mxu1 %v680_v1  ;;  %v664_v21 = vld [vmem:[%s973_s1 + $0xb0] sm:$0xff]   ;;  %v667_v25 = vld [vmem:[%s973_s1 + $0xb8] sm:$0xff]   ;;  %424 = vst.msk [vmem:[%s977_s4 + $0x10] sm:$0xff] %vm415_vm1, %v680_v1  ;;  %425 = vst.msk [vmem:[%s977_s4 + $0x18] sm:$0xff] %vm415_vm1, %v680_v1 }
   0xa   :  { %v670_v23 = vld [vmem:[%s974_s0 + $0x4] ss:$12 sps:$4 sm:$0xff]   ;;  %v671_v27 = vld [vmem:[%s974_s0 + $0x8] ss:$12 sps:$4 sm:$0xff]   ;;  %426 = vst.msk [vmem:[%s977_s4 + $0x20] sm:$0xff] %vm415_vm1, %v680_v1  ;;  %427 = vst.msk [vmem:[%s977_s4 + $0x28] sm:$0xff] %vm415_vm1, %v680_v1 }
   0xb   :  { %574 = vmatpush3.bf16.msra.mxu0 %v651_v8  ;;  %299 = vmatprep.mubr.bf16.mxu0 %v670_v23  ;;  %v672_v28 = vld [vmem:[%s974_s0 + $0x1c] ss:$12 sps:$4 sm:$0xff]   ;;  %v674_v29 = vld [vmem:[%s974_s0 + $0x18] ss:$12 sps:$4 sm:$0xff]   ;;  %v676_v31 = vld [vmem:[%s974_s0 + $0x34] ss:$12 sps:$4 sm:$0xff]  }
   0xc   :  { %619 = vmatpush3.bf16.msra.mxu1 %v652_v9  ;;  %575 = vmatprep.subr.bf16.mxu0 %v653_v10  ;;  %v678_v32 = vld [vmem:[%s974_s0 + $0x30] ss:$12 sps:$4 sm:$0xff]   ;;  %v679_v33 = vld [vmem:[%s974_s0 + $0x38] ss:$12 sps:$4 sm:$0xff]  }
   0xd   :  { %620 = vmatprep.subr.bf16.mxu1 %v680_v1 }
   0xf   :  { %576 = vmatpush3.bf16.msra.mxu0 %v654_v11 }
  0x10   :  { %621 = vmatpush3.bf16.msra.mxu1 %v655_v12  ;;  %577 = vmatprep.subr.bf16.mxu0 %v656_v13 }
  0x11   :  { %622 = vmatprep.subr.bf16.mxu1 %v680_v1 }
  0x13   :  { %578 = vmatpush3.bf16.msra.mxu0 %v657_v14 }
  0x14   :  { %623 = vmatpush3.bf16.msra.mxu1 %v658_v15  ;;  %579 = vmatprep.subr.bf16.mxu0 %v659_v16  ;;  %v428_v15 = vld [vmem:[%s975_s3] sm:$0xff] }
  0x15   :  { %624 = vmatprep.subr.bf16.mxu1 %v680_v1 }
  0x17   :  { %580 = vmatpush3.bf16.msra.mxu0 %v660_v17 }
  0x18   :  { %625 = vmatpush3.bf16.msra.mxu1 %v661_v18  ;;  %581 = vmatprep.subr.bf16.mxu0 %v662_v19  ;;  %v460_v18 = vld [vmem:[%s977_s4 + $0x8] sm:$0xff] }
  0x19   :  { %626 = vmatprep.subr.bf16.mxu1 %v680_v1  ;;  %v429_v19 = vld [vmem:[%s975_s3 + $0x8] sm:$0xff] }
  0x1b   :  { %582 = vmatpush3.bf16.msra.mxu0 %v663_v20 }
  0x1c   :  { %627 = vmatpush3.bf16.msra.mxu1 %v664_v21  ;;  %583 = vmatprep.subr.bf16.mxu0 %v665_v22 }
  0x1d   :  { %628 = vmatprep.subr.bf16.mxu1 %v680_v1 }
  0x1f   :  { %584 = vmatpush3.bf16.msra.mxu0 %v666_v24  ;;  %v430_v24 = vld [vmem:[%s975_s3 + $0x10] sm:$0xff] }
  0x20   :  { %629 = vmatpush3.bf16.msra.mxu1 %v667_v25  ;;  %v459_v25 = vld [vmem:[%s977_s4] sm:$0xff] }
  0x22   :  { %300 = vmatmul.mubr.bf16.vlgmr.msra.gmra.mrb[0].mxu0 %v668_v26 }
  0x23   :  { %631 = vmatmul.mubr.bf16.vlgmr.msra.gmra.mrb[0].mxu1 %v671_v27  ;;  %307 = vmatprep.mubr.bf16.mxu0 %v672_v28 }
  0x24   :  { %634 = vmatprep.mubr.msk.bf16.mxu1 %vm681_vm0, %v680_v1 }
  0x2a   :  { %308 = vmatmul.mubr.bf16.gmra.mrb[4].mxu0 %v674_v29 }
  0x2b   :  { %635 = vmatmul.mubr.bf16.gmra.mrb[4].mxu1 %v675_v30  ;;  %315 = vmatprep.mubr.bf16.mxu0 %v676_v31  ;;  %v431_v30 = vld [vmem:[%s975_s3 + $0x18] sm:$0xff]  ;;  %v461_v31 = vld [vmem:[%s977_s4 + $0x10] sm:$0xff] }
  0x2c   :  { %638 = vmatprep.mubr.msk.bf16.mxu1 %vm681_vm0, %v680_v1 }
  0x32   :  { %316 = vmatmul.mubr.bf16.gmra.mrb[8].mxu0 %v678_v32 }
  0x33   :  { %639 = vmatmul.mubr.bf16.gmra.mrb[8].mxu1 %v679_v33 }
  0xf5   :  { %v585_v34 = vpop.f32.mrb[0].mxu0 }
  0xf6   :  { %v358_v35 = vpop.f32.mrb[0].mxu1  ;;  %v586_v36 = vpop.f32.mrb[1].mxu0 }
  0xf7   :  { %v587_v37 = vadd.f32 %v586_v36, %v585_v34  ;;  %v632_v38 = vpop.f32.mrb[1].mxu1  ;;  %v588_v39 = vpop.f32.mrb[2].mxu0  ;;  %v462_v36 = vld [vmem:[%s977_s4 + $0x18] sm:$0xff] }
  0xf8   :  { %v361_v40 = vpop.f32.mrb[2].mxu1  ;;  %v589_v41 = vpop.f32.mrb[3].mxu0 }
  0xf9   :  { %v359_v42 = vadd.f32 %v587_v37, %v358_v35  ;;  %v590_v43 = vadd.f32 %v589_v41, %v588_v39  ;;  %v633_v44 = vpop.f32.mrb[3].mxu1  ;;  %v432_v37 = vld [vmem:[%s975_s3 + $0x20] sm:$0xff] }
  0xfb   :  { %v362_v45 = vadd.f32 %v590_v43, %v361_v40  ;;  %434 = vadd.xlane.f32.xlu0 %v359_v42  ;;  %v465_v59 = vmul.f32 %v359_v42, %v359_v42  ;;  %v463_v43 = vld [vmem:[%s977_s4 + $0x20] sm:$0xff] }
  0xfd   :  { %v555_v46 = vpack.c.bf16 %v362_v45, %v359_v42  ;;  %v591_v47 = vpop.f32.mrb[4].mxu0  ;;  %v466_v48 = vmul.f32 %v362_v45, %v362_v45  ;;  %v433_v42 = vld [vmem:[%s975_s3 + $0x28] sm:$0xff] }
  0xfe   :  { %v366_v49 = vpop.f32.mrb[4].mxu1  ;;  %v592_v50 = vpop.f32.mrb[5].mxu0 }
  0xff   :  { %556 = vst [vmem:[%s976_s2] sm:$0xff] %v555_v46   ;;  %v593_v51 = vadd.f32 %v592_v50, %v591_v47  ;;  %v636_v52 = vpop.f32.mrb[5].mxu1  ;;  %v594_v53 = vpop.f32.mrb[6].mxu0  ;;  %473 = vadd.xlane.f32.xlu1 %v466_v48  ;;  %436 = vadd.xlane.f32.xlu0 %v362_v45  ;;  %v464_v48 = vld [vmem:[%s977_s4 + $0x28] sm:$0xff] }
 0x100   :  { %v369_v54 = vpop.f32.mrb[6].mxu1  ;;  %v595_v55 = vpop.f32.mrb[7].mxu0 }
 0x101   :  { %v367_v56 = vadd.f32 %v593_v51, %v366_v49  ;;  %v596_v57 = vadd.f32 %v595_v55, %v594_v53  ;;  %v637_v58 = vpop.f32.mrb[7].mxu1 }
 0x103   :  { %v370_v60 = vadd.f32 %v596_v57, %v369_v54  ;;  %438 = vadd.xlane.f32.xlu1 %v367_v56  ;;  %471 = vadd.xlane.f32.xlu0 %v465_v59  ;;  %v467_v63 = vmul.f32 %v367_v56, %v367_v56 }
 0x105   :  { %v560_v61 = vpack.c.bf16 %v370_v60, %v367_v56  ;;  %v597_v62 = vpop.f32.mrb[8].mxu0  ;;  %v468_v11 = vmul.f32 %v370_v60, %v370_v60 }
 0x106   :  { %v598_v0 = vpop.f32.mrb[9].mxu0  ;;  %v374_v2 = vpop.f32.mrb[8].mxu1 }
 0x107   :  { %567 = vst [vmem:[%s976_s2 + $0x8] sm:$0xff] %v560_v61   ;;  %v599_v3 = vadd.f32 %v598_v0, %v597_v62  ;;  %v600_v4 = vpop.f32.mrb[10].mxu0  ;;  %440 = vadd.xlane.f32.xlu1 %v370_v60  ;;  %475 = vadd.xlane.f32.xlu0 %v467_v63  ;;  %v640_v5 = vpop.f32.mrb[9].mxu1 }
 0x108   :  { %v601_v6 = vpop.f32.mrb[11].mxu0  ;;  %v377_v7 = vpop.f32.mrb[10].mxu1 }
 0x109   :  { %v375_v8 = vadd.f32 %v599_v3, %v374_v2  ;;  %v602_v9 = vadd.f32 %v601_v6, %v600_v4  ;;  %v641_v10 = vpop.f32.mrb[11].mxu1 }
 0x10b   :  { %v378_v12 = vadd.f32 %v602_v9, %v377_v7  ;;  %477 = vadd.xlane.f32.xlu1 %v468_v11  ;;  %442 = vadd.xlane.f32.xlu0 %v375_v8  ;;  %v469_v13 = vmul.f32 %v375_v8, %v375_v8 }
 0x10d   :  { %v565_v1 = vpack.c.bf16 %v378_v12, %v375_v8  ;;  %v470_v14 = vmul.f32 %v378_v12, %v378_v12 }
 0x10f   :  { %568 = vst [vmem:[%s976_s2 + $0x10] sm:$0xff] %v565_v1   ;;  %444 = vadd.xlane.f32.xlu1 %v378_v12  ;;  %479 = vadd.xlane.f32.xlu0 %v469_v13 }
 0x113   :  { %481 = vadd.xlane.f32.xlu1 %v470_v14 }
 0x188   :  { %v435_v16 = vpop.xlane.xlu0 %434 }
 0x189   :  { %v446_v17 = vadd.f32 %v435_v16, %v428_v15 }
 0x18b   :  { %453 = vst.msk [vmem:[%s975_s3] sm:$0xff] %vm415_vm1, %v446_v17 }
 0x18c   :  { %v474_v20 = vpop.xlane.xlu1 %473  ;;  %v437_v21 = vpop.xlane.xlu0 %436 }
 0x18d   :  { %v484_v22 = vadd.f32 %v474_v20, %v460_v18  ;;  %v447_v23 = vadd.f32 %v437_v21, %v429_v19 }
 0x18f   :  { %490 = vst.msk [vmem:[%s977_s4 + $0x8] sm:$0xff] %vm415_vm1, %v484_v22  ;;  %454 = vst.msk [vmem:[%s975_s3 + $0x8] sm:$0xff] %vm415_vm1, %v447_v23 }
 0x190   :  { %v439_v26 = vpop.xlane.xlu1 %438  ;;  %v472_v27 = vpop.xlane.xlu0 %471 }
 0x191   :  { %v448_v28 = vadd.f32 %v439_v26, %v430_v24  ;;  %v483_v29 = vadd.f32 %v472_v27, %v459_v25 }
 0x193   :  { %455 = vst.msk [vmem:[%s975_s3 + $0x10] sm:$0xff] %vm415_vm1, %v448_v28  ;;  %489 = vst.msk [vmem:[%s977_s4] sm:$0xff] %vm415_vm1, %v483_v29 }
 0x194   :  { %v441_v32 = vpop.xlane.xlu1 %440  ;;  %v476_v33 = vpop.xlane.xlu0 %475 }
 0x195   :  { %v449_v34 = vadd.f32 %v441_v32, %v431_v30  ;;  %v485_v35 = vadd.f32 %v476_v33, %v461_v31 }
 0x197   :  { %456 = vst.msk [vmem:[%s975_s3 + $0x18] sm:$0xff] %vm415_vm1, %v449_v34  ;;  %491 = vst.msk [vmem:[%s977_s4 + $0x10] sm:$0xff] %vm415_vm1, %v485_v35 }
 0x198   :  { %v478_v38 = vpop.xlane.xlu1 %477  ;;  %v443_v39 = vpop.xlane.xlu0 %442 }
 0x199   :  { %v486_v40 = vadd.f32 %v478_v38, %v462_v36  ;;  %v450_v41 = vadd.f32 %v443_v39, %v432_v37 }
 0x19b   :  { %492 = vst.msk [vmem:[%s977_s4 + $0x18] sm:$0xff] %vm415_vm1, %v486_v40  ;;  %457 = vst.msk [vmem:[%s975_s3 + $0x20] sm:$0xff] %vm415_vm1, %v450_v41 }
 0x19c   :  { %v445_v44 = vpop.xlane.xlu1 %444  ;;  %v480_v45 = vpop.xlane.xlu0 %479 }
 0x19d   :  { %v451_v46 = vadd.f32 %v445_v44, %v433_v42  ;;  %v487_v47 = vadd.f32 %v480_v45, %v463_v43 }
 0x19f   :  { %458 = vst.msk [vmem:[%s975_s3 + $0x28] sm:$0xff] %vm415_vm1, %v451_v46  ;;  %493 = vst.msk [vmem:[%s977_s4 + $0x20] sm:$0xff] %vm415_vm1, %v487_v47 }
 0x1a0   :  { %v482_v49 = vpop.xlane.xlu1 %481 }
 0x1a1   :  { %v488_v50 = vadd.f32 %v482_v49, %v464_v48 }
 0x1a3   :  { %494 = vst.msk [vmem:[%s977_s4 + $0x28] sm:$0xff] %vm415_vm1, %v488_v50 }

// kernel: generator_forward.73
= control target key start
LH: loop header
LB: loop body
LE: loop exit
PB: predicated region body
PF: predicated region fallthrough
CT: control target
= control target key end

     0   :  { %v374_v0 = vmov 0.0   ;;  %vm375_vm0 = vmmov 0   ;;  %vm84_vm1 = vcmask 785408   ;;  %vm185_vm2 = vcmask 7168   ;;  %s599_s1 = inlined_call_operand.vmem [shape: bf16[96,128], index: 1, kind: input, shape index: {}]   ;;  %s600_s0 = inlined_call_operand.vmem [shape: bf16[48,96], index: 0, kind: input, shape index: {}]   ;;  %s601_s3 = inlined_call_operand.vmem [shape: f32[48,1], index: 3, kind: output, shape index: {1}]   ;;  %s602_s2 = inlined_call_operand.vmem [shape: bf16[48,128], index: 2, kind: output, shape index: {0}]   ;;  %s603_s4 = inlined_call_operand.vmem [shape: f32[48,1], index: 4, kind: output, shape index: {2}]  }
   0x1   :  { %327 = vmatprep.subr.bf16.mxu0 %v374_v0  ;;  %351 = vmatprep.subr.bf16.mxu1 %v374_v0  ;;  %v365_v1 = vld [vmem:[%s599_s1] sm:$0xff]   ;;  %v366_v2 = vld [vmem:[%s599_s1 + $0x8] sm:$0xff]   ;;  %v367_v3 = vld [vmem:[%s599_s1 + $0x10] sm:$0xff]   ;;  %188 = vst.msk [vmem:[%s601_s3 + $0x10] sm:$0xff] %vm185_vm2, %v374_v0 }
   0x2   :  { %339 = vmatprep.mubr.msk.bf16.mxu0 %vm375_vm0, %v374_v0  ;;  %343 = vmatprep.mubr.msk.bf16.mxu1 %vm375_vm0, %v374_v0  ;;  %v368_v4 = vld [vmem:[%s599_s1 + $0x18] sm:$0xff]   ;;  %v369_v5 = vld [vmem:[%s599_s1 + $0x20] sm:$0xff]   ;;  %v370_v6 = vld [vmem:[%s599_s1 + $0x28] sm:$0xff]   ;;  %186 = vst.msk [vmem:[%s601_s3] sm:$0xff] %vm185_vm2, %v374_v0 }
   0x3   :  { %328 = vmatpush3.bf16.msra.mxu0 %v365_v1  ;;  %357 = vmatpush3.bf16.msra.mxu1 %v365_v1  ;;  %v371_v7 = vld [vmem:[%s600_s0] sm:$0xff]   ;;  %v372_v8 = vld [vmem:[%s600_s0 + $0x8] sm:$0xff]   ;;  %v373_v9 = vld [vmem:[%s600_s0 + $0x10] sm:$0xff]   ;;  %187 = vst.msk [vmem:[%s601_s3 + $0x8] sm:$0xff] %vm185_vm2, %v374_v0 }
   0x4   :  { %329 = vmatprep.subr.bf16.mxu0 %v374_v0  ;;  %352 = vmatprep.subr.bf16.mxu1 %v374_v0  ;;  %189 = vst.msk [vmem:[%s601_s3 + $0x18] sm:$0xff] %vm185_vm2, %v374_v0  ;;  %190 = vst.msk [vmem:[%s601_s3 + $0x20] sm:$0xff] %vm185_vm2, %v374_v0 }
   0x5   :  { %191 = vst.msk [vmem:[%s601_s3 + $0x28] sm:$0xff] %vm185_vm2, %v374_v0  ;;  %192 = vst.msk [vmem:[%s603_s4] sm:$0xff] %vm185_vm2, %v374_v0 }
   0x6   :  { %193 = vst.msk [vmem:[%s603_s4 + $0x8] sm:$0xff] %vm185_vm2, %v374_v0  ;;  %194 = vst.msk [vmem:[%s603_s4 + $0x10] sm:$0xff] %vm185_vm2, %v374_v0 }
   0x7   :  { %330 = vmatpush3.bf16.msra.mxu0 %v366_v2  ;;  %358 = vmatpush3.bf16.msra.mxu1 %v366_v2  ;;  %195 = vst.msk [vmem:[%s603_s4 + $0x18] sm:$0xff] %vm185_vm2, %v374_v0  ;;  %196 = vst.msk [vmem:[%s603_s4 + $0x20] sm:$0xff] %vm185_vm2, %v374_v0 }
   0x8   :  { %331 = vmatprep.subr.bf16.mxu0 %v374_v0  ;;  %353 = vmatprep.subr.bf16.mxu1 %v374_v0  ;;  %197 = vst.msk [vmem:[%s603_s4 + $0x28] sm:$0xff] %vm185_vm2, %v374_v0  ;;  %v200_v31 = vld [vmem:[%s601_s3 + $0x10] sm:$0xff] }
   0x9   :  { %v198_v32 = vld [vmem:[%s601_s3] sm:$0xff] }
   0xa   :  { %v199_v38 = vld [vmem:[%s601_s3 + $0x8] sm:$0xff] }
   0xb   :  { %332 = vmatpush3.bf16.msra.mxu0 %v367_v3  ;;  %359 = vmatpush3.bf16.msra.mxu1 %v367_v3  ;;  %v201_v37 = vld [vmem:[%s601_s3 + $0x18] sm:$0xff]  ;;  %v202_v55 = vld [vmem:[%s601_s3 + $0x20] sm:$0xff] }
   0xc   :  { %333 = vmatprep.subr.bf16.mxu0 %v374_v0  ;;  %354 = vmatprep.subr.bf16.mxu1 %v374_v0  ;;  %v229_v43 = vld [vmem:[%s603_s4] sm:$0xff]  ;;  %v203_v56 = vld [vmem:[%s601_s3 + $0x28] sm:$0xff] }
   0xd   :  { %v230_v44 = vld [vmem:[%s603_s4 + $0x8] sm:$0xff]  ;;  %v231_v49 = vld [vmem:[%s603_s4 + $0x10] sm:$0xff] }
   0xe   :  { %v232_v50 = vld [vmem:[%s603_s4 + $0x18] sm:$0xff]  ;;  %v233_v61 = vld [vmem:[%s603_s4 + $0x20] sm:$0xff] }
   0xf   :  { %334 = vmatpush3.bf16.msra.mxu0 %v368_v4  ;;  %360 = vmatpush3.bf16.msra.mxu1 %v368_v4  ;;  %v234_v62 = vld [vmem:[%s603_s4 + $0x28] sm:$0xff] }
  0x10   :  { %335 = vmatprep.subr.bf16.mxu0 %v374_v0  ;;  %355 = vmatprep.subr.bf16.mxu1 %v374_v0 }
  0x13   :  { %336 = vmatpush3.bf16.msra.mxu0 %v369_v5  ;;  %361 = vmatpush3.bf16.msra.mxu1 %v369_v5 }
  0x14   :  { %337 = vmatprep.subr.bf16.mxu0 %v374_v0  ;;  %356 = vmatprep.subr.bf16.mxu1 %v374_v0 }
  0x17   :  { %338 = vmatpush3.bf16.msra.mxu0 %v370_v6  ;;  %362 = vmatpush3.bf16.msra.mxu1 %v370_v6 }
  0x1a   :  { %340 = vmatmul.mubr.msk.bf16.vlgmr.msra.gmra.mrb[0].mxu0 %vm84_vm1, %v371_v7  ;;  %344 = vmatmul.mubr.msk.bf16.vlgmr.msra.gmra.mrb[0].mxu1 %vm84_vm1, %v372_v8 }
  0x1b   :  { %347 = vmatprep.mubr.msk.bf16.mxu1 %vm375_vm0, %v374_v0 }
  0x22   :  { %348 = vmatmul.mubr.msk.bf16.gmra.mrb[4].mxu1 %vm84_vm1, %v373_v9 }
  0xed   :  { %v128_v10 = vpop.f32.mrb[0].mxu0  ;;  %v136_v11 = vpop.f32.mrb[0].mxu1 }
  0xee   :  { %208 = vadd.xlane.f32.xlu1 %v136_v11  ;;  %v345_v12 = vpop.f32.mrb[1].mxu1  ;;  %204 = vadd.xlane.f32.xlu0 %v128_v10  ;;  %v341_v13 = vpop.f32.mrb[1].mxu0  ;;  %v235_v20 = vmul.f32 %v128_v10, %v128_v10  ;;  %v237_v26 = vmul.f32 %v136_v11, %v136_v11 }
  0xef   :  { %v131_v14 = vpop.f32.mrb[2].mxu0  ;;  %v139_v15 = vpop.f32.mrb[2].mxu1 }
  0xf0   :  { %v304_v16 = vpack.c.bf16 %v131_v14, %v128_v10  ;;  %v309_v17 = vpack.c.bf16 %v139_v15, %v136_v11  ;;  %v342_v18 = vpop.f32.mrb[3].mxu0  ;;  %v346_v19 = vpop.f32.mrb[3].mxu1  ;;  %v236_v21 = vmul.f32 %v131_v14, %v131_v14  ;;  %v238_v27 = vmul.f32 %v139_v15, %v139_v15 }
  0xf2   :  { %305 = vst [vmem:[%s602_s2] sm:$0xff] %v304_v16   ;;  %316 = vst [vmem:[%s602_s2 + $0x8] sm:$0xff] %v309_v17   ;;  %210 = vadd.xlane.f32.xlu1 %v139_v15  ;;  %206 = vadd.xlane.f32.xlu0 %v131_v14 }
  0xf5   :  { %v144_v22 = vpop.f32.mrb[4].mxu1 }
  0xf6   :  { %241 = vadd.xlane.f32.xlu0 %v235_v20  ;;  %243 = vadd.xlane.f32.xlu1 %v236_v21  ;;  %v349_v23 = vpop.f32.mrb[5].mxu1  ;;  %v239_v29 = vmul.f32 %v144_v22, %v144_v22 }
  0xf7   :  { %v147_v24 = vpop.f32.mrb[6].mxu1 }
  0xf8   :  { %v314_v25 = vpack.c.bf16 %v147_v24, %v144_v22  ;;  %v350_v28 = vpop.f32.mrb[7].mxu1  ;;  %v240_v30 = vmul.f32 %v147_v24, %v147_v24 }
  0xfa   :  { %317 = vst [vmem:[%s602_s2 + $0x10] sm:$0xff] %v314_v25   ;;  %245 = vadd.xlane.f32.xlu0 %v237_v26  ;;  %247 = vadd.xlane.f32.xlu1 %v238_v27 }
  0xfe   :  { %212 = vadd.xlane.f32.xlu0 %v144_v22  ;;  %214 = vadd.xlane.f32.xlu1 %v147_v24 }
 0x102   :  { %249 = vadd.xlane.f32.xlu0 %v239_v29  ;;  %251 = vadd.xlane.f32.xlu1 %v240_v30 }
 0x17b   :  { %v209_v33 = vpop.xlane.xlu1 %208  ;;  %v205_v34 = vpop.xlane.xlu0 %204 }
 0x17c   :  { %v218_v35 = vadd.f32 %v209_v33, %v200_v31  ;;  %v216_v36 = vadd.f32 %v205_v34, %v198_v32 }
 0x17e   :  { %225 = vst.msk [vmem:[%s601_s3 + $0x10] sm:$0xff] %vm185_vm2, %v218_v35  ;;  %223 = vst.msk [vmem:[%s601_s3] sm:$0xff] %vm185_vm2, %v216_v36 }
 0x17f   :  { %v211_v39 = vpop.xlane.xlu1 %210  ;;  %v207_v40 = vpop.xlane.xlu0 %206 }
 0x180   :  { %v219_v41 = vadd.f32 %v211_v39, %v201_v37  ;;  %v217_v42 = vadd.f32 %v207_v40, %v199_v38 }
 0x182   :  { %226 = vst.msk [vmem:[%s601_s3 + $0x18] sm:$0xff] %vm185_vm2, %v219_v41  ;;  %224 = vst.msk [vmem:[%s601_s3 + $0x8] sm:$0xff] %vm185_vm2, %v217_v42 }
 0x183   :  { %v242_v45 = vpop.xlane.xlu0 %241  ;;  %v244_v46 = vpop.xlane.xlu1 %243 }
 0x184   :  { %v253_v47 = vadd.f32 %v242_v45, %v229_v43  ;;  %v254_v48 = vadd.f32 %v244_v46, %v230_v44 }
 0x186   :  { %259 = vst.msk [vmem:[%s603_s4] sm:$0xff] %vm185_vm2, %v253_v47  ;;  %260 = vst.msk [vmem:[%s603_s4 + $0x8] sm:$0xff] %vm185_vm2, %v254_v48 }
 0x187   :  { %v246_v51 = vpop.xlane.xlu0 %245  ;;  %v248_v52 = vpop.xlane.xlu1 %247 }
 0x188   :  { %v255_v53 = vadd.f32 %v246_v51, %v231_v49  ;;  %v256_v54 = vadd.f32 %v248_v52, %v232_v50 }
 0x18a   :  { %261 = vst.msk [vmem:[%s603_s4 + $0x10] sm:$0xff] %vm185_vm2, %v255_v53  ;;  %262 = vst.msk [vmem:[%s603_s4 + $0x18] sm:$0xff] %vm185_vm2, %v256_v54 }
 0x18b   :  { %v213_v57 = vpop.xlane.xlu0 %212  ;;  %v215_v58 = vpop.xlane.xlu1 %214 }
 0x18c   :  { %v220_v59 = vadd.f32 %v213_v57, %v202_v55  ;;  %v221_v60 = vadd.f32 %v215_v58, %v203_v56 }
 0x18e   :  { %227 = vst.msk [vmem:[%s601_s3 + $0x20] sm:$0xff] %vm185_vm2, %v220_v59  ;;  %228 = vst.msk [vmem:[%s601_s3 + $0x28] sm:$0xff] %vm185_vm2, %v221_v60 }
 0x18f   :  { %v250_v63 = vpop.xlane.xlu0 %249  ;;  %v252_v0 = vpop.xlane.xlu1 %251 }
 0x190   :  { %v257_v1 = vadd.f32 %v250_v63, %v233_v61  ;;  %v258_v2 = vadd.f32 %v252_v0, %v234_v62 }
 0x192   :  { %263 = vst.msk [vmem:[%s603_s4 + $0x20] sm:$0xff] %vm185_vm2, %v257_v1  ;;  %264 = vst.msk [vmem:[%s603_s4 + $0x28] sm:$0xff] %vm185_vm2, %v258_v2 }

// kernel: generator_forward.79
= control target key start
LH: loop header
LB: loop body
LE: loop exit
PB: predicated region body
PF: predicated region fallthrough
CT: control target
= control target key end

     0   :  { %v329_v0 = vmov 0   ;;  %vm129_vm0 = vcmask 523264   ;;  %vm204_vm1 = vcmask 7168   ;;  %v330_v18 = vmov 0.0   ;;  %s497_s1 = inlined_call_operand.vmem [shape: bf16[192,128], index: 1, kind: input, shape index: {}]   ;;  %s498_s0 = inlined_call_operand.vmem [shape: bf16[24,192], index: 0, kind: input, shape index: {}]   ;;  %s499_s3 = inlined_call_operand.vmem [shape: f32[24,1], index: 3, kind: output, shape index: {1}]   ;;  %s500_s2 = inlined_call_operand.vmem [shape: bf16[24,128], index: 2, kind: output, shape index: {0}]   ;;  %s501_s4 = inlined_call_operand.vmem [shape: f32[24,1], index: 4, kind: output, shape index: {2}]  }
   0x1   :  { %136 = vmatprep.subr.bf16.mxu0 %v329_v0  ;;  %286 = vmatprep.subr.bf16.mxu1 %v329_v0  ;;  %v312_v1 = vld [vmem:[%s497_s1] sm:$0xff]   ;;  %v313_v2 = vld [vmem:[%s497_s1 + $0x8] sm:$0xff]   ;;  %v314_v3 = vld [vmem:[%s497_s1 + $0x10] sm:$0xff]   ;;  %207 = vst.msk [vmem:[%s499_s3 + $0x10] sm:$0xff] %vm204_vm1, %v330_v18 }
   0x2   :  { %137 = vmatpush1.bf16.msra.mxu0 %v312_v1  ;;  %298 = vmatpush1.bf16.msra.mxu1 %v312_v1  ;;  %v315_v4 = vld [vmem:[%s497_s1 + $0x18] sm:$0xff]   ;;  %v326_v5 = vld [vmem:[%s498_s0 + $0x4] ss:$8 sps:$4 sm:$0xff]   ;;  %v17_v6 = vld [vmem:[%s498_s0 + $0x10] sm:$0xff]  ;;  %205 = vst.msk [vmem:[%s499_s3] sm:$0xff] %vm204_vm1, %v330_v18 }
   0x3   :  { %138 = vmatprep.subr.bf16.mxu0 %v329_v0  ;;  %287 = vmatprep.subr.bf16.mxu1 %v329_v0  ;;  %v316_v7 = vld [vmem:[%s497_s1 + $0x20] sm:$0xff]   ;;  %v260_v8 = vcombine.high %v17_v6, %v17_v6  ;;  %v317_v9 = vld [vmem:[%s497_s1 + $0x28] sm:$0xff]   ;;  %v318_v10 = vld [vmem:[%s497_s1 + $0x30] sm:$0xff]   ;;  %v259_v17 = vcombine.low %v17_v6, %v17_v6  ;;  %206 = vst.msk [vmem:[%s499_s3 + $0x8] sm:$0xff] %vm204_vm1, %v330_v18 }
   0x4   :  { %273 = vmatprep.mubr.msk.bf16.mxu0 %vm129_vm0, %v326_v5  ;;  %v319_v11 = vld [vmem:[%s497_s1 + $0x38] sm:$0xff]   ;;  %v320_v12 = vld [vmem:[%s497_s1 + $0x40] sm:$0xff]   ;;  %v321_v13 = vld [vmem:[%s497_s1 + $0x48] sm:$0xff]   ;;  %208 = vst.msk [vmem:[%s501_s4] sm:$0xff] %vm204_vm1, %v330_v18 }
   0x5   :  { %274 = vmatprep.mubr.msk.bf16.mxu1 %vm129_vm0, %v260_v8  ;;  %v322_v14 = vld [vmem:[%s497_s1 + $0x50] sm:$0xff]   ;;  %v323_v15 = vld [vmem:[%s497_s1 + $0x58] sm:$0xff]   ;;  %v324_v16 = vld [vmem:[%s498_s0] ss:$8 sps:$4 sm:$0xff]   ;;  %209 = vst.msk [vmem:[%s501_s4 + $0x8] sm:$0xff] %vm204_vm1, %v330_v18 }
   0x6   :  { %139 = vmatpush1.bf16.msra.mxu0 %v313_v2  ;;  %299 = vmatpush1.bf16.msra.mxu1 %v313_v2  ;;  %210 = vst.msk [vmem:[%s501_s4 + $0x10] sm:$0xff] %vm204_vm1, %v330_v18 }
   0x7   :  { %140 = vmatprep.subr.bf16.mxu0 %v329_v0  ;;  %288 = vmatprep.subr.bf16.mxu1 %v329_v0 }
   0x8   :  { %v213_v32 = vld [vmem:[%s499_s3 + $0x10] sm:$0xff] }
   0x9   :  { %v211_v33 = vld [vmem:[%s499_s3] sm:$0xff] }
   0xa   :  { %141 = vmatpush1.bf16.msra.mxu0 %v314_v3  ;;  %300 = vmatpush1.bf16.msra.mxu1 %v314_v3  ;;  %v212_v39 = vld [vmem:[%s499_s3 + $0x8] sm:$0xff] }
   0xb   :  { %142 = vmatprep.subr.bf16.mxu0 %v329_v0  ;;  %289 = vmatprep.subr.bf16.mxu1 %v329_v0  ;;  %v227_v38 = vld [vmem:[%s501_s4] sm:$0xff] }
   0xc   :  { %v228_v45 = vld [vmem:[%s501_s4 + $0x8] sm:$0xff] }
   0xd   :  { %v229_v44 = vld [vmem:[%s501_s4 + $0x10] sm:$0xff] }
   0xe   :  { %143 = vmatpush1.bf16.msra.mxu0 %v315_v4  ;;  %301 = vmatpush1.bf16.msra.mxu1 %v315_v4 }
   0xf   :  { %144 = vmatprep.subr.bf16.mxu0 %v329_v0  ;;  %290 = vmatprep.subr.bf16.mxu1 %v329_v0 }
  0x12   :  { %145 = vmatpush1.bf16.msra.mxu0 %v316_v7  ;;  %302 = vmatpush1.bf16.msra.mxu1 %v316_v7 }
  0x13   :  { %146 = vmatprep.subr.bf16.mxu0 %v329_v0  ;;  %291 = vmatprep.subr.bf16.mxu1 %v329_v0 }
  0x16   :  { %147 = vmatpush1.bf16.msra.mxu0 %v317_v9  ;;  %303 = vmatpush1.bf16.msra.mxu1 %v317_v9 }
  0x17   :  { %148 = vmatprep.subr.bf16.mxu0 %v329_v0  ;;  %292 = vmatprep.subr.bf16.mxu1 %v329_v0 }
  0x1a   :  { %149 = vmatpush1.bf16.msra.mxu0 %v318_v10  ;;  %304 = vmatpush1.bf16.msra.mxu1 %v318_v10 }
  0x1b   :  { %150 = vmatprep.subr.bf16.mxu0 %v329_v0  ;;  %293 = vmatprep.subr.bf16.mxu1 %v329_v0 }
  0x1e   :  { %151 = vmatpush1.bf16.msra.mxu0 %v319_v11  ;;  %305 = vmatpush1.bf16.msra.mxu1 %v319_v11 }
  0x1f   :  { %152 = vmatprep.subr.bf16.mxu0 %v329_v0  ;;  %294 = vmatprep.subr.bf16.mxu1 %v329_v0 }
  0x22   :  { %153 = vmatpush1.bf16.msra.mxu0 %v320_v12  ;;  %306 = vmatpush1.bf16.msra.mxu1 %v320_v12 }
  0x23   :  { %154 = vmatprep.subr.bf16.mxu0 %v329_v0  ;;  %295 = vmatprep.subr.bf16.mxu1 %v329_v0 }
  0x26   :  { %155 = vmatpush1.bf16.msra.mxu0 %v321_v13  ;;  %307 = vmatpush1.bf16.msra.mxu1 %v321_v13 }
  0x27   :  { %156 = vmatprep.subr.bf16.mxu0 %v329_v0  ;;  %296 = vmatprep.subr.bf16.mxu1 %v329_v0 }
  0x2a   :  { %157 = vmatpush1.bf16.msra.mxu0 %v322_v14  ;;  %308 = vmatpush1.bf16.msra.mxu1 %v322_v14 }
  0x2b   :  { %158 = vmatprep.subr.bf16.mxu0 %v329_v0  ;;  %297 = vmatprep.subr.bf16.mxu1 %v329_v0 }
  0x2e   :  { %159 = vmatpush1.bf16.msra.mxu0 %v323_v15  ;;  %309 = vmatpush1.bf16.msra.mxu1 %v323_v15 }
  0x31   :  { %169 = vmatmul.mubr.bf16.vlgmr.msra.gmra.mrb[0].mxu0 %v324_v16  ;;  %177 = vmatmul.mubr.bf16.vlgmr.msra.gmra.mrb[0].mxu1 %v259_v17 }
 0x104   :  { %v170_v19 = vpop.f32.mrb[0].mxu0  ;;  %v178_v20 = vpop.f32.mrb[0].mxu1 }
 0x105   :  { %v280_v21 = vpack.c.bf16 %v178_v20, %v178_v20  ;;  %218 = vadd.xlane.f32.xlu1 %v178_v20  ;;  %v180_v22 = vpop.f32.mrb[1].mxu1  ;;  %214 = vadd.xlane.f32.xlu0 %v170_v19  ;;  %v172_v23 = vpop.f32.mrb[1].mxu0  ;;  %v230_v29 = vmul.f32 %v170_v19, %v170_v19  ;;  %v232_v30 = vmul.f32 %v178_v20, %v178_v20 }
 0x106   :  { %v173_v24 = vpop.f32.mrb[2].mxu0  ;;  %v181_v25 = vpop.f32.mrb[2].mxu1 }
 0x107   :  { %199 = vst [vmem:[%s500_s2 + $0x8] sm:$0xf] %v280_v21  ;;  %v284_v26 = vpack.c.bf16 %v173_v24, %v170_v19  ;;  %v175_v27 = vpop.f32.mrb[3].mxu0  ;;  %v182_v28 = vpop.f32.mrb[3].mxu1  ;;  %v231_v31 = vmul.f32 %v173_v24, %v173_v24 }
 0x109   :  { %285 = vst [vmem:[%s500_s2] sm:$0xff] %v284_v26   ;;  %233 = vadd.xlane.f32.xlu1 %v230_v29  ;;  %216 = vadd.xlane.f32.xlu0 %v173_v24 }
 0x10d   :  { %237 = vadd.xlane.f32.xlu1 %v232_v30  ;;  %235 = vadd.xlane.f32.xlu0 %v231_v31 }
 0x192   :  { %v219_v34 = vpop.xlane.xlu1 %218  ;;  %v215_v35 = vpop.xlane.xlu0 %214 }
 0x193   :  { %v222_v36 = vadd.f32 %v219_v34, %v213_v32  ;;  %v220_v37 = vadd.f32 %v215_v35, %v211_v33 }
 0x195   :  { %226 = vst.msk [vmem:[%s499_s3 + $0x10] sm:$0xff] %vm204_vm1, %v222_v36  ;;  %224 = vst.msk [vmem:[%s499_s3] sm:$0xff] %vm204_vm1, %v220_v37 }
 0x196   :  { %v234_v40 = vpop.xlane.xlu1 %233  ;;  %v217_v41 = vpop.xlane.xlu0 %216 }
 0x197   :  { %v239_v42 = vadd.f32 %v234_v40, %v227_v38  ;;  %v221_v43 = vadd.f32 %v217_v41, %v212_v39 }
 0x199   :  { %242 = vst.msk [vmem:[%s501_s4] sm:$0xff] %vm204_vm1, %v239_v42  ;;  %225 = vst.msk [vmem:[%s499_s3 + $0x8] sm:$0xff] %vm204_vm1, %v221_v43 }
 0x19a   :  { %v238_v46 = vpop.xlane.xlu1 %237  ;;  %v236_v47 = vpop.xlane.xlu0 %235 }
 0x19b   :  { %v241_v48 = vadd.f32 %v238_v46, %v229_v44  ;;  %v240_v49 = vadd.f32 %v236_v47, %v228_v45 }
 0x19d   :  { %244 = vst.msk [vmem:[%s501_s4 + $0x10] sm:$0xff] %vm204_vm1, %v241_v48  ;;  %243 = vst.msk [vmem:[%s501_s4 + $0x8] sm:$0xff] %vm204_vm1, %v240_v49 }

// kernel: generator_forward.84
= control target key start
LH: loop header
LB: loop body
LE: loop exit
PB: predicated region body
PF: predicated region fallthrough
CT: control target
= control target key end

     0   :  { %v389_v1 = vmov 0   ;;  %vm98_vm0 = vcmask 392192   ;;  %vm257_vm1 = vcmask 7168   ;;  %v390_v15 = vmov 0.0   ;;  %s548_s1 = inlined_call_operand.vmem [shape: bf16[48,512], index: 1, kind: input, shape index: {}]   ;;  %s549_s0 = inlined_call_operand.vmem [shape: bf16[24,48], index: 0, kind: input, shape index: {}]   ;;  %s550_s3 = inlined_call_operand.vmem [shape: f32[24,1], index: 3, kind: output, shape index: {1}]   ;;  %s551_s2 = inlined_call_operand.vmem [shape: bf16[24,512], index: 2, kind: output, shape index: {0}]   ;;  %s552_s4 = inlined_call_operand.vmem [shape: f32[24,1], index: 4, kind: output, shape index: {2}]  }
   0x1   :  { %v369_v0 = vld [vmem:[%s548_s1 + $0x4] ss:$16 sps:$4 sm:$0xff]   ;;  %137 = vmatprep.mubr.bf16.mxu0 %v389_v1  ;;  %188 = vmatprep.mubr.bf16.mxu1 %v389_v1  ;;  %v371_v2 = vld [vmem:[%s548_s1 + $0xc] ss:$16 sps:$4 sm:$0xff]   ;;  %v373_v3 = vld [vmem:[%s548_s1] ss:$16 sps:$4 sm:$0xff]  }
   0x2   :  { %105 = vmatprep.subr.bf16.mxu0 %v369_v0  ;;  %v374_v4 = vld [vmem:[%s548_s1 + $0x8] ss:$16 sps:$4 sm:$0xff]   ;;  %156 = vmatprep.subr.bf16.mxu1 %v371_v2  ;;  %v375_v5 = vld [vmem:[%s548_s1 + $0x24] ss:$16 sps:$4 sm:$0xff]   ;;  %v377_v6 = vld [vmem:[%s548_s1 + $0x2c] ss:$16 sps:$4 sm:$0xff]  }
   0x3   :  { %106 = vmatpush1.bf16.msra.mxu0 %v373_v3  ;;  %157 = vmatpush1.bf16.msra.mxu1 %v374_v4  ;;  %v379_v7 = vld [vmem:[%s548_s1 + $0x20] ss:$16 sps:$4 sm:$0xff]   ;;  %v380_v8 = vld [vmem:[%s548_s1 + $0x28] ss:$16 sps:$4 sm:$0xff]   ;;  %v381_v9 = vld [vmem:[%s548_s1 + $0x44] ss:$16 sps:$4 sm:$0xff]  }
   0x4   :  { %107 = vmatprep.subr.bf16.mxu0 %v375_v5  ;;  %158 = vmatprep.subr.bf16.mxu1 %v377_v6  ;;  %v383_v10 = vld [vmem:[%s548_s1 + $0x4c] ss:$16 sps:$4 sm:$0xff]   ;;  %v385_v11 = vld [vmem:[%s548_s1 + $0x40] ss:$16 sps:$4 sm:$0xff]   ;;  %v386_v12 = vld [vmem:[%s548_s1 + $0x48] ss:$16 sps:$4 sm:$0xff]  }
   0x5   :  { %v387_v13 = vld [vmem:[%s549_s0] sm:$0xff]   ;;  %v388_v14 = vld [vmem:[%s549_s0 + $0x8] ss:$0 sps:$4 sm:$0xff]   ;;  %258 = vst.msk [vmem:[%s550_s3] sm:$0xff] %vm257_vm1, %v390_v15  ;;  %259 = vst.msk [vmem:[%s550_s3 + $0x8] sm:$0xff] %vm257_vm1, %v390_v15 }
   0x6   :  { %260 = vst.msk [vmem:[%s550_s3 + $0x10] sm:$0xff] %vm257_vm1, %v390_v15  ;;  %261 = vst.msk [vmem:[%s552_s4] sm:$0xff] %vm257_vm1, %v390_v15 }
   0x7   :  { %108 = vmatpush1.bf16.msra.mxu0 %v379_v7  ;;  %159 = vmatpush1.bf16.msra.mxu1 %v380_v8  ;;  %262 = vst.msk [vmem:[%s552_s4 + $0x8] sm:$0xff] %vm257_vm1, %v390_v15  ;;  %263 = vst.msk [vmem:[%s552_s4 + $0x10] sm:$0xff] %vm257_vm1, %v390_v15 }
   0x8   :  { %109 = vmatprep.subr.bf16.mxu0 %v381_v9  ;;  %160 = vmatprep.subr.bf16.mxu1 %v383_v10 }
   0xb   :  { %110 = vmatpush1.bf16.msra.mxu0 %v385_v11  ;;  %161 = vmatpush1.bf16.msra.mxu1 %v386_v12 }
   0xc   :  { %v264_v4 = vld [vmem:[%s550_s3] sm:$0xff]  ;;  %v265_v9 = vld [vmem:[%s550_s3 + $0x8] sm:$0xff] }
   0xd   :  { %v289_v6 = vld [vmem:[%s552_s4] sm:$0xff] }
   0xe   :  { %351 = vmatmul.mubr.msk.bf16.vlgmr.msra.gmra.mrb[0].mxu0 %vm98_vm0, %v387_v13  ;;  %353 = vmatmul.mubr.msk.bf16.vlgmr.msra.gmra.mrb[0].mxu1 %vm98_vm0, %v387_v13  ;;  %v266_v13 = vld [vmem:[%s550_s3 + $0x10] sm:$0xff] }
   0xf   :  { %147 = vmatprep.mubr.bf16.mxu0 %v389_v1  ;;  %198 = vmatprep.mubr.bf16.mxu1 %v389_v1 }
  0x16   :  { %352 = vmatmul.mubr.msk.bf16.gmra.mrb[4].mxu0 %vm98_vm0, %v388_v14  ;;  %354 = vmatmul.mubr.msk.bf16.gmra.mrb[4].mxu1 %vm98_vm0, %v388_v14  ;;  %v290_v14 = vld [vmem:[%s552_s4 + $0x8] sm:$0xff] }
  0xe1   :  { %v139_v16 = vpop.f32.mrb[0].mxu0  ;;  %v190_v17 = vpop.f32.mrb[0].mxu1 }
  0xe2   :  { %v292_v18 = vmul.f32 %v139_v16, %v139_v16  ;;  %v141_v19 = vpop.f32.mrb[1].mxu0  ;;  %v192_v20 = vpop.f32.mrb[1].mxu1  ;;  %v294_v27 = vmul.f32 %v190_v17, %v190_v17 }
  0xe3   :  { %v361_v21 = vpack.c.bf16 %v141_v19, %v139_v16  ;;  %v267_v22 = vadd.f32 %v141_v19, %v139_v16  ;;  %v293_v23 = vmul.f32 %v141_v19, %v141_v19  ;;  %v362_v24 = vpack.c.bf16 %v192_v20, %v190_v17  ;;  %v143_v25 = vpop.f32.mrb[2].mxu0  ;;  %v194_v26 = vpop.f32.mrb[2].mxu1  ;;  %v291_v19 = vld [vmem:[%s552_s4 + $0x10] sm:$0xff] }
  0xe4   :  { %v296_v28 = vmul.f32 %v143_v25, %v143_v25  ;;  %v145_v29 = vpop.f32.mrb[3].mxu0  ;;  %v196_v30 = vpop.f32.mrb[3].mxu1  ;;  %v298_v37 = vmul.f32 %v194_v26, %v194_v26  ;;  %v295_v41 = vmul.f32 %v192_v20, %v192_v20 }
  0xe5   :  { %247 = vst [vmem:[%s551_s2] sm:$0xff] %v361_v21  ;;  %248 = vst [vmem:[%s551_s2 + $0x8] sm:$0xff] %v362_v24  ;;  %v363_v31 = vpack.c.bf16 %v145_v29, %v143_v25  ;;  %v272_v32 = vadd.f32 %v145_v29, %v143_v25  ;;  %v297_v33 = vmul.f32 %v145_v29, %v145_v29 }
  0xe6   :  { %v364_v34 = vpack.c.bf16 %v196_v30, %v194_v26  ;;  %v268_v35 = vadd.f32 %v267_v22, %v190_v17  ;;  %v304_v36 = vadd.f32 %v293_v23, %v292_v18  ;;  %v299_v52 = vmul.f32 %v196_v30, %v196_v30 }
  0xe7   :  { %249 = vst [vmem:[%s551_s2 + $0x10] sm:$0xff] %v363_v31  ;;  %v273_v38 = vadd.f32 %v272_v32, %v194_v26  ;;  %v309_v39 = vadd.f32 %v297_v33, %v296_v28 }
  0xe8   :  { %250 = vst [vmem:[%s551_s2 + $0x18] sm:$0xff] %v364_v34  ;;  %v269_v40 = vadd.f32 %v268_v35, %v192_v20  ;;  %v305_v42 = vadd.f32 %v304_v36, %v294_v27 }
  0xe9   :  { %v200_v43 = vpop.f32.mrb[4].mxu1  ;;  %v149_v44 = vpop.f32.mrb[4].mxu0  ;;  %v274_v45 = vadd.f32 %v273_v38, %v196_v30  ;;  %v310_v46 = vadd.f32 %v309_v39, %v298_v37 }
  0xea   :  { %v302_v47 = vmul.f32 %v200_v43, %v200_v43  ;;  %270 = vadd.xlane.f32.xlu0 %v269_v40  ;;  %v300_v48 = vmul.f32 %v149_v44, %v149_v44  ;;  %v151_v49 = vpop.f32.mrb[5].mxu0  ;;  %v202_v50 = vpop.f32.mrb[5].mxu1  ;;  %v306_v51 = vadd.f32 %v305_v42, %v295_v41 }
  0xeb   :  { %v365_v53 = vpack.c.bf16 %v151_v49, %v149_v44  ;;  %v277_v54 = vadd.f32 %v151_v49, %v149_v44  ;;  %v301_v55 = vmul.f32 %v151_v49, %v151_v49  ;;  %v366_v56 = vpack.c.bf16 %v202_v50, %v200_v43  ;;  %v204_v57 = vpop.f32.mrb[6].mxu1  ;;  %v153_v58 = vpop.f32.mrb[6].mxu0 }
  0xec   :  { %307 = vadd.xlane.f32.xlu1 %v306_v51  ;;  %v154_v59 = vpop.f32.mrb[7].mxu0  ;;  %v205_v60 = vpop.f32.mrb[7].mxu1  ;;  %v311_v61 = vadd.f32 %v310_v46, %v299_v52  ;;  %v303_v1 = vmul.f32 %v202_v50, %v202_v50 }
  0xed   :  { %251 = vst [vmem:[%s551_s2 + $0x20] sm:$0xff] %v365_v53  ;;  %252 = vst [vmem:[%s551_s2 + $0x28] sm:$0xff] %v366_v56  ;;  %v278_v62 = vadd.f32 %v277_v54, %v200_v43  ;;  %v314_v63 = vadd.f32 %v301_v55, %v300_v48 }
  0xee   :  { %275 = vadd.xlane.f32.xlu0 %v274_v45 }
  0xef   :  { %v279_v0 = vadd.f32 %v278_v62, %v202_v50  ;;  %v315_v2 = vadd.f32 %v314_v63, %v302_v47 }
  0xf1   :  { %280 = vadd.xlane.f32.xlu1 %v279_v0  ;;  %v316_v3 = vadd.f32 %v315_v2, %v303_v1 }
  0xf2   :  { %312 = vadd.xlane.f32.xlu0 %v311_v61 }
  0xf5   :  { %317 = vadd.xlane.f32.xlu1 %v316_v3 }
 0x177   :  { %v271_v5 = vpop.xlane.xlu0 %270 }
 0x178   :  { %v282_v7 = vadd.f32 %v271_v5, %v264_v4 }
 0x179   :  { %v308_v8 = vpop.xlane.xlu1 %307 }
 0x17a   :  { %286 = vst.msk [vmem:[%s550_s3] sm:$0xff] %vm257_vm1, %v282_v7  ;;  %v319_v10 = vadd.f32 %v308_v8, %v289_v6 }
 0x17b   :  { %v276_v11 = vpop.xlane.xlu0 %275 }
 0x17c   :  { %322 = vst.msk [vmem:[%s552_s4] sm:$0xff] %vm257_vm1, %v319_v10  ;;  %v283_v12 = vadd.f32 %v276_v11, %v265_v9 }
 0x17e   :  { %287 = vst.msk [vmem:[%s550_s3 + $0x8] sm:$0xff] %vm257_vm1, %v283_v12  ;;  %v281_v15 = vpop.xlane.xlu1 %280 }
 0x17f   :  { %v313_v16 = vpop.xlane.xlu0 %312  ;;  %v284_v17 = vadd.f32 %v281_v15, %v266_v13 }
 0x180   :  { %v320_v18 = vadd.f32 %v313_v16, %v290_v14 }
 0x181   :  { %288 = vst.msk [vmem:[%s550_s3 + $0x10] sm:$0xff] %vm257_vm1, %v284_v17 }
 0x182   :  { %323 = vst.msk [vmem:[%s552_s4 + $0x8] sm:$0xff] %vm257_vm1, %v320_v18  ;;  %v318_v20 = vpop.xlane.xlu1 %317 }
 0x183   :  { %v321_v21 = vadd.f32 %v318_v20, %v291_v19 }
 0x185   :  { %324 = vst.msk [vmem:[%s552_s4 + $0x10] sm:$0xff] %vm257_vm1, %v321_v21 }

// kernel: generator_forward.91
= control target key start
LH: loop header
LB: loop body
LE: loop exit
PB: predicated region body
PF: predicated region fallthrough
CT: control target
= control target key end

     0   :  { %s78_s0 = inlined_call_operand.vmem [shape: f32[3,512], index: 0, kind: input, shape index: {}]   ;;  %s79_s1 = inlined_call_operand.vmem [shape: f32[3,512], index: 1, kind: input, shape index: {}]   ;;  %s80_s2 = inlined_call_operand.vmem [shape: f32[3,512], index: 2, kind: output, shape index: {}]  }
   0x1   :  { %v11_v0 = vld [vmem:[%s78_s0] sm:$0x77]  ;;  %v12_v2 = vld [vmem:[%s78_s0 + $0x8] sm:$0x77] }
   0x2   :  { %v13_v1 = vld [vmem:[%s79_s1] sm:$0x77]  ;;  %v14_v4 = vld [vmem:[%s79_s1 + $0x8] sm:$0x77] }
   0x3   :  { %v15_v3 = vadd.f32 %v13_v1, %v11_v0  ;;  %v16_v5 = vadd.f32 %v14_v4, %v12_v2 }
   0x5   :  { %v17_v6 = vsub.f32 0.0, %v15_v3  ;;  %v18_v7 = vsub.f32 0.0, %v16_v5 }
   0x7   :  { %v19_v8 = vmul.f32 1.442695, %v17_v6  ;;  %v21_v9 = vmul.f32 1.442695, %v18_v7 }
   0x9   :  { %37 = vpow2.f32 %v19_v8 }
   0xa   :  { %39 = vpow2.f32 %v21_v9 }
  0x13   :  { %v38_v10 = vpop.eup %37 }
  0x14   :  { %v40_v11 = vpop.eup %39  ;;  %v23_v12 = vadd.f32 1.0, %v38_v10 }
  0x15   :  { %v24_v13 = vadd.f32 1.0, %v40_v11 }
  0x16   :  { %41 = vrcp.f32 %v23_v12 }
  0x17   :  { %43 = vrcp.f32 %v24_v13 }
  0x20   :  { %v42_v14 = vpop.eup %41 }
  0x21   :  { %v44_v15 = vpop.eup %43  ;;  %v27_v16 = vmax.f32 %v42_v14, 0.0 }
  0x22   :  { %v28_v17 = vmax.f32 %v44_v15, 0.0 }
  0x23   :  { %v29_v18 = vmin.f32 %v27_v16, 1.0 }
  0x24   :  { %v30_v19 = vmin.f32 %v28_v17, 1.0 }
  0x25   :  { %31 = vst [vmem:[%s80_s2] sm:$0x77] %v29_v18 }
  0x26   :  { %32 = vst [vmem:[%s80_s2 + $0x8] sm:$0x77] %v30_v19 }

// kernel: generator_forward.90
= control target key start
LH: loop header
LB: loop body
LE: loop exit
PB: predicated region body
PF: predicated region fallthrough
CT: control target
= control target key end

     0   :  { %v614_v1 = vmov 0   ;;  %vm356_vm0 = vcmask 719872   ;;  %vm360_vm1 = vcmask 1043456   ;;  %s809_s1 = inlined_call_operand.vmem [shape: bf16[216,512], index: 1, kind: input, shape index: {}]   ;;  %s810_s0 = inlined_call_operand.vmem [shape: bf16[3,216], index: 0, kind: input, shape index: {}]   ;;  %s811_s2 = inlined_call_operand.vmem [shape: f32[3,1], index: 2, kind: input, shape index: {}]   ;;  %s812_s3 = inlined_call_operand.vmem [shape: f32[3,512], index: 3, kind: output, shape index: {}]  }
   0x1   :  { %v532_v0 = vld [vmem:[%s809_s1 + $0x4] ss:$16 sps:$4 sm:$0xff]   ;;  %531 = vset.pattern.permute.xlu0 %v614_v1  ;;  %v534_v2 = vld [vmem:[%s809_s1 + $0xc] ss:$16 sps:$4 sm:$0xff]   ;;  %v536_v3 = vld [vmem:[%s809_s1] ss:$16 sps:$4 sm:$0xff]  }
   0x2   :  { %373 = vmatprep.subr.bf16.mxu0 %v532_v0  ;;  %v537_v4 = vld [vmem:[%s809_s1 + $0x8] ss:$16 sps:$4 sm:$0xff]   ;;  %414 = vmatprep.subr.bf16.mxu1 %v534_v2  ;;  %v538_v5 = vld [vmem:[%s809_s1 + $0x24] ss:$16 sps:$4 sm:$0xff]   ;;  %v540_v6 = vld [vmem:[%s809_s1 + $0x2c] ss:$16 sps:$4 sm:$0xff]  }
   0x3   :  { %374 = vmatpush1.bf16.msra.mxu0 %v536_v3  ;;  %415 = vmatpush1.bf16.msra.mxu1 %v537_v4  ;;  %v542_v7 = vld [vmem:[%s809_s1 + $0x20] ss:$16 sps:$4 sm:$0xff]   ;;  %v543_v8 = vld [vmem:[%s809_s1 + $0x28] ss:$16 sps:$4 sm:$0xff]   ;;  %v544_v9 = vld [vmem:[%s809_s1 + $0x44] ss:$16 sps:$4 sm:$0xff]  }
   0x4   :  { %375 = vmatprep.subr.bf16.mxu0 %v538_v5  ;;  %416 = vmatprep.subr.bf16.mxu1 %v540_v6  ;;  %v546_v10 = vld [vmem:[%s809_s1 + $0x4c] ss:$16 sps:$4 sm:$0xff]   ;;  %v548_v11 = vld [vmem:[%s809_s1 + $0x40] ss:$16 sps:$4 sm:$0xff]   ;;  %v549_v12 = vld [vmem:[%s809_s1 + $0x48] ss:$16 sps:$4 sm:$0xff]  }
   0x5   :  { %v550_v13 = vld [vmem:[%s809_s1 + $0x64] ss:$16 sps:$4 sm:$0xff]   ;;  %v552_v14 = vld [vmem:[%s809_s1 + $0x6c] ss:$16 sps:$4 sm:$0xff]   ;;  %v554_v15 = vld [vmem:[%s809_s1 + $0x60] ss:$16 sps:$4 sm:$0xff]  }
   0x6   :  { %v555_v16 = vld [vmem:[%s809_s1 + $0x68] ss:$16 sps:$4 sm:$0xff]   ;;  %v556_v17 = vld [vmem:[%s809_s1 + $0x84] ss:$16 sps:$4 sm:$0xff]   ;;  %v558_v18 = vld [vmem:[%s809_s1 + $0x8c] ss:$16 sps:$4 sm:$0xff]  }
   0x7   :  { %376 = vmatpush1.bf16.msra.mxu0 %v542_v7  ;;  %417 = vmatpush1.bf16.msra.mxu1 %v543_v8  ;;  %v560_v19 = vld [vmem:[%s809_s1 + $0x80] ss:$16 sps:$4 sm:$0xff]   ;;  %v561_v20 = vld [vmem:[%s809_s1 + $0x88] ss:$16 sps:$4 sm:$0xff]   ;;  %v562_v21 = vld [vmem:[%s809_s1 + $0xa4] ss:$16 sps:$4 sm:$0xff]  }
   0x8   :  { %377 = vmatprep.subr.bf16.mxu0 %v544_v9  ;;  %418 = vmatprep.subr.bf16.mxu1 %v546_v10  ;;  %v564_v22 = vld [vmem:[%s809_s1 + $0xac] ss:$16 sps:$4 sm:$0xff]   ;;  %v566_v23 = vld [vmem:[%s809_s1 + $0xa0] ss:$16 sps:$4 sm:$0xff]   ;;  %v567_v24 = vld [vmem:[%s809_s1 + $0xa8] ss:$16 sps:$4 sm:$0xff]  }
   0x9   :  { %v568_v25 = vld [vmem:[%s809_s1 + $0xc4] ss:$16 sps:$4 sm:$0xff]   ;;  %v570_v26 = vld [vmem:[%s809_s1 + $0xcc] ss:$16 sps:$4 sm:$0xff]   ;;  %v572_v27 = vld [vmem:[%s809_s1 + $0xc0] ss:$16 sps:$4 sm:$0xff]  }
   0xa   :  { %v573_v28 = vld [vmem:[%s809_s1 + $0xc8] ss:$16 sps:$4 sm:$0xff]   ;;  %v574_v29 = vld [vmem:[%s809_s1 + $0xe4] ss:$16 sps:$4 sm:$0xff]   ;;  %v576_v30 = vld [vmem:[%s809_s1 + $0xec] ss:$16 sps:$4 sm:$0xff]  }
   0xb   :  { %378 = vmatpush1.bf16.msra.mxu0 %v548_v11  ;;  %419 = vmatpush1.bf16.msra.mxu1 %v549_v12  ;;  %v578_v31 = vld [vmem:[%s809_s1 + $0xe0] ss:$16 sps:$4 sm:$0xff]   ;;  %v579_v32 = vld [vmem:[%s809_s1 + $0xe8] ss:$16 sps:$4 sm:$0xff]   ;;  %v580_v33 = vld [vmem:[%s809_s1 + $0x104] ss:$16 sps:$4 sm:$0xff]  }
   0xc   :  { %379 = vmatprep.subr.bf16.mxu0 %v550_v13  ;;  %420 = vmatprep.subr.bf16.mxu1 %v552_v14  ;;  %v582_v34 = vld [vmem:[%s809_s1 + $0x10c] ss:$16 sps:$4 sm:$0xff]   ;;  %v584_v35 = vld [vmem:[%s809_s1 + $0x100] ss:$16 sps:$4 sm:$0xff]   ;;  %v585_v36 = vld [vmem:[%s809_s1 + $0x108] ss:$16 sps:$4 sm:$0xff]  }
   0xd   :  { %v586_v37 = vld [vmem:[%s809_s1 + $0x124] ss:$16 sps:$4 sm:$0xff]   ;;  %v588_v38 = vld [vmem:[%s809_s1 + $0x12c] ss:$16 sps:$4 sm:$0xff]   ;;  %v590_v40 = vld [vmem:[%s809_s1 + $0x120] ss:$16 sps:$4 sm:$0xff]  }
   0xe   :  { %v469_v39 = vld.sshfl [vmem:[%s810_s0] sm:$0x33 pattern:$0x76325410]  ;;  %v591_v41 = vld [vmem:[%s809_s1 + $0x128] ss:$16 sps:$4 sm:$0xff]  }
   0xf   :  { %380 = vmatpush1.bf16.msra.mxu0 %v554_v15  ;;  %421 = vmatpush1.bf16.msra.mxu1 %v555_v16  ;;  %v84_v42 = vcombine.high %v469_v39, %v469_v39  ;;  %v70_v43 = vld [vmem:[%s811_s2] sm:$0x7]  ;;  %v592_v44 = vld [vmem:[%s809_s1 + $0x144] ss:$16 sps:$4 sm:$0xff]   ;;  %v594_v45 = vld [vmem:[%s809_s1 + $0x14c] ss:$16 sps:$4 sm:$0xff]  }
  0x10   :  { %381 = vmatprep.subr.bf16.mxu0 %v556_v17  ;;  %422 = vmatprep.subr.bf16.mxu1 %v558_v18  ;;  %v596_v46 = vld [vmem:[%s809_s1 + $0x140] ss:$16 sps:$4 sm:$0xff]   ;;  %v597_v47 = vld [vmem:[%s809_s1 + $0x148] ss:$16 sps:$4 sm:$0xff]   ;;  %v598_v48 = vld [vmem:[%s809_s1 + $0x164] ss:$16 sps:$4 sm:$0xff]  }
  0x11   :  { %527 = vmatprep.mubr.msk.bf16.mxu0 %vm356_vm0, %v84_v42  ;;  %529 = vmatprep.mubr.msk.bf16.mxu1 %vm356_vm0, %v84_v42  ;;  %v600_v49 = vld [vmem:[%s809_s1 + $0x16c] ss:$16 sps:$4 sm:$0xff]   ;;  %v602_v50 = vld [vmem:[%s809_s1 + $0x160] ss:$16 sps:$4 sm:$0xff]   ;;  %v603_v51 = vld [vmem:[%s809_s1 + $0x168] ss:$16 sps:$4 sm:$0xff]  }
  0x12   :  { %73 = vperm.xlu0 %531, %v70_v43   ;;  %v604_v52 = vld [vmem:[%s809_s1 + $0x184] ss:$16 sps:$4 sm:$0xff]   ;;  %v606_v53 = vld [vmem:[%s809_s1 + $0x18c] ss:$16 sps:$4 sm:$0xff]   ;;  %v608_v56 = vld [vmem:[%s809_s1 + $0x180] ss:$16 sps:$4 sm:$0xff]  }
  0x13   :  { %382 = vmatpush1.bf16.msra.mxu0 %v560_v19  ;;  %423 = vmatpush1.bf16.msra.mxu1 %v561_v20  ;;  %v68_v54 = vld [vmem:[%s809_s1 + $0x1a0] sm:$0xff]  ;;  %v69_v55 = vld [vmem:[%s809_s1 + $0x1a8] sm:$0xff] }
  0x14   :  { %383 = vmatprep.subr.bf16.mxu0 %v562_v21  ;;  %424 = vmatprep.subr.bf16.mxu1 %v564_v22  ;;  %v609_v57 = vld [vmem:[%s809_s1 + $0x188] ss:$16 sps:$4 sm:$0xff]   ;;  %v523_v58 = vcombine.high %v68_v54, %v68_v54  ;;  %v525_v59 = vcombine.high %v69_v55, %v69_v55  ;;  %v522_v60 = vcombine.low %v68_v54, %v68_v54 }
  0x15   :  { %v524_v61 = vcombine.low %v69_v55, %v69_v55 }
  0x16   :  { %v362_v62 = vsel %vm360_vm1, %v522_v60, 0 }
  0x17   :  { %384 = vmatpush1.bf16.msra.mxu0 %v566_v23  ;;  %425 = vmatpush1.bf16.msra.mxu1 %v567_v24  ;;  %v368_v63 = vsel %vm360_vm1, %v524_v61, 0 }
  0x18   :  { %385 = vmatprep.subr.bf16.mxu0 %v568_v25  ;;  %426 = vmatprep.subr.bf16.mxu1 %v570_v26 }
  0x1b   :  { %386 = vmatpush1.bf16.msra.mxu0 %v572_v27  ;;  %427 = vmatpush1.bf16.msra.mxu1 %v573_v28 }
  0x1c   :  { %387 = vmatprep.subr.bf16.mxu0 %v574_v29  ;;  %428 = vmatprep.subr.bf16.mxu1 %v576_v30 }
  0x1f   :  { %388 = vmatpush1.bf16.msra.mxu0 %v578_v31  ;;  %429 = vmatpush1.bf16.msra.mxu1 %v579_v32 }
  0x20   :  { %389 = vmatprep.subr.bf16.mxu0 %v580_v33  ;;  %430 = vmatprep.subr.bf16.mxu1 %v582_v34 }
  0x23   :  { %390 = vmatpush1.bf16.msra.mxu0 %v584_v35  ;;  %431 = vmatpush1.bf16.msra.mxu1 %v585_v36 }
  0x24   :  { %391 = vmatprep.subr.bf16.mxu0 %v586_v37  ;;  %432 = vmatprep.subr.bf16.mxu1 %v588_v38 }
  0x27   :  { %392 = vmatpush1.bf16.msra.mxu0 %v590_v40  ;;  %433 = vmatpush1.bf16.msra.mxu1 %v591_v41 }
  0x28   :  { %393 = vmatprep.subr.bf16.mxu0 %v592_v44  ;;  %434 = vmatprep.subr.bf16.mxu1 %v594_v45 }
  0x2b   :  { %394 = vmatpush1.bf16.msra.mxu0 %v596_v46  ;;  %435 = vmatpush1.bf16.msra.mxu1 %v597_v47 }
  0x2c   :  { %395 = vmatprep.subr.bf16.mxu0 %v598_v48  ;;  %436 = vmatprep.subr.bf16.mxu1 %v600_v49 }
  0x2f   :  { %396 = vmatpush1.bf16.msra.mxu0 %v602_v50  ;;  %437 = vmatpush1.bf16.msra.mxu1 %v603_v51 }
  0x30   :  { %397 = vmatprep.subr.bf16.mxu0 %v604_v52  ;;  %438 = vmatprep.subr.bf16.mxu1 %v606_v53 }
  0x33   :  { %398 = vmatpush1.bf16.msra.mxu0 %v608_v56  ;;  %439 = vmatpush1.bf16.msra.mxu1 %v609_v57 }
  0x34   :  { %526 = vmatprep.subr.msk.bf16.mxu0 %vm360_vm1, %v523_v58  ;;  %528 = vmatprep.subr.msk.bf16.mxu1 %vm360_vm1, %v525_v59 }
  0x37   :  { %400 = vmatpush1.bf16.msra.mxu0 %v362_v62  ;;  %441 = vmatpush1.bf16.msra.mxu1 %v368_v63 }
  0x3a   :  { %406 = vmatmul.mubr.bf16.vlgmr.msra.gmra.mrb[0].mxu0 %v469_v39  ;;  %447 = vmatmul.mubr.bf16.vlgmr.msra.gmra.mrb[0].mxu1 %v469_v39 }
  0x91   :  { %v74_v0 = vpop.permute.xlu0 %73 }
 0x10d   :  { %v407_v1 = vpop.f32.mrb[0].mxu0  ;;  %v448_v2 = vpop.f32.mrb[0].mxu1 }
 0x10e   :  { %v408_v3 = vadd.f32 %v407_v1, %v74_v0  ;;  %v449_v4 = vadd.f32 %v448_v2, %v74_v0  ;;  %v409_v5 = vpop.f32.mrb[1].mxu0  ;;  %v450_v6 = vpop.f32.mrb[1].mxu1 }
 0x10f   :  { %v410_v7 = vadd.f32 %v409_v5, %v74_v0  ;;  %v451_v8 = vadd.f32 %v450_v6, %v74_v0  ;;  %v411_v9 = vpop.f32.mrb[2].mxu0  ;;  %v452_v10 = vpop.f32.mrb[2].mxu1 }
 0x110   :  { %v412_v11 = vpop.f32.mrb[3].mxu0  ;;  %v453_v12 = vpop.f32.mrb[3].mxu1 }
 0x111   :  { %v459_v13 = vcombine.low %v408_v3, %v410_v7  ;;  %v460_v14 = vcombine.low %v449_v4, %v451_v8 }
 0x113   :  { %463 = vst [vmem:[%s812_s3] sm:$0x77] %v459_v13  ;;  %464 = vst [vmem:[%s812_s3 + $0x8] sm:$0x77] %v460_v14 }

</bundles_post_ra>
